<compile_context>
chip_gen: v7x
topology: tpu7x:2x2x1
jax: 0.10.0
libtpu: 0.0.40
codegen_flags: <defaults>
</compile_context>

<pallas_src>
import jax
import jax.numpy as jnp
from jax import lax
from jax.experimental import pallas as pl
from jax.experimental.pallas import tpu as pltpu

BN_EPS = 1e-5
CPAD = 8          # channel padding (one sublane row-group)
PAD = 128         # lane-aligned margin of the tap-staging scratch
_TAPS = [(dy, dx) for dy in (-1, 0, 1) for dx in (-1, 0, 1)]   # t == ky*3 + kx

_VMEM = pl.BlockSpec(memory_space=pltpu.MemorySpace.VMEM)
_SMEM = pl.BlockSpec(memory_space=pltpu.MemorySpace.SMEM)


def _round_up(x, m):
    return (x + m - 1) // m * m


def _halo_geom(N, H, W):
    """Zero-halo flat layout: rows = [halo][img0 r0..rH-1][halo][img1 ...][halo],
    row pitch W+2 (one zero column each side).  Returns (pitch, Mh, Mw)."""
    Wp = W + 2
    n_rows = N * (H + 1) + 1
    Mh = n_rows * Wp
    return Wp, Mh, _round_up(Mh, 128)


def _row_base(n, y, H, Wp):
    # lane index of pixel (n, y, x=0) in the zero-halo flat layout
    return (1 + n * (H + 1) + y) * Wp + 1


# --------------------------- fused kernel ------------------------------------

def _build_kernel(N, H, W):
    Hd, Wd = H // 2, W // 2
    Wp, Mh_u, Mw_u = _halo_geom(N, H, W)
    Wdp, Mh_d, Mw_d = _halo_geom(N, Hd, Wd)
    Mu, Md = float(N * H * W), float(N * Hd * Wd)   # true pixel counts for BN
    assert Wp + 1 <= PAD and Wdp + 1 <= PAD

    def kernel(x_ref, w_ref, g_ref, b_ref, mu_ref, md_ref, dec_ref, rep_ref,
               a_ref, o_ref, tap_u, tap_d, act_u, act_d):
        f32 = jnp.float32
        mask_u = mu_ref[...]            # (1, Mw_u) interior mask (hoisted)
        mask_d = md_ref[...]            # (1, Mw_d)

        # One-time zeroing of the only tap-window lanes that can ever be read
        # without having been written (they feed masked halo outputs, but must
        # be finite).  Edges only -- not the whole scratch line.
        eu, ed = Wp + 2, Wdp + 2
        tap_u[:, PAD:PAD + eu] = jnp.zeros((9 * CPAD, eu), f32)
        tap_u[:, PAD + Mw_u - eu:PAD + Mw_u] = jnp.zeros((9 * CPAD, eu), f32)
        tap_d[:, PAD:PAD + ed] = jnp.zeros((9 * CPAD, ed), f32)
        tap_d[:, PAD + Mw_d - ed:PAD + Mw_d] = jnp.zeros((9 * CPAD, ed), f32)

        def conv3x3(h, widx, pitch, Mw, mask, tap):
            # h: (CPAD, Mw) zero-halo activation.  Stage the 9 shifted taps as
            # 9 sublane row-groups, then ONE fused (8,72)@(72,Mw) MXU dot.
            for t, (dy, dx) in enumerate(_TAPS):
                s = dy * pitch + dx
                tap[t * CPAD:(t + 1) * CPAD, PAD - s:PAD - s + Mw] = h
            acc = jnp.dot(w_ref[widx], tap[:, PAD:PAD + Mw],
                          preferred_element_type=f32)
            return acc * mask                       # restore zero halo

        def bn(h, idx, count, mask):
            # BatchNorm2d, training-mode batch stats, biased variance,
            # single-pass (halo lanes are zero so flat sums == (N,H,W) sums).
            inv = 1.0 / count
            g = g_ref[:, idx:idx + 1]               # (CPAD, 1)
            b = b_ref[:, idx:idx + 1]
            s1 = jnp.sum(h, axis=1, keepdims=True) * inv
            s2 = jnp.sum(h * h, axis=1, keepdims=True) * inv
            var = s2 - s1 * s1
            scale = lax.rsqrt(var + BN_EPS) * g     # zero for padded channels
            shift = b - s1 * scale
            return (h * scale + shift) * mask       # halo stays exactly zero

        def prelu(h, idx):
            a = a_ref[idx]                          # shared scalar slope (SMEM)
            return jnp.where(h >= 0.0, h, a * h)

        def resblock(h, cidx, bidx, aidx, pitch, Mw, count, mask, tap):
            r = h
            o = conv3x3(h, cidx, pitch, Mw, mask, tap)
            o = bn(o, bidx, count, mask)
            o = prelu(o, aidx)
            o = conv3x3(o, cidx + 1, pitch, Mw, mask, tap)
            o = bn(o, bidx + 1, count, mask)
            return prelu(o + r, aidx + 1)

        x = x_ref[...]                              # (CPAD, Mw_u), zero halo

        # ---- down path: Conv3x3/s2 -> PReLU -> 3 x ResidualBlock(inner) ----
        hf = conv3x3(x, 0, Wp, Mw_u, mask_u, tap_u)    # full-res conv taps
        act_d[...] = jnp.zeros((CPAD, Mw_d), f32)      # half-res zero-halo dest
        dec = dec_ref[...]                             # (W, Wd) one-hot
        for n in range(N):
            for yo in range(Hd):
                src = _row_base(n, 2 * yo, H, Wp)
                dst = _row_base(n, yo, Hd, Wdp)
                act_d[:, dst:dst + Wd] = jnp.dot(
                    hf[:, src:src + W], dec, preferred_element_type=f32)
        h = prelu(act_d[...], 0)                       # downrelu
        for i in range(3):
            h = resblock(h, 1 + 2 * i, 2 * i, 1 + 2 * i,
                         Wdp, Mw_d, Md, mask_d, tap_d)

        # ---- up path: nearest x2 -> Conv3x3 -> BN -> PReLU -> 3 x ResBlock ----
        act_u[...] = jnp.zeros((CPAD, Mw_u), f32)      # full-res zero-halo dest
        rep = rep_ref[...]                             # (Wd, W) one-hot
        for n in range(N):
            for yo in range(Hd):
                src = _row_base(n, yo, Hd, Wdp)
                row = jnp.dot(h[:, src:src + Wd], rep,
                              preferred_element_type=f32)   # (CPAD, W)
                d0 = _row_base(n, 2 * yo, H, Wp)
                d1 = _row_base(n, 2 * yo + 1, H, Wp)
                act_u[:, d0:d0 + W] = row
                act_u[:, d1:d1 + W] = row
        u = act_u[...]

        o = conv3x3(u, 7, Wp, Mw_u, mask_u, tap_u)     # upconv
        o = bn(o, 6, Mu, mask_u)                       # upnorm
        o = prelu(o, 7)                                # uprelu
        for i in range(3):
            o = resblock(o, 8 + 2 * i, 7 + 2 * i, 8 + 2 * i,
                         Wp, Mw_u, Mu, mask_u, tap_u)

        o_ref[...] = o                                 # model(x) branch

    return kernel, (Wp, Mh_u, Mw_u), (Wdp, Mh_d, Mw_d)


# --------------------------- wrapper ------------------------------------------

def _pack_conv(w):
    # torch (Cout, Cin, 3, 3) -> lane-dense (CPAD, 72): column index = t*8 + ci.
    cout, cin = w.shape[0], w.shape[1]
    wt = jnp.transpose(w.astype(jnp.float32), (0, 2, 3, 1))        # (co,ky,kx,ci)
    wt = jnp.pad(wt, ((0, CPAD - cout), (0, 0), (0, 0), (0, CPAD - cin)))
    return wt.reshape(CPAD, 9 * CPAD)


def _pack_chan(v):
    v = jnp.reshape(v, (-1,)).astype(jnp.float32)
    return jnp.pad(v, (0, CPAD - v.shape[0]))


def res_unet_innermost(x_nchw, params):
    N, cx, H, W = x_nchw.shape
    inner_nc = params["downconv_w"].shape[0]
    outer_nc = params["upconv_w"].shape[0]
    assert H % 2 == 0 and W % 2 == 0
    assert max(cx, inner_nc, outer_nc) <= CPAD  # TODO(synk): tile channels for nc > 8
    assert W + 3 <= PAD

    f32 = jnp.float32
    Hd, Wd = H // 2, W // 2
    kernel, (Wp, Mh_u, Mw_u), (Wdp, Mh_d, Mw_d) = _build_kernel(N, H, W)
    n_rows_u = N * (H + 1) + 1

    # NCHW -> zero-halo flat layout (CPAD, Mw_u); padded channels are zero.
    rows_u = (1 + jnp.arange(N)[:, None] * (H + 1)
              + jnp.arange(H)[None, :]).reshape(-1)                       # (N*H,)
    x_chw = jnp.transpose(x_nchw, (1, 0, 2, 3)).astype(f32).reshape(cx, N * H, W)
    x_h = jnp.zeros((CPAD, n_rows_u, Wp), f32)
    x_h = x_h.at[:cx, rows_u, 1:1 + W].set(x_chw)
    x2d = jnp.pad(x_h.reshape(CPAD, Mh_u), ((0, 0), (0, Mw_u - Mh_u)))

    def interior_mask(Np, Hp, Wpix, pitch, Mh, Mw):
        j = jnp.arange(Mw)
        r, c = j // pitch, j % pitch
        ok = ((r >= 1) & (r <= Np * (Hp + 1) - 1) & (((r - 1) % (Hp + 1)) < Hp)
              & (c >= 1) & (c <= Wpix) & (j < Mh))
        return ok.astype(f32).reshape(1, Mw)

    mask_u = interior_mask(N, H, W, Wp, Mh_u, Mw_u)
    mask_d = interior_mask(N, Hd, Wd, Wdp, Mh_d, Mw_d)
    dec_row = (jnp.arange(W)[:, None] == 2 * jnp.arange(Wd)[None, :]).astype(f32)
    rep_row = (jnp.arange(Wd)[:, None] == (jnp.arange(W)[None, :] // 2)).astype(f32)

    # conv weights: downconv, 3x down-res (w1,w2), upconv, 3x up-res (w1,w2)
    w_list = [params["downconv_w"]]
    for p in params["res_down"]:
        w_list += [p["w1"], p["w2"]]
    w_list.append(params["upconv_w"])
    for p in params["res_up"]:
        w_list += [p["w1"], p["w2"]]
    wp = jnp.stack([_pack_conv(w) for w in w_list], axis=0)          # (14, 8, 72)

    # BN affine params: 3x down-res (bn1,bn2), upnorm, 3x up-res (bn1,bn2)
    g_list, b_list = [], []
    for p in params["res_down"]:
        g_list += [p["g1"], p["g2"]]
        b_list += [p["b1"], p["b2"]]
    g_list.append(params["upnorm_g"])
    b_list.append(params["upnorm_b"])
    for p in params["res_up"]:
        g_list += [p["g1"], p["g2"]]
        b_list += [p["b1"], p["b2"]]
    gp = jnp.stack([_pack_chan(g) for g in g_list], axis=1)          # (8, 13)
    bp = jnp.stack([_pack_chan(b) for b in b_list], axis=1)          # (8, 13)

    # PReLU slopes: downrelu, 3x down-res (blk,out), uprelu, 3x up-res (blk,out)
    a_list = [params["downrelu_a"]]
    for p in params["res_down"]:
        a_list += [p["a_blk"], p["a_out"]]
    a_list.append(params["uprelu_a"])
    for p in params["res_up"]:
        a_list += [p["a_blk"], p["a_out"]]
    ap = jnp.stack([jnp.reshape(a, ()) for a in a_list]).astype(f32)  # (14,)

    h2d = pl.pallas_call(
        kernel,
        out_shape=jax.ShapeDtypeStruct((CPAD, Mw_u), f32),
        in_specs=[_VMEM] * 8 + [_SMEM],
        out_specs=_VMEM,
        scratch_shapes=[
            pltpu.VMEM((9 * CPAD, Mw_u + 2 * PAD), f32),   # full-res tap stack
            pltpu.VMEM((9 * CPAD, Mw_d + 2 * PAD), f32),   # half-res tap stack
            pltpu.VMEM((CPAD, Mw_u), f32),                 # upsample assembly
            pltpu.VMEM((CPAD, Mw_d), f32),                 # downsample assembly
        ],
        compiler_params=pltpu.CompilerParams(vmem_limit_bytes=32 * 1024 * 1024),
    )(x2d, wp, gp, bp, mask_u, mask_d, dec_row, rep_row, ap)

    # unpack zero-halo layout -> NCHW and torch.cat([x, model(x)], dim=1)
    h3 = h2d[:, :Mh_u].reshape(CPAD, n_rows_u, Wp)
    model_out = jnp.transpose(
        h3[:outer_nc, rows_u, 1:1 + W].reshape(outer_nc, N, H, W), (1, 0, 2, 3))
    return jnp.concatenate([x_nchw.astype(f32), model_out], axis=1)


# --------------------------- parameter init -----------------------------------

def _conv_w(key, cout, cin):
    fan_in = cin * 9
    return jax.random.normal(key, (cout, cin, 3, 3), jnp.float32) / jnp.sqrt(fan_in)


def _resblock_params(key, c):
    k1, k2 = jax.random.split(key)
    return dict(
        w1=_conv_w(k1, c, c),
        g1=jnp.ones((c,), jnp.float32), b1=jnp.zeros((c,), jnp.float32),
        a_blk=jnp.full((), 0.25, jnp.float32),
        w2=_conv_w(k2, c, c),
        g2=jnp.ones((c,), jnp.float32), b2=jnp.zeros((c,), jnp.float32),
        a_out=jnp.full((), 0.25, jnp.float32),
    )


def init_params(key, outer_nc, inner_nc, input_nc=None):
    if input_nc is None:
        input_nc = outer_nc
    keys = jax.random.split(key, 8)
    return dict(
        downconv_w=_conv_w(keys[0], inner_nc, input_nc),
        downrelu_a=jnp.full((), 0.25, jnp.float32),
        res_down=[_resblock_params(keys[1 + i], inner_nc) for i in range(3)],
        upconv_w=_conv_w(keys[4], outer_nc, inner_nc),
        upnorm_g=jnp.ones((outer_nc,), jnp.float32),
        upnorm_b=jnp.zeros((outer_nc,), jnp.float32),
        uprelu_a=jnp.full((), 0.25, jnp.float32),
        res_up=[_resblock_params(keys[5 + i], outer_nc) for i in range(3)],
    )

# TODO(synk): the outermost / intermediate configurations (recursive submodule,
# optional Dropout(0.5)) are not instantiated here; only the innermost forward
# is implemented, exactly as in the reference module.


# --------------------------- main ----------------------------------------------

if __name__ == "__main__":
    key = jax.random.PRNGKey(0)
    kx, kp = jax.random.split(key)

    N, outer_nc, inner_nc, H, W = 2, 4, 8, 16, 16
    x = jax.random.normal(kx, (N, outer_nc, H, W), jnp.float32)   # NCHW input
    params = init_params(kp, outer_nc, inner_nc)

    fwd = jax.jit(res_unet_innermost)
    out = jax.block_until_ready(fwd(x, params))

    assert out.shape == (N, 2 * outer_nc, H, W), out.shape
    assert out.dtype == jnp.float32
    assert bool(jnp.all(jnp.isfinite(out)))
    print("KERNEL_OK")
</pallas_src>

<mosaic_0001>
module attributes {stable_mosaic.version = 11 : i64} {
  func.func @kernel(%arg0: memref<8x640xf32, #tpu.memory_space<vmem>>, %arg1: memref<14x8x72xf32, #tpu.memory_space<vmem>>, %arg2: memref<8x13xf32, #tpu.memory_space<vmem>>, %arg3: memref<8x13xf32, #tpu.memory_space<vmem>>, %arg4: memref<1x640xf32, #tpu.memory_space<vmem>>, %arg5: memref<1x256xf32, #tpu.memory_space<vmem>>, %arg6: memref<16x8xf32, #tpu.memory_space<vmem>>, %arg7: memref<8x16xf32, #tpu.memory_space<vmem>>, %arg8: memref<14xf32, #tpu.memory_space<smem>>, %arg9: memref<8x640xf32, #tpu.memory_space<vmem>>, %arg10: memref<72x896xf32, #tpu.memory_space<vmem>>, %arg11: memref<72x512xf32, #tpu.memory_space<vmem>>, %arg12: memref<8x640xf32, #tpu.memory_space<vmem>>, %arg13: memref<8x256xf32, #tpu.memory_space<vmem>>) attributes {dimension_semantics = [], scalar_prefetch = 0 : i64, scratch_operands = 4 : i64, tpu.core_type = #tpu.core_type<tc>} {
    %c0 = arith.constant 0 : index
    %c0_0 = arith.constant 0 : index
    %0 = vector.load %arg4[%c0, %c0_0] : memref<1x640xf32, #tpu.memory_space<vmem>>, vector<1x640xf32>
    %c0_1 = arith.constant 0 : index
    %c0_2 = arith.constant 0 : index
    %1 = vector.load %arg5[%c0_1, %c0_2] : memref<1x256xf32, #tpu.memory_space<vmem>>, vector<1x256xf32>
    %cst = arith.constant 0.000000e+00 : f32
    %2 = vector.broadcast %cst : f32 to vector<72x20xf32>
    %c0_3 = arith.constant 0 : index
    %c128 = arith.constant 128 : index
    %3 = vector.load %arg10[%c0_3, %c128] : memref<72x896xf32, #tpu.memory_space<vmem>>, vector<72x20xf32>
    tpu.vector_store %arg10[%c0_3, %c128], %2 {strides = array<i32>} : memref<72x896xf32, #tpu.memory_space<vmem>>, vector<72x20xf32>,
    %cst_4 = arith.constant 0.000000e+00 : f32
    %4 = vector.broadcast %cst_4 : f32 to vector<72x20xf32>
    %c0_5 = arith.constant 0 : index
    %c748 = arith.constant 748 : index
    %5 = vector.load %arg10[%c0_5, %c748] : memref<72x896xf32, #tpu.memory_space<vmem>>, vector<72x20xf32>
    tpu.vector_store %arg10[%c0_5, %c748], %4 {strides = array<i32>} : memref<72x896xf32, #tpu.memory_space<vmem>>, vector<72x20xf32>,
    %cst_6 = arith.constant 0.000000e+00 : f32
    %6 = vector.broadcast %cst_6 : f32 to vector<72x12xf32>
    %c0_7 = arith.constant 0 : index
    %c128_8 = arith.constant 128 : index
    %7 = vector.load %arg11[%c0_7, %c128_8] : memref<72x512xf32, #tpu.memory_space<vmem>>, vector<72x12xf32>
    tpu.vector_store %arg11[%c0_7, %c128_8], %6 {strides = array<i32>} : memref<72x512xf32, #tpu.memory_space<vmem>>, vector<72x12xf32>,
    %cst_9 = arith.constant 0.000000e+00 : f32
    %8 = vector.broadcast %cst_9 : f32 to vector<72x12xf32>
    %c0_10 = arith.constant 0 : index
    %c372 = arith.constant 372 : index
    %9 = vector.load %arg11[%c0_10, %c372] : memref<72x512xf32, #tpu.memory_space<vmem>>, vector<72x12xf32>
    tpu.vector_store %arg11[%c0_10, %c372], %8 {strides = array<i32>} : memref<72x512xf32, #tpu.memory_space<vmem>>, vector<72x12xf32>,
    %c0_11 = arith.constant 0 : index
    %c0_12 = arith.constant 0 : index
    %10 = vector.load %arg0[%c0_11, %c0_12] : memref<8x640xf32, #tpu.memory_space<vmem>>, vector<8x640xf32>
    %c0_13 = arith.constant 0 : index
    %c147 = arith.constant 147 : index
    %11 = vector.load %arg10[%c0_13, %c147] : memref<72x896xf32, #tpu.memory_space<vmem>>, vector<8x640xf32>
    tpu.vector_store %arg10[%c0_13, %c147], %10 {strides = array<i32>} : memref<72x896xf32, #tpu.memory_space<vmem>>, vector<8x640xf32>,
    %c8 = arith.constant 8 : index
    %c146 = arith.constant 146 : index
    %12 = vector.load %arg10[%c8, %c146] : memref<72x896xf32, #tpu.memory_space<vmem>>, vector<8x640xf32>
    tpu.vector_store %arg10[%c8, %c146], %10 {strides = array<i32>} : memref<72x896xf32, #tpu.memory_space<vmem>>, vector<8x640xf32>,
    %c16 = arith.constant 16 : index
    %c145 = arith.constant 145 : index
    %13 = vector.load %arg10[%c16, %c145] : memref<72x896xf32, #tpu.memory_space<vmem>>, vector<8x640xf32>
    tpu.vector_store %arg10[%c16, %c145], %10 {strides = array<i32>} : memref<72x896xf32, #tpu.memory_space<vmem>>, vector<8x640xf32>,
    %c24 = arith.constant 24 : index
    %c129 = arith.constant 129 : index
    %14 = vector.load %arg10[%c24, %c129] : memref<72x896xf32, #tpu.memory_space<vmem>>, vector<8x640xf32>
    tpu.vector_store %arg10[%c24, %c129], %10 {strides = array<i32>} : memref<72x896xf32, #tpu.memory_space<vmem>>, vector<8x640xf32>,
    %c32 = arith.constant 32 : index
    %c128_14 = arith.constant 128 : index
    %15 = vector.load %arg10[%c32, %c128_14] : memref<72x896xf32, #tpu.memory_space<vmem>>, vector<8x640xf32>
    tpu.vector_store %arg10[%c32, %c128_14], %10 {strides = array<i32>} : memref<72x896xf32, #tpu.memory_space<vmem>>, vector<8x640xf32>,
    %c40 = arith.constant 40 : index
    %c127 = arith.constant 127 : index
    %16 = vector.load %arg10[%c40, %c127] : memref<72x896xf32, #tpu.memory_space<vmem>>, vector<8x640xf32>
    tpu.vector_store %arg10[%c40, %c127], %10 {strides = array<i32>} : memref<72x896xf32, #tpu.memory_space<vmem>>, vector<8x640xf32>,
    %c48 = arith.constant 48 : index
    %c111 = arith.constant 111 : index
    %17 = vector.load %arg10[%c48, %c111] : memref<72x896xf32, #tpu.memory_space<vmem>>, vector<8x640xf32>
    tpu.vector_store %arg10[%c48, %c111], %10 {strides = array<i32>} : memref<72x896xf32, #tpu.memory_space<vmem>>, vector<8x640xf32>,
    %c56 = arith.constant 56 : index
    %c110 = arith.constant 110 : index
    %18 = vector.load %arg10[%c56, %c110] : memref<72x896xf32, #tpu.memory_space<vmem>>, vector<8x640xf32>
    tpu.vector_store %arg10[%c56, %c110], %10 {strides = array<i32>} : memref<72x896xf32, #tpu.memory_space<vmem>>, vector<8x640xf32>,
    %c64 = arith.constant 64 : index
    %c109 = arith.constant 109 : index
    %19 = vector.load %arg10[%c64, %c109] : memref<72x896xf32, #tpu.memory_space<vmem>>, vector<8x640xf32>
    tpu.vector_store %arg10[%c64, %c109], %10 {strides = array<i32>} : memref<72x896xf32, #tpu.memory_space<vmem>>, vector<8x640xf32>,
    %c0_15 = arith.constant 0 : index
    %c0_16 = arith.constant 0 : index
    %c0_17 = arith.constant 0 : index
    %20 = vector.load %arg1[%c0_15, %c0_16, %c0_17] : memref<14x8x72xf32, #tpu.memory_space<vmem>>, vector<1x8x72xf32>
    %21 = vector.shape_cast %20 : vector<1x8x72xf32> to vector<8x72xf32>
    %c0_18 = arith.constant 0 : index
    %c128_19 = arith.constant 128 : index
    %22 = vector.load %arg10[%c0_18, %c128_19] : memref<72x896xf32, #tpu.memory_space<vmem>>, vector<72x640xf32>
    %cst_20 = arith.constant dense<0.000000e+00> : vector<8x640xf32>
    %23 = tpu.matmul %21, %22, %cst_20 {dimension_numbers = #tpu.dot_dimension_numbers<[1], [0], [0], [1], [0, 0, 1, 1], [], []>} : vector<8x72xf32>, vector<72x640xf32>, vector<8x640xf32> -> vector<8x640xf32>
    %24 = vector.broadcast %0 : vector<1x640xf32> to vector<8x640xf32>
    %25 = arith.mulf %23, %24 : vector<8x640xf32>
    %cst_21 = arith.constant 0.000000e+00 : f32
    %26 = vector.broadcast %cst_21 : f32 to vector<8x256xf32>
    %c0_22 = arith.constant 0 : index
    %c0_23 = arith.constant 0 : index
    %27 = vector.load %arg13[%c0_22, %c0_23] : memref<8x256xf32, #tpu.memory_space<vmem>>, vector<8x256xf32>
    tpu.vector_store %arg13[%c0_22, %c0_23], %26 {strides = array<i32>} : memref<8x256xf32, #tpu.memory_space<vmem>>, vector<8x256xf32>,
    %c0_24 = arith.constant 0 : index
    %c0_25 = arith.constant 0 : index
    %28 = vector.load %arg6[%c0_24, %c0_25] : memref<16x8xf32, #tpu.memory_space<vmem>>, vector<16x8xf32>
    %29 = vector.extract_strided_slice %25 {offsets = [0, 19], sizes = [8, 16], strides = [1, 1]} : vector<8x640xf32> to vector<8x16xf32>
    %cst_26 = arith.constant dense<0.000000e+00> : vector<8x8xf32>
    %30 = tpu.matmul %29, %28, %cst_26 {dimension_numbers = #tpu.dot_dimension_numbers<[1], [0], [0], [1], [0, 0, 1, 1], [], []>} : vector<8x16xf32>, vector<16x8xf32>, vector<8x8xf32> -> vector<8x8xf32>
    %c0_27 = arith.constant 0 : index
    %c11 = arith.constant 11 : index
    %31 = vector.load %arg13[%c0_27, %c11] : memref<8x256xf32, #tpu.memory_space<vmem>>, vector<8x8xf32>
    tpu.vector_store %arg13[%c0_27, %c11], %30 {strides = array<i32>} : memref<8x256xf32, #tpu.memory_space<vmem>>, vector<8x8xf32>,
    %32 = vector.extract_strided_slice %25 {offsets = [0, 55], sizes = [8, 16], strides = [1, 1]} : vector<8x640xf32> to vector<8x16xf32>
    %cst_28 = arith.constant dense<0.000000e+00> : vector<8x8xf32>
    %33 = tpu.matmul %32, %28, %cst_28 {dimension_numbers = #tpu.dot_dimension_numbers<[1], [0], [0], [1], [0, 0, 1, 1], [], []>} : vector<8x16xf32>, vector<16x8xf32>, vector<8x8xf32> -> vector<8x8xf32>
    %c0_29 = arith.constant 0 : index
    %c21 = arith.constant 21 : index
    %34 = vector.load %arg13[%c0_29, %c21] : memref<8x256xf32, #tpu.memory_space<vmem>>, vector<8x8xf32>
    tpu.vector_store %arg13[%c0_29, %c21], %33 {strides = array<i32>} : memref<8x256xf32, #tpu.memory_space<vmem>>, vector<8x8xf32>,
    %35 = vector.extract_strided_slice %25 {offsets = [0, 91], sizes = [8, 16], strides = [1, 1]} : vector<8x640xf32> to vector<8x16xf32>
    %cst_30 = arith.constant dense<0.000000e+00> : vector<8x8xf32>
    %36 = tpu.matmul %35, %28, %cst_30 {dimension_numbers = #tpu.dot_dimension_numbers<[1], [0], [0], [1], [0, 0, 1, 1], [], []>} : vector<8x16xf32>, vector<16x8xf32>, vector<8x8xf32> -> vector<8x8xf32>
    %c0_31 = arith.constant 0 : index
    %c31 = arith.constant 31 : index
    %37 = vector.load %arg13[%c0_31, %c31] : memref<8x256xf32, #tpu.memory_space<vmem>>, vector<8x8xf32>
    tpu.vector_store %arg13[%c0_31, %c31], %36 {strides = array<i32>} : memref<8x256xf32, #tpu.memory_space<vmem>>, vector<8x8xf32>,
    %38 = vector.extract_strided_slice %25 {offsets = [0, 127], sizes = [8, 16], strides = [1, 1]} : vector<8x640xf32> to vector<8x16xf32>
    %cst_32 = arith.constant dense<0.000000e+00> : vector<8x8xf32>
    %39 = tpu.matmul %38, %28, %cst_32 {dimension_numbers = #tpu.dot_dimension_numbers<[1], [0], [0], [1], [0, 0, 1, 1], [], []>} : vector<8x16xf32>, vector<16x8xf32>, vector<8x8xf32> -> vector<8x8xf32>
    %c0_33 = arith.constant 0 : index
    %c41 = arith.constant 41 : index
    %40 = vector.load %arg13[%c0_33, %c41] : memref<8x256xf32, #tpu.memory_space<vmem>>, vector<8x8xf32>
    tpu.vector_store %arg13[%c0_33, %c41], %39 {strides = array<i32>} : memref<8x256xf32, #tpu.memory_space<vmem>>, vector<8x8xf32>,
    %41 = vector.extract_strided_slice %25 {offsets = [0, 163], sizes = [8, 16], strides = [1, 1]} : vector<8x640xf32> to vector<8x16xf32>
    %cst_34 = arith.constant dense<0.000000e+00> : vector<8x8xf32>
    %42 = tpu.matmul %41, %28, %cst_34 {dimension_numbers = #tpu.dot_dimension_numbers<[1], [0], [0], [1], [0, 0, 1, 1], [], []>} : vector<8x16xf32>, vector<16x8xf32>, vector<8x8xf32> -> vector<8x8xf32>
    %c0_35 = arith.constant 0 : index
    %c51 = arith.constant 51 : index
    %43 = vector.load %arg13[%c0_35, %c51] : memref<8x256xf32, #tpu.memory_space<vmem>>, vector<8x8xf32>
    tpu.vector_store %arg13[%c0_35, %c51], %42 {strides = array<i32>} : memref<8x256xf32, #tpu.memory_space<vmem>>, vector<8x8xf32>,
    %44 = vector.extract_strided_slice %25 {offsets = [0, 199], sizes = [8, 16], strides = [1, 1]} : vector<8x640xf32> to vector<8x16xf32>
    %cst_36 = arith.constant dense<0.000000e+00> : vector<8x8xf32>
    %45 = tpu.matmul %44, %28, %cst_36 {dimension_numbers = #tpu.dot_dimension_numbers<[1], [0], [0], [1], [0, 0, 1, 1], [], []>} : vector<8x16xf32>, vector<16x8xf32>, vector<8x8xf32> -> vector<8x8xf32>
    %c0_37 = arith.constant 0 : index
    %c61 = arith.constant 61 : index
    %46 = vector.load %arg13[%c0_37, %c61] : memref<8x256xf32, #tpu.memory_space<vmem>>, vector<8x8xf32>
    tpu.vector_store %arg13[%c0_37, %c61], %45 {strides = array<i32>} : memref<8x256xf32, #tpu.memory_space<vmem>>, vector<8x8xf32>,
    %47 = vector.extract_strided_slice %25 {offsets = [0, 235], sizes = [8, 16], strides = [1, 1]} : vector<8x640xf32> to vector<8x16xf32>
    %cst_38 = arith.constant dense<0.000000e+00> : vector<8x8xf32>
    %48 = tpu.matmul %47, %28, %cst_38 {dimension_numbers = #tpu.dot_dimension_numbers<[1], [0], [0], [1], [0, 0, 1, 1], [], []>} : vector<8x16xf32>, vector<16x8xf32>, vector<8x8xf32> -> vector<8x8xf32>
    %c0_39 = arith.constant 0 : index
    %c71 = arith.constant 71 : index
    %49 = vector.load %arg13[%c0_39, %c71] : memref<8x256xf32, #tpu.memory_space<vmem>>, vector<8x8xf32>
    tpu.vector_store %arg13[%c0_39, %c71], %48 {strides = array<i32>} : memref<8x256xf32, #tpu.memory_space<vmem>>, vector<8x8xf32>,
    %50 = vector.extract_strided_slice %25 {offsets = [0, 271], sizes = [8, 16], strides = [1, 1]} : vector<8x640xf32> to vector<8x16xf32>
    %cst_40 = arith.constant dense<0.000000e+00> : vector<8x8xf32>
    %51 = tpu.matmul %50, %28, %cst_40 {dimension_numbers = #tpu.dot_dimension_numbers<[1], [0], [0], [1], [0, 0, 1, 1], [], []>} : vector<8x16xf32>, vector<16x8xf32>, vector<8x8xf32> -> vector<8x8xf32>
    %c0_41 = arith.constant 0 : index
    %c81 = arith.constant 81 : index
    %52 = vector.load %arg13[%c0_41, %c81] : memref<8x256xf32, #tpu.memory_space<vmem>>, vector<8x8xf32>
    tpu.vector_store %arg13[%c0_41, %c81], %51 {strides = array<i32>} : memref<8x256xf32, #tpu.memory_space<vmem>>, vector<8x8xf32>,
    %53 = vector.extract_strided_slice %25 {offsets = [0, 325], sizes = [8, 16], strides = [1, 1]} : vector<8x640xf32> to vector<8x16xf32>
    %cst_42 = arith.constant dense<0.000000e+00> : vector<8x8xf32>
    %54 = tpu.matmul %53, %28, %cst_42 {dimension_numbers = #tpu.dot_dimension_numbers<[1], [0], [0], [1], [0, 0, 1, 1], [], []>} : vector<8x16xf32>, vector<16x8xf32>, vector<8x8xf32> -> vector<8x8xf32>
    %c0_43 = arith.constant 0 : index
    %c101 = arith.constant 101 : index
    %55 = vector.load %arg13[%c0_43, %c101] : memref<8x256xf32, #tpu.memory_space<vmem>>, vector<8x8xf32>
    tpu.vector_store %arg13[%c0_43, %c101], %54 {strides = array<i32>} : memref<8x256xf32, #tpu.memory_space<vmem>>, vector<8x8xf32>,
    %56 = vector.extract_strided_slice %25 {offsets = [0, 361], sizes = [8, 16], strides = [1, 1]} : vector<8x640xf32> to vector<8x16xf32>
    %cst_44 = arith.constant dense<0.000000e+00> : vector<8x8xf32>
    %57 = tpu.matmul %56, %28, %cst_44 {dimension_numbers = #tpu.dot_dimension_numbers<[1], [0], [0], [1], [0, 0, 1, 1], [], []>} : vector<8x16xf32>, vector<16x8xf32>, vector<8x8xf32> -> vector<8x8xf32>
    %c0_45 = arith.constant 0 : index
    %c111_46 = arith.constant 111 : index
    %58 = vector.load %arg13[%c0_45, %c111_46] : memref<8x256xf32, #tpu.memory_space<vmem>>, vector<8x8xf32>
    tpu.vector_store %arg13[%c0_45, %c111_46], %57 {strides = array<i32>} : memref<8x256xf32, #tpu.memory_space<vmem>>, vector<8x8xf32>,
    %59 = vector.extract_strided_slice %25 {offsets = [0, 397], sizes = [8, 16], strides = [1, 1]} : vector<8x640xf32> to vector<8x16xf32>
    %cst_47 = arith.constant dense<0.000000e+00> : vector<8x8xf32>
    %60 = tpu.matmul %59, %28, %cst_47 {dimension_numbers = #tpu.dot_dimension_numbers<[1], [0], [0], [1], [0, 0, 1, 1], [], []>} : vector<8x16xf32>, vector<16x8xf32>, vector<8x8xf32> -> vector<8x8xf32>
    %c0_48 = arith.constant 0 : index
    %c121 = arith.constant 121 : index
    %61 = vector.load %arg13[%c0_48, %c121] : memref<8x256xf32, #tpu.memory_space<vmem>>, vector<8x8xf32>
    tpu.vector_store %arg13[%c0_48, %c121], %60 {strides = array<i32>} : memref<8x256xf32, #tpu.memory_space<vmem>>, vector<8x8xf32>,
    %62 = vector.extract_strided_slice %25 {offsets = [0, 433], sizes = [8, 16], strides = [1, 1]} : vector<8x640xf32> to vector<8x16xf32>
    %cst_49 = arith.constant dense<0.000000e+00> : vector<8x8xf32>
    %63 = tpu.matmul %62, %28, %cst_49 {dimension_numbers = #tpu.dot_dimension_numbers<[1], [0], [0], [1], [0, 0, 1, 1], [], []>} : vector<8x16xf32>, vector<16x8xf32>, vector<8x8xf32> -> vector<8x8xf32>
    %c0_50 = arith.constant 0 : index
    %c131 = arith.constant 131 : index
    %64 = vector.load %arg13[%c0_50, %c131] : memref<8x256xf32, #tpu.memory_space<vmem>>, vector<8x8xf32>
    tpu.vector_store %arg13[%c0_50, %c131], %63 {strides = array<i32>} : memref<8x256xf32, #tpu.memory_space<vmem>>, vector<8x8xf32>,
    %65 = vector.extract_strided_slice %25 {offsets = [0, 469], sizes = [8, 16], strides = [1, 1]} : vector<8x640xf32> to vector<8x16xf32>
    %cst_51 = arith.constant dense<0.000000e+00> : vector<8x8xf32>
    %66 = tpu.matmul %65, %28, %cst_51 {dimension_numbers = #tpu.dot_dimension_numbers<[1], [0], [0], [1], [0, 0, 1, 1], [], []>} : vector<8x16xf32>, vector<16x8xf32>, vector<8x8xf32> -> vector<8x8xf32>
    %c0_52 = arith.constant 0 : index
    %c141 = arith.constant 141 : index
    %67 = vector.load %arg13[%c0_52, %c141] : memref<8x256xf32, #tpu.memory_space<vmem>>, vector<8x8xf32>
    tpu.vector_store %arg13[%c0_52, %c141], %66 {strides = array<i32>} : memref<8x256xf32, #tpu.memory_space<vmem>>, vector<8x8xf32>,
    %68 = vector.extract_strided_slice %25 {offsets = [0, 505], sizes = [8, 16], strides = [1, 1]} : vector<8x640xf32> to vector<8x16xf32>
    %cst_53 = arith.constant dense<0.000000e+00> : vector<8x8xf32>
    %69 = tpu.matmul %68, %28, %cst_53 {dimension_numbers = #tpu.dot_dimension_numbers<[1], [0], [0], [1], [0, 0, 1, 1], [], []>} : vector<8x16xf32>, vector<16x8xf32>, vector<8x8xf32> -> vector<8x8xf32>
    %c0_54 = arith.constant 0 : index
    %c151 = arith.constant 151 : index
    %70 = vector.load %arg13[%c0_54, %c151] : memref<8x256xf32, #tpu.memory_space<vmem>>, vector<8x8xf32>
    tpu.vector_store %arg13[%c0_54, %c151], %69 {strides = array<i32>} : memref<8x256xf32, #tpu.memory_space<vmem>>, vector<8x8xf32>,
    %71 = vector.extract_strided_slice %25 {offsets = [0, 541], sizes = [8, 16], strides = [1, 1]} : vector<8x640xf32> to vector<8x16xf32>
    %cst_55 = arith.constant dense<0.000000e+00> : vector<8x8xf32>
    %72 = tpu.matmul %71, %28, %cst_55 {dimension_numbers = #tpu.dot_dimension_numbers<[1], [0], [0], [1], [0, 0, 1, 1], [], []>} : vector<8x16xf32>, vector<16x8xf32>, vector<8x8xf32> -> vector<8x8xf32>
    %c0_56 = arith.constant 0 : index
    %c161 = arith.constant 161 : index
    %73 = vector.load %arg13[%c0_56, %c161] : memref<8x256xf32, #tpu.memory_space<vmem>>, vector<8x8xf32>
    tpu.vector_store %arg13[%c0_56, %c161], %72 {strides = array<i32>} : memref<8x256xf32, #tpu.memory_space<vmem>>, vector<8x8xf32>,
    %74 = vector.extract_strided_slice %25 {offsets = [0, 577], sizes = [8, 16], strides = [1, 1]} : vector<8x640xf32> to vector<8x16xf32>
    %cst_57 = arith.constant dense<0.000000e+00> : vector<8x8xf32>
    %75 = tpu.matmul %74, %28, %cst_57 {dimension_numbers = #tpu.dot_dimension_numbers<[1], [0], [0], [1], [0, 0, 1, 1], [], []>} : vector<8x16xf32>, vector<16x8xf32>, vector<8x8xf32> -> vector<8x8xf32>
    %c0_58 = arith.constant 0 : index
    %c171 = arith.constant 171 : index
    %76 = vector.load %arg13[%c0_58, %c171] : memref<8x256xf32, #tpu.memory_space<vmem>>, vector<8x8xf32>
    tpu.vector_store %arg13[%c0_58, %c171], %75 {strides = array<i32>} : memref<8x256xf32, #tpu.memory_space<vmem>>, vector<8x8xf32>,
    %c0_59 = arith.constant 0 : index
    %c0_60 = arith.constant 0 : index
    %77 = vector.load %arg13[%c0_59, %c0_60] : memref<8x256xf32, #tpu.memory_space<vmem>>, vector<8x256xf32>
    %c0_61 = arith.constant 0 : index
    %78 = memref.load %arg8[%c0_61] : memref<14xf32, #tpu.memory_space<smem>>
    %cst_62 = arith.constant 0.000000e+00 : f32
    %79 = vector.broadcast %cst_62 : f32 to vector<8x256xf32>
    %80 = arith.cmpf oge, %77, %79 : vector<8x256xf32>
    %81 = vector.broadcast %78 : f32 to vector<8x256xf32>
    %82 = arith.mulf %81, %77 : vector<8x256xf32>
    %83 = arith.select %80, %77, %82 : vector<8x256xi1>, vector<8x256xf32>
    %c0_63 = arith.constant 0 : index
    %c139 = arith.constant 139 : index
    %84 = vector.load %arg11[%c0_63, %c139] : memref<72x512xf32, #tpu.memory_space<vmem>>, vector<8x256xf32>
    tpu.vector_store %arg11[%c0_63, %c139], %83 {strides = array<i32>} : memref<72x512xf32, #tpu.memory_space<vmem>>, vector<8x256xf32>,
    %c8_64 = arith.constant 8 : index
    %c138 = arith.constant 138 : index
    %85 = vector.load %arg11[%c8_64, %c138] : memref<72x512xf32, #tpu.memory_space<vmem>>, vector<8x256xf32>
    tpu.vector_store %arg11[%c8_64, %c138], %83 {strides = array<i32>} : memref<72x512xf32, #tpu.memory_space<vmem>>, vector<8x256xf32>,
    %c16_65 = arith.constant 16 : index
    %c137 = arith.constant 137 : index
    %86 = vector.load %arg11[%c16_65, %c137] : memref<72x512xf32, #tpu.memory_space<vmem>>, vector<8x256xf32>
    tpu.vector_store %arg11[%c16_65, %c137], %83 {strides = array<i32>} : memref<72x512xf32, #tpu.memory_space<vmem>>, vector<8x256xf32>,
    %c24_66 = arith.constant 24 : index
    %c129_67 = arith.constant 129 : index
    %87 = vector.load %arg11[%c24_66, %c129_67] : memref<72x512xf32, #tpu.memory_space<vmem>>, vector<8x256xf32>
    tpu.vector_store %arg11[%c24_66, %c129_67], %83 {strides = array<i32>} : memref<72x512xf32, #tpu.memory_space<vmem>>, vector<8x256xf32>,
    %c32_68 = arith.constant 32 : index
    %c128_69 = arith.constant 128 : index
    %88 = vector.load %arg11[%c32_68, %c128_69] : memref<72x512xf32, #tpu.memory_space<vmem>>, vector<8x256xf32>
    tpu.vector_store %arg11[%c32_68, %c128_69], %83 {strides = array<i32>} : memref<72x512xf32, #tpu.memory_space<vmem>>, vector<8x256xf32>,
    %c40_70 = arith.constant 40 : index
    %c127_71 = arith.constant 127 : index
    %89 = vector.load %arg11[%c40_70, %c127_71] : memref<72x512xf32, #tpu.memory_space<vmem>>, vector<8x256xf32>
    tpu.vector_store %arg11[%c40_70, %c127_71], %83 {strides = array<i32>} : memref<72x512xf32, #tpu.memory_space<vmem>>, vector<8x256xf32>,
    %c48_72 = arith.constant 48 : index
    %c119 = arith.constant 119 : index
    %90 = vector.load %arg11[%c48_72, %c119] : memref<72x512xf32, #tpu.memory_space<vmem>>, vector<8x256xf32>
    tpu.vector_store %arg11[%c48_72, %c119], %83 {strides = array<i32>} : memref<72x512xf32, #tpu.memory_space<vmem>>, vector<8x256xf32>,
    %c56_73 = arith.constant 56 : index
    %c118 = arith.constant 118 : index
    %91 = vector.load %arg11[%c56_73, %c118] : memref<72x512xf32, #tpu.memory_space<vmem>>, vector<8x256xf32>
    tpu.vector_store %arg11[%c56_73, %c118], %83 {strides = array<i32>} : memref<72x512xf32, #tpu.memory_space<vmem>>, vector<8x256xf32>,
    %c64_74 = arith.constant 64 : index
    %c117 = arith.constant 117 : index
    %92 = vector.load %arg11[%c64_74, %c117] : memref<72x512xf32, #tpu.memory_space<vmem>>, vector<8x256xf32>
    tpu.vector_store %arg11[%c64_74, %c117], %83 {strides = array<i32>} : memref<72x512xf32, #tpu.memory_space<vmem>>, vector<8x256xf32>,
    %c1 = arith.constant 1 : index
    %c0_75 = arith.constant 0 : index
    %c0_76 = arith.constant 0 : index
    %93 = vector.load %arg1[%c1, %c0_75, %c0_76] : memref<14x8x72xf32, #tpu.memory_space<vmem>>, vector<1x8x72xf32>
    %94 = vector.shape_cast %93 : vector<1x8x72xf32> to vector<8x72xf32>
    %c0_77 = arith.constant 0 : index
    %c128_78 = arith.constant 128 : index
    %95 = vector.load %arg11[%c0_77, %c128_78] : memref<72x512xf32, #tpu.memory_space<vmem>>, vector<72x256xf32>
    %cst_79 = arith.constant dense<0.000000e+00> : vector<8x256xf32>
    %96 = tpu.matmul %94, %95, %cst_79 {dimension_numbers = #tpu.dot_dimension_numbers<[1], [0], [0], [1], [0, 0, 1, 1], [], []>} : vector<8x72xf32>, vector<72x256xf32>, vector<8x256xf32> -> vector<8x256xf32>
    %97 = vector.broadcast %1 : vector<1x256xf32> to vector<8x256xf32>
    %98 = arith.mulf %96, %97 : vector<8x256xf32>
    %c0_80 = arith.constant 0 : index
    %c0_81 = arith.constant 0 : index
    %99 = vector.load %arg2[%c0_80, %c0_81] : memref<8x13xf32, #tpu.memory_space<vmem>>, vector<8x1xf32>
    %c0_82 = arith.constant 0 : index
    %c0_83 = arith.constant 0 : index
    %100 = vector.load %arg3[%c0_82, %c0_83] : memref<8x13xf32, #tpu.memory_space<vmem>>, vector<8x1xf32>
    %cst_84 = arith.constant dense<0.000000e+00> : vector<8xf32>
    %101 = vector.multi_reduction <add>, %98, %cst_84 [1] : vector<8x256xf32> to vector<8xf32>
    %102 = vector.shape_cast %101 : vector<8xf32> to vector<8x1xf32>
    %cst_85 = arith.constant 7.812500e-03 : f32
    %103 = vector.broadcast %cst_85 : f32 to vector<8x1xf32>
    %104 = arith.mulf %102, %103 : vector<8x1xf32>
    %105 = arith.mulf %98, %98 : vector<8x256xf32>
    %cst_86 = arith.constant dense<0.000000e+00> : vector<8xf32>
    %106 = vector.multi_reduction <add>, %105, %cst_86 [1] : vector<8x256xf32> to vector<8xf32>
    %107 = vector.shape_cast %106 : vector<8xf32> to vector<8x1xf32>
    %cst_87 = arith.constant 7.812500e-03 : f32
    %108 = vector.broadcast %cst_87 : f32 to vector<8x1xf32>
    %109 = arith.mulf %107, %108 : vector<8x1xf32>
    %110 = arith.mulf %104, %104 : vector<8x1xf32>
    %111 = arith.subf %109, %110 : vector<8x1xf32>
    %cst_88 = arith.constant 9.99999974E-6 : f32
    %112 = vector.broadcast %cst_88 : f32 to vector<8x1xf32>
    %113 = arith.addf %111, %112 : vector<8x1xf32>
    %114 = math.rsqrt %113 : vector<8x1xf32>
    %115 = arith.mulf %114, %99 : vector<8x1xf32>
    %116 = arith.mulf %104, %115 : vector<8x1xf32>
    %117 = arith.subf %100, %116 : vector<8x1xf32>
    %118 = vector.broadcast %115 : vector<8x1xf32> to vector<8x256xf32>
    %119 = arith.mulf %98, %118 : vector<8x256xf32>
    %120 = vector.broadcast %117 : vector<8x1xf32> to vector<8x256xf32>
    %121 = arith.addf %119, %120 : vector<8x256xf32>
    %122 = vector.broadcast %1 : vector<1x256xf32> to vector<8x256xf32>
    %123 = arith.mulf %121, %122 : vector<8x256xf32>
    %c1_89 = arith.constant 1 : index
    %124 = memref.load %arg8[%c1_89] : memref<14xf32, #tpu.memory_space<smem>>
    %cst_90 = arith.constant 0.000000e+00 : f32
    %125 = vector.broadcast %cst_90 : f32 to vector<8x256xf32>
    %126 = arith.cmpf oge, %123, %125 : vector<8x256xf32>
    %127 = vector.broadcast %124 : f32 to vector<8x256xf32>
    %128 = arith.mulf %127, %123 : vector<8x256xf32>
    %129 = arith.select %126, %123, %128 : vector<8x256xi1>, vector<8x256xf32>
    %c0_91 = arith.constant 0 : index
    %c139_92 = arith.constant 139 : index
    %130 = vector.load %arg11[%c0_91, %c139_92] : memref<72x512xf32, #tpu.memory_space<vmem>>, vector<8x256xf32>
    tpu.vector_store %arg11[%c0_91, %c139_92], %129 {strides = array<i32>} : memref<72x512xf32, #tpu.memory_space<vmem>>, vector<8x256xf32>,
    %c8_93 = arith.constant 8 : index
    %c138_94 = arith.constant 138 : index
    %131 = vector.load %arg11[%c8_93, %c138_94] : memref<72x512xf32, #tpu.memory_space<vmem>>, vector<8x256xf32>
    tpu.vector_store %arg11[%c8_93, %c138_94], %129 {strides = array<i32>} : memref<72x512xf32, #tpu.memory_space<vmem>>, vector<8x256xf32>,
    %c16_95 = arith.constant 16 : index
    %c137_96 = arith.constant 137 : index
    %132 = vector.load %arg11[%c16_95, %c137_96] : memref<72x512xf32, #tpu.memory_space<vmem>>, vector<8x256xf32>
    tpu.vector_store %arg11[%c16_95, %c137_96], %129 {strides = array<i32>} : memref<72x512xf32, #tpu.memory_space<vmem>>, vector<8x256xf32>,
    %c24_97 = arith.constant 24 : index
    %c129_98 = arith.constant 129 : index
    %133 = vector.load %arg11[%c24_97, %c129_98] : memref<72x512xf32, #tpu.memory_space<vmem>>, vector<8x256xf32>
    tpu.vector_store %arg11[%c24_97, %c129_98], %129 {strides = array<i32>} : memref<72x512xf32, #tpu.memory_space<vmem>>, vector<8x256xf32>,
    %c32_99 = arith.constant 32 : index
    %c128_100 = arith.constant 128 : index
    %134 = vector.load %arg11[%c32_99, %c128_100] : memref<72x512xf32, #tpu.memory_space<vmem>>, vector<8x256xf32>
    tpu.vector_store %arg11[%c32_99, %c128_100], %129 {strides = array<i32>} : memref<72x512xf32, #tpu.memory_space<vmem>>, vector<8x256xf32>,
    %c40_101 = arith.constant 40 : index
    %c127_102 = arith.constant 127 : index
    %135 = vector.load %arg11[%c40_101, %c127_102] : memref<72x512xf32, #tpu.memory_space<vmem>>, vector<8x256xf32>
    tpu.vector_store %arg11[%c40_101, %c127_102], %129 {strides = array<i32>} : memref<72x512xf32, #tpu.memory_space<vmem>>, vector<8x256xf32>,
    %c48_103 = arith.constant 48 : index
    %c119_104 = arith.constant 119 : index
    %136 = vector.load %arg11[%c48_103, %c119_104] : memref<72x512xf32, #tpu.memory_space<vmem>>, vector<8x256xf32>
    tpu.vector_store %arg11[%c48_103, %c119_104], %129 {strides = array<i32>} : memref<72x512xf32, #tpu.memory_space<vmem>>, vector<8x256xf32>,
    %c56_105 = arith.constant 56 : index
    %c118_106 = arith.constant 118 : index
    %137 = vector.load %arg11[%c56_105, %c118_106] : memref<72x512xf32, #tpu.memory_space<vmem>>, vector<8x256xf32>
    tpu.vector_store %arg11[%c56_105, %c118_106], %129 {strides = array<i32>} : memref<72x512xf32, #tpu.memory_space<vmem>>, vector<8x256xf32>,
    %c64_107 = arith.constant 64 : index
    %c117_108 = arith.constant 117 : index
    %138 = vector.load %arg11[%c64_107, %c117_108] : memref<72x512xf32, #tpu.memory_space<vmem>>, vector<8x256xf32>
    tpu.vector_store %arg11[%c64_107, %c117_108], %129 {strides = array<i32>} : memref<72x512xf32, #tpu.memory_space<vmem>>, vector<8x256xf32>,
    %c2 = arith.constant 2 : index
    %c0_109 = arith.constant 0 : index
    %c0_110 = arith.constant 0 : index
    %139 = vector.load %arg1[%c2, %c0_109, %c0_110] : memref<14x8x72xf32, #tpu.memory_space<vmem>>, vector<1x8x72xf32>
    %140 = vector.shape_cast %139 : vector<1x8x72xf32> to vector<8x72xf32>
    %c0_111 = arith.constant 0 : index
    %c128_112 = arith.constant 128 : index
    %141 = vector.load %arg11[%c0_111, %c128_112] : memref<72x512xf32, #tpu.memory_space<vmem>>, vector<72x256xf32>
    %cst_113 = arith.constant dense<0.000000e+00> : vector<8x256xf32>
    %142 = tpu.matmul %140, %141, %cst_113 {dimension_numbers = #tpu.dot_dimension_numbers<[1], [0], [0], [1], [0, 0, 1, 1], [], []>} : vector<8x72xf32>, vector<72x256xf32>, vector<8x256xf32> -> vector<8x256xf32>
    %143 = vector.broadcast %1 : vector<1x256xf32> to vector<8x256xf32>
    %144 = arith.mulf %142, %143 : vector<8x256xf32>
    %c0_114 = arith.constant 0 : index
    %c1_115 = arith.constant 1 : index
    %145 = vector.load %arg2[%c0_114, %c1_115] : memref<8x13xf32, #tpu.memory_space<vmem>>, vector<8x1xf32>
    %c0_116 = arith.constant 0 : index
    %c1_117 = arith.constant 1 : index
    %146 = vector.load %arg3[%c0_116, %c1_117] : memref<8x13xf32, #tpu.memory_space<vmem>>, vector<8x1xf32>
    %cst_118 = arith.constant dense<0.000000e+00> : vector<8xf32>
    %147 = vector.multi_reduction <add>, %144, %cst_118 [1] : vector<8x256xf32> to vector<8xf32>
    %148 = vector.shape_cast %147 : vector<8xf32> to vector<8x1xf32>
    %cst_119 = arith.constant 7.812500e-03 : f32
    %149 = vector.broadcast %cst_119 : f32 to vector<8x1xf32>
    %150 = arith.mulf %148, %149 : vector<8x1xf32>
    %151 = arith.mulf %144, %144 : vector<8x256xf32>
    %cst_120 = arith.constant dense<0.000000e+00> : vector<8xf32>
    %152 = vector.multi_reduction <add>, %151, %cst_120 [1] : vector<8x256xf32> to vector<8xf32>
    %153 = vector.shape_cast %152 : vector<8xf32> to vector<8x1xf32>
    %cst_121 = arith.constant 7.812500e-03 : f32
    %154 = vector.broadcast %cst_121 : f32 to vector<8x1xf32>
    %155 = arith.mulf %153, %154 : vector<8x1xf32>
    %156 = arith.mulf %150, %150 : vector<8x1xf32>
    %157 = arith.subf %155, %156 : vector<8x1xf32>
    %cst_122 = arith.constant 9.99999974E-6 : f32
    %158 = vector.broadcast %cst_122 : f32 to vector<8x1xf32>
    %159 = arith.addf %157, %158 : vector<8x1xf32>
    %160 = math.rsqrt %159 : vector<8x1xf32>
    %161 = arith.mulf %160, %145 : vector<8x1xf32>
    %162 = arith.mulf %150, %161 : vector<8x1xf32>
    %163 = arith.subf %146, %162 : vector<8x1xf32>
    %164 = vector.broadcast %161 : vector<8x1xf32> to vector<8x256xf32>
    %165 = arith.mulf %144, %164 : vector<8x256xf32>
    %166 = vector.broadcast %163 : vector<8x1xf32> to vector<8x256xf32>
    %167 = arith.addf %165, %166 : vector<8x256xf32>
    %168 = vector.broadcast %1 : vector<1x256xf32> to vector<8x256xf32>
    %169 = arith.mulf %167, %168 : vector<8x256xf32>
    %170 = arith.addf %169, %83 : vector<8x256xf32>
    %c2_123 = arith.constant 2 : index
    %171 = memref.load %arg8[%c2_123] : memref<14xf32, #tpu.memory_space<smem>>
    %cst_124 = arith.constant 0.000000e+00 : f32
    %172 = vector.broadcast %cst_124 : f32 to vector<8x256xf32>
    %173 = arith.cmpf oge, %170, %172 : vector<8x256xf32>
    %174 = vector.broadcast %171 : f32 to vector<8x256xf32>
    %175 = arith.mulf %174, %170 : vector<8x256xf32>
    %176 = arith.select %173, %170, %175 : vector<8x256xi1>, vector<8x256xf32>
    %c0_125 = arith.constant 0 : index
    %c139_126 = arith.constant 139 : index
    %177 = vector.load %arg11[%c0_125, %c139_126] : memref<72x512xf32, #tpu.memory_space<vmem>>, vector<8x256xf32>
    tpu.vector_store %arg11[%c0_125, %c139_126], %176 {strides = array<i32>} : memref<72x512xf32, #tpu.memory_space<vmem>>, vector<8x256xf32>,
    %c8_127 = arith.constant 8 : index
    %c138_128 = arith.constant 138 : index
    %178 = vector.load %arg11[%c8_127, %c138_128] : memref<72x512xf32, #tpu.memory_space<vmem>>, vector<8x256xf32>
    tpu.vector_store %arg11[%c8_127, %c138_128], %176 {strides = array<i32>} : memref<72x512xf32, #tpu.memory_space<vmem>>, vector<8x256xf32>,
    %c16_129 = arith.constant 16 : index
    %c137_130 = arith.constant 137 : index
    %179 = vector.load %arg11[%c16_129, %c137_130] : memref<72x512xf32, #tpu.memory_space<vmem>>, vector<8x256xf32>
    tpu.vector_store %arg11[%c16_129, %c137_130], %176 {strides = array<i32>} : memref<72x512xf32, #tpu.memory_space<vmem>>, vector<8x256xf32>,
    %c24_131 = arith.constant 24 : index
    %c129_132 = arith.constant 129 : index
    %180 = vector.load %arg11[%c24_131, %c129_132] : memref<72x512xf32, #tpu.memory_space<vmem>>, vector<8x256xf32>
    tpu.vector_store %arg11[%c24_131, %c129_132], %176 {strides = array<i32>} : memref<72x512xf32, #tpu.memory_space<vmem>>, vector<8x256xf32>,
    %c32_133 = arith.constant 32 : index
    %c128_134 = arith.constant 128 : index
    %181 = vector.load %arg11[%c32_133, %c128_134] : memref<72x512xf32, #tpu.memory_space<vmem>>, vector<8x256xf32>
    tpu.vector_store %arg11[%c32_133, %c128_134], %176 {strides = array<i32>} : memref<72x512xf32, #tpu.memory_space<vmem>>, vector<8x256xf32>,
    %c40_135 = arith.constant 40 : index
    %c127_136 = arith.constant 127 : index
    %182 = vector.load %arg11[%c40_135, %c127_136] : memref<72x512xf32, #tpu.memory_space<vmem>>, vector<8x256xf32>
    tpu.vector_store %arg11[%c40_135, %c127_136], %176 {strides = array<i32>} : memref<72x512xf32, #tpu.memory_space<vmem>>, vector<8x256xf32>,
    %c48_137 = arith.constant 48 : index
    %c119_138 = arith.constant 119 : index
    %183 = vector.load %arg11[%c48_137, %c119_138] : memref<72x512xf32, #tpu.memory_space<vmem>>, vector<8x256xf32>
    tpu.vector_store %arg11[%c48_137, %c119_138], %176 {strides = array<i32>} : memref<72x512xf32, #tpu.memory_space<vmem>>, vector<8x256xf32>,
    %c56_139 = arith.constant 56 : index
    %c118_140 = arith.constant 118 : index
    %184 = vector.load %arg11[%c56_139, %c118_140] : memref<72x512xf32, #tpu.memory_space<vmem>>, vector<8x256xf32>
    tpu.vector_store %arg11[%c56_139, %c118_140], %176 {strides = array<i32>} : memref<72x512xf32, #tpu.memory_space<vmem>>, vector<8x256xf32>,
    %c64_141 = arith.constant 64 : index
    %c117_142 = arith.constant 117 : index
    %185 = vector.load %arg11[%c64_141, %c117_142] : memref<72x512xf32, #tpu.memory_space<vmem>>, vector<8x256xf32>
    tpu.vector_store %arg11[%c64_141, %c117_142], %176 {strides = array<i32>} : memref<72x512xf32, #tpu.memory_space<vmem>>, vector<8x256xf32>,
    %c3 = arith.constant 3 : index
    %c0_143 = arith.constant 0 : index
    %c0_144 = arith.constant 0 : index
    %186 = vector.load %arg1[%c3, %c0_143, %c0_144] : memref<14x8x72xf32, #tpu.memory_space<vmem>>, vector<1x8x72xf32>
    %187 = vector.shape_cast %186 : vector<1x8x72xf32> to vector<8x72xf32>
    %c0_145 = arith.constant 0 : index
    %c128_146 = arith.constant 128 : index
    %188 = vector.load %arg11[%c0_145, %c128_146] : memref<72x512xf32, #tpu.memory_space<vmem>>, vector<72x256xf32>
    %cst_147 = arith.constant dense<0.000000e+00> : vector<8x256xf32>
    %189 = tpu.matmul %187, %188, %cst_147 {dimension_numbers = #tpu.dot_dimension_numbers<[1], [0], [0], [1], [0, 0, 1, 1], [], []>} : vector<8x72xf32>, vector<72x256xf32>, vector<8x256xf32> -> vector<8x256xf32>
    %190 = vector.broadcast %1 : vector<1x256xf32> to vector<8x256xf32>
    %191 = arith.mulf %189, %190 : vector<8x256xf32>
    %c0_148 = arith.constant 0 : index
    %c2_149 = arith.constant 2 : index
    %192 = vector.load %arg2[%c0_148, %c2_149] : memref<8x13xf32, #tpu.memory_space<vmem>>, vector<8x1xf32>
    %c0_150 = arith.constant 0 : index
    %c2_151 = arith.constant 2 : index
    %193 = vector.load %arg3[%c0_150, %c2_151] : memref<8x13xf32, #tpu.memory_space<vmem>>, vector<8x1xf32>
    %cst_152 = arith.constant dense<0.000000e+00> : vector<8xf32>
    %194 = vector.multi_reduction <add>, %191, %cst_152 [1] : vector<8x256xf32> to vector<8xf32>
    %195 = vector.shape_cast %194 : vector<8xf32> to vector<8x1xf32>
    %cst_153 = arith.constant 7.812500e-03 : f32
    %196 = vector.broadcast %cst_153 : f32 to vector<8x1xf32>
    %197 = arith.mulf %195, %196 : vector<8x1xf32>
    %198 = arith.mulf %191, %191 : vector<8x256xf32>
    %cst_154 = arith.constant dense<0.000000e+00> : vector<8xf32>
    %199 = vector.multi_reduction <add>, %198, %cst_154 [1] : vector<8x256xf32> to vector<8xf32>
    %200 = vector.shape_cast %199 : vector<8xf32> to vector<8x1xf32>
    %cst_155 = arith.constant 7.812500e-03 : f32
    %201 = vector.broadcast %cst_155 : f32 to vector<8x1xf32>
    %202 = arith.mulf %200, %201 : vector<8x1xf32>
    %203 = arith.mulf %197, %197 : vector<8x1xf32>
    %204 = arith.subf %202, %203 : vector<8x1xf32>
    %cst_156 = arith.constant 9.99999974E-6 : f32
    %205 = vector.broadcast %cst_156 : f32 to vector<8x1xf32>
    %206 = arith.addf %204, %205 : vector<8x1xf32>
    %207 = math.rsqrt %206 : vector<8x1xf32>
    %208 = arith.mulf %207, %192 : vector<8x1xf32>
    %209 = arith.mulf %197, %208 : vector<8x1xf32>
    %210 = arith.subf %193, %209 : vector<8x1xf32>
    %211 = vector.broadcast %208 : vector<8x1xf32> to vector<8x256xf32>
    %212 = arith.mulf %191, %211 : vector<8x256xf32>
    %213 = vector.broadcast %210 : vector<8x1xf32> to vector<8x256xf32>
    %214 = arith.addf %212, %213 : vector<8x256xf32>
    %215 = vector.broadcast %1 : vector<1x256xf32> to vector<8x256xf32>
    %216 = arith.mulf %214, %215 : vector<8x256xf32>
    %c3_157 = arith.constant 3 : index
    %217 = memref.load %arg8[%c3_157] : memref<14xf32, #tpu.memory_space<smem>>
    %cst_158 = arith.constant 0.000000e+00 : f32
    %218 = vector.broadcast %cst_158 : f32 to vector<8x256xf32>
    %219 = arith.cmpf oge, %216, %218 : vector<8x256xf32>
    %220 = vector.broadcast %217 : f32 to vector<8x256xf32>
    %221 = arith.mulf %220, %216 : vector<8x256xf32>
    %222 = arith.select %219, %216, %221 : vector<8x256xi1>, vector<8x256xf32>
    %c0_159 = arith.constant 0 : index
    %c139_160 = arith.constant 139 : index
    %223 = vector.load %arg11[%c0_159, %c139_160] : memref<72x512xf32, #tpu.memory_space<vmem>>, vector<8x256xf32>
    tpu.vector_store %arg11[%c0_159, %c139_160], %222 {strides = array<i32>} : memref<72x512xf32, #tpu.memory_space<vmem>>, vector<8x256xf32>,
    %c8_161 = arith.constant 8 : index
    %c138_162 = arith.constant 138 : index
    %224 = vector.load %arg11[%c8_161, %c138_162] : memref<72x512xf32, #tpu.memory_space<vmem>>, vector<8x256xf32>
    tpu.vector_store %arg11[%c8_161, %c138_162], %222 {strides = array<i32>} : memref<72x512xf32, #tpu.memory_space<vmem>>, vector<8x256xf32>,
    %c16_163 = arith.constant 16 : index
    %c137_164 = arith.constant 137 : index
    %225 = vector.load %arg11[%c16_163, %c137_164] : memref<72x512xf32, #tpu.memory_space<vmem>>, vector<8x256xf32>
    tpu.vector_store %arg11[%c16_163, %c137_164], %222 {strides = array<i32>} : memref<72x512xf32, #tpu.memory_space<vmem>>, vector<8x256xf32>,
    %c24_165 = arith.constant 24 : index
    %c129_166 = arith.constant 129 : index
    %226 = vector.load %arg11[%c24_165, %c129_166] : memref<72x512xf32, #tpu.memory_space<vmem>>, vector<8x256xf32>
    tpu.vector_store %arg11[%c24_165, %c129_166], %222 {strides = array<i32>} : memref<72x512xf32, #tpu.memory_space<vmem>>, vector<8x256xf32>,
    %c32_167 = arith.constant 32 : index
    %c128_168 = arith.constant 128 : index
    %227 = vector.load %arg11[%c32_167, %c128_168] : memref<72x512xf32, #tpu.memory_space<vmem>>, vector<8x256xf32>
    tpu.vector_store %arg11[%c32_167, %c128_168], %222 {strides = array<i32>} : memref<72x512xf32, #tpu.memory_space<vmem>>, vector<8x256xf32>,
    %c40_169 = arith.constant 40 : index
    %c127_170 = arith.constant 127 : index
    %228 = vector.load %arg11[%c40_169, %c127_170] : memref<72x512xf32, #tpu.memory_space<vmem>>, vector<8x256xf32>
    tpu.vector_store %arg11[%c40_169, %c127_170], %222 {strides = array<i32>} : memref<72x512xf32, #tpu.memory_space<vmem>>, vector<8x256xf32>,
    %c48_171 = arith.constant 48 : index
    %c119_172 = arith.constant 119 : index
    %229 = vector.load %arg11[%c48_171, %c119_172] : memref<72x512xf32, #tpu.memory_space<vmem>>, vector<8x256xf32>
    tpu.vector_store %arg11[%c48_171, %c119_172], %222 {strides = array<i32>} : memref<72x512xf32, #tpu.memory_space<vmem>>, vector<8x256xf32>,
    %c56_173 = arith.constant 56 : index
    %c118_174 = arith.constant 118 : index
    %230 = vector.load %arg11[%c56_173, %c118_174] : memref<72x512xf32, #tpu.memory_space<vmem>>, vector<8x256xf32>
    tpu.vector_store %arg11[%c56_173, %c118_174], %222 {strides = array<i32>} : memref<72x512xf32, #tpu.memory_space<vmem>>, vector<8x256xf32>,
    %c64_175 = arith.constant 64 : index
    %c117_176 = arith.constant 117 : index
    %231 = vector.load %arg11[%c64_175, %c117_176] : memref<72x512xf32, #tpu.memory_space<vmem>>, vector<8x256xf32>
    tpu.vector_store %arg11[%c64_175, %c117_176], %222 {strides = array<i32>} : memref<72x512xf32, #tpu.memory_space<vmem>>, vector<8x256xf32>,
    %c4 = arith.constant 4 : index
    %c0_177 = arith.constant 0 : index
    %c0_178 = arith.constant 0 : index
    %232 = vector.load %arg1[%c4, %c0_177, %c0_178] : memref<14x8x72xf32, #tpu.memory_space<vmem>>, vector<1x8x72xf32>
    %233 = vector.shape_cast %232 : vector<1x8x72xf32> to vector<8x72xf32>
    %c0_179 = arith.constant 0 : index
    %c128_180 = arith.constant 128 : index
    %234 = vector.load %arg11[%c0_179, %c128_180] : memref<72x512xf32, #tpu.memory_space<vmem>>, vector<72x256xf32>
    %cst_181 = arith.constant dense<0.000000e+00> : vector<8x256xf32>
    %235 = tpu.matmul %233, %234, %cst_181 {dimension_numbers = #tpu.dot_dimension_numbers<[1], [0], [0], [1], [0, 0, 1, 1], [], []>} : vector<8x72xf32>, vector<72x256xf32>, vector<8x256xf32> -> vector<8x256xf32>
    %236 = vector.broadcast %1 : vector<1x256xf32> to vector<8x256xf32>
    %237 = arith.mulf %235, %236 : vector<8x256xf32>
    %c0_182 = arith.constant 0 : index
    %c3_183 = arith.constant 3 : index
    %238 = vector.load %arg2[%c0_182, %c3_183] : memref<8x13xf32, #tpu.memory_space<vmem>>, vector<8x1xf32>
    %c0_184 = arith.constant 0 : index
    %c3_185 = arith.constant 3 : index
    %239 = vector.load %arg3[%c0_184, %c3_185] : memref<8x13xf32, #tpu.memory_space<vmem>>, vector<8x1xf32>
    %cst_186 = arith.constant dense<0.000000e+00> : vector<8xf32>
    %240 = vector.multi_reduction <add>, %237, %cst_186 [1] : vector<8x256xf32> to vector<8xf32>
    %241 = vector.shape_cast %240 : vector<8xf32> to vector<8x1xf32>
    %cst_187 = arith.constant 7.812500e-03 : f32
    %242 = vector.broadcast %cst_187 : f32 to vector<8x1xf32>
    %243 = arith.mulf %241, %242 : vector<8x1xf32>
    %244 = arith.mulf %237, %237 : vector<8x256xf32>
    %cst_188 = arith.constant dense<0.000000e+00> : vector<8xf32>
    %245 = vector.multi_reduction <add>, %244, %cst_188 [1] : vector<8x256xf32> to vector<8xf32>
    %246 = vector.shape_cast %245 : vector<8xf32> to vector<8x1xf32>
    %cst_189 = arith.constant 7.812500e-03 : f32
    %247 = vector.broadcast %cst_189 : f32 to vector<8x1xf32>
    %248 = arith.mulf %246, %247 : vector<8x1xf32>
    %249 = arith.mulf %243, %243 : vector<8x1xf32>
    %250 = arith.subf %248, %249 : vector<8x1xf32>
    %cst_190 = arith.constant 9.99999974E-6 : f32
    %251 = vector.broadcast %cst_190 : f32 to vector<8x1xf32>
    %252 = arith.addf %250, %251 : vector<8x1xf32>
    %253 = math.rsqrt %252 : vector<8x1xf32>
    %254 = arith.mulf %253, %238 : vector<8x1xf32>
    %255 = arith.mulf %243, %254 : vector<8x1xf32>
    %256 = arith.subf %239, %255 : vector<8x1xf32>
    %257 = vector.broadcast %254 : vector<8x1xf32> to vector<8x256xf32>
    %258 = arith.mulf %237, %257 : vector<8x256xf32>
    %259 = vector.broadcast %256 : vector<8x1xf32> to vector<8x256xf32>
    %260 = arith.addf %258, %259 : vector<8x256xf32>
    %261 = vector.broadcast %1 : vector<1x256xf32> to vector<8x256xf32>
    %262 = arith.mulf %260, %261 : vector<8x256xf32>
    %263 = arith.addf %262, %176 : vector<8x256xf32>
    %c4_191 = arith.constant 4 : index
    %264 = memref.load %arg8[%c4_191] : memref<14xf32, #tpu.memory_space<smem>>
    %cst_192 = arith.constant 0.000000e+00 : f32
    %265 = vector.broadcast %cst_192 : f32 to vector<8x256xf32>
    %266 = arith.cmpf oge, %263, %265 : vector<8x256xf32>
    %267 = vector.broadcast %264 : f32 to vector<8x256xf32>
    %268 = arith.mulf %267, %263 : vector<8x256xf32>
    %269 = arith.select %266, %263, %268 : vector<8x256xi1>, vector<8x256xf32>
    %c0_193 = arith.constant 0 : index
    %c139_194 = arith.constant 139 : index
    %270 = vector.load %arg11[%c0_193, %c139_194] : memref<72x512xf32, #tpu.memory_space<vmem>>, vector<8x256xf32>
    tpu.vector_store %arg11[%c0_193, %c139_194], %269 {strides = array<i32>} : memref<72x512xf32, #tpu.memory_space<vmem>>, vector<8x256xf32>,
    %c8_195 = arith.constant 8 : index
    %c138_196 = arith.constant 138 : index
    %271 = vector.load %arg11[%c8_195, %c138_196] : memref<72x512xf32, #tpu.memory_space<vmem>>, vector<8x256xf32>
    tpu.vector_store %arg11[%c8_195, %c138_196], %269 {strides = array<i32>} : memref<72x512xf32, #tpu.memory_space<vmem>>, vector<8x256xf32>,
    %c16_197 = arith.constant 16 : index
    %c137_198 = arith.constant 137 : index
    %272 = vector.load %arg11[%c16_197, %c137_198] : memref<72x512xf32, #tpu.memory_space<vmem>>, vector<8x256xf32>
    tpu.vector_store %arg11[%c16_197, %c137_198], %269 {strides = array<i32>} : memref<72x512xf32, #tpu.memory_space<vmem>>, vector<8x256xf32>,
    %c24_199 = arith.constant 24 : index
    %c129_200 = arith.constant 129 : index
    %273 = vector.load %arg11[%c24_199, %c129_200] : memref<72x512xf32, #tpu.memory_space<vmem>>, vector<8x256xf32>
    tpu.vector_store %arg11[%c24_199, %c129_200], %269 {strides = array<i32>} : memref<72x512xf32, #tpu.memory_space<vmem>>, vector<8x256xf32>,
    %c32_201 = arith.constant 32 : index
    %c128_202 = arith.constant 128 : index
    %274 = vector.load %arg11[%c32_201, %c128_202] : memref<72x512xf32, #tpu.memory_space<vmem>>, vector<8x256xf32>
    tpu.vector_store %arg11[%c32_201, %c128_202], %269 {strides = array<i32>} : memref<72x512xf32, #tpu.memory_space<vmem>>, vector<8x256xf32>,
    %c40_203 = arith.constant 40 : index
    %c127_204 = arith.constant 127 : index
    %275 = vector.load %arg11[%c40_203, %c127_204] : memref<72x512xf32, #tpu.memory_space<vmem>>, vector<8x256xf32>
    tpu.vector_store %arg11[%c40_203, %c127_204], %269 {strides = array<i32>} : memref<72x512xf32, #tpu.memory_space<vmem>>, vector<8x256xf32>,
    %c48_205 = arith.constant 48 : index
    %c119_206 = arith.constant 119 : index
    %276 = vector.load %arg11[%c48_205, %c119_206] : memref<72x512xf32, #tpu.memory_space<vmem>>, vector<8x256xf32>
    tpu.vector_store %arg11[%c48_205, %c119_206], %269 {strides = array<i32>} : memref<72x512xf32, #tpu.memory_space<vmem>>, vector<8x256xf32>,
    %c56_207 = arith.constant 56 : index
    %c118_208 = arith.constant 118 : index
    %277 = vector.load %arg11[%c56_207, %c118_208] : memref<72x512xf32, #tpu.memory_space<vmem>>, vector<8x256xf32>
    tpu.vector_store %arg11[%c56_207, %c118_208], %269 {strides = array<i32>} : memref<72x512xf32, #tpu.memory_space<vmem>>, vector<8x256xf32>,
    %c64_209 = arith.constant 64 : index
    %c117_210 = arith.constant 117 : index
    %278 = vector.load %arg11[%c64_209, %c117_210] : memref<72x512xf32, #tpu.memory_space<vmem>>, vector<8x256xf32>
    tpu.vector_store %arg11[%c64_209, %c117_210], %269 {strides = array<i32>} : memref<72x512xf32, #tpu.memory_space<vmem>>, vector<8x256xf32>,
    %c5 = arith.constant 5 : index
    %c0_211 = arith.constant 0 : index
    %c0_212 = arith.constant 0 : index
    %279 = vector.load %arg1[%c5, %c0_211, %c0_212] : memref<14x8x72xf32, #tpu.memory_space<vmem>>, vector<1x8x72xf32>
    %280 = vector.shape_cast %279 : vector<1x8x72xf32> to vector<8x72xf32>
    %c0_213 = arith.constant 0 : index
    %c128_214 = arith.constant 128 : index
    %281 = vector.load %arg11[%c0_213, %c128_214] : memref<72x512xf32, #tpu.memory_space<vmem>>, vector<72x256xf32>
    %cst_215 = arith.constant dense<0.000000e+00> : vector<8x256xf32>
    %282 = tpu.matmul %280, %281, %cst_215 {dimension_numbers = #tpu.dot_dimension_numbers<[1], [0], [0], [1], [0, 0, 1, 1], [], []>} : vector<8x72xf32>, vector<72x256xf32>, vector<8x256xf32> -> vector<8x256xf32>
    %283 = vector.broadcast %1 : vector<1x256xf32> to vector<8x256xf32>
    %284 = arith.mulf %282, %283 : vector<8x256xf32>
    %c0_216 = arith.constant 0 : index
    %c4_217 = arith.constant 4 : index
    %285 = vector.load %arg2[%c0_216, %c4_217] : memref<8x13xf32, #tpu.memory_space<vmem>>, vector<8x1xf32>
    %c0_218 = arith.constant 0 : index
    %c4_219 = arith.constant 4 : index
    %286 = vector.load %arg3[%c0_218, %c4_219] : memref<8x13xf32, #tpu.memory_space<vmem>>, vector<8x1xf32>
    %cst_220 = arith.constant dense<0.000000e+00> : vector<8xf32>
    %287 = vector.multi_reduction <add>, %284, %cst_220 [1] : vector<8x256xf32> to vector<8xf32>
    %288 = vector.shape_cast %287 : vector<8xf32> to vector<8x1xf32>
    %cst_221 = arith.constant 7.812500e-03 : f32
    %289 = vector.broadcast %cst_221 : f32 to vector<8x1xf32>
    %290 = arith.mulf %288, %289 : vector<8x1xf32>
    %291 = arith.mulf %284, %284 : vector<8x256xf32>
    %cst_222 = arith.constant dense<0.000000e+00> : vector<8xf32>
    %292 = vector.multi_reduction <add>, %291, %cst_222 [1] : vector<8x256xf32> to vector<8xf32>
    %293 = vector.shape_cast %292 : vector<8xf32> to vector<8x1xf32>
    %cst_223 = arith.constant 7.812500e-03 : f32
    %294 = vector.broadcast %cst_223 : f32 to vector<8x1xf32>
    %295 = arith.mulf %293, %294 : vector<8x1xf32>
    %296 = arith.mulf %290, %290 : vector<8x1xf32>
    %297 = arith.subf %295, %296 : vector<8x1xf32>
    %cst_224 = arith.constant 9.99999974E-6 : f32
    %298 = vector.broadcast %cst_224 : f32 to vector<8x1xf32>
    %299 = arith.addf %297, %298 : vector<8x1xf32>
    %300 = math.rsqrt %299 : vector<8x1xf32>
    %301 = arith.mulf %300, %285 : vector<8x1xf32>
    %302 = arith.mulf %290, %301 : vector<8x1xf32>
    %303 = arith.subf %286, %302 : vector<8x1xf32>
    %304 = vector.broadcast %301 : vector<8x1xf32> to vector<8x256xf32>
    %305 = arith.mulf %284, %304 : vector<8x256xf32>
    %306 = vector.broadcast %303 : vector<8x1xf32> to vector<8x256xf32>
    %307 = arith.addf %305, %306 : vector<8x256xf32>
    %308 = vector.broadcast %1 : vector<1x256xf32> to vector<8x256xf32>
    %309 = arith.mulf %307, %308 : vector<8x256xf32>
    %c5_225 = arith.constant 5 : index
    %310 = memref.load %arg8[%c5_225] : memref<14xf32, #tpu.memory_space<smem>>
    %cst_226 = arith.constant 0.000000e+00 : f32
    %311 = vector.broadcast %cst_226 : f32 to vector<8x256xf32>
    %312 = arith.cmpf oge, %309, %311 : vector<8x256xf32>
    %313 = vector.broadcast %310 : f32 to vector<8x256xf32>
    %314 = arith.mulf %313, %309 : vector<8x256xf32>
    %315 = arith.select %312, %309, %314 : vector<8x256xi1>, vector<8x256xf32>
    %c0_227 = arith.constant 0 : index
    %c139_228 = arith.constant 139 : index
    %316 = vector.load %arg11[%c0_227, %c139_228] : memref<72x512xf32, #tpu.memory_space<vmem>>, vector<8x256xf32>
    tpu.vector_store %arg11[%c0_227, %c139_228], %315 {strides = array<i32>} : memref<72x512xf32, #tpu.memory_space<vmem>>, vector<8x256xf32>,
    %c8_229 = arith.constant 8 : index
    %c138_230 = arith.constant 138 : index
    %317 = vector.load %arg11[%c8_229, %c138_230] : memref<72x512xf32, #tpu.memory_space<vmem>>, vector<8x256xf32>
    tpu.vector_store %arg11[%c8_229, %c138_230], %315 {strides = array<i32>} : memref<72x512xf32, #tpu.memory_space<vmem>>, vector<8x256xf32>,
    %c16_231 = arith.constant 16 : index
    %c137_232 = arith.constant 137 : index
    %318 = vector.load %arg11[%c16_231, %c137_232] : memref<72x512xf32, #tpu.memory_space<vmem>>, vector<8x256xf32>
    tpu.vector_store %arg11[%c16_231, %c137_232], %315 {strides = array<i32>} : memref<72x512xf32, #tpu.memory_space<vmem>>, vector<8x256xf32>,
    %c24_233 = arith.constant 24 : index
    %c129_234 = arith.constant 129 : index
    %319 = vector.load %arg11[%c24_233, %c129_234] : memref<72x512xf32, #tpu.memory_space<vmem>>, vector<8x256xf32>
    tpu.vector_store %arg11[%c24_233, %c129_234], %315 {strides = array<i32>} : memref<72x512xf32, #tpu.memory_space<vmem>>, vector<8x256xf32>,
    %c32_235 = arith.constant 32 : index
    %c128_236 = arith.constant 128 : index
    %320 = vector.load %arg11[%c32_235, %c128_236] : memref<72x512xf32, #tpu.memory_space<vmem>>, vector<8x256xf32>
    tpu.vector_store %arg11[%c32_235, %c128_236], %315 {strides = array<i32>} : memref<72x512xf32, #tpu.memory_space<vmem>>, vector<8x256xf32>,
    %c40_237 = arith.constant 40 : index
    %c127_238 = arith.constant 127 : index
    %321 = vector.load %arg11[%c40_237, %c127_238] : memref<72x512xf32, #tpu.memory_space<vmem>>, vector<8x256xf32>
    tpu.vector_store %arg11[%c40_237, %c127_238], %315 {strides = array<i32>} : memref<72x512xf32, #tpu.memory_space<vmem>>, vector<8x256xf32>,
    %c48_239 = arith.constant 48 : index
    %c119_240 = arith.constant 119 : index
    %322 = vector.load %arg11[%c48_239, %c119_240] : memref<72x512xf32, #tpu.memory_space<vmem>>, vector<8x256xf32>
    tpu.vector_store %arg11[%c48_239, %c119_240], %315 {strides = array<i32>} : memref<72x512xf32, #tpu.memory_space<vmem>>, vector<8x256xf32>,
    %c56_241 = arith.constant 56 : index
    %c118_242 = arith.constant 118 : index
    %323 = vector.load %arg11[%c56_241, %c118_242] : memref<72x512xf32, #tpu.memory_space<vmem>>, vector<8x256xf32>
    tpu.vector_store %arg11[%c56_241, %c118_242], %315 {strides = array<i32>} : memref<72x512xf32, #tpu.memory_space<vmem>>, vector<8x256xf32>,
    %c64_243 = arith.constant 64 : index
    %c117_244 = arith.constant 117 : index
    %324 = vector.load %arg11[%c64_243, %c117_244] : memref<72x512xf32, #tpu.memory_space<vmem>>, vector<8x256xf32>
    tpu.vector_store %arg11[%c64_243, %c117_244], %315 {strides = array<i32>} : memref<72x512xf32, #tpu.memory_space<vmem>>, vector<8x256xf32>,
    %c6 = arith.constant 6 : index
    %c0_245 = arith.constant 0 : index
    %c0_246 = arith.constant 0 : index
    %325 = vector.load %arg1[%c6, %c0_245, %c0_246] : memref<14x8x72xf32, #tpu.memory_space<vmem>>, vector<1x8x72xf32>
    %326 = vector.shape_cast %325 : vector<1x8x72xf32> to vector<8x72xf32>
    %c0_247 = arith.constant 0 : index
    %c128_248 = arith.constant 128 : index
    %327 = vector.load %arg11[%c0_247, %c128_248] : memref<72x512xf32, #tpu.memory_space<vmem>>, vector<72x256xf32>
    %cst_249 = arith.constant dense<0.000000e+00> : vector<8x256xf32>
    %328 = tpu.matmul %326, %327, %cst_249 {dimension_numbers = #tpu.dot_dimension_numbers<[1], [0], [0], [1], [0, 0, 1, 1], [], []>} : vector<8x72xf32>, vector<72x256xf32>, vector<8x256xf32> -> vector<8x256xf32>
    %329 = vector.broadcast %1 : vector<1x256xf32> to vector<8x256xf32>
    %330 = arith.mulf %328, %329 : vector<8x256xf32>
    %c0_250 = arith.constant 0 : index
    %c5_251 = arith.constant 5 : index
    %331 = vector.load %arg2[%c0_250, %c5_251] : memref<8x13xf32, #tpu.memory_space<vmem>>, vector<8x1xf32>
    %c0_252 = arith.constant 0 : index
    %c5_253 = arith.constant 5 : index
    %332 = vector.load %arg3[%c0_252, %c5_253] : memref<8x13xf32, #tpu.memory_space<vmem>>, vector<8x1xf32>
    %cst_254 = arith.constant dense<0.000000e+00> : vector<8xf32>
    %333 = vector.multi_reduction <add>, %330, %cst_254 [1] : vector<8x256xf32> to vector<8xf32>
    %334 = vector.shape_cast %333 : vector<8xf32> to vector<8x1xf32>
    %cst_255 = arith.constant 7.812500e-03 : f32
    %335 = vector.broadcast %cst_255 : f32 to vector<8x1xf32>
    %336 = arith.mulf %334, %335 : vector<8x1xf32>
    %337 = arith.mulf %330, %330 : vector<8x256xf32>
    %cst_256 = arith.constant dense<0.000000e+00> : vector<8xf32>
    %338 = vector.multi_reduction <add>, %337, %cst_256 [1] : vector<8x256xf32> to vector<8xf32>
    %339 = vector.shape_cast %338 : vector<8xf32> to vector<8x1xf32>
    %cst_257 = arith.constant 7.812500e-03 : f32
    %340 = vector.broadcast %cst_257 : f32 to vector<8x1xf32>
    %341 = arith.mulf %339, %340 : vector<8x1xf32>
    %342 = arith.mulf %336, %336 : vector<8x1xf32>
    %343 = arith.subf %341, %342 : vector<8x1xf32>
    %cst_258 = arith.constant 9.99999974E-6 : f32
    %344 = vector.broadcast %cst_258 : f32 to vector<8x1xf32>
    %345 = arith.addf %343, %344 : vector<8x1xf32>
    %346 = math.rsqrt %345 : vector<8x1xf32>
    %347 = arith.mulf %346, %331 : vector<8x1xf32>
    %348 = arith.mulf %336, %347 : vector<8x1xf32>
    %349 = arith.subf %332, %348 : vector<8x1xf32>
    %350 = vector.broadcast %347 : vector<8x1xf32> to vector<8x256xf32>
    %351 = arith.mulf %330, %350 : vector<8x256xf32>
    %352 = vector.broadcast %349 : vector<8x1xf32> to vector<8x256xf32>
    %353 = arith.addf %351, %352 : vector<8x256xf32>
    %354 = vector.broadcast %1 : vector<1x256xf32> to vector<8x256xf32>
    %355 = arith.mulf %353, %354 : vector<8x256xf32>
    %356 = arith.addf %355, %269 : vector<8x256xf32>
    %c6_259 = arith.constant 6 : index
    %357 = memref.load %arg8[%c6_259] : memref<14xf32, #tpu.memory_space<smem>>
    %cst_260 = arith.constant 0.000000e+00 : f32
    %358 = vector.broadcast %cst_260 : f32 to vector<8x256xf32>
    %359 = arith.cmpf oge, %356, %358 : vector<8x256xf32>
    %360 = vector.broadcast %357 : f32 to vector<8x256xf32>
    %361 = arith.mulf %360, %356 : vector<8x256xf32>
    %362 = arith.select %359, %356, %361 : vector<8x256xi1>, vector<8x256xf32>
    %cst_261 = arith.constant 0.000000e+00 : f32
    %363 = vector.broadcast %cst_261 : f32 to vector<8x640xf32>
    %c0_262 = arith.constant 0 : index
    %c0_263 = arith.constant 0 : index
    %364 = vector.load %arg12[%c0_262, %c0_263] : memref<8x640xf32, #tpu.memory_space<vmem>>, vector<8x640xf32>
    tpu.vector_store %arg12[%c0_262, %c0_263], %363 {strides = array<i32>} : memref<8x640xf32, #tpu.memory_space<vmem>>, vector<8x640xf32>,
    %c0_264 = arith.constant 0 : index
    %c0_265 = arith.constant 0 : index
    %365 = vector.load %arg7[%c0_264, %c0_265] : memref<8x16xf32, #tpu.memory_space<vmem>>, vector<8x16xf32>
    %366 = vector.extract_strided_slice %362 {offsets = [0, 11], sizes = [8, 8], strides = [1, 1]} : vector<8x256xf32> to vector<8x8xf32>
    %cst_266 = arith.constant dense<0.000000e+00> : vector<8x16xf32>
    %367 = tpu.matmul %366, %365, %cst_266 {dimension_numbers = #tpu.dot_dimension_numbers<[1], [0], [0], [1], [0, 0, 1, 1], [], []>} : vector<8x8xf32>, vector<8x16xf32>, vector<8x16xf32> -> vector<8x16xf32>
    %c0_267 = arith.constant 0 : index
    %c19 = arith.constant 19 : index
    %368 = vector.load %arg12[%c0_267, %c19] : memref<8x640xf32, #tpu.memory_space<vmem>>, vector<8x16xf32>
    tpu.vector_store %arg12[%c0_267, %c19], %367 {strides = array<i32>} : memref<8x640xf32, #tpu.memory_space<vmem>>, vector<8x16xf32>,
    %c0_268 = arith.constant 0 : index
    %c37 = arith.constant 37 : index
    %369 = vector.load %arg12[%c0_268, %c37] : memref<8x640xf32, #tpu.memory_space<vmem>>, vector<8x16xf32>
    tpu.vector_store %arg12[%c0_268, %c37], %367 {strides = array<i32>} : memref<8x640xf32, #tpu.memory_space<vmem>>, vector<8x16xf32>,
    %370 = vector.extract_strided_slice %362 {offsets = [0, 21], sizes = [8, 8], strides = [1, 1]} : vector<8x256xf32> to vector<8x8xf32>
    %cst_269 = arith.constant dense<0.000000e+00> : vector<8x16xf32>
    %371 = tpu.matmul %370, %365, %cst_269 {dimension_numbers = #tpu.dot_dimension_numbers<[1], [0], [0], [1], [0, 0, 1, 1], [], []>} : vector<8x8xf32>, vector<8x16xf32>, vector<8x16xf32> -> vector<8x16xf32>
    %c0_270 = arith.constant 0 : index
    %c55 = arith.constant 55 : index
    %372 = vector.load %arg12[%c0_270, %c55] : memref<8x640xf32, #tpu.memory_space<vmem>>, vector<8x16xf32>
    tpu.vector_store %arg12[%c0_270, %c55], %371 {strides = array<i32>} : memref<8x640xf32, #tpu.memory_space<vmem>>, vector<8x16xf32>,
    %c0_271 = arith.constant 0 : index
    %c73 = arith.constant 73 : index
    %373 = vector.load %arg12[%c0_271, %c73] : memref<8x640xf32, #tpu.memory_space<vmem>>, vector<8x16xf32>
    tpu.vector_store %arg12[%c0_271, %c73], %371 {strides = array<i32>} : memref<8x640xf32, #tpu.memory_space<vmem>>, vector<8x16xf32>,
    %374 = vector.extract_strided_slice %362 {offsets = [0, 31], sizes = [8, 8], strides = [1, 1]} : vector<8x256xf32> to vector<8x8xf32>
    %cst_272 = arith.constant dense<0.000000e+00> : vector<8x16xf32>
    %375 = tpu.matmul %374, %365, %cst_272 {dimension_numbers = #tpu.dot_dimension_numbers<[1], [0], [0], [1], [0, 0, 1, 1], [], []>} : vector<8x8xf32>, vector<8x16xf32>, vector<8x16xf32> -> vector<8x16xf32>
    %c0_273 = arith.constant 0 : index
    %c91 = arith.constant 91 : index
    %376 = vector.load %arg12[%c0_273, %c91] : memref<8x640xf32, #tpu.memory_space<vmem>>, vector<8x16xf32>
    tpu.vector_store %arg12[%c0_273, %c91], %375 {strides = array<i32>} : memref<8x640xf32, #tpu.memory_space<vmem>>, vector<8x16xf32>,
    %c0_274 = arith.constant 0 : index
    %c109_275 = arith.constant 109 : index
    %377 = vector.load %arg12[%c0_274, %c109_275] : memref<8x640xf32, #tpu.memory_space<vmem>>, vector<8x16xf32>
    tpu.vector_store %arg12[%c0_274, %c109_275], %375 {strides = array<i32>} : memref<8x640xf32, #tpu.memory_space<vmem>>, vector<8x16xf32>,
    %378 = vector.extract_strided_slice %362 {offsets = [0, 41], sizes = [8, 8], strides = [1, 1]} : vector<8x256xf32> to vector<8x8xf32>
    %cst_276 = arith.constant dense<0.000000e+00> : vector<8x16xf32>
    %379 = tpu.matmul %378, %365, %cst_276 {dimension_numbers = #tpu.dot_dimension_numbers<[1], [0], [0], [1], [0, 0, 1, 1], [], []>} : vector<8x8xf32>, vector<8x16xf32>, vector<8x16xf32> -> vector<8x16xf32>
    %c0_277 = arith.constant 0 : index
    %c127_278 = arith.constant 127 : index
    %380 = vector.load %arg12[%c0_277, %c127_278] : memref<8x640xf32, #tpu.memory_space<vmem>>, vector<8x16xf32>
    tpu.vector_store %arg12[%c0_277, %c127_278], %379 {strides = array<i32>} : memref<8x640xf32, #tpu.memory_space<vmem>>, vector<8x16xf32>,
    %c0_279 = arith.constant 0 : index
    %c145_280 = arith.constant 145 : index
    %381 = vector.load %arg12[%c0_279, %c145_280] : memref<8x640xf32, #tpu.memory_space<vmem>>, vector<8x16xf32>
    tpu.vector_store %arg12[%c0_279, %c145_280], %379 {strides = array<i32>} : memref<8x640xf32, #tpu.memory_space<vmem>>, vector<8x16xf32>,
    %382 = vector.extract_strided_slice %362 {offsets = [0, 51], sizes = [8, 8], strides = [1, 1]} : vector<8x256xf32> to vector<8x8xf32>
    %cst_281 = arith.constant dense<0.000000e+00> : vector<8x16xf32>
    %383 = tpu.matmul %382, %365, %cst_281 {dimension_numbers = #tpu.dot_dimension_numbers<[1], [0], [0], [1], [0, 0, 1, 1], [], []>} : vector<8x8xf32>, vector<8x16xf32>, vector<8x16xf32> -> vector<8x16xf32>
    %c0_282 = arith.constant 0 : index
    %c163 = arith.constant 163 : index
    %384 = vector.load %arg12[%c0_282, %c163] : memref<8x640xf32, #tpu.memory_space<vmem>>, vector<8x16xf32>
    tpu.vector_store %arg12[%c0_282, %c163], %383 {strides = array<i32>} : memref<8x640xf32, #tpu.memory_space<vmem>>, vector<8x16xf32>,
    %c0_283 = arith.constant 0 : index
    %c181 = arith.constant 181 : index
    %385 = vector.load %arg12[%c0_283, %c181] : memref<8x640xf32, #tpu.memory_space<vmem>>, vector<8x16xf32>
    tpu.vector_store %arg12[%c0_283, %c181], %383 {strides = array<i32>} : memref<8x640xf32, #tpu.memory_space<vmem>>, vector<8x16xf32>,
    %386 = vector.extract_strided_slice %362 {offsets = [0, 61], sizes = [8, 8], strides = [1, 1]} : vector<8x256xf32> to vector<8x8xf32>
    %cst_284 = arith.constant dense<0.000000e+00> : vector<8x16xf32>
    %387 = tpu.matmul %386, %365, %cst_284 {dimension_numbers = #tpu.dot_dimension_numbers<[1], [0], [0], [1], [0, 0, 1, 1], [], []>} : vector<8x8xf32>, vector<8x16xf32>, vector<8x16xf32> -> vector<8x16xf32>
    %c0_285 = arith.constant 0 : index
    %c199 = arith.constant 199 : index
    %388 = vector.load %arg12[%c0_285, %c199] : memref<8x640xf32, #tpu.memory_space<vmem>>, vector<8x16xf32>
    tpu.vector_store %arg12[%c0_285, %c199], %387 {strides = array<i32>} : memref<8x640xf32, #tpu.memory_space<vmem>>, vector<8x16xf32>,
    %c0_286 = arith.constant 0 : index
    %c217 = arith.constant 217 : index
    %389 = vector.load %arg12[%c0_286, %c217] : memref<8x640xf32, #tpu.memory_space<vmem>>, vector<8x16xf32>
    tpu.vector_store %arg12[%c0_286, %c217], %387 {strides = array<i32>} : memref<8x640xf32, #tpu.memory_space<vmem>>, vector<8x16xf32>,
    %390 = vector.extract_strided_slice %362 {offsets = [0, 71], sizes = [8, 8], strides = [1, 1]} : vector<8x256xf32> to vector<8x8xf32>
    %cst_287 = arith.constant dense<0.000000e+00> : vector<8x16xf32>
    %391 = tpu.matmul %390, %365, %cst_287 {dimension_numbers = #tpu.dot_dimension_numbers<[1], [0], [0], [1], [0, 0, 1, 1], [], []>} : vector<8x8xf32>, vector<8x16xf32>, vector<8x16xf32> -> vector<8x16xf32>
    %c0_288 = arith.constant 0 : index
    %c235 = arith.constant 235 : index
    %392 = vector.load %arg12[%c0_288, %c235] : memref<8x640xf32, #tpu.memory_space<vmem>>, vector<8x16xf32>
    tpu.vector_store %arg12[%c0_288, %c235], %391 {strides = array<i32>} : memref<8x640xf32, #tpu.memory_space<vmem>>, vector<8x16xf32>,
    %c0_289 = arith.constant 0 : index
    %c253 = arith.constant 253 : index
    %393 = vector.load %arg12[%c0_289, %c253] : memref<8x640xf32, #tpu.memory_space<vmem>>, vector<8x16xf32>
    tpu.vector_store %arg12[%c0_289, %c253], %391 {strides = array<i32>} : memref<8x640xf32, #tpu.memory_space<vmem>>, vector<8x16xf32>,
    %394 = vector.extract_strided_slice %362 {offsets = [0, 81], sizes = [8, 8], strides = [1, 1]} : vector<8x256xf32> to vector<8x8xf32>
    %cst_290 = arith.constant dense<0.000000e+00> : vector<8x16xf32>
    %395 = tpu.matmul %394, %365, %cst_290 {dimension_numbers = #tpu.dot_dimension_numbers<[1], [0], [0], [1], [0, 0, 1, 1], [], []>} : vector<8x8xf32>, vector<8x16xf32>, vector<8x16xf32> -> vector<8x16xf32>
    %c0_291 = arith.constant 0 : index
    %c271 = arith.constant 271 : index
    %396 = vector.load %arg12[%c0_291, %c271] : memref<8x640xf32, #tpu.memory_space<vmem>>, vector<8x16xf32>
    tpu.vector_store %arg12[%c0_291, %c271], %395 {strides = array<i32>} : memref<8x640xf32, #tpu.memory_space<vmem>>, vector<8x16xf32>,
    %c0_292 = arith.constant 0 : index
    %c289 = arith.constant 289 : index
    %397 = vector.load %arg12[%c0_292, %c289] : memref<8x640xf32, #tpu.memory_space<vmem>>, vector<8x16xf32>
    tpu.vector_store %arg12[%c0_292, %c289], %395 {strides = array<i32>} : memref<8x640xf32, #tpu.memory_space<vmem>>, vector<8x16xf32>,
    %398 = vector.extract_strided_slice %362 {offsets = [0, 101], sizes = [8, 8], strides = [1, 1]} : vector<8x256xf32> to vector<8x8xf32>
    %cst_293 = arith.constant dense<0.000000e+00> : vector<8x16xf32>
    %399 = tpu.matmul %398, %365, %cst_293 {dimension_numbers = #tpu.dot_dimension_numbers<[1], [0], [0], [1], [0, 0, 1, 1], [], []>} : vector<8x8xf32>, vector<8x16xf32>, vector<8x16xf32> -> vector<8x16xf32>
    %c0_294 = arith.constant 0 : index
    %c325 = arith.constant 325 : index
    %400 = vector.load %arg12[%c0_294, %c325] : memref<8x640xf32, #tpu.memory_space<vmem>>, vector<8x16xf32>
    tpu.vector_store %arg12[%c0_294, %c325], %399 {strides = array<i32>} : memref<8x640xf32, #tpu.memory_space<vmem>>, vector<8x16xf32>,
    %c0_295 = arith.constant 0 : index
    %c343 = arith.constant 343 : index
    %401 = vector.load %arg12[%c0_295, %c343] : memref<8x640xf32, #tpu.memory_space<vmem>>, vector<8x16xf32>
    tpu.vector_store %arg12[%c0_295, %c343], %399 {strides = array<i32>} : memref<8x640xf32, #tpu.memory_space<vmem>>, vector<8x16xf32>,
    %402 = vector.extract_strided_slice %362 {offsets = [0, 111], sizes = [8, 8], strides = [1, 1]} : vector<8x256xf32> to vector<8x8xf32>
    %cst_296 = arith.constant dense<0.000000e+00> : vector<8x16xf32>
    %403 = tpu.matmul %402, %365, %cst_296 {dimension_numbers = #tpu.dot_dimension_numbers<[1], [0], [0], [1], [0, 0, 1, 1], [], []>} : vector<8x8xf32>, vector<8x16xf32>, vector<8x16xf32> -> vector<8x16xf32>
    %c0_297 = arith.constant 0 : index
    %c361 = arith.constant 361 : index
    %404 = vector.load %arg12[%c0_297, %c361] : memref<8x640xf32, #tpu.memory_space<vmem>>, vector<8x16xf32>
    tpu.vector_store %arg12[%c0_297, %c361], %403 {strides = array<i32>} : memref<8x640xf32, #tpu.memory_space<vmem>>, vector<8x16xf32>,
    %c0_298 = arith.constant 0 : index
    %c379 = arith.constant 379 : index
    %405 = vector.load %arg12[%c0_298, %c379] : memref<8x640xf32, #tpu.memory_space<vmem>>, vector<8x16xf32>
    tpu.vector_store %arg12[%c0_298, %c379], %403 {strides = array<i32>} : memref<8x640xf32, #tpu.memory_space<vmem>>, vector<8x16xf32>,
    %406 = vector.extract_strided_slice %362 {offsets = [0, 121], sizes = [8, 8], strides = [1, 1]} : vector<8x256xf32> to vector<8x8xf32>
    %cst_299 = arith.constant dense<0.000000e+00> : vector<8x16xf32>
    %407 = tpu.matmul %406, %365, %cst_299 {dimension_numbers = #tpu.dot_dimension_numbers<[1], [0], [0], [1], [0, 0, 1, 1], [], []>} : vector<8x8xf32>, vector<8x16xf32>, vector<8x16xf32> -> vector<8x16xf32>
    %c0_300 = arith.constant 0 : index
    %c397 = arith.constant 397 : index
    %408 = vector.load %arg12[%c0_300, %c397] : memref<8x640xf32, #tpu.memory_space<vmem>>, vector<8x16xf32>
    tpu.vector_store %arg12[%c0_300, %c397], %407 {strides = array<i32>} : memref<8x640xf32, #tpu.memory_space<vmem>>, vector<8x16xf32>,
    %c0_301 = arith.constant 0 : index
    %c415 = arith.constant 415 : index
    %409 = vector.load %arg12[%c0_301, %c415] : memref<8x640xf32, #tpu.memory_space<vmem>>, vector<8x16xf32>
    tpu.vector_store %arg12[%c0_301, %c415], %407 {strides = array<i32>} : memref<8x640xf32, #tpu.memory_space<vmem>>, vector<8x16xf32>,
    %410 = vector.extract_strided_slice %362 {offsets = [0, 131], sizes = [8, 8], strides = [1, 1]} : vector<8x256xf32> to vector<8x8xf32>
    %cst_302 = arith.constant dense<0.000000e+00> : vector<8x16xf32>
    %411 = tpu.matmul %410, %365, %cst_302 {dimension_numbers = #tpu.dot_dimension_numbers<[1], [0], [0], [1], [0, 0, 1, 1], [], []>} : vector<8x8xf32>, vector<8x16xf32>, vector<8x16xf32> -> vector<8x16xf32>
    %c0_303 = arith.constant 0 : index
    %c433 = arith.constant 433 : index
    %412 = vector.load %arg12[%c0_303, %c433] : memref<8x640xf32, #tpu.memory_space<vmem>>, vector<8x16xf32>
    tpu.vector_store %arg12[%c0_303, %c433], %411 {strides = array<i32>} : memref<8x640xf32, #tpu.memory_space<vmem>>, vector<8x16xf32>,
    %c0_304 = arith.constant 0 : index
    %c451 = arith.constant 451 : index
    %413 = vector.load %arg12[%c0_304, %c451] : memref<8x640xf32, #tpu.memory_space<vmem>>, vector<8x16xf32>
    tpu.vector_store %arg12[%c0_304, %c451], %411 {strides = array<i32>} : memref<8x640xf32, #tpu.memory_space<vmem>>, vector<8x16xf32>,
    %414 = vector.extract_strided_slice %362 {offsets = [0, 141], sizes = [8, 8], strides = [1, 1]} : vector<8x256xf32> to vector<8x8xf32>
    %cst_305 = arith.constant dense<0.000000e+00> : vector<8x16xf32>
    %415 = tpu.matmul %414, %365, %cst_305 {dimension_numbers = #tpu.dot_dimension_numbers<[1], [0], [0], [1], [0, 0, 1, 1], [], []>} : vector<8x8xf32>, vector<8x16xf32>, vector<8x16xf32> -> vector<8x16xf32>
    %c0_306 = arith.constant 0 : index
    %c469 = arith.constant 469 : index
    %416 = vector.load %arg12[%c0_306, %c469] : memref<8x640xf32, #tpu.memory_space<vmem>>, vector<8x16xf32>
    tpu.vector_store %arg12[%c0_306, %c469], %415 {strides = array<i32>} : memref<8x640xf32, #tpu.memory_space<vmem>>, vector<8x16xf32>,
    %c0_307 = arith.constant 0 : index
    %c487 = arith.constant 487 : index
    %417 = vector.load %arg12[%c0_307, %c487] : memref<8x640xf32, #tpu.memory_space<vmem>>, vector<8x16xf32>
    tpu.vector_store %arg12[%c0_307, %c487], %415 {strides = array<i32>} : memref<8x640xf32, #tpu.memory_space<vmem>>, vector<8x16xf32>,
    %418 = vector.extract_strided_slice %362 {offsets = [0, 151], sizes = [8, 8], strides = [1, 1]} : vector<8x256xf32> to vector<8x8xf32>
    %cst_308 = arith.constant dense<0.000000e+00> : vector<8x16xf32>
    %419 = tpu.matmul %418, %365, %cst_308 {dimension_numbers = #tpu.dot_dimension_numbers<[1], [0], [0], [1], [0, 0, 1, 1], [], []>} : vector<8x8xf32>, vector<8x16xf32>, vector<8x16xf32> -> vector<8x16xf32>
    %c0_309 = arith.constant 0 : index
    %c505 = arith.constant 505 : index
    %420 = vector.load %arg12[%c0_309, %c505] : memref<8x640xf32, #tpu.memory_space<vmem>>, vector<8x16xf32>
    tpu.vector_store %arg12[%c0_309, %c505], %419 {strides = array<i32>} : memref<8x640xf32, #tpu.memory_space<vmem>>, vector<8x16xf32>,
    %c0_310 = arith.constant 0 : index
    %c523 = arith.constant 523 : index
    %421 = vector.load %arg12[%c0_310, %c523] : memref<8x640xf32, #tpu.memory_space<vmem>>, vector<8x16xf32>
    tpu.vector_store %arg12[%c0_310, %c523], %419 {strides = array<i32>} : memref<8x640xf32, #tpu.memory_space<vmem>>, vector<8x16xf32>,
    %422 = vector.extract_strided_slice %362 {offsets = [0, 161], sizes = [8, 8], strides = [1, 1]} : vector<8x256xf32> to vector<8x8xf32>
    %cst_311 = arith.constant dense<0.000000e+00> : vector<8x16xf32>
    %423 = tpu.matmul %422, %365, %cst_311 {dimension_numbers = #tpu.dot_dimension_numbers<[1], [0], [0], [1], [0, 0, 1, 1], [], []>} : vector<8x8xf32>, vector<8x16xf32>, vector<8x16xf32> -> vector<8x16xf32>
    %c0_312 = arith.constant 0 : index
    %c541 = arith.constant 541 : index
    %424 = vector.load %arg12[%c0_312, %c541] : memref<8x640xf32, #tpu.memory_space<vmem>>, vector<8x16xf32>
    tpu.vector_store %arg12[%c0_312, %c541], %423 {strides = array<i32>} : memref<8x640xf32, #tpu.memory_space<vmem>>, vector<8x16xf32>,
    %c0_313 = arith.constant 0 : index
    %c559 = arith.constant 559 : index
    %425 = vector.load %arg12[%c0_313, %c559] : memref<8x640xf32, #tpu.memory_space<vmem>>, vector<8x16xf32>
    tpu.vector_store %arg12[%c0_313, %c559], %423 {strides = array<i32>} : memref<8x640xf32, #tpu.memory_space<vmem>>, vector<8x16xf32>,
    %426 = vector.extract_strided_slice %362 {offsets = [0, 171], sizes = [8, 8], strides = [1, 1]} : vector<8x256xf32> to vector<8x8xf32>
    %cst_314 = arith.constant dense<0.000000e+00> : vector<8x16xf32>
    %427 = tpu.matmul %426, %365, %cst_314 {dimension_numbers = #tpu.dot_dimension_numbers<[1], [0], [0], [1], [0, 0, 1, 1], [], []>} : vector<8x8xf32>, vector<8x16xf32>, vector<8x16xf32> -> vector<8x16xf32>
    %c0_315 = arith.constant 0 : index
    %c577 = arith.constant 577 : index
    %428 = vector.load %arg12[%c0_315, %c577] : memref<8x640xf32, #tpu.memory_space<vmem>>, vector<8x16xf32>
    tpu.vector_store %arg12[%c0_315, %c577], %427 {strides = array<i32>} : memref<8x640xf32, #tpu.memory_space<vmem>>, vector<8x16xf32>,
    %c0_316 = arith.constant 0 : index
    %c595 = arith.constant 595 : index
    %429 = vector.load %arg12[%c0_316, %c595] : memref<8x640xf32, #tpu.memory_space<vmem>>, vector<8x16xf32>
    tpu.vector_store %arg12[%c0_316, %c595], %427 {strides = array<i32>} : memref<8x640xf32, #tpu.memory_space<vmem>>, vector<8x16xf32>,
    %c0_317 = arith.constant 0 : index
    %c0_318 = arith.constant 0 : index
    %430 = vector.load %arg12[%c0_317, %c0_318] : memref<8x640xf32, #tpu.memory_space<vmem>>, vector<8x640xf32>
    %c0_319 = arith.constant 0 : index
    %c147_320 = arith.constant 147 : index
    %431 = vector.load %arg10[%c0_319, %c147_320] : memref<72x896xf32, #tpu.memory_space<vmem>>, vector<8x640xf32>
    tpu.vector_store %arg10[%c0_319, %c147_320], %430 {strides = array<i32>} : memref<72x896xf32, #tpu.memory_space<vmem>>, vector<8x640xf32>,
    %c8_321 = arith.constant 8 : index
    %c146_322 = arith.constant 146 : index
    %432 = vector.load %arg10[%c8_321, %c146_322] : memref<72x896xf32, #tpu.memory_space<vmem>>, vector<8x640xf32>
    tpu.vector_store %arg10[%c8_321, %c146_322], %430 {strides = array<i32>} : memref<72x896xf32, #tpu.memory_space<vmem>>, vector<8x640xf32>,
    %c16_323 = arith.constant 16 : index
    %c145_324 = arith.constant 145 : index
    %433 = vector.load %arg10[%c16_323, %c145_324] : memref<72x896xf32, #tpu.memory_space<vmem>>, vector<8x640xf32>
    tpu.vector_store %arg10[%c16_323, %c145_324], %430 {strides = array<i32>} : memref<72x896xf32, #tpu.memory_space<vmem>>, vector<8x640xf32>,
    %c24_325 = arith.constant 24 : index
    %c129_326 = arith.constant 129 : index
    %434 = vector.load %arg10[%c24_325, %c129_326] : memref<72x896xf32, #tpu.memory_space<vmem>>, vector<8x640xf32>
    tpu.vector_store %arg10[%c24_325, %c129_326], %430 {strides = array<i32>} : memref<72x896xf32, #tpu.memory_space<vmem>>, vector<8x640xf32>,
    %c32_327 = arith.constant 32 : index
    %c128_328 = arith.constant 128 : index
    %435 = vector.load %arg10[%c32_327, %c128_328] : memref<72x896xf32, #tpu.memory_space<vmem>>, vector<8x640xf32>
    tpu.vector_store %arg10[%c32_327, %c128_328], %430 {strides = array<i32>} : memref<72x896xf32, #tpu.memory_space<vmem>>, vector<8x640xf32>,
    %c40_329 = arith.constant 40 : index
    %c127_330 = arith.constant 127 : index
    %436 = vector.load %arg10[%c40_329, %c127_330] : memref<72x896xf32, #tpu.memory_space<vmem>>, vector<8x640xf32>
    tpu.vector_store %arg10[%c40_329, %c127_330], %430 {strides = array<i32>} : memref<72x896xf32, #tpu.memory_space<vmem>>, vector<8x640xf32>,
    %c48_331 = arith.constant 48 : index
    %c111_332 = arith.constant 111 : index
    %437 = vector.load %arg10[%c48_331, %c111_332] : memref<72x896xf32, #tpu.memory_space<vmem>>, vector<8x640xf32>
    tpu.vector_store %arg10[%c48_331, %c111_332], %430 {strides = array<i32>} : memref<72x896xf32, #tpu.memory_space<vmem>>, vector<8x640xf32>,
    %c56_333 = arith.constant 56 : index
    %c110_334 = arith.constant 110 : index
    %438 = vector.load %arg10[%c56_333, %c110_334] : memref<72x896xf32, #tpu.memory_space<vmem>>, vector<8x640xf32>
    tpu.vector_store %arg10[%c56_333, %c110_334], %430 {strides = array<i32>} : memref<72x896xf32, #tpu.memory_space<vmem>>, vector<8x640xf32>,
    %c64_335 = arith.constant 64 : index
    %c109_336 = arith.constant 109 : index
    %439 = vector.load %arg10[%c64_335, %c109_336] : memref<72x896xf32, #tpu.memory_space<vmem>>, vector<8x640xf32>
    tpu.vector_store %arg10[%c64_335, %c109_336], %430 {strides = array<i32>} : memref<72x896xf32, #tpu.memory_space<vmem>>, vector<8x640xf32>,
    %c7 = arith.constant 7 : index
    %c0_337 = arith.constant 0 : index
    %c0_338 = arith.constant 0 : index
    %440 = vector.load %arg1[%c7, %c0_337, %c0_338] : memref<14x8x72xf32, #tpu.memory_space<vmem>>, vector<1x8x72xf32>
    %441 = vector.shape_cast %440 : vector<1x8x72xf32> to vector<8x72xf32>
    %c0_339 = arith.constant 0 : index
    %c128_340 = arith.constant 128 : index
    %442 = vector.load %arg10[%c0_339, %c128_340] : memref<72x896xf32, #tpu.memory_space<vmem>>, vector<72x640xf32>
    %cst_341 = arith.constant dense<0.000000e+00> : vector<8x640xf32>
    %443 = tpu.matmul %441, %442, %cst_341 {dimension_numbers = #tpu.dot_dimension_numbers<[1], [0], [0], [1], [0, 0, 1, 1], [], []>} : vector<8x72xf32>, vector<72x640xf32>, vector<8x640xf32> -> vector<8x640xf32>
    %444 = vector.broadcast %0 : vector<1x640xf32> to vector<8x640xf32>
    %445 = arith.mulf %443, %444 : vector<8x640xf32>
    %c0_342 = arith.constant 0 : index
    %c6_343 = arith.constant 6 : index
    %446 = vector.load %arg2[%c0_342, %c6_343] : memref<8x13xf32, #tpu.memory_space<vmem>>, vector<8x1xf32>
    %c0_344 = arith.constant 0 : index
    %c6_345 = arith.constant 6 : index
    %447 = vector.load %arg3[%c0_344, %c6_345] : memref<8x13xf32, #tpu.memory_space<vmem>>, vector<8x1xf32>
    %cst_346 = arith.constant dense<0.000000e+00> : vector<8xf32>
    %448 = vector.multi_reduction <add>, %445, %cst_346 [1] : vector<8x640xf32> to vector<8xf32>
    %449 = vector.shape_cast %448 : vector<8xf32> to vector<8x1xf32>
    %cst_347 = arith.constant 0.001953125 : f32
    %450 = vector.broadcast %cst_347 : f32 to vector<8x1xf32>
    %451 = arith.mulf %449, %450 : vector<8x1xf32>
    %452 = arith.mulf %445, %445 : vector<8x640xf32>
    %cst_348 = arith.constant dense<0.000000e+00> : vector<8xf32>
    %453 = vector.multi_reduction <add>, %452, %cst_348 [1] : vector<8x640xf32> to vector<8xf32>
    %454 = vector.shape_cast %453 : vector<8xf32> to vector<8x1xf32>
    %cst_349 = arith.constant 0.001953125 : f32
    %455 = vector.broadcast %cst_349 : f32 to vector<8x1xf32>
    %456 = arith.mulf %454, %455 : vector<8x1xf32>
    %457 = arith.mulf %451, %451 : vector<8x1xf32>
    %458 = arith.subf %456, %457 : vector<8x1xf32>
    %cst_350 = arith.constant 9.99999974E-6 : f32
    %459 = vector.broadcast %cst_350 : f32 to vector<8x1xf32>
    %460 = arith.addf %458, %459 : vector<8x1xf32>
    %461 = math.rsqrt %460 : vector<8x1xf32>
    %462 = arith.mulf %461, %446 : vector<8x1xf32>
    %463 = arith.mulf %451, %462 : vector<8x1xf32>
    %464 = arith.subf %447, %463 : vector<8x1xf32>
    %465 = vector.broadcast %462 : vector<8x1xf32> to vector<8x640xf32>
    %466 = arith.mulf %445, %465 : vector<8x640xf32>
    %467 = vector.broadcast %464 : vector<8x1xf32> to vector<8x640xf32>
    %468 = arith.addf %466, %467 : vector<8x640xf32>
    %469 = vector.broadcast %0 : vector<1x640xf32> to vector<8x640xf32>
    %470 = arith.mulf %468, %469 : vector<8x640xf32>
    %c7_351 = arith.constant 7 : index
    %471 = memref.load %arg8[%c7_351] : memref<14xf32, #tpu.memory_space<smem>>
    %cst_352 = arith.constant 0.000000e+00 : f32
    %472 = vector.broadcast %cst_352 : f32 to vector<8x640xf32>
    %473 = arith.cmpf oge, %470, %472 : vector<8x640xf32>
    %474 = vector.broadcast %471 : f32 to vector<8x640xf32>
    %475 = arith.mulf %474, %470 : vector<8x640xf32>
    %476 = arith.select %473, %470, %475 : vector<8x640xi1>, vector<8x640xf32>
    %c0_353 = arith.constant 0 : index
    %c147_354 = arith.constant 147 : index
    %477 = vector.load %arg10[%c0_353, %c147_354] : memref<72x896xf32, #tpu.memory_space<vmem>>, vector<8x640xf32>
    tpu.vector_store %arg10[%c0_353, %c147_354], %476 {strides = array<i32>} : memref<72x896xf32, #tpu.memory_space<vmem>>, vector<8x640xf32>,
    %c8_355 = arith.constant 8 : index
    %c146_356 = arith.constant 146 : index
    %478 = vector.load %arg10[%c8_355, %c146_356] : memref<72x896xf32, #tpu.memory_space<vmem>>, vector<8x640xf32>
    tpu.vector_store %arg10[%c8_355, %c146_356], %476 {strides = array<i32>} : memref<72x896xf32, #tpu.memory_space<vmem>>, vector<8x640xf32>,
    %c16_357 = arith.constant 16 : index
    %c145_358 = arith.constant 145 : index
    %479 = vector.load %arg10[%c16_357, %c145_358] : memref<72x896xf32, #tpu.memory_space<vmem>>, vector<8x640xf32>
    tpu.vector_store %arg10[%c16_357, %c145_358], %476 {strides = array<i32>} : memref<72x896xf32, #tpu.memory_space<vmem>>, vector<8x640xf32>,
    %c24_359 = arith.constant 24 : index
    %c129_360 = arith.constant 129 : index
    %480 = vector.load %arg10[%c24_359, %c129_360] : memref<72x896xf32, #tpu.memory_space<vmem>>, vector<8x640xf32>
    tpu.vector_store %arg10[%c24_359, %c129_360], %476 {strides = array<i32>} : memref<72x896xf32, #tpu.memory_space<vmem>>, vector<8x640xf32>,
    %c32_361 = arith.constant 32 : index
    %c128_362 = arith.constant 128 : index
    %481 = vector.load %arg10[%c32_361, %c128_362] : memref<72x896xf32, #tpu.memory_space<vmem>>, vector<8x640xf32>
    tpu.vector_store %arg10[%c32_361, %c128_362], %476 {strides = array<i32>} : memref<72x896xf32, #tpu.memory_space<vmem>>, vector<8x640xf32>,
    %c40_363 = arith.constant 40 : index
    %c127_364 = arith.constant 127 : index
    %482 = vector.load %arg10[%c40_363, %c127_364] : memref<72x896xf32, #tpu.memory_space<vmem>>, vector<8x640xf32>
    tpu.vector_store %arg10[%c40_363, %c127_364], %476 {strides = array<i32>} : memref<72x896xf32, #tpu.memory_space<vmem>>, vector<8x640xf32>,
    %c48_365 = arith.constant 48 : index
    %c111_366 = arith.constant 111 : index
    %483 = vector.load %arg10[%c48_365, %c111_366] : memref<72x896xf32, #tpu.memory_space<vmem>>, vector<8x640xf32>
    tpu.vector_store %arg10[%c48_365, %c111_366], %476 {strides = array<i32>} : memref<72x896xf32, #tpu.memory_space<vmem>>, vector<8x640xf32>,
    %c56_367 = arith.constant 56 : index
    %c110_368 = arith.constant 110 : index
    %484 = vector.load %arg10[%c56_367, %c110_368] : memref<72x896xf32, #tpu.memory_space<vmem>>, vector<8x640xf32>
    tpu.vector_store %arg10[%c56_367, %c110_368], %476 {strides = array<i32>} : memref<72x896xf32, #tpu.memory_space<vmem>>, vector<8x640xf32>,
    %c64_369 = arith.constant 64 : index
    %c109_370 = arith.constant 109 : index
    %485 = vector.load %arg10[%c64_369, %c109_370] : memref<72x896xf32, #tpu.memory_space<vmem>>, vector<8x640xf32>
    tpu.vector_store %arg10[%c64_369, %c109_370], %476 {strides = array<i32>} : memref<72x896xf32, #tpu.memory_space<vmem>>, vector<8x640xf32>,
    %c8_371 = arith.constant 8 : index
    %c0_372 = arith.constant 0 : index
    %c0_373 = arith.constant 0 : index
    %486 = vector.load %arg1[%c8_371, %c0_372, %c0_373] : memref<14x8x72xf32, #tpu.memory_space<vmem>>, vector<1x8x72xf32>
    %487 = vector.shape_cast %486 : vector<1x8x72xf32> to vector<8x72xf32>
    %c0_374 = arith.constant 0 : index
    %c128_375 = arith.constant 128 : index
    %488 = vector.load %arg10[%c0_374, %c128_375] : memref<72x896xf32, #tpu.memory_space<vmem>>, vector<72x640xf32>
    %cst_376 = arith.constant dense<0.000000e+00> : vector<8x640xf32>
    %489 = tpu.matmul %487, %488, %cst_376 {dimension_numbers = #tpu.dot_dimension_numbers<[1], [0], [0], [1], [0, 0, 1, 1], [], []>} : vector<8x72xf32>, vector<72x640xf32>, vector<8x640xf32> -> vector<8x640xf32>
    %490 = vector.broadcast %0 : vector<1x640xf32> to vector<8x640xf32>
    %491 = arith.mulf %489, %490 : vector<8x640xf32>
    %c0_377 = arith.constant 0 : index
    %c7_378 = arith.constant 7 : index
    %492 = vector.load %arg2[%c0_377, %c7_378] : memref<8x13xf32, #tpu.memory_space<vmem>>, vector<8x1xf32>
    %c0_379 = arith.constant 0 : index
    %c7_380 = arith.constant 7 : index
    %493 = vector.load %arg3[%c0_379, %c7_380] : memref<8x13xf32, #tpu.memory_space<vmem>>, vector<8x1xf32>
    %cst_381 = arith.constant dense<0.000000e+00> : vector<8xf32>
    %494 = vector.multi_reduction <add>, %491, %cst_381 [1] : vector<8x640xf32> to vector<8xf32>
    %495 = vector.shape_cast %494 : vector<8xf32> to vector<8x1xf32>
    %cst_382 = arith.constant 0.001953125 : f32
    %496 = vector.broadcast %cst_382 : f32 to vector<8x1xf32>
    %497 = arith.mulf %495, %496 : vector<8x1xf32>
    %498 = arith.mulf %491, %491 : vector<8x640xf32>
    %cst_383 = arith.constant dense<0.000000e+00> : vector<8xf32>
    %499 = vector.multi_reduction <add>, %498, %cst_383 [1] : vector<8x640xf32> to vector<8xf32>
    %500 = vector.shape_cast %499 : vector<8xf32> to vector<8x1xf32>
    %cst_384 = arith.constant 0.001953125 : f32
    %501 = vector.broadcast %cst_384 : f32 to vector<8x1xf32>
    %502 = arith.mulf %500, %501 : vector<8x1xf32>
    %503 = arith.mulf %497, %497 : vector<8x1xf32>
    %504 = arith.subf %502, %503 : vector<8x1xf32>
    %cst_385 = arith.constant 9.99999974E-6 : f32
    %505 = vector.broadcast %cst_385 : f32 to vector<8x1xf32>
    %506 = arith.addf %504, %505 : vector<8x1xf32>
    %507 = math.rsqrt %506 : vector<8x1xf32>
    %508 = arith.mulf %507, %492 : vector<8x1xf32>
    %509 = arith.mulf %497, %508 : vector<8x1xf32>
    %510 = arith.subf %493, %509 : vector<8x1xf32>
    %511 = vector.broadcast %508 : vector<8x1xf32> to vector<8x640xf32>
    %512 = arith.mulf %491, %511 : vector<8x640xf32>
    %513 = vector.broadcast %510 : vector<8x1xf32> to vector<8x640xf32>
    %514 = arith.addf %512, %513 : vector<8x640xf32>
    %515 = vector.broadcast %0 : vector<1x640xf32> to vector<8x640xf32>
    %516 = arith.mulf %514, %515 : vector<8x640xf32>
    %c8_386 = arith.constant 8 : index
    %517 = memref.load %arg8[%c8_386] : memref<14xf32, #tpu.memory_space<smem>>
    %cst_387 = arith.constant 0.000000e+00 : f32
    %518 = vector.broadcast %cst_387 : f32 to vector<8x640xf32>
    %519 = arith.cmpf oge, %516, %518 : vector<8x640xf32>
    %520 = vector.broadcast %517 : f32 to vector<8x640xf32>
    %521 = arith.mulf %520, %516 : vector<8x640xf32>
    %522 = arith.select %519, %516, %521 : vector<8x640xi1>, vector<8x640xf32>
    %c0_388 = arith.constant 0 : index
    %c147_389 = arith.constant 147 : index
    %523 = vector.load %arg10[%c0_388, %c147_389] : memref<72x896xf32, #tpu.memory_space<vmem>>, vector<8x640xf32>
    tpu.vector_store %arg10[%c0_388, %c147_389], %522 {strides = array<i32>} : memref<72x896xf32, #tpu.memory_space<vmem>>, vector<8x640xf32>,
    %c8_390 = arith.constant 8 : index
    %c146_391 = arith.constant 146 : index
    %524 = vector.load %arg10[%c8_390, %c146_391] : memref<72x896xf32, #tpu.memory_space<vmem>>, vector<8x640xf32>
    tpu.vector_store %arg10[%c8_390, %c146_391], %522 {strides = array<i32>} : memref<72x896xf32, #tpu.memory_space<vmem>>, vector<8x640xf32>,
    %c16_392 = arith.constant 16 : index
    %c145_393 = arith.constant 145 : index
    %525 = vector.load %arg10[%c16_392, %c145_393] : memref<72x896xf32, #tpu.memory_space<vmem>>, vector<8x640xf32>
    tpu.vector_store %arg10[%c16_392, %c145_393], %522 {strides = array<i32>} : memref<72x896xf32, #tpu.memory_space<vmem>>, vector<8x640xf32>,
    %c24_394 = arith.constant 24 : index
    %c129_395 = arith.constant 129 : index
    %526 = vector.load %arg10[%c24_394, %c129_395] : memref<72x896xf32, #tpu.memory_space<vmem>>, vector<8x640xf32>
    tpu.vector_store %arg10[%c24_394, %c129_395], %522 {strides = array<i32>} : memref<72x896xf32, #tpu.memory_space<vmem>>, vector<8x640xf32>,
    %c32_396 = arith.constant 32 : index
    %c128_397 = arith.constant 128 : index
    %527 = vector.load %arg10[%c32_396, %c128_397] : memref<72x896xf32, #tpu.memory_space<vmem>>, vector<8x640xf32>
    tpu.vector_store %arg10[%c32_396, %c128_397], %522 {strides = array<i32>} : memref<72x896xf32, #tpu.memory_space<vmem>>, vector<8x640xf32>,
    %c40_398 = arith.constant 40 : index
    %c127_399 = arith.constant 127 : index
    %528 = vector.load %arg10[%c40_398, %c127_399] : memref<72x896xf32, #tpu.memory_space<vmem>>, vector<8x640xf32>
    tpu.vector_store %arg10[%c40_398, %c127_399], %522 {strides = array<i32>} : memref<72x896xf32, #tpu.memory_space<vmem>>, vector<8x640xf32>,
    %c48_400 = arith.constant 48 : index
    %c111_401 = arith.constant 111 : index
    %529 = vector.load %arg10[%c48_400, %c111_401] : memref<72x896xf32, #tpu.memory_space<vmem>>, vector<8x640xf32>
    tpu.vector_store %arg10[%c48_400, %c111_401], %522 {strides = array<i32>} : memref<72x896xf32, #tpu.memory_space<vmem>>, vector<8x640xf32>,
    %c56_402 = arith.constant 56 : index
    %c110_403 = arith.constant 110 : index
    %530 = vector.load %arg10[%c56_402, %c110_403] : memref<72x896xf32, #tpu.memory_space<vmem>>, vector<8x640xf32>
    tpu.vector_store %arg10[%c56_402, %c110_403], %522 {strides = array<i32>} : memref<72x896xf32, #tpu.memory_space<vmem>>, vector<8x640xf32>,
    %c64_404 = arith.constant 64 : index
    %c109_405 = arith.constant 109 : index
    %531 = vector.load %arg10[%c64_404, %c109_405] : memref<72x896xf32, #tpu.memory_space<vmem>>, vector<8x640xf32>
    tpu.vector_store %arg10[%c64_404, %c109_405], %522 {strides = array<i32>} : memref<72x896xf32, #tpu.memory_space<vmem>>, vector<8x640xf32>,
    %c9 = arith.constant 9 : index
    %c0_406 = arith.constant 0 : index
    %c0_407 = arith.constant 0 : index
    %532 = vector.load %arg1[%c9, %c0_406, %c0_407] : memref<14x8x72xf32, #tpu.memory_space<vmem>>, vector<1x8x72xf32>
    %533 = vector.shape_cast %532 : vector<1x8x72xf32> to vector<8x72xf32>
    %c0_408 = arith.constant 0 : index
    %c128_409 = arith.constant 128 : index
    %534 = vector.load %arg10[%c0_408, %c128_409] : memref<72x896xf32, #tpu.memory_space<vmem>>, vector<72x640xf32>
    %cst_410 = arith.constant dense<0.000000e+00> : vector<8x640xf32>
    %535 = tpu.matmul %533, %534, %cst_410 {dimension_numbers = #tpu.dot_dimension_numbers<[1], [0], [0], [1], [0, 0, 1, 1], [], []>} : vector<8x72xf32>, vector<72x640xf32>, vector<8x640xf32> -> vector<8x640xf32>
    %536 = vector.broadcast %0 : vector<1x640xf32> to vector<8x640xf32>
    %537 = arith.mulf %535, %536 : vector<8x640xf32>
    %c0_411 = arith.constant 0 : index
    %c8_412 = arith.constant 8 : index
    %538 = vector.load %arg2[%c0_411, %c8_412] : memref<8x13xf32, #tpu.memory_space<vmem>>, vector<8x1xf32>
    %c0_413 = arith.constant 0 : index
    %c8_414 = arith.constant 8 : index
    %539 = vector.load %arg3[%c0_413, %c8_414] : memref<8x13xf32, #tpu.memory_space<vmem>>, vector<8x1xf32>
    %cst_415 = arith.constant dense<0.000000e+00> : vector<8xf32>
    %540 = vector.multi_reduction <add>, %537, %cst_415 [1] : vector<8x640xf32> to vector<8xf32>
    %541 = vector.shape_cast %540 : vector<8xf32> to vector<8x1xf32>
    %cst_416 = arith.constant 0.001953125 : f32
    %542 = vector.broadcast %cst_416 : f32 to vector<8x1xf32>
    %543 = arith.mulf %541, %542 : vector<8x1xf32>
    %544 = arith.mulf %537, %537 : vector<8x640xf32>
    %cst_417 = arith.constant dense<0.000000e+00> : vector<8xf32>
    %545 = vector.multi_reduction <add>, %544, %cst_417 [1] : vector<8x640xf32> to vector<8xf32>
    %546 = vector.shape_cast %545 : vector<8xf32> to vector<8x1xf32>
    %cst_418 = arith.constant 0.001953125 : f32
    %547 = vector.broadcast %cst_418 : f32 to vector<8x1xf32>
    %548 = arith.mulf %546, %547 : vector<8x1xf32>
    %549 = arith.mulf %543, %543 : vector<8x1xf32>
    %550 = arith.subf %548, %549 : vector<8x1xf32>
    %cst_419 = arith.constant 9.99999974E-6 : f32
    %551 = vector.broadcast %cst_419 : f32 to vector<8x1xf32>
    %552 = arith.addf %550, %551 : vector<8x1xf32>
    %553 = math.rsqrt %552 : vector<8x1xf32>
    %554 = arith.mulf %553, %538 : vector<8x1xf32>
    %555 = arith.mulf %543, %554 : vector<8x1xf32>
    %556 = arith.subf %539, %555 : vector<8x1xf32>
    %557 = vector.broadcast %554 : vector<8x1xf32> to vector<8x640xf32>
    %558 = arith.mulf %537, %557 : vector<8x640xf32>
    %559 = vector.broadcast %556 : vector<8x1xf32> to vector<8x640xf32>
    %560 = arith.addf %558, %559 : vector<8x640xf32>
    %561 = vector.broadcast %0 : vector<1x640xf32> to vector<8x640xf32>
    %562 = arith.mulf %560, %561 : vector<8x640xf32>
    %563 = arith.addf %562, %476 : vector<8x640xf32>
    %c9_420 = arith.constant 9 : index
    %564 = memref.load %arg8[%c9_420] : memref<14xf32, #tpu.memory_space<smem>>
    %cst_421 = arith.constant 0.000000e+00 : f32
    %565 = vector.broadcast %cst_421 : f32 to vector<8x640xf32>
    %566 = arith.cmpf oge, %563, %565 : vector<8x640xf32>
    %567 = vector.broadcast %564 : f32 to vector<8x640xf32>
    %568 = arith.mulf %567, %563 : vector<8x640xf32>
    %569 = arith.select %566, %563, %568 : vector<8x640xi1>, vector<8x640xf32>
    %c0_422 = arith.constant 0 : index
    %c147_423 = arith.constant 147 : index
    %570 = vector.load %arg10[%c0_422, %c147_423] : memref<72x896xf32, #tpu.memory_space<vmem>>, vector<8x640xf32>
    tpu.vector_store %arg10[%c0_422, %c147_423], %569 {strides = array<i32>} : memref<72x896xf32, #tpu.memory_space<vmem>>, vector<8x640xf32>,
    %c8_424 = arith.constant 8 : index
    %c146_425 = arith.constant 146 : index
    %571 = vector.load %arg10[%c8_424, %c146_425] : memref<72x896xf32, #tpu.memory_space<vmem>>, vector<8x640xf32>
    tpu.vector_store %arg10[%c8_424, %c146_425], %569 {strides = array<i32>} : memref<72x896xf32, #tpu.memory_space<vmem>>, vector<8x640xf32>,
    %c16_426 = arith.constant 16 : index
    %c145_427 = arith.constant 145 : index
    %572 = vector.load %arg10[%c16_426, %c145_427] : memref<72x896xf32, #tpu.memory_space<vmem>>, vector<8x640xf32>
    tpu.vector_store %arg10[%c16_426, %c145_427], %569 {strides = array<i32>} : memref<72x896xf32, #tpu.memory_space<vmem>>, vector<8x640xf32>,
    %c24_428 = arith.constant 24 : index
    %c129_429 = arith.constant 129 : index
    %573 = vector.load %arg10[%c24_428, %c129_429] : memref<72x896xf32, #tpu.memory_space<vmem>>, vector<8x640xf32>
    tpu.vector_store %arg10[%c24_428, %c129_429], %569 {strides = array<i32>} : memref<72x896xf32, #tpu.memory_space<vmem>>, vector<8x640xf32>,
    %c32_430 = arith.constant 32 : index
    %c128_431 = arith.constant 128 : index
    %574 = vector.load %arg10[%c32_430, %c128_431] : memref<72x896xf32, #tpu.memory_space<vmem>>, vector<8x640xf32>
    tpu.vector_store %arg10[%c32_430, %c128_431], %569 {strides = array<i32>} : memref<72x896xf32, #tpu.memory_space<vmem>>, vector<8x640xf32>,
    %c40_432 = arith.constant 40 : index
    %c127_433 = arith.constant 127 : index
    %575 = vector.load %arg10[%c40_432, %c127_433] : memref<72x896xf32, #tpu.memory_space<vmem>>, vector<8x640xf32>
    tpu.vector_store %arg10[%c40_432, %c127_433], %569 {strides = array<i32>} : memref<72x896xf32, #tpu.memory_space<vmem>>, vector<8x640xf32>,
    %c48_434 = arith.constant 48 : index
    %c111_435 = arith.constant 111 : index
    %576 = vector.load %arg10[%c48_434, %c111_435] : memref<72x896xf32, #tpu.memory_space<vmem>>, vector<8x640xf32>
    tpu.vector_store %arg10[%c48_434, %c111_435], %569 {strides = array<i32>} : memref<72x896xf32, #tpu.memory_space<vmem>>, vector<8x640xf32>,
    %c56_436 = arith.constant 56 : index
    %c110_437 = arith.constant 110 : index
    %577 = vector.load %arg10[%c56_436, %c110_437] : memref<72x896xf32, #tpu.memory_space<vmem>>, vector<8x640xf32>
    tpu.vector_store %arg10[%c56_436, %c110_437], %569 {strides = array<i32>} : memref<72x896xf32, #tpu.memory_space<vmem>>, vector<8x640xf32>,
    %c64_438 = arith.constant 64 : index
    %c109_439 = arith.constant 109 : index
    %578 = vector.load %arg10[%c64_438, %c109_439] : memref<72x896xf32, #tpu.memory_space<vmem>>, vector<8x640xf32>
    tpu.vector_store %arg10[%c64_438, %c109_439], %569 {strides = array<i32>} : memref<72x896xf32, #tpu.memory_space<vmem>>, vector<8x640xf32>,
    %c10 = arith.constant 10 : index
    %c0_440 = arith.constant 0 : index
    %c0_441 = arith.constant 0 : index
    %579 = vector.load %arg1[%c10, %c0_440, %c0_441] : memref<14x8x72xf32, #tpu.memory_space<vmem>>, vector<1x8x72xf32>
    %580 = vector.shape_cast %579 : vector<1x8x72xf32> to vector<8x72xf32>
    %c0_442 = arith.constant 0 : index
    %c128_443 = arith.constant 128 : index
    %581 = vector.load %arg10[%c0_442, %c128_443] : memref<72x896xf32, #tpu.memory_space<vmem>>, vector<72x640xf32>
    %cst_444 = arith.constant dense<0.000000e+00> : vector<8x640xf32>
    %582 = tpu.matmul %580, %581, %cst_444 {dimension_numbers = #tpu.dot_dimension_numbers<[1], [0], [0], [1], [0, 0, 1, 1], [], []>} : vector<8x72xf32>, vector<72x640xf32>, vector<8x640xf32> -> vector<8x640xf32>
    %583 = vector.broadcast %0 : vector<1x640xf32> to vector<8x640xf32>
    %584 = arith.mulf %582, %583 : vector<8x640xf32>
    %c0_445 = arith.constant 0 : index
    %c9_446 = arith.constant 9 : index
    %585 = vector.load %arg2[%c0_445, %c9_446] : memref<8x13xf32, #tpu.memory_space<vmem>>, vector<8x1xf32>
    %c0_447 = arith.constant 0 : index
    %c9_448 = arith.constant 9 : index
    %586 = vector.load %arg3[%c0_447, %c9_448] : memref<8x13xf32, #tpu.memory_space<vmem>>, vector<8x1xf32>
    %cst_449 = arith.constant dense<0.000000e+00> : vector<8xf32>
    %587 = vector.multi_reduction <add>, %584, %cst_449 [1] : vector<8x640xf32> to vector<8xf32>
    %588 = vector.shape_cast %587 : vector<8xf32> to vector<8x1xf32>
    %cst_450 = arith.constant 0.001953125 : f32
    %589 = vector.broadcast %cst_450 : f32 to vector<8x1xf32>
    %590 = arith.mulf %588, %589 : vector<8x1xf32>
    %591 = arith.mulf %584, %584 : vector<8x640xf32>
    %cst_451 = arith.constant dense<0.000000e+00> : vector<8xf32>
    %592 = vector.multi_reduction <add>, %591, %cst_451 [1] : vector<8x640xf32> to vector<8xf32>
    %593 = vector.shape_cast %592 : vector<8xf32> to vector<8x1xf32>
    %cst_452 = arith.constant 0.001953125 : f32
    %594 = vector.broadcast %cst_452 : f32 to vector<8x1xf32>
    %595 = arith.mulf %593, %594 : vector<8x1xf32>
    %596 = arith.mulf %590, %590 : vector<8x1xf32>
    %597 = arith.subf %595, %596 : vector<8x1xf32>
    %cst_453 = arith.constant 9.99999974E-6 : f32
    %598 = vector.broadcast %cst_453 : f32 to vector<8x1xf32>
    %599 = arith.addf %597, %598 : vector<8x1xf32>
    %600 = math.rsqrt %599 : vector<8x1xf32>
    %601 = arith.mulf %600, %585 : vector<8x1xf32>
    %602 = arith.mulf %590, %601 : vector<8x1xf32>
    %603 = arith.subf %586, %602 : vector<8x1xf32>
    %604 = vector.broadcast %601 : vector<8x1xf32> to vector<8x640xf32>
    %605 = arith.mulf %584, %604 : vector<8x640xf32>
    %606 = vector.broadcast %603 : vector<8x1xf32> to vector<8x640xf32>
    %607 = arith.addf %605, %606 : vector<8x640xf32>
    %608 = vector.broadcast %0 : vector<1x640xf32> to vector<8x640xf32>
    %609 = arith.mulf %607, %608 : vector<8x640xf32>
    %c10_454 = arith.constant 10 : index
    %610 = memref.load %arg8[%c10_454] : memref<14xf32, #tpu.memory_space<smem>>
    %cst_455 = arith.constant 0.000000e+00 : f32
    %611 = vector.broadcast %cst_455 : f32 to vector<8x640xf32>
    %612 = arith.cmpf oge, %609, %611 : vector<8x640xf32>
    %613 = vector.broadcast %610 : f32 to vector<8x640xf32>
    %614 = arith.mulf %613, %609 : vector<8x640xf32>
    %615 = arith.select %612, %609, %614 : vector<8x640xi1>, vector<8x640xf32>
    %c0_456 = arith.constant 0 : index
    %c147_457 = arith.constant 147 : index
    %616 = vector.load %arg10[%c0_456, %c147_457] : memref<72x896xf32, #tpu.memory_space<vmem>>, vector<8x640xf32>
    tpu.vector_store %arg10[%c0_456, %c147_457], %615 {strides = array<i32>} : memref<72x896xf32, #tpu.memory_space<vmem>>, vector<8x640xf32>,
    %c8_458 = arith.constant 8 : index
    %c146_459 = arith.constant 146 : index
    %617 = vector.load %arg10[%c8_458, %c146_459] : memref<72x896xf32, #tpu.memory_space<vmem>>, vector<8x640xf32>
    tpu.vector_store %arg10[%c8_458, %c146_459], %615 {strides = array<i32>} : memref<72x896xf32, #tpu.memory_space<vmem>>, vector<8x640xf32>,
    %c16_460 = arith.constant 16 : index
    %c145_461 = arith.constant 145 : index
    %618 = vector.load %arg10[%c16_460, %c145_461] : memref<72x896xf32, #tpu.memory_space<vmem>>, vector<8x640xf32>
    tpu.vector_store %arg10[%c16_460, %c145_461], %615 {strides = array<i32>} : memref<72x896xf32, #tpu.memory_space<vmem>>, vector<8x640xf32>,
    %c24_462 = arith.constant 24 : index
    %c129_463 = arith.constant 129 : index
    %619 = vector.load %arg10[%c24_462, %c129_463] : memref<72x896xf32, #tpu.memory_space<vmem>>, vector<8x640xf32>
    tpu.vector_store %arg10[%c24_462, %c129_463], %615 {strides = array<i32>} : memref<72x896xf32, #tpu.memory_space<vmem>>, vector<8x640xf32>,
    %c32_464 = arith.constant 32 : index
    %c128_465 = arith.constant 128 : index
    %620 = vector.load %arg10[%c32_464, %c128_465] : memref<72x896xf32, #tpu.memory_space<vmem>>, vector<8x640xf32>
    tpu.vector_store %arg10[%c32_464, %c128_465], %615 {strides = array<i32>} : memref<72x896xf32, #tpu.memory_space<vmem>>, vector<8x640xf32>,
    %c40_466 = arith.constant 40 : index
    %c127_467 = arith.constant 127 : index
    %621 = vector.load %arg10[%c40_466, %c127_467] : memref<72x896xf32, #tpu.memory_space<vmem>>, vector<8x640xf32>
    tpu.vector_store %arg10[%c40_466, %c127_467], %615 {strides = array<i32>} : memref<72x896xf32, #tpu.memory_space<vmem>>, vector<8x640xf32>,
    %c48_468 = arith.constant 48 : index
    %c111_469 = arith.constant 111 : index
    %622 = vector.load %arg10[%c48_468, %c111_469] : memref<72x896xf32, #tpu.memory_space<vmem>>, vector<8x640xf32>
    tpu.vector_store %arg10[%c48_468, %c111_469], %615 {strides = array<i32>} : memref<72x896xf32, #tpu.memory_space<vmem>>, vector<8x640xf32>,
    %c56_470 = arith.constant 56 : index
    %c110_471 = arith.constant 110 : index
    %623 = vector.load %arg10[%c56_470, %c110_471] : memref<72x896xf32, #tpu.memory_space<vmem>>, vector<8x640xf32>
    tpu.vector_store %arg10[%c56_470, %c110_471], %615 {strides = array<i32>} : memref<72x896xf32, #tpu.memory_space<vmem>>, vector<8x640xf32>,
    %c64_472 = arith.constant 64 : index
    %c109_473 = arith.constant 109 : index
    %624 = vector.load %arg10[%c64_472, %c109_473] : memref<72x896xf32, #tpu.memory_space<vmem>>, vector<8x640xf32>
    tpu.vector_store %arg10[%c64_472, %c109_473], %615 {strides = array<i32>} : memref<72x896xf32, #tpu.memory_space<vmem>>, vector<8x640xf32>,
    %c11_474 = arith.constant 11 : index
    %c0_475 = arith.constant 0 : index
    %c0_476 = arith.constant 0 : index
    %625 = vector.load %arg1[%c11_474, %c0_475, %c0_476] : memref<14x8x72xf32, #tpu.memory_space<vmem>>, vector<1x8x72xf32>
    %626 = vector.shape_cast %625 : vector<1x8x72xf32> to vector<8x72xf32>
    %c0_477 = arith.constant 0 : index
    %c128_478 = arith.constant 128 : index
    %627 = vector.load %arg10[%c0_477, %c128_478] : memref<72x896xf32, #tpu.memory_space<vmem>>, vector<72x640xf32>
    %cst_479 = arith.constant dense<0.000000e+00> : vector<8x640xf32>
    %628 = tpu.matmul %626, %627, %cst_479 {dimension_numbers = #tpu.dot_dimension_numbers<[1], [0], [0], [1], [0, 0, 1, 1], [], []>} : vector<8x72xf32>, vector<72x640xf32>, vector<8x640xf32> -> vector<8x640xf32>
    %629 = vector.broadcast %0 : vector<1x640xf32> to vector<8x640xf32>
    %630 = arith.mulf %628, %629 : vector<8x640xf32>
    %c0_480 = arith.constant 0 : index
    %c10_481 = arith.constant 10 : index
    %631 = vector.load %arg2[%c0_480, %c10_481] : memref<8x13xf32, #tpu.memory_space<vmem>>, vector<8x1xf32>
    %c0_482 = arith.constant 0 : index
    %c10_483 = arith.constant 10 : index
    %632 = vector.load %arg3[%c0_482, %c10_483] : memref<8x13xf32, #tpu.memory_space<vmem>>, vector<8x1xf32>
    %cst_484 = arith.constant dense<0.000000e+00> : vector<8xf32>
    %633 = vector.multi_reduction <add>, %630, %cst_484 [1] : vector<8x640xf32> to vector<8xf32>
    %634 = vector.shape_cast %633 : vector<8xf32> to vector<8x1xf32>
    %cst_485 = arith.constant 0.001953125 : f32
    %635 = vector.broadcast %cst_485 : f32 to vector<8x1xf32>
    %636 = arith.mulf %634, %635 : vector<8x1xf32>
    %637 = arith.mulf %630, %630 : vector<8x640xf32>
    %cst_486 = arith.constant dense<0.000000e+00> : vector<8xf32>
    %638 = vector.multi_reduction <add>, %637, %cst_486 [1] : vector<8x640xf32> to vector<8xf32>
    %639 = vector.shape_cast %638 : vector<8xf32> to vector<8x1xf32>
    %cst_487 = arith.constant 0.001953125 : f32
    %640 = vector.broadcast %cst_487 : f32 to vector<8x1xf32>
    %641 = arith.mulf %639, %640 : vector<8x1xf32>
    %642 = arith.mulf %636, %636 : vector<8x1xf32>
    %643 = arith.subf %641, %642 : vector<8x1xf32>
    %cst_488 = arith.constant 9.99999974E-6 : f32
    %644 = vector.broadcast %cst_488 : f32 to vector<8x1xf32>
    %645 = arith.addf %643, %644 : vector<8x1xf32>
    %646 = math.rsqrt %645 : vector<8x1xf32>
    %647 = arith.mulf %646, %631 : vector<8x1xf32>
    %648 = arith.mulf %636, %647 : vector<8x1xf32>
    %649 = arith.subf %632, %648 : vector<8x1xf32>
    %650 = vector.broadcast %647 : vector<8x1xf32> to vector<8x640xf32>
    %651 = arith.mulf %630, %650 : vector<8x640xf32>
    %652 = vector.broadcast %649 : vector<8x1xf32> to vector<8x640xf32>
    %653 = arith.addf %651, %652 : vector<8x640xf32>
    %654 = vector.broadcast %0 : vector<1x640xf32> to vector<8x640xf32>
    %655 = arith.mulf %653, %654 : vector<8x640xf32>
    %656 = arith.addf %655, %569 : vector<8x640xf32>
    %c11_489 = arith.constant 11 : index
    %657 = memref.load %arg8[%c11_489] : memref<14xf32, #tpu.memory_space<smem>>
    %cst_490 = arith.constant 0.000000e+00 : f32
    %658 = vector.broadcast %cst_490 : f32 to vector<8x640xf32>
    %659 = arith.cmpf oge, %656, %658 : vector<8x640xf32>
    %660 = vector.broadcast %657 : f32 to vector<8x640xf32>
    %661 = arith.mulf %660, %656 : vector<8x640xf32>
    %662 = arith.select %659, %656, %661 : vector<8x640xi1>, vector<8x640xf32>
    %c0_491 = arith.constant 0 : index
    %c147_492 = arith.constant 147 : index
    %663 = vector.load %arg10[%c0_491, %c147_492] : memref<72x896xf32, #tpu.memory_space<vmem>>, vector<8x640xf32>
    tpu.vector_store %arg10[%c0_491, %c147_492], %662 {strides = array<i32>} : memref<72x896xf32, #tpu.memory_space<vmem>>, vector<8x640xf32>,
    %c8_493 = arith.constant 8 : index
    %c146_494 = arith.constant 146 : index
    %664 = vector.load %arg10[%c8_493, %c146_494] : memref<72x896xf32, #tpu.memory_space<vmem>>, vector<8x640xf32>
    tpu.vector_store %arg10[%c8_493, %c146_494], %662 {strides = array<i32>} : memref<72x896xf32, #tpu.memory_space<vmem>>, vector<8x640xf32>,
    %c16_495 = arith.constant 16 : index
    %c145_496 = arith.constant 145 : index
    %665 = vector.load %arg10[%c16_495, %c145_496] : memref<72x896xf32, #tpu.memory_space<vmem>>, vector<8x640xf32>
    tpu.vector_store %arg10[%c16_495, %c145_496], %662 {strides = array<i32>} : memref<72x896xf32, #tpu.memory_space<vmem>>, vector<8x640xf32>,
    %c24_497 = arith.constant 24 : index
    %c129_498 = arith.constant 129 : index
    %666 = vector.load %arg10[%c24_497, %c129_498] : memref<72x896xf32, #tpu.memory_space<vmem>>, vector<8x640xf32>
    tpu.vector_store %arg10[%c24_497, %c129_498], %662 {strides = array<i32>} : memref<72x896xf32, #tpu.memory_space<vmem>>, vector<8x640xf32>,
    %c32_499 = arith.constant 32 : index
    %c128_500 = arith.constant 128 : index
    %667 = vector.load %arg10[%c32_499, %c128_500] : memref<72x896xf32, #tpu.memory_space<vmem>>, vector<8x640xf32>
    tpu.vector_store %arg10[%c32_499, %c128_500], %662 {strides = array<i32>} : memref<72x896xf32, #tpu.memory_space<vmem>>, vector<8x640xf32>,
    %c40_501 = arith.constant 40 : index
    %c127_502 = arith.constant 127 : index
    %668 = vector.load %arg10[%c40_501, %c127_502] : memref<72x896xf32, #tpu.memory_space<vmem>>, vector<8x640xf32>
    tpu.vector_store %arg10[%c40_501, %c127_502], %662 {strides = array<i32>} : memref<72x896xf32, #tpu.memory_space<vmem>>, vector<8x640xf32>,
    %c48_503 = arith.constant 48 : index
    %c111_504 = arith.constant 111 : index
    %669 = vector.load %arg10[%c48_503, %c111_504] : memref<72x896xf32, #tpu.memory_space<vmem>>, vector<8x640xf32>
    tpu.vector_store %arg10[%c48_503, %c111_504], %662 {strides = array<i32>} : memref<72x896xf32, #tpu.memory_space<vmem>>, vector<8x640xf32>,
    %c56_505 = arith.constant 56 : index
    %c110_506 = arith.constant 110 : index
    %670 = vector.load %arg10[%c56_505, %c110_506] : memref<72x896xf32, #tpu.memory_space<vmem>>, vector<8x640xf32>
    tpu.vector_store %arg10[%c56_505, %c110_506], %662 {strides = array<i32>} : memref<72x896xf32, #tpu.memory_space<vmem>>, vector<8x640xf32>,
    %c64_507 = arith.constant 64 : index
    %c109_508 = arith.constant 109 : index
    %671 = vector.load %arg10[%c64_507, %c109_508] : memref<72x896xf32, #tpu.memory_space<vmem>>, vector<8x640xf32>
    tpu.vector_store %arg10[%c64_507, %c109_508], %662 {strides = array<i32>} : memref<72x896xf32, #tpu.memory_space<vmem>>, vector<8x640xf32>,
    %c12 = arith.constant 12 : index
    %c0_509 = arith.constant 0 : index
    %c0_510 = arith.constant 0 : index
    %672 = vector.load %arg1[%c12, %c0_509, %c0_510] : memref<14x8x72xf32, #tpu.memory_space<vmem>>, vector<1x8x72xf32>
    %673 = vector.shape_cast %672 : vector<1x8x72xf32> to vector<8x72xf32>
    %c0_511 = arith.constant 0 : index
    %c128_512 = arith.constant 128 : index
    %674 = vector.load %arg10[%c0_511, %c128_512] : memref<72x896xf32, #tpu.memory_space<vmem>>, vector<72x640xf32>
    %cst_513 = arith.constant dense<0.000000e+00> : vector<8x640xf32>
    %675 = tpu.matmul %673, %674, %cst_513 {dimension_numbers = #tpu.dot_dimension_numbers<[1], [0], [0], [1], [0, 0, 1, 1], [], []>} : vector<8x72xf32>, vector<72x640xf32>, vector<8x640xf32> -> vector<8x640xf32>
    %676 = vector.broadcast %0 : vector<1x640xf32> to vector<8x640xf32>
    %677 = arith.mulf %675, %676 : vector<8x640xf32>
    %c0_514 = arith.constant 0 : index
    %c11_515 = arith.constant 11 : index
    %678 = vector.load %arg2[%c0_514, %c11_515] : memref<8x13xf32, #tpu.memory_space<vmem>>, vector<8x1xf32>
    %c0_516 = arith.constant 0 : index
    %c11_517 = arith.constant 11 : index
    %679 = vector.load %arg3[%c0_516, %c11_517] : memref<8x13xf32, #tpu.memory_space<vmem>>, vector<8x1xf32>
    %cst_518 = arith.constant dense<0.000000e+00> : vector<8xf32>
    %680 = vector.multi_reduction <add>, %677, %cst_518 [1] : vector<8x640xf32> to vector<8xf32>
    %681 = vector.shape_cast %680 : vector<8xf32> to vector<8x1xf32>
    %cst_519 = arith.constant 0.001953125 : f32
    %682 = vector.broadcast %cst_519 : f32 to vector<8x1xf32>
    %683 = arith.mulf %681, %682 : vector<8x1xf32>
    %684 = arith.mulf %677, %677 : vector<8x640xf32>
    %cst_520 = arith.constant dense<0.000000e+00> : vector<8xf32>
    %685 = vector.multi_reduction <add>, %684, %cst_520 [1] : vector<8x640xf32> to vector<8xf32>
    %686 = vector.shape_cast %685 : vector<8xf32> to vector<8x1xf32>
    %cst_521 = arith.constant 0.001953125 : f32
    %687 = vector.broadcast %cst_521 : f32 to vector<8x1xf32>
    %688 = arith.mulf %686, %687 : vector<8x1xf32>
    %689 = arith.mulf %683, %683 : vector<8x1xf32>
    %690 = arith.subf %688, %689 : vector<8x1xf32>
    %cst_522 = arith.constant 9.99999974E-6 : f32
    %691 = vector.broadcast %cst_522 : f32 to vector<8x1xf32>
    %692 = arith.addf %690, %691 : vector<8x1xf32>
    %693 = math.rsqrt %692 : vector<8x1xf32>
    %694 = arith.mulf %693, %678 : vector<8x1xf32>
    %695 = arith.mulf %683, %694 : vector<8x1xf32>
    %696 = arith.subf %679, %695 : vector<8x1xf32>
    %697 = vector.broadcast %694 : vector<8x1xf32> to vector<8x640xf32>
    %698 = arith.mulf %677, %697 : vector<8x640xf32>
    %699 = vector.broadcast %696 : vector<8x1xf32> to vector<8x640xf32>
    %700 = arith.addf %698, %699 : vector<8x640xf32>
    %701 = vector.broadcast %0 : vector<1x640xf32> to vector<8x640xf32>
    %702 = arith.mulf %700, %701 : vector<8x640xf32>
    %c12_523 = arith.constant 12 : index
    %703 = memref.load %arg8[%c12_523] : memref<14xf32, #tpu.memory_space<smem>>
    %cst_524 = arith.constant 0.000000e+00 : f32
    %704 = vector.broadcast %cst_524 : f32 to vector<8x640xf32>
    %705 = arith.cmpf oge, %702, %704 : vector<8x640xf32>
    %706 = vector.broadcast %703 : f32 to vector<8x640xf32>
    %707 = arith.mulf %706, %702 : vector<8x640xf32>
    %708 = arith.select %705, %702, %707 : vector<8x640xi1>, vector<8x640xf32>
    %c0_525 = arith.constant 0 : index
    %c147_526 = arith.constant 147 : index
    %709 = vector.load %arg10[%c0_525, %c147_526] : memref<72x896xf32, #tpu.memory_space<vmem>>, vector<8x640xf32>
    tpu.vector_store %arg10[%c0_525, %c147_526], %708 {strides = array<i32>} : memref<72x896xf32, #tpu.memory_space<vmem>>, vector<8x640xf32>,
    %c8_527 = arith.constant 8 : index
    %c146_528 = arith.constant 146 : index
    %710 = vector.load %arg10[%c8_527, %c146_528] : memref<72x896xf32, #tpu.memory_space<vmem>>, vector<8x640xf32>
    tpu.vector_store %arg10[%c8_527, %c146_528], %708 {strides = array<i32>} : memref<72x896xf32, #tpu.memory_space<vmem>>, vector<8x640xf32>,
    %c16_529 = arith.constant 16 : index
    %c145_530 = arith.constant 145 : index
    %711 = vector.load %arg10[%c16_529, %c145_530] : memref<72x896xf32, #tpu.memory_space<vmem>>, vector<8x640xf32>
    tpu.vector_store %arg10[%c16_529, %c145_530], %708 {strides = array<i32>} : memref<72x896xf32, #tpu.memory_space<vmem>>, vector<8x640xf32>,
    %c24_531 = arith.constant 24 : index
    %c129_532 = arith.constant 129 : index
    %712 = vector.load %arg10[%c24_531, %c129_532] : memref<72x896xf32, #tpu.memory_space<vmem>>, vector<8x640xf32>
    tpu.vector_store %arg10[%c24_531, %c129_532], %708 {strides = array<i32>} : memref<72x896xf32, #tpu.memory_space<vmem>>, vector<8x640xf32>,
    %c32_533 = arith.constant 32 : index
    %c128_534 = arith.constant 128 : index
    %713 = vector.load %arg10[%c32_533, %c128_534] : memref<72x896xf32, #tpu.memory_space<vmem>>, vector<8x640xf32>
    tpu.vector_store %arg10[%c32_533, %c128_534], %708 {strides = array<i32>} : memref<72x896xf32, #tpu.memory_space<vmem>>, vector<8x640xf32>,
    %c40_535 = arith.constant 40 : index
    %c127_536 = arith.constant 127 : index
    %714 = vector.load %arg10[%c40_535, %c127_536] : memref<72x896xf32, #tpu.memory_space<vmem>>, vector<8x640xf32>
    tpu.vector_store %arg10[%c40_535, %c127_536], %708 {strides = array<i32>} : memref<72x896xf32, #tpu.memory_space<vmem>>, vector<8x640xf32>,
    %c48_537 = arith.constant 48 : index
    %c111_538 = arith.constant 111 : index
    %715 = vector.load %arg10[%c48_537, %c111_538] : memref<72x896xf32, #tpu.memory_space<vmem>>, vector<8x640xf32>
    tpu.vector_store %arg10[%c48_537, %c111_538], %708 {strides = array<i32>} : memref<72x896xf32, #tpu.memory_space<vmem>>, vector<8x640xf32>,
    %c56_539 = arith.constant 56 : index
    %c110_540 = arith.constant 110 : index
    %716 = vector.load %arg10[%c56_539, %c110_540] : memref<72x896xf32, #tpu.memory_space<vmem>>, vector<8x640xf32>
    tpu.vector_store %arg10[%c56_539, %c110_540], %708 {strides = array<i32>} : memref<72x896xf32, #tpu.memory_space<vmem>>, vector<8x640xf32>,
    %c64_541 = arith.constant 64 : index
    %c109_542 = arith.constant 109 : index
    %717 = vector.load %arg10[%c64_541, %c109_542] : memref<72x896xf32, #tpu.memory_space<vmem>>, vector<8x640xf32>
    tpu.vector_store %arg10[%c64_541, %c109_542], %708 {strides = array<i32>} : memref<72x896xf32, #tpu.memory_space<vmem>>, vector<8x640xf32>,
    %c13 = arith.constant 13 : index
    %c0_543 = arith.constant 0 : index
    %c0_544 = arith.constant 0 : index
    %718 = vector.load %arg1[%c13, %c0_543, %c0_544] : memref<14x8x72xf32, #tpu.memory_space<vmem>>, vector<1x8x72xf32>
    %719 = vector.shape_cast %718 : vector<1x8x72xf32> to vector<8x72xf32>
    %c0_545 = arith.constant 0 : index
    %c128_546 = arith.constant 128 : index
    %720 = vector.load %arg10[%c0_545, %c128_546] : memref<72x896xf32, #tpu.memory_space<vmem>>, vector<72x640xf32>
    %cst_547 = arith.constant dense<0.000000e+00> : vector<8x640xf32>
    %721 = tpu.matmul %719, %720, %cst_547 {dimension_numbers = #tpu.dot_dimension_numbers<[1], [0], [0], [1], [0, 0, 1, 1], [], []>} : vector<8x72xf32>, vector<72x640xf32>, vector<8x640xf32> -> vector<8x640xf32>
    %722 = vector.broadcast %0 : vector<1x640xf32> to vector<8x640xf32>
    %723 = arith.mulf %721, %722 : vector<8x640xf32>
    %c0_548 = arith.constant 0 : index
    %c12_549 = arith.constant 12 : index
    %724 = vector.load %arg2[%c0_548, %c12_549] : memref<8x13xf32, #tpu.memory_space<vmem>>, vector<8x1xf32>
    %c0_550 = arith.constant 0 : index
    %c12_551 = arith.constant 12 : index
    %725 = vector.load %arg3[%c0_550, %c12_551] : memref<8x13xf32, #tpu.memory_space<vmem>>, vector<8x1xf32>
    %cst_552 = arith.constant dense<0.000000e+00> : vector<8xf32>
    %726 = vector.multi_reduction <add>, %723, %cst_552 [1] : vector<8x640xf32> to vector<8xf32>
    %727 = vector.shape_cast %726 : vector<8xf32> to vector<8x1xf32>
    %cst_553 = arith.constant 0.001953125 : f32
    %728 = vector.broadcast %cst_553 : f32 to vector<8x1xf32>
    %729 = arith.mulf %727, %728 : vector<8x1xf32>
    %730 = arith.mulf %723, %723 : vector<8x640xf32>
    %cst_554 = arith.constant dense<0.000000e+00> : vector<8xf32>
    %731 = vector.multi_reduction <add>, %730, %cst_554 [1] : vector<8x640xf32> to vector<8xf32>
    %732 = vector.shape_cast %731 : vector<8xf32> to vector<8x1xf32>
    %cst_555 = arith.constant 0.001953125 : f32
    %733 = vector.broadcast %cst_555 : f32 to vector<8x1xf32>
    %734 = arith.mulf %732, %733 : vector<8x1xf32>
    %735 = arith.mulf %729, %729 : vector<8x1xf32>
    %736 = arith.subf %734, %735 : vector<8x1xf32>
    %cst_556 = arith.constant 9.99999974E-6 : f32
    %737 = vector.broadcast %cst_556 : f32 to vector<8x1xf32>
    %738 = arith.addf %736, %737 : vector<8x1xf32>
    %739 = math.rsqrt %738 : vector<8x1xf32>
    %740 = arith.mulf %739, %724 : vector<8x1xf32>
    %741 = arith.mulf %729, %740 : vector<8x1xf32>
    %742 = arith.subf %725, %741 : vector<8x1xf32>
    %743 = vector.broadcast %740 : vector<8x1xf32> to vector<8x640xf32>
    %744 = arith.mulf %723, %743 : vector<8x640xf32>
    %745 = vector.broadcast %742 : vector<8x1xf32> to vector<8x640xf32>
    %746 = arith.addf %744, %745 : vector<8x640xf32>
    %747 = vector.broadcast %0 : vector<1x640xf32> to vector<8x640xf32>
    %748 = arith.mulf %746, %747 : vector<8x640xf32>
    %749 = arith.addf %748, %662 : vector<8x640xf32>
    %c13_557 = arith.constant 13 : index
    %750 = memref.load %arg8[%c13_557] : memref<14xf32, #tpu.memory_space<smem>>
    %cst_558 = arith.constant 0.000000e+00 : f32
    %751 = vector.broadcast %cst_558 : f32 to vector<8x640xf32>
    %752 = arith.cmpf oge, %749, %751 : vector<8x640xf32>
    %753 = vector.broadcast %750 : f32 to vector<8x640xf32>
    %754 = arith.mulf %753, %749 : vector<8x640xf32>
    %755 = arith.select %752, %749, %754 : vector<8x640xi1>, vector<8x640xf32>
    %c0_559 = arith.constant 0 : index
    %c0_560 = arith.constant 0 : index
    %756 = vector.load %arg9[%c0_559, %c0_560] : memref<8x640xf32, #tpu.memory_space<vmem>>, vector<8x640xf32>
    tpu.vector_store %arg9[%c0_559, %c0_560], %755 {strides = array<i32>} : memref<8x640xf32, #tpu.memory_space<vmem>>, vector<8x640xf32>,
    return
  }
}

</mosaic_0001>

<bundles_post_ra>
// kernel: custom-call.1
= control target key start
LH: loop header
LB: loop body
LE: loop exit
PB: predicated region body
PF: predicated region fallthrough
CT: control target
= control target key end

     0   :  { %s6_s0 = inlined_call_operand.vmem [shape: f32[32,4,16], index: 0, kind: output, shape index: {}]  }

// kernel: res_unet_innermost.1
= control target key start
LH: loop header
LB: loop body
LE: loop exit
PB: predicated region body
PF: predicated region fallthrough
CT: control target
= control target key end

     0   :  { %14 = vsyncpa [#allocation7], 0  ;;  %s12265_s0 = inlined_call_operand.vmem [shape: f32[8,640], index: 0, kind: input, shape index: {}]   ;;  %s12266_s1 = inlined_call_operand.vmem [shape: f32[14,8,72], index: 1, kind: input, shape index: {}]   ;;  %s12267_s2 = inlined_call_operand.vmem [shape: f32[8,13], index: 2, kind: input, shape index: {}]   ;;  %s12268_s3 = inlined_call_operand.vmem [shape: f32[8,13], index: 3, kind: input, shape index: {}]   ;;  %s12269_s4 = inlined_call_operand.vmem [shape: f32[1,640], index: 4, kind: input, shape index: {}]   ;;  %s12270_s5 = inlined_call_operand.vmem [shape: f32[1,256], index: 5, kind: input, shape index: {}]   ;;  %s12271_s6 = inlined_call_operand.vmem [shape: f32[16,8], index: 6, kind: input, shape index: {}]   ;;  %s12272_s7 = inlined_call_operand.vmem [shape: f32[8,16], index: 7, kind: input, shape index: {}]   ;;  %s12273_s8 = inlined_call_operand.vmem [shape: f32[14], index: 8, kind: input, shape index: {}]   ;;  %s12274_s9 = inlined_call_operand.vmem [shape: f32[8,640], index: 9, kind: output, shape index: {}]  }
   0x1   :  { %s37_s11 = sshll.u32 %s12273_s8, 4  ;;  %s38_s11 = int_to_ptr.vmem [resolvable:$true] %s37_s11 }
   0x2   :  { %s9871_s12 = scalar_lea.vmem %s38_s11, 16  ;;  %p9876_p1 = scmp.lt.s32.totalorder %s38_s11, %s38_s11 }
   0x3   :  { %p9872_p0 = scmp.ne.s32.totalorder %s38_s11, %s9871_s12  ;;  %p9877_p2 = scmp.lt.s32.totalorder %s9871_s12, %s9871_s12 }
   0x5   :  { %p9878_p3 = por %p9877_p2, %p9876_p1 }
   0x7   :  { %p9879_p4 = pnand %p9878_p3, %p9872_p0 }
   0x9   :  { %9882 = shalt.err (!%p9879_p4)
}
   0xa   :  { %s9885_s13 = smov [#allocation6]  }
   0xb   :  { %40 = dma.vmem_to_smem %s38_s11, 16, %s9885_s13, [#allocation7]  }
   0xc   :  { %9883 = dma.done.wait [#allocation7], 16  }
   0xd   :  { %9884 = vsyncadd [#allocation7], 4294967280 }
   0xe   :  { %44 = sfence }
   0xf   :  { %v10021_v0 = vld [vmem:[%s12265_s0] sm:$0xff]  ;;  %s12287_s16 = smov 18   ;;  %s9887_s8 = smov 19   ;;  %vm47_vm0 = vcmask 162816   ;;  %v10030_v1 = vld [vmem:[%s12265_s0 + $0x8] sm:$0xff]  ;;  %v9888_v2 = vmov 0.0  }
  0x10   :  { %125 = vrot.lane.b32.xlu1 %v10021_v0, %s12287_s16  ;;  %97 = vrot.lane.b32.xlu0 %v10021_v0, %s9887_s8  ;;  %49 = vst.msk [vmem:[#allocation2 + $0x40] sm:$0xff] %vm47_vm0, %v9888_v2  ;;  %48 = vst.msk [vmem:[#allocation2 + $0x8] sm:$0xff] %vm47_vm0, %v9888_v2  ;;  %s9889_s19 = smov 17   ;;  %s9890_s20 = smov 1   ;;  %v10060_v3 = vld [vmem:[%s12265_s0 + $0x10] sm:$0xff]  ;;  %v10081_v4 = vld [vmem:[%s12265_s0 + $0x18] sm:$0xff] }
  0x11   :  { %50 = vst.msk [vmem:[#allocation2 + $0x78] sm:$0xff] %vm47_vm0, %v9888_v2  ;;  %51 = vst.msk [vmem:[#allocation2 + $0xb0] sm:$0xff] %vm47_vm0, %v9888_v2  ;;  %440 = vmatprep.mubr.f32.mxu0 %v9888_v2  ;;  %511 = vmatprep.mubr.f32.mxu1 %v9888_v2  ;;  %s9891_s23 = smov 127   ;;  %s12289_s24 = smov 111   ;;  %vm57_vm1 = vcmask 1048416   ;;  %v10114_v5 = vld [vmem:[%s12265_s0 + $0x20] sm:$0xff] }
  0x12   :  { %619 = vst [vmem:[#allocation5] sm:$0xff] %v9888_v2  ;;  %620 = vst [vmem:[#allocation5 + $0x8] sm:$0xff] %v9888_v2  ;;  %s12285_s25 = smov 110   ;;  %s9894_s28 = smov 109   ;;  %vm12282_vm2 = vcmask 1047696   ;;  %vm12283_vm3 = vcmask 1047704  }
  0x13   :  { %3342 = vst [vmem:[#allocation4] sm:$0xff] %v9888_v2  ;;  %3343 = vst [vmem:[#allocation4 + $0x8] sm:$0xff] %v9888_v2  ;;  %vm12279_vm4 = vcmask 146432   ;;  %vm12280_vm5 = vcmask 154624   ;;  %vm12281_vm6 = vcmask 1047688   ;;  %vm12278_vm7 = vcmask 138240  }
  0x14   :  { %3344 = vst [vmem:[#allocation4 + $0x10] sm:$0xff] %v9888_v2  ;;  %3345 = vst [vmem:[#allocation4 + $0x18] sm:$0xff] %v9888_v2  ;;  %127 = vrot.lane.b32.xlu1 %v10030_v1, %s12287_s16  ;;  %99 = vrot.lane.b32.xlu0 %v10030_v1, %s9887_s8  ;;  %vm191_vm8 = vcmask 7168   ;;  %vm202_vm9 = vcmask 1047560   ;;  %vm224_vm10 = vcmask 1039360   ;;  %vm12276_vm12 = vcmask 908288  }
  0x15   :  { %3346 = vst [vmem:[#allocation4 + $0x20] sm:$0xff] %v9888_v2  ;;  %63 = vst.msk [vmem:[#allocation2 + $0x140] sm:$0xff] %vm57_vm1, %v9888_v2  ;;  %vm12277_vm13 = vcmask 900096   ;;  %vm12275_vm14 = vcmask 891904   ;;  %vm372_vm15 = vcmask 588800   ;;  %vm9896_vm0 = vmmov 0  }
  0x16   :  { %64 = vst.msk [vmem:[#allocation2 + $0x178] sm:$0xff] %vm57_vm1, %v9888_v2  ;;  %65 = vst.msk [vmem:[#allocation2 + $0x1b0] sm:$0xff] %vm57_vm1, %v9888_v2  ;;  %s9899_s18 = smov 93   ;;  %s9900_s21 = smov 57  }
  0x17   :  { %66 = vst.msk [vmem:[#allocation2 + $0x1e8] sm:$0xff] %vm57_vm1, %v9888_v2  ;;  %s9901_s22 = smov 59   ;;  %s9902_s26 = smov 113   ;;  %vm626_vm1 = vcmask 130048  }
  0x18   :  { %155 = vrot.lane.b32.xlu1 %v10030_v1, %s9889_s19  ;;  %153 = vrot.lane.b32.xlu0 %v10021_v0, %s9889_s19  ;;  %s9903_s27 = smov 21   ;;  %s9904_s29 = smov 23  }
  0x19   :  { %s9905_s30 = smov 115   ;;  %s9906_s0 = smov 79  }
  0x1a   :  { %s9907_s10 = smov 43   ;;  %s9908_s11 = smov 7  }
  0x1b   :  { %s9909_s12 = smov 99   ;;  %s9910_s13 = smov 63  }
  0x1c   :  { %183 = vrot.lane.b32.xlu1 %v10030_v1, %s9890_s20  ;;  %181 = vrot.lane.b32.xlu0 %v10021_v0, %s9890_s20  ;;  %s9911_s14 = smov 11   ;;  %s9912_s15 = smov 31  }
  0x1d   :  { %s9913_s17 = smov 51  }
  0x20   :  { %218 = vrot.lane.b32.xlu1 %v10060_v3, %s9891_s23  ;;  %216 = vrot.lane.b32.xlu0 %v10030_v1, %s9891_s23 }
  0x24   :  { %244 = vrot.lane.b32.xlu1 %v10030_v1, %s12289_s24  ;;  %214 = vrot.lane.b32.xlu0 %v10021_v0, %s9891_s23 }
  0x28   :  { %272 = vrot.lane.b32.xlu1 %v10030_v1, %s12285_s25  ;;  %246 = vrot.lane.b32.xlu0 %v10060_v3, %s12289_s24 }
  0x2c   :  { %101 = vrot.lane.b32.xlu1 %v10060_v3, %s9887_s8  ;;  %274 = vrot.lane.b32.xlu0 %v10060_v3, %s12285_s25 }
  0x30   :  { %129 = vrot.lane.b32.xlu1 %v10060_v3, %s12287_s16  ;;  %103 = vrot.lane.b32.xlu0 %v10081_v4, %s9887_s8 }
  0x34   :  { %242 = vrot.lane.b32.xlu1 %v10021_v0, %s12289_s24  ;;  %131 = vrot.lane.b32.xlu0 %v10081_v4, %s12287_s16 }
  0x38   :  { %157 = vrot.lane.b32.xlu1 %v10060_v3, %s9889_s19  ;;  %270 = vrot.lane.b32.xlu0 %v10021_v0, %s12285_s25 }
  0x3c   :  { %185 = vrot.lane.b32.xlu1 %v10060_v3, %s9890_s20  ;;  %159 = vrot.lane.b32.xlu0 %v10081_v4, %s9889_s19 }
  0x40   :  { %300 = vrot.lane.b32.xlu1 %v10030_v1, %s9894_s28  ;;  %187 = vrot.lane.b32.xlu0 %v10081_v4, %s9890_s20 }
  0x44   :  { %298 = vrot.lane.b32.xlu1 %v10021_v0, %s9894_s28  ;;  %302 = vrot.lane.b32.xlu0 %v10060_v3, %s9894_s28 }
  0x48   :  { %222 = vrot.lane.b32.xlu1 %v10114_v5, %s9891_s23  ;;  %220 = vrot.lane.b32.xlu0 %v10081_v4, %s9891_s23 }
  0x4c   :  { %133 = vrot.lane.b32.xlu1 %v10114_v5, %s12287_s16  ;;  %105 = vrot.lane.b32.xlu0 %v10114_v5, %s9887_s8  ;;  %s8669_s16 = sld [smem:[#allocation6 + $0x6]] }
  0x50   :  { %250 = vrot.lane.b32.xlu1 %v10114_v5, %s12289_s24  ;;  %248 = vrot.lane.b32.xlu0 %v10081_v4, %s12289_s24 }
  0x54   :  { %278 = vrot.lane.b32.xlu1 %v10114_v5, %s12285_s25  ;;  %276 = vrot.lane.b32.xlu0 %v10081_v4, %s12285_s25  ;;  %s8663_s25 = sld [smem:[#allocation6 + $0x4]] }
  0x58   :  { %189 = vrot.lane.b32.xlu1 %v10114_v5, %s9890_s20  ;;  %161 = vrot.lane.b32.xlu0 %v10114_v5, %s9889_s19 }
  0x5c   :  { %306 = vrot.lane.b32.xlu1 %v10114_v5, %s9894_s28  ;;  %304 = vrot.lane.b32.xlu0 %v10081_v4, %s9894_s28 }
  0x82   :  { %v126_v6 = vpop.permute.xlu1 %125  ;;  %v98_v7 = vpop.permute.xlu0 %97 }
  0x83   :  { %147 = vst.msk [vmem:[#allocation2 + $0x40] sm:$0xff] %vm12282_vm2, %v126_v6  ;;  %vm1187_vm2 = vcmask 646712  }
  0x84   :  { %119 = vst.msk [vmem:[#allocation2 + $0x8] sm:$0xff] %vm12283_vm3, %v98_v7  ;;  %vm12284_vm3 = vcmask 1048520  }
  0x86   :  { %v128_v8 = vpop.permute.xlu1 %127  ;;  %v100_v9 = vpop.permute.xlu0 %99 }
  0x87   :  { %v136_v10 = vsel %vm12279_vm4, %v126_v6, %v128_v8  ;;  %v108_v11 = vsel %vm12280_vm5, %v98_v7, %v100_v9 }
  0x88   :  { %v9241_v12 = vpack.c.bf16 %v136_v10, %v108_v11  ;;  %v10182_v10 = vld [vmem:[%s12266_s1] sm:$0xff] }
  0x8a   :  { %v10144_v13 = vpop.permute.xlu1 %155  ;;  %v154_v14 = vpop.permute.xlu0 %153  ;;  %9242 = vmatprep.subr.bf16.mxu0 %v9241_v12  ;;  %v332_v16 = vld [vmem:[#allocation2 + $0x40] sm:$0xff] }
  0x8b   :  { %v327_v15 = vld [vmem:[#allocation2 + $0x8] sm:$0xff]  ;;  %175 = vst.msk [vmem:[#allocation2 + $0x78] sm:$0xff] %vm12281_vm6, %v154_v14  ;;  %v164_v20 = vsel %vm12278_vm7, %v154_v14, %v10144_v13  ;;  %vm1107_vm6 = vcmask 564712  }
  0x8c   :  { %v9243_v17 = vpack.c.bf16 %v332_v16, %v327_v15 }
  0x8e   :  { %9244 = vmatpush1.bf16.msra.mxu0 %v9243_v17  ;;  %v184_v18 = vpop.permute.xlu1 %183  ;;  %v182_v19 = vpop.permute.xlu0 %181 }
  0x8f   :  { %v192_v21 = vsel %vm191_vm8, %v182_v19, %v184_v18  ;;  %203 = vst.msk [vmem:[#allocation2 + $0xb0] sm:$0xff] %vm202_vm9, %v182_v19 }
  0x90   :  { %v9245_v22 = vpack.c.bf16 %v192_v21, %v164_v20 }
  0x92   :  { %v10151_v23 = vpop.permute.xlu1 %218  ;;  %v217_v24 = vpop.permute.xlu0 %216  ;;  %9246 = vmatprep.subr.bf16.mxu0 %v9245_v22  ;;  %v337_v28 = vld [vmem:[#allocation2 + $0x78] sm:$0xff] }
  0x93   :  { %v226_v25 = vsel %vm224_vm10, %v217_v24, %v10151_v23 }
  0x94   :  { %v9249_v32 = vpack.c.bf16 %v226_v25, %v10030_v1 }
  0x96   :  { %v245_v26 = vpop.permute.xlu1 %244  ;;  %v215_v27 = vpop.permute.xlu0 %214  ;;  %v342_v29 = vld [vmem:[#allocation2 + $0xb0] sm:$0xff] }
  0x97   :  { %v9247_v30 = vpack.c.bf16 %v342_v29, %v337_v28  ;;  %v225_v31 = vsel %vm224_vm10, %v215_v27, %v217_v24 }
  0x98   :  { %v9251_v35 = vpack.c.bf16 %v225_v31, %v10021_v0 }
  0x99   :  { %9248 = vmatpush1.bf16.msra.mxu0 %v9247_v30 }
  0x9a   :  { %v273_v33 = vpop.permute.xlu1 %272  ;;  %v10157_v34 = vpop.permute.xlu0 %246  ;;  %9250 = vmatprep.subr.bf16.mxu0 %v9249_v32 }
  0x9b   :  { %v254_v38 = vsel %vm12276_vm12, %v245_v26, %v10157_v34 }
  0x9d   :  { %9252 = vmatpush1.bf16.msra.mxu0 %v9251_v35 }
  0x9e   :  { %v102_v36 = vpop.permute.xlu1 %101  ;;  %v10160_v37 = vpop.permute.xlu0 %274 }
  0x9f   :  { %v282_v39 = vsel %vm12277_vm13, %v273_v33, %v10160_v37  ;;  %v109_v48 = vsel %vm12280_vm5, %v100_v9, %v102_v36 }
  0xa0   :  { %v9253_v40 = vpack.c.bf16 %v282_v39, %v254_v38 }
  0xa2   :  { %v130_v41 = vpop.permute.xlu1 %129  ;;  %v104_v42 = vpop.permute.xlu0 %103  ;;  %9254 = vmatprep.subr.bf16.mxu0 %v9253_v40 }
  0xa3   :  { %v137_v43 = vsel %vm12279_vm4, %v128_v8, %v130_v41  ;;  %v110_v46 = vsel %vm12280_vm5, %v102_v36, %v104_v42 }
  0xa4   :  { %v9259_v50 = vpack.c.bf16 %v137_v43, %v109_v48 }
  0xa6   :  { %v243_v44 = vpop.permute.xlu1 %242  ;;  %v132_v45 = vpop.permute.xlu0 %131 }
  0xa7   :  { %v138_v47 = vsel %vm12279_vm4, %v130_v41, %v132_v45  ;;  %v253_v53 = vsel %vm12276_vm12, %v243_v44, %v245_v26 }
  0xa8   :  { %v9257_v49 = vpack.c.bf16 %v138_v47, %v110_v46  ;;  %v621_v46 = vld [vmem:[%s12271_s6] sm:$0xff]  ;;  %v622_v47 = vld [vmem:[%s12271_s6 + $0x8] sm:$0xff]  ;;  %s9897_s6 = smov 37  }
  0xa9   :  { %v10231_v48 = vpack.c.bf16 %v622_v47, %v621_v46 }
  0xaa   :  { %v158_v51 = vpop.permute.xlu1 %157  ;;  %v271_v52 = vpop.permute.xlu0 %270  ;;  %9258 = vmatprep.subr.bf16.mxu1 %v9257_v49 }
  0xab   :  { %v281_v54 = vsel %vm12277_vm13, %v271_v52, %v273_v33  ;;  %9260 = vmatpush1.bf16.msra.mxu1 %v9259_v50  ;;  %v165_v63 = vsel %vm12278_vm7, %v10144_v13, %v158_v51  ;;  %v9895_v13 = vmov 0.0|0.0  }
  0xac   :  { %v9255_v55 = vpack.c.bf16 %v281_v54, %v253_v53 }
  0xae   :  { %v186_v56 = vpop.permute.xlu1 %185  ;;  %v160_v57 = vpop.permute.xlu0 %159  ;;  %9256 = vmatpush1.bf16.msra.mxu0 %v9255_v55 }
  0xaf   :  { %v193_v58 = vsel %vm191_vm8, %v184_v18, %v186_v56  ;;  %v166_v61 = vsel %vm12278_vm7, %v158_v51, %v160_v57  ;;  %v45_v51 = vld [vmem:[%s12269_s4] sm:$0x1f]  ;;  %s9898_s4 = smov 73  }
  0xb0   :  { %v9263_v1 = vpack.c.bf16 %v193_v58, %v165_v63 }
  0xb2   :  { %v301_v59 = vpop.permute.xlu1 %300  ;;  %v188_v60 = vpop.permute.xlu0 %187 }
  0xb3   :  { %v194_v62 = vsel %vm191_vm8, %v186_v56, %v188_v60 }
  0xb4   :  { %v9261_v0 = vpack.c.bf16 %v194_v62, %v166_v61 }
  0xb6   :  { %v299_v6 = vpop.permute.xlu1 %298  ;;  %v303_v7 = vpop.permute.xlu0 %302  ;;  %9262 = vmatprep.subr.bf16.mxu1 %v9261_v0 }
  0xb7   :  { %v309_v8 = vsel %vm12275_vm14, %v299_v6, %v301_v59  ;;  %v310_v9 = vsel %vm12275_vm14, %v301_v59, %v303_v7  ;;  %9264 = vmatpush1.bf16.msra.mxu1 %v9263_v1 }
  0xb8   :  { %392 = vmatprep.subr.mxu0 %v310_v9 }
  0xb9   :  { %393 = vmatpush1.msra.mxu0 %v309_v8 }
  0xba   :  { %v223_v11 = vpop.permute.xlu1 %222  ;;  %v221_v12 = vpop.permute.xlu0 %220  ;;  %8633 = vmatmul.mubr.msk.f32.vlgmr.msra.gmra.mrb[0].mxu0 %vm372_vm15, %v10182_v10  ;;  %9273 = vmatprep.subr.bf16.mxu0 %v9895_v13 }
  0xbb   :  { %241 = vst.msk [vmem:[#allocation2 + $0x140] sm:$0xff] %vm224_vm10, %v223_v11  ;;  %v227_v14 = vsel %vm224_vm10, %v10151_v23, %v221_v12  ;;  %v228_v15 = vsel %vm224_vm10, %v221_v12, %v223_v11  ;;  %8899 = vmatprep.mubr.msk.f32.mxu0 %vm9896_vm0, %v9888_v2 }
  0xbc   :  { %v9265_v16 = vpack.c.bf16 %v228_v15, %v10081_v4  ;;  %v9267_v17 = vpack.c.bf16 %v227_v14, %v10060_v3 }
  0xbe   :  { %v134_v18 = vpop.permute.xlu1 %133  ;;  %v106_v19 = vpop.permute.xlu0 %105  ;;  %9266 = vmatprep.subr.bf16.mxu1 %v9265_v16 }
  0xbf   :  { %v139_v20 = vsel %vm12279_vm4, %v132_v45, %v134_v18  ;;  %v111_v21 = vsel %vm12280_vm5, %v104_v42, %v106_v19  ;;  %9268 = vmatpush1.bf16.msra.mxu1 %v9267_v17  ;;  %vm947_vm4 = vcmask 400712   ;;  %vm1027_vm5 = vcmask 482712  }
  0xc0   :  { %v9274_v22 = vpack.c.bf16 %v139_v20, %v111_v21 }
  0xc2   :  { %v251_v23 = vpop.permute.xlu1 %250  ;;  %v249_v24 = vpop.permute.xlu0 %248  ;;  %9275 = vmatpush3.bf16.msra.mxu0 %v9274_v22  ;;  %v356_v36 = vld [vmem:[#allocation2 + $0x140] sm:$0xff] }
  0xc3   :  { %269 = vst.msk [vmem:[#allocation2 + $0x178] sm:$0xff] %vm12276_vm12, %v251_v23  ;;  %9276 = vmatprep.subr.bf16.mxu0 %v9895_v13  ;;  %v255_v3 = vsel %vm12276_vm12, %v10157_v34, %v249_v24  ;;  %v256_v26 = vsel %vm12276_vm12, %v249_v24, %v251_v23  ;;  %v9280_v41 = vpack.c.bf16 %v356_v36, %v10114_v5  ;;  %v589_v5 = vlaneseq }
  0xc4   :  { %vm703_vm12 = vcmask 154712  }
  0xc5   :  { %v10233_v49 = vshrl.u32 %v589_v5, 7 }
  0xc6   :  { %v279_v25 = vpop.permute.xlu1 %278  ;;  %v277_v4 = vpop.permute.xlu0 %276 }
  0xc7   :  { %297 = vst.msk [vmem:[#allocation2 + $0x1b0] sm:$0xff] %vm12277_vm13, %v279_v25  ;;  %v283_v27 = vsel %vm12277_vm13, %v10160_v37, %v277_v4  ;;  %v284_v28 = vsel %vm12277_vm13, %v277_v4, %v279_v25  ;;  %v591_v50 = vsub.s32 0, %v10233_v49  ;;  %v595_v52 = vsub.s32 1, %v10233_v49 }
  0xc8   :  { %v9269_v29 = vpack.c.bf16 %v284_v28, %v256_v26  ;;  %v9271_v30 = vpack.c.bf16 %v283_v27, %v255_v3  ;;  %v599_v59 = vsub.s32 2, %v10233_v49  ;;  %v603_v0 = vsub.s32 3, %v10233_v49 }
  0xc9   :  { %v10246_v53 = vrot.slane %v45_v51, %v591_v50  ;;  %v10250_v54 = vrot.slane %v45_v51, %v595_v52  ;;  %v607_v6 = vsub.s32 4, %v10233_v49  ;;  %vm783_vm13 = vcmask 236712  }
  0xca   :  { %v190_v31 = vpop.permute.xlu1 %189  ;;  %v162_v32 = vpop.permute.xlu0 %161  ;;  %9270 = vmatprep.subr.bf16.mxu1 %v9269_v29  ;;  %v361_v43 = vld [vmem:[#allocation2 + $0x178] sm:$0xff]  ;;  %v10265_v1 = vrot.slane %v45_v51, %v603_v0 }
  0xcb   :  { %v195_v33 = vsel %vm191_vm8, %v188_v60, %v190_v31  ;;  %v167_v35 = vsel %vm12278_vm7, %v160_v57, %v162_v32  ;;  %9272 = vmatpush1.bf16.msra.mxu1 %v9271_v30  ;;  %v10261_v60 = vrot.slane %v45_v51, %v599_v59  ;;  %vm863_vm7 = vcmask 318712  }
  0xcc   :  { %v9277_v34 = vpack.c.bf16 %v195_v33, %v167_v35 }
  0xce   :  { %v307_v38 = vpop.permute.xlu1 %306  ;;  %v305_v39 = vpop.permute.xlu0 %304  ;;  %9278 = vmatpush3.bf16.msra.mxu0 %v9277_v34  ;;  %v366_v42 = vld [vmem:[#allocation2 + $0x1b0] sm:$0xff] }
  0xcf   :  { %325 = vst.msk [vmem:[#allocation2 + $0x1e8] sm:$0xff] %vm12275_vm14, %v307_v38  ;;  %v311_v37 = vsel %vm12275_vm14, %v303_v7, %v305_v39  ;;  %v312_v40 = vsel %vm12275_vm14, %v305_v39, %v307_v38  ;;  %9279 = vmatprep.subr.bf16.mxu0 %v9895_v13  ;;  %v9283_v44 = vpack.c.bf16 %v366_v42, %v361_v43  ;;  %vm12291_vm14 = vcmask 56320  }
  0xd0   :  { %463 = vmatprep.subr.mxu1 %v312_v40 }
  0xd1   :  { %464 = vmatpush1.msra.mxu1 %v311_v37 }
  0xd2   :  { %8634 = vmatmul.mubr.msk.f32.vlgmr.msra.gmra.mrb[0].mxu1 %vm372_vm15, %v10182_v10  ;;  %9281 = vmatpush3.bf16.msra.mxu0 %v9280_v41 }
  0xd3   :  { %9282 = vmatprep.subr.bf16.mxu0 %v9895_v13  ;;  %9291 = vmatprep.subr.bf16.mxu1 %v9895_v13 }
  0xd4   :  { %8920 = vmatprep.mubr.msk.f32.mxu1 %vm9896_vm0, %v9888_v2  ;;  %9293 = vmatpush3.bf16.msra.mxu1 %v10231_v48 }
  0xd5   :  { %9294 = vmatprep.subr.bf16.mxu1 %v9895_v13 }
  0xd6   :  { %9284 = vmatpush3.bf16.msra.mxu0 %v9283_v44  ;;  %v371_v45 = vld [vmem:[#allocation2 + $0x1e8] sm:$0xff] }
  0xd7   :  { %8897 = vmatprep.subr.mxu0 %v9888_v2 }
  0xda   :  { %8898 = vmatpush3.msra.mxu0 %v371_v45 }
  0xdb   :  { %8900 = vmatmul.mubr.msk.f32.vlgmr.msra.gmra.mrb[2].mxu0 %vm372_vm15, %v10182_v10  ;;  %9285 = vmatprep.subr.bf16.mxu0 %v9895_v13  ;;  %v10272_v10 = vrot.slane %v45_v51, %v607_v6 }
  0xdc   :  { %8906 = vmatprep.mubr.msk.f32.mxu0 %vm9896_vm0, %v9888_v2  ;;  %9287 = vmatpush3.bf16.msra.mxu0 %v10231_v48 }
  0xdd   :  { %9288 = vmatprep.subr.bf16.mxu0 %v9895_v13 }
 0x18d   :  { %v442_v55 = vpop.f32.mrb[0].mxu0 }
 0x18e   :  { %v614_v56 = vmul.f32 %v10246_v53, %v442_v55  ;;  %v444_v57 = vpop.f32.mrb[1].mxu0 }
 0x18f   :  { %v615_v58 = vmul.f32 %v10250_v54, %v444_v57 }
 0x190   :  { %785 = vrot.lane.b32.xlu0 %v614_v56, %s9897_s6  ;;  %624 = vrot.lane.b32.xlu1 %v614_v56, %s9894_s28 }
 0x194   :  { %866 = vrot.lane.b32.xlu0 %v614_v56, %s9890_s20  ;;  %868 = vrot.lane.b32.xlu1 %v615_v58, %s9890_s20 }
 0x198   :  { %705 = vrot.lane.b32.xlu0 %v614_v56, %s9898_s4  ;;  %949 = vrot.lane.b32.xlu1 %v615_v58, %s9899_s18  ;;  %s9914_s18 = smov 41  }
 0x19c   :  { %1029 = vrot.lane.b32.xlu0 %v615_v58, %s9900_s21 }
 0x1a5   :  { %v513_v61 = vpop.f32.mrb[0].mxu1 }
 0x1a6   :  { %v616_v62 = vmul.f32 %v10261_v60, %v513_v61  ;;  %v515_v63 = vpop.f32.mrb[1].mxu1 }
 0x1a7   :  { %v617_v7 = vmul.f32 %v10265_v1, %v515_v63 }
 0x1a8   :  { %1270 = vrot.lane.b32.xlu1 %v616_v62, %s9901_s22  ;;  %1190 = vrot.lane.b32.xlu0 %v616_v62, %s9902_s26  ;;  %s9915_s22 = smov 61   ;;  %s9916_s26 = smov 71  }
 0x1ac   :  { %1109 = vrot.lane.b32.xlu1 %v615_v58, %s9903_s27  ;;  %1350 = vrot.lane.b32.xlu0 %v616_v62, %s9904_s29 }
 0x1ae   :  { %v584_v8 = vpop.f32.mrb[2].mxu0 }
 0x1af   :  { %v8901_v9 = vpop.f32.mrb[3].mxu0  ;;  %v618_v11 = vmul.f32 %v10272_v10, %v584_v8 }
 0x1b0   :  { %1431 = vrot.lane.b32.xlu1 %v617_v7, %s9905_s30  ;;  %1512 = vrot.lane.b32.xlu0 %v617_v7, %s9906_s0  ;;  %s9918_s0 = smov 121  }
 0x1b4   :  { %1592 = vrot.lane.b32.xlu1 %v617_v7, %s9907_s10  ;;  %1673 = vrot.lane.b32.xlu0 %v617_v7, %s9908_s11 }
 0x1b8   :  { %1675 = vrot.lane.b32.xlu1 %v618_v11, %s9908_s11  ;;  %1757 = vrot.lane.b32.xlu0 %v618_v11, %s9909_s12  ;;  %s9919_s12 = smov 101  }
 0x1bc   :  { %1837 = vrot.lane.b32.xlu1 %v618_v11, %s9910_s13  ;;  %s9920_s13 = smov 3  }
 0x202   :  { %v786_v12 = vpop.permute.xlu0 %785  ;;  %v625_v14 = vpop.permute.xlu1 %624 }
 0x203   :  { %8921 = vmatmul.mubr.msk.f32.vlgmr.msra.gmra.mrb[2].mxu1 %vm626_vm1, %v786_v12  ;;  %8907 = vmatmul.mubr.msk.f32.vlgmr.msra.gmra.mrb[4].mxu0 %vm626_vm1, %v625_v14 }
 0x204   :  { %9296 = vmatpush3.bf16.msra.mxu1 %v10231_v48  ;;  %9290 = vmatpush3.bf16.msra.mxu0 %v10231_v48 }
 0x205   :  { %8927 = vmatprep.mubr.msk.f32.mxu1 %vm9896_vm0, %v9888_v2  ;;  %8913 = vmatprep.mubr.msk.f32.mxu0 %vm9896_vm0, %v9888_v2 }
 0x206   :  { %v867_v15 = vpop.permute.xlu0 %866  ;;  %v869_v16 = vpop.permute.xlu1 %868  ;;  %9297 = vmatprep.subr.bf16.mxu1 %v9895_v13  ;;  %9300 = vmatprep.subr.bf16.mxu0 %v9895_v13 }
 0x207   :  { %v870_v17 = vsel %vm191_vm8, %v867_v15, %v869_v16 }
 0x208   :  { %8928 = vmatmul.mubr.msk.f32.vlgmr.msra.gmra.mrb[4].mxu1 %vm626_vm1, %v870_v17 }
 0x209   :  { %9299 = vmatpush3.bf16.msra.mxu1 %v10231_v48  ;;  %8934 = vmatprep.mubr.msk.f32.mxu1 %vm9896_vm0, %v9888_v2 }
 0x20a   :  { %v706_v18 = vpop.permute.xlu0 %705  ;;  %v950_v19 = vpop.permute.xlu1 %949  ;;  %9303 = vmatprep.subr.bf16.mxu1 %v9895_v13 }
 0x20b   :  { %8914 = vmatmul.mubr.msk.f32.vlgmr.msra.gmra.mrb[6].mxu0 %vm626_vm1, %v706_v18 }
 0x20c   :  { %9302 = vmatpush3.bf16.msra.mxu0 %v10231_v48  ;;  %8935 = vmatmul.mubr.msk.f32.vlgmr.msra.gmra.mrb[6].mxu1 %vm626_vm1, %v950_v19 }
 0x20d   :  { %8941 = vmatprep.mubr.msk.f32.mxu0 %vm9896_vm0, %v9888_v2  ;;  %9306 = vmatprep.subr.bf16.mxu0 %v9895_v13 }
 0x20e   :  { %v1030_v20 = vpop.permute.xlu0 %1029  ;;  %9305 = vmatpush3.bf16.msra.mxu1 %v10231_v48  ;;  %8948 = vmatprep.mubr.msk.f32.mxu1 %vm9896_vm0, %v9888_v2 }
 0x20f   :  { %8942 = vmatmul.mubr.msk.f32.vlgmr.msra.gmra.mrb[8].mxu0 %vm626_vm1, %v1030_v20  ;;  %9309 = vmatprep.subr.bf16.mxu1 %v9895_v13 }
 0x210   :  { %9308 = vmatpush3.bf16.msra.mxu0 %v10231_v48  ;;  %8955 = vmatprep.mubr.msk.f32.mxu0 %vm9896_vm0, %v9888_v2 }
 0x211   :  { %9312 = vmatprep.subr.bf16.mxu0 %v9895_v13 }
 0x21a   :  { %v1271_v21 = vpop.permute.xlu1 %1270  ;;  %v1191_v22 = vpop.permute.xlu0 %1190 }
 0x21b   :  { %8956 = vmatmul.mubr.msk.f32.vlgmr.msra.gmra.mrb[10].mxu0 %vm626_vm1, %v1191_v22 }
 0x21c   :  { %9314 = vmatpush3.bf16.msra.mxu0 %v10231_v48  ;;  %8969 = vmatprep.mubr.msk.f32.mxu0 %vm9896_vm0, %v9888_v2 }
 0x21d   :  { %9318 = vmatprep.subr.bf16.mxu0 %v9895_v13 }
 0x21e   :  { %v1110_v23 = vpop.permute.xlu1 %1109  ;;  %v1351_v24 = vpop.permute.xlu0 %1350 }
 0x21f   :  { %8949 = vmatmul.mubr.msk.f32.vlgmr.msra.gmra.mrb[8].mxu1 %vm626_vm1, %v1110_v23  ;;  %8970 = vmatmul.mubr.msk.f32.vlgmr.msra.gmra.mrb[12].mxu0 %vm626_vm1, %v1351_v24 }
 0x220   :  { %9311 = vmatpush3.bf16.msra.mxu1 %v10231_v48  ;;  %9320 = vmatpush3.bf16.msra.mxu0 %v10231_v48 }
 0x221   :  { %8962 = vmatprep.mubr.msk.f32.mxu1 %vm9896_vm0, %v9888_v2  ;;  %9315 = vmatprep.subr.bf16.mxu1 %v9895_v13 }
 0x222   :  { %v1432_v25 = vpop.permute.xlu1 %1431  ;;  %8983 = vmatprep.mubr.msk.f32.mxu0 %vm9896_vm0, %v9888_v2  ;;  %v1513_v4 = vpop.permute.xlu0 %1512  ;;  %9324 = vmatprep.subr.bf16.mxu0 %v9895_v13 }
 0x223   :  { %8963 = vmatmul.mubr.msk.f32.vlgmr.msra.gmra.mrb[10].mxu1 %vm626_vm1, %v1271_v21  ;;  %8984 = vmatmul.mubr.msk.f32.vlgmr.msra.gmra.mrb[14].mxu0 %vm626_vm1, %v1513_v4 }
 0x224   :  { %9317 = vmatpush3.bf16.msra.mxu1 %v10231_v48  ;;  %8976 = vmatprep.mubr.msk.f32.mxu1 %vm9896_vm0, %v9888_v2 }
 0x225   :  { %9321 = vmatprep.subr.bf16.mxu1 %v9895_v13  ;;  %9326 = vmatpush3.bf16.msra.mxu0 %v10231_v48 }
 0x226   :  { %v1593_v3 = vpop.permute.xlu1 %1592  ;;  %8997 = vmatprep.mubr.msk.f32.mxu0 %vm9896_vm0, %v9888_v2  ;;  %9330 = vmatprep.subr.bf16.mxu0 %v9895_v13  ;;  %v1674_v26 = vpop.permute.xlu0 %1673 }
 0x227   :  { %8977 = vmatmul.mubr.msk.f32.vlgmr.msra.gmra.mrb[12].mxu1 %vm626_vm1, %v1432_v25 }
 0x228   :  { %9323 = vmatpush3.bf16.msra.mxu1 %v10231_v48  ;;  %8990 = vmatprep.mubr.msk.f32.mxu1 %vm9896_vm0, %v9888_v2 }
 0x229   :  { %9327 = vmatprep.subr.bf16.mxu1 %v9895_v13 }
 0x22a   :  { %v1676_v27 = vpop.permute.xlu1 %1675  ;;  %v1758_v29 = vpop.permute.xlu0 %1757 }
 0x22b   :  { %v1678_v28 = vsel %vm12291_vm14, %v1674_v26, %v1676_v27  ;;  %8991 = vmatmul.mubr.msk.f32.vlgmr.msra.gmra.mrb[14].mxu1 %vm626_vm1, %v1593_v3 }
 0x22c   :  { %8998 = vmatmul.mubr.msk.f32.vlgmr.msra.gmra.mrb[16].mxu0 %vm626_vm1, %v1678_v28  ;;  %9329 = vmatpush3.bf16.msra.mxu1 %v10231_v48 }
 0x22d   :  { %9332 = vmatpush3.bf16.msra.mxu0 %v10231_v48  ;;  %9004 = vmatprep.mubr.msk.f32.mxu1 %vm9896_vm0, %v9888_v2 }
 0x22e   :  { %v1838_v30 = vpop.permute.xlu1 %1837  ;;  %9011 = vmatprep.mubr.msk.f32.mxu0 %vm9896_vm0, %v9888_v2 }
 0x22f   :  { %9005 = vmatmul.mubr.msk.f32.vlgmr.msra.gmra.mrb[16].mxu1 %vm626_vm1, %v1758_v29 }
 0x230   :  { %9012 = vmatmul.mubr.msk.f32.vlgmr.msra.gmra.mrb[18].mxu0 %vm626_vm1, %v1838_v30  ;;  %2118 = vmatprep.mubr.f32.mxu1 %v9888_v2  ;;  %vm67_vm1 = vcmask 97280  }
 0x231   :  { %2360 = vmatprep.mubr.f32.mxu0 %v9888_v2  ;;  %68 = vst.msk [vmem:[#allocation3 + $0x8] sm:$0xff] %vm67_vm1, %v9888_v2  ;;  %69 = vst.msk [vmem:[#allocation3 + $0x28] sm:$0xff] %vm67_vm1, %v9888_v2 }
 0x232   :  { %70 = vst.msk [vmem:[#allocation3 + $0x48] sm:$0xff] %vm67_vm1, %v9888_v2  ;;  %71 = vst.msk [vmem:[#allocation3 + $0x68] sm:$0xff] %vm67_vm1, %v9888_v2  ;;  %vm1268_vm1 = vcmask 728712  }
 0x2d6   :  { %v695_v31 = vpop.f32.mrb[4].mxu0  ;;  %v855_v32 = vpop.f32.mrb[2].mxu1 }
 0x2d7   :  { %700 = vrot.lane.b32.xlu0 %v695_v31, %s9911_s14  ;;  %v8908_v33 = vpop.f32.mrb[5].mxu0  ;;  %v8922_v35 = vpop.f32.mrb[3].mxu1 }
 0x2db   :  { %860 = vrot.lane.b32.xlu0 %v855_v32, %s9912_s15  ;;  %v939_v34 = vpop.f32.mrb[4].mxu1 }
 0x2dc   :  { %v8929_v36 = vpop.f32.mrb[5].mxu1 }
 0x2de   :  { %v775_v38 = vpop.f32.mrb[6].mxu0 }
 0x2df   :  { %780 = vrot.lane.b32.xlu1 %v775_v38, %s9903_s27  ;;  %v8915_v39 = vpop.f32.mrb[7].mxu0  ;;  %v1019_v37 = vpop.f32.mrb[6].mxu1  ;;  %s9917_s27 = smov 81  }
 0x2e0   :  { %v8936_v40 = vpop.f32.mrb[7].mxu1  ;;  %1024 = vrot.lane.b32.xlu0 %v1019_v37, %s9913_s17  ;;  %s9921_s17 = smov 13  }
 0x2e2   :  { %v1099_v41 = vpop.f32.mrb[8].mxu0 }
 0x2e3   :  { %944 = vrot.lane.b32.xlu1 %v939_v34, %s9914_s18  ;;  %v8943_v42 = vpop.f32.mrb[9].mxu0  ;;  %s9922_s18 = smov 33  }
 0x2e7   :  { %1104 = vrot.lane.b32.xlu1 %v1099_v41, %s9915_s22  ;;  %s9924_s22 = smov 9  }
 0x2ee   :  { %v1260_v43 = vpop.f32.mrb[10].mxu0 }
 0x2ef   :  { %v8957_v44 = vpop.f32.mrb[11].mxu0 }
 0x2f2   :  { %v1179_v45 = vpop.f32.mrb[8].mxu1  ;;  %v1420_v5 = vpop.f32.mrb[12].mxu0 }
 0x2f3   :  { %v8950_v46 = vpop.f32.mrb[9].mxu1  ;;  %1184 = vrot.lane.b32.xlu1 %v1179_v45, %s9916_s26  ;;  %v8971_v47 = vpop.f32.mrb[13].mxu0 }
 0x2f6   :  { %v1340_v48 = vpop.f32.mrb[10].mxu1  ;;  %v1582_v51 = vpop.f32.mrb[14].mxu0 }
 0x2f7   :  { %v8964_v55 = vpop.f32.mrb[11].mxu1  ;;  %1265 = vrot.lane.b32.xlu1 %v1260_v43, %s9917_s27  ;;  %v8985_v56 = vpop.f32.mrb[15].mxu0  ;;  %s9925_s27 = smov 119  }
 0x2fa   :  { %v1501_v57 = vpop.f32.mrb[12].mxu1 }
 0x2fb   :  { %1506 = vrot.lane.b32.xlu0 %v1501_v57, %s9918_s0  ;;  %v8978_v58 = vpop.f32.mrb[13].mxu1  ;;  %1345 = vrot.lane.b32.xlu1 %v1340_v48, %s9919_s12  ;;  %s9926_s12 = smov 118  }
 0x2fe   :  { %v1662_v59 = vpop.f32.mrb[14].mxu1 }
 0x2ff   :  { %v8992_v61 = vpop.f32.mrb[15].mxu1  ;;  %1425 = vrot.lane.b32.xlu1 %v1420_v5, %s12289_s24  ;;  %1587 = vrot.lane.b32.xlu0 %v1582_v51, %s9920_s13  ;;  %v1747_v62 = vpop.f32.mrb[16].mxu0  ;;  %s9927_s13 = smov 117   ;;  %s8657_s24 = sld [smem:[#allocation6 + $0x2]] }
 0x300   :  { %v8999_v63 = vpop.f32.mrb[17].mxu0 }
 0x302   :  { %v1827_v0 = vpop.f32.mrb[16].mxu1 }
 0x303   :  { %1667 = vrot.lane.b32.xlu0 %v1662_v59, %s9921_s17  ;;  %v1907_v6 = vpop.f32.mrb[18].mxu0  ;;  %v9006_v7 = vpop.f32.mrb[17].mxu1 }
 0x304   :  { %v9013_v8 = vpop.f32.mrb[19].mxu0  ;;  %1912 = vrot.lane.b32.xlu1 %v1907_v6, %s9907_s10  ;;  %s9923_s10 = smov 10  }
 0x307   :  { %1752 = vrot.lane.b32.xlu0 %v1747_v62, %s9904_s29  ;;  %s10367_s29 = sld [smem:[#allocation6]] }
 0x30b   :  { %1832 = vrot.lane.b32.xlu0 %v1827_v0, %s9922_s18 }
 0x30d   :  { %v1922_v24 = vstv %s10367_s29  ;;  %s8654_s29 = sld [smem:[#allocation6 + $0x1]] }
 0x349   :  { %v701_v9 = vpop.permute.xlu0 %700 }
 0x34a   :  { %704 = vst.msk [vmem:[#allocation5] sm:$0xff] %vm703_vm12, %v701_v9  ;;  %vm1348_vm12 = vcmask 892712  }
 0x34d   :  { %v861_v11 = vpop.permute.xlu0 %860 }
 0x351   :  { %v781_v12 = vpop.permute.xlu1 %780 }
 0x352   :  { %784 = vst.msk [vmem:[#allocation5] sm:$0xff] %vm783_vm13, %v781_v12  ;;  %v1025_v14 = vpop.permute.xlu0 %1024  ;;  %vm1590_vm13 = vcmask 89112  }
 0x353   :  { %864 = vst.msk [vmem:[#allocation5] sm:$0xff] %vm863_vm7, %v861_v11  ;;  %vm1428_vm7 = vcmask 974712  }
 0x355   :  { %v945_v15 = vpop.permute.xlu1 %944 }
 0x356   :  { %948 = vst.msk [vmem:[#allocation5] sm:$0xff] %vm947_vm4, %v945_v15  ;;  %vm1755_vm4 = vcmask 253112  }
 0x357   :  { %1028 = vst.msk [vmem:[#allocation5] sm:$0xff] %vm1027_vm5, %v1025_v14  ;;  %vm77_vm5 = vcmask 1048480  }
 0x358   :  { %83 = vst.msk [vmem:[#allocation3 + $0xb0] sm:$0xff] %vm77_vm5, %v9888_v2  ;;  %84 = vst.msk [vmem:[#allocation3 + $0xd0] sm:$0xff] %vm77_vm5, %v9888_v2 }
 0x359   :  { %v1105_v16 = vpop.permute.xlu1 %1104  ;;  %85 = vst.msk [vmem:[#allocation3 + $0xf0] sm:$0xff] %vm77_vm5, %v9888_v2  ;;  %86 = vst.msk [vmem:[#allocation3 + $0x110] sm:$0xff] %vm77_vm5, %v9888_v2  ;;  %vm1933_vm5 = vcmask 89088  }
 0x35a   :  { %1108 = vst.msk [vmem:[#allocation5] sm:$0xff] %vm1107_vm6, %v1105_v16  ;;  %vm1835_vm6 = vcmask 335112  }
 0x365   :  { %v1185_v17 = vpop.permute.xlu1 %1184 }
 0x366   :  { %1188 = vst.msk [vmem:[#allocation5] sm:$0xff] %vm1187_vm2, %v1185_v17  ;;  %vm1670_vm2 = vcmask 171112  }
 0x369   :  { %v1266_v18 = vpop.permute.xlu1 %1265 }
 0x36a   :  { %1269 = vst.msk [vmem:[#allocation5] sm:$0xff] %vm1268_vm1, %v1266_v18  ;;  %v8652_v18 = vld [vmem:[%s12266_s1 + $0x8] sm:$0xff] }
 0x36d   :  { %v1346_v19 = vpop.permute.xlu1 %1345  ;;  %v1507_v20 = vpop.permute.xlu0 %1506 }
 0x36e   :  { %1349 = vst.msk [vmem:[#allocation5] sm:$0xff] %vm1348_vm12, %v1346_v19  ;;  %vm1915_vm12 = vcmask 417112  }
 0x36f   :  { %1511 = vst.msk [vmem:[#allocation5 + $0x8] sm:$0xff] %vm191_vm8, %v1507_v20 }
 0x371   :  { %v1426_v21 = vpop.permute.xlu1 %1425  ;;  %v1588_v22 = vpop.permute.xlu0 %1587 }
 0x372   :  { %1429 = vst.msk [vmem:[#allocation5] sm:$0xff] %vm1428_vm7, %v1426_v21  ;;  %v46_v21 = vld [vmem:[%s12270_s5] sm:$0x3]  ;;  %s8660_s5 = sld [smem:[#allocation6 + $0x3]] }
 0x373   :  { %1591 = vst.msk [vmem:[#allocation5 + $0x8] sm:$0xff] %vm1590_vm13, %v1588_v22  ;;  %vm1938_vm13 = vcmask 1047640   ;;  %v10441_v22 = vrot.slane %v46_v21, %v591_v50 }
 0x374   :  { %1510 = vst.msk [vmem:[#allocation5] sm:$0xff] %vm12284_vm3, %v1507_v20  ;;  %vm2022_vm3 = vcmask 957440   ;;  %v10433_v20 = vld [vmem:[#allocation4] sm:$0xff] }
 0x375   :  { %v1668_v23 = vpop.permute.xlu0 %1667 }
 0x376   :  { %1671 = vst.msk [vmem:[#allocation5 + $0x8] sm:$0xff] %vm1670_vm2, %v1668_v23  ;;  %v1913_v28 = vpop.permute.xlu1 %1912  ;;  %vm1951_vm2 = vcmask 1047632   ;;  %v10445_v23 = vrot.slane %v46_v21, %v595_v52 }
 0x379   :  { %v1753_v25 = vpop.permute.xlu0 %1752 }
 0x37a   :  { %1756 = vst.msk [vmem:[#allocation5 + $0x8] sm:$0xff] %vm1755_vm4, %v1753_v25  ;;  %vm1964_vm4 = vcmask 1047624  }
 0x37b   :  { %v1917_v4 = vld [vmem:[#allocation5] sm:$0xff] }
 0x37c   :  { %vm1920_vm1 = vcmp.ge.f32.partialorder %v1917_v4, 0.0  ;;  %v1923_v3 = vmul.f32 %v1922_v24, %v1917_v4 }
 0x37d   :  { %v1833_v26 = vpop.permute.xlu0 %1832 }
 0x37e   :  { %v10375_v27 = vsel %vm1920_vm1, %v1917_v4, %v1923_v3  ;;  %1836 = vst.msk [vmem:[#allocation5 + $0x8] sm:$0xff] %vm1835_vm6, %v1833_v26  ;;  %vm1946_vm6 = vcmask 80896   ;;  %vm1959_vm1 = vcmask 72704  }
 0x37f   :  { %1929 = vrot.lane.b32.xlu0 %v10375_v27, %s9911_s14  ;;  %1916 = vst.msk [vmem:[#allocation5 + $0x8] sm:$0xff] %vm1915_vm12, %v1913_v28  ;;  %vm1996_vm12 = vcmask 973824  }
 0x383   :  { %1942 = vrot.lane.b32.xlu0 %v10375_v27, %s9923_s10 }
 0x386   :  { %v1918_v2 = vld [vmem:[#allocation5 + $0x8] sm:$0xff] }
 0x387   :  { %1955 = vrot.lane.b32.xlu0 %v10375_v27, %s9924_s22  ;;  %vm1921_vm7 = vcmp.ge.f32.partialorder %v1918_v2, 0.0  ;;  %v1924_v29 = vmul.f32 %v1922_v24, %v1918_v2 }
 0x389   :  { %v10383_v30 = vsel %vm1921_vm7, %v1918_v2, %v1924_v29  ;;  %vm2009_vm7 = vcmask 965632  }
 0x38a   :  { %1931 = vrot.lane.b32.xlu1 %v10383_v30, %s9911_s14 }
 0x38b   :  { %1968 = vrot.lane.b32.xlu0 %v10375_v27, %s9890_s20 }
 0x38e   :  { %1944 = vrot.lane.b32.xlu1 %v10383_v30, %s9923_s10 }
 0x38f   :  { %1981 = vrot.lane.b32.xlu0 %v10375_v27, %s9891_s23 }
 0x392   :  { %1957 = vrot.lane.b32.xlu1 %v10383_v30, %s9924_s22 }
 0x393   :  { %1992 = vrot.lane.b32.xlu0 %v10375_v27, %s9925_s27 }
 0x396   :  { %1970 = vrot.lane.b32.xlu1 %v10383_v30, %s9890_s20 }
 0x397   :  { %2005 = vrot.lane.b32.xlu0 %v10375_v27, %s9926_s12 }
 0x39a   :  { %1983 = vrot.lane.b32.xlu1 %v10383_v30, %s9891_s23 }
 0x39b   :  { %2018 = vrot.lane.b32.xlu0 %v10375_v27, %s9927_s13 }
 0x39e   :  { %1994 = vrot.lane.b32.xlu1 %v10383_v30, %s9925_s27 }
 0x3a2   :  { %2007 = vrot.lane.b32.xlu1 %v10383_v30, %s9926_s12 }
 0x3a6   :  { %2020 = vrot.lane.b32.xlu1 %v10383_v30, %s9927_s13 }
 0x3f1   :  { %v1930_v31 = vpop.permute.xlu0 %1929 }
 0x3f2   :  { %1939 = vst.msk [vmem:[#allocation3 + $0x8] sm:$0xff] %vm1938_vm13, %v1930_v31 }
 0x3f5   :  { %v1943_v32 = vpop.permute.xlu0 %1942 }
 0x3f6   :  { %1952 = vst.msk [vmem:[#allocation3 + $0x28] sm:$0xff] %vm1951_vm2, %v1943_v32 }
 0x3f9   :  { %v1956_v33 = vpop.permute.xlu0 %1955  ;;  %v2033_v42 = vld [vmem:[#allocation3 + $0x8] sm:$0xff] }
 0x3fa   :  { %1965 = vst.msk [vmem:[#allocation3 + $0x48] sm:$0xff] %vm1964_vm4, %v1956_v33 }
 0x3fc   :  { %v1932_v35 = vpop.permute.xlu1 %1931 }
 0x3fd   :  { %v1969_v34 = vpop.permute.xlu0 %1968  ;;  %v2035_v39 = vld [vmem:[#allocation3 + $0x28] sm:$0xff]  ;;  %v1934_v37 = vsel %vm1933_vm5, %v1930_v31, %v1932_v35  ;;  %v9928_v31 = vmov 0  }
 0x3fe   :  { %1976 = vst.msk [vmem:[#allocation3 + $0x68] sm:$0xff] %vm202_vm9, %v1969_v34  ;;  %v9335_v43 = vpack.c.bf16 %v2035_v39, %v2033_v42  ;;  %9817 = vset.pattern.permute.xlu0 %v9928_v31  ;;  %9818 = vset.pattern.permute.xlu1 %v9928_v31 }
 0x400   :  { %v1945_v36 = vpop.permute.xlu1 %1944 }
 0x401   :  { %v1982_v38 = vpop.permute.xlu0 %1981  ;;  %v1947_v40 = vsel %vm1946_vm6, %v1943_v32, %v1945_v36  ;;  %v2037_v56 = vld [vmem:[#allocation3 + $0x48] sm:$0xff] }
 0x402   :  { %v9333_v41 = vpack.c.bf16 %v1947_v40, %v1934_v37  ;;  %v10452_v36 = vld [vmem:[%s12267_s2] sm:$0xff] }
 0x403   :  { %v10458_v37 = vld [vmem:[%s12268_s3] sm:$0xff] }
 0x404   :  { %v1958_v44 = vpop.permute.xlu1 %1957  ;;  %9334 = vmatprep.subr.bf16.mxu1 %v9333_v41 }
 0x405   :  { %v1993_v45 = vpop.permute.xlu0 %1992  ;;  %9336 = vmatpush1.bf16.msra.mxu1 %v9335_v43  ;;  %v2039_v47 = vld [vmem:[#allocation3 + $0x68] sm:$0xff]  ;;  %v1960_v48 = vsel %vm1959_vm1, %v1956_v33, %v1958_v44 }
 0x406   :  { %v9339_v57 = vpack.c.bf16 %v2039_v47, %v2037_v56  ;;  %v2176_v47 = vstv %s8654_s29  ;;  %s9937_s29 = smov 97  }
 0x408   :  { %v1971_v5 = vpop.permute.xlu1 %1970 }
 0x409   :  { %v2006_v46 = vpop.permute.xlu0 %2005  ;;  %v1972_v51 = vsel %vm191_vm8, %v1969_v34, %v1971_v5 }
 0x40a   :  { %v9337_v55 = vpack.c.bf16 %v1972_v51, %v1960_v48 }
 0x40c   :  { %v1984_v58 = vpop.permute.xlu1 %1983  ;;  %9338 = vmatprep.subr.bf16.mxu1 %v9337_v55 }
 0x40d   :  { %v2019_v59 = vpop.permute.xlu0 %2018  ;;  %1991 = vst.msk [vmem:[#allocation3 + $0xb0] sm:$0xff] %vm224_vm10, %v1984_v58  ;;  %9340 = vmatpush1.bf16.msra.mxu1 %v9339_v57  ;;  %v1985_v62 = vsel %vm224_vm10, %v1982_v38, %v1984_v58 }
 0x40e   :  { %v9343_v7 = vpack.c.bf16 %v1985_v62, %v10375_v27 }
 0x410   :  { %v1995_v61 = vpop.permute.xlu1 %1994 }
 0x411   :  { %2004 = vst.msk [vmem:[#allocation3 + $0xd0] sm:$0xff] %vm1996_vm12, %v1995_v61  ;;  %v1997_v14 = vsel %vm1996_vm12, %v1993_v45, %v1995_v61 }
 0x414   :  { %v2008_v63 = vpop.permute.xlu1 %2007  ;;  %v2044_v0 = vld [vmem:[#allocation3 + $0xb0] sm:$0xff] }
 0x415   :  { %2017 = vst.msk [vmem:[#allocation3 + $0xf0] sm:$0xff] %vm2009_vm7, %v2008_v63  ;;  %v9341_v6 = vpack.c.bf16 %v2044_v0, %v10383_v30  ;;  %v2010_v9 = vsel %vm2009_vm7, %v2006_v46, %v2008_v63 }
 0x416   :  { %v9347_v16 = vpack.c.bf16 %v2010_v9, %v1997_v14 }
 0x417   :  { %9342 = vmatprep.subr.bf16.mxu1 %v9341_v6 }
 0x418   :  { %v2021_v8 = vpop.permute.xlu1 %2020  ;;  %9344 = vmatpush1.bf16.msra.mxu1 %v9343_v7  ;;  %v2046_v11 = vld [vmem:[#allocation3 + $0xd0] sm:$0xff] }
 0x419   :  { %2030 = vst.msk [vmem:[#allocation3 + $0x110] sm:$0xff] %vm2022_vm3, %v2021_v8  ;;  %v2023_v19 = vsel %vm2022_vm3, %v2019_v59, %v2021_v8 }
 0x41c   :  { %v2048_v12 = vld [vmem:[#allocation3 + $0xf0] sm:$0xff] }
 0x41d   :  { %v9345_v15 = vpack.c.bf16 %v2048_v12, %v2046_v11 }
 0x41f   :  { %9346 = vmatprep.subr.bf16.mxu1 %v9345_v15 }
 0x420   :  { %9348 = vmatpush1.bf16.msra.mxu1 %v9347_v16  ;;  %v2050_v17 = vld [vmem:[#allocation3 + $0x110] sm:$0xff] }
 0x421   :  { %2070 = vmatprep.subr.mxu1 %v2050_v17 }
 0x424   :  { %2071 = vmatpush1.msra.mxu1 %v2023_v19 }
 0x425   :  { %8653 = vmatmul.mubr.msk.f32.vlgmr.msra.gmra.mrb[18].mxu1 %vm372_vm15, %v8652_v18 }
 0x426   :  { %2593 = vmatprep.mubr.f32.mxu1 %v10433_v20 }
 0x4f8   :  { %v2120_v24 = vpop.f32.mrb[18].mxu1 }
 0x4f9   :  { %v2136_v25 = vmul.f32 %v10441_v22, %v2120_v24  ;;  %v2122_v4 = vpop.f32.mrb[19].mxu1 }
 0x4fa   :  { %v2137_v3 = vmul.f32 %v10445_v23, %v2122_v4 }
 0x4fb   :  { %v2144_v26 = vmul.f32 %v2136_v25, %v2136_v25 }
 0x4fc   :  { %v2140_v28 = vadd.f32 %v2137_v3, %v2136_v25  ;;  %v2145_v2 = vmul.f32 %v2137_v3, %v2137_v3 }
 0x4fe   :  { %2141 = vadd.xlane.f32.xlu0 %v2140_v28  ;;  %v2146_v29 = vadd.f32 %v2145_v2, %v2144_v26 }
 0x500   :  { %2147 = vadd.xlane.f32.xlu1 %v2146_v29 }
 0x58b   :  { %v2142_v50 = vpop.xlane.xlu0 %2141 }
 0x58c   :  { %v2143_v32 = vmul.f32 0.0078125, %v2142_v50 }
 0x58d   :  { %v2148_v49 = vpop.xlane.xlu1 %2147 }
 0x58e   :  { %v2150_v52 = vmul.f32 %v2143_v32, %v2143_v32  ;;  %v2149_v33 = vmul.f32 0.0078125, %v2148_v49 }
 0x590   :  { %v2151_v35 = vsub.f32 %v2149_v33, %v2150_v52 }
 0x592   :  { %v2152_v34 = vadd.f32 1e-05, %v2151_v35 }
 0x594   :  { %9843 = vrsqrt.f32 %v2152_v34 }
 0x59e   :  { %v9844_v38 = vpop.eup %9843 }
 0x59f   :  { %v2154_v39 = vmul.f32 %v9844_v38, %v10452_v36 }
 0x5a1   :  { %2159 = vperm.xlu0 %9817, %v2154_v39   ;;  %v2155_v40 = vmul.f32 %v2154_v39, %v2143_v32 }
 0x5a3   :  { %v2156_v41 = vsub.f32 %v10458_v37, %v2155_v40 }
 0x5a5   :  { %2166 = vperm.xlu1 %9818, %v2156_v41  }
 0x620   :  { %v2160_v42 = vpop.permute.xlu0 %2159 }
 0x621   :  { %v2162_v43 = vmul.f32 %v2160_v42, %v2136_v25  ;;  %v2163_v44 = vmul.f32 %v2160_v42, %v2137_v3 }
 0x624   :  { %v2167_v45 = vpop.permute.xlu1 %2166 }
 0x625   :  { %v2169_v5 = vadd.f32 %v2167_v45, %v2162_v43  ;;  %v2170_v46 = vadd.f32 %v2167_v45, %v2163_v44  ;;  %v8655_v43 = vld [vmem:[%s12266_s1 + $0x10] sm:$0xff] }
 0x627   :  { %v2171_v48 = vmul.f32 %v2169_v5, %v10441_v22  ;;  %v2172_v51 = vmul.f32 %v2170_v46, %v10445_v23 }
 0x629   :  { %vm2174_vm11 = vcmp.ge.f32.partialorder %v2171_v48, 0.0  ;;  %v2177_v55 = vmul.f32 %v2176_v47, %v2171_v48  ;;  %v2178_v56 = vmul.f32 %v2176_v47, %v2172_v51  ;;  %vm2175_vm14 = vcmp.ge.f32.partialorder %v2172_v51, 0.0 }
 0x62b   :  { %v10463_v57 = vsel %vm2174_vm11, %v2171_v48, %v2177_v55  ;;  %v2180_v58 = vsel %vm2175_vm14, %v2172_v51, %v2178_v56 }
 0x62c   :  { %2216 = vrot.lane.b32.xlu0 %v10463_v57, %s9890_s20  ;;  %2183 = vrot.lane.b32.xlu1 %v10463_v57, %s9911_s14 }
 0x630   :  { %2229 = vrot.lane.b32.xlu0 %v10463_v57, %s9891_s23  ;;  %2185 = vrot.lane.b32.xlu1 %v2180_v58, %s9911_s14 }
 0x634   :  { %2240 = vrot.lane.b32.xlu0 %v10463_v57, %s9925_s27  ;;  %2194 = vrot.lane.b32.xlu1 %v10463_v57, %s9923_s10 }
 0x638   :  { %2251 = vrot.lane.b32.xlu0 %v10463_v57, %s9926_s12  ;;  %2196 = vrot.lane.b32.xlu1 %v2180_v58, %s9923_s10 }
 0x63c   :  { %2262 = vrot.lane.b32.xlu0 %v10463_v57, %s9927_s13  ;;  %2205 = vrot.lane.b32.xlu1 %v10463_v57, %s9924_s22 }
 0x640   :  { %2207 = vrot.lane.b32.xlu1 %v2180_v58, %s9924_s22 }
 0x644   :  { %2218 = vrot.lane.b32.xlu1 %v2180_v58, %s9890_s20 }
 0x648   :  { %2231 = vrot.lane.b32.xlu1 %v2180_v58, %s9891_s23 }
 0x64c   :  { %2242 = vrot.lane.b32.xlu1 %v2180_v58, %s9925_s27 }
 0x650   :  { %2253 = vrot.lane.b32.xlu1 %v2180_v58, %s9926_s12 }
 0x654   :  { %2264 = vrot.lane.b32.xlu1 %v2180_v58, %s9927_s13 }
 0x69e   :  { %v2217_v59 = vpop.permute.xlu0 %2216  ;;  %v2184_v61 = vpop.permute.xlu1 %2183 }
 0x69f   :  { %2224 = vst.msk [vmem:[#allocation3 + $0x68] sm:$0xff] %vm202_vm9, %v2217_v59 }
 0x6a0   :  { %2191 = vst.msk [vmem:[#allocation3 + $0x8] sm:$0xff] %vm1938_vm13, %v2184_v61 }
 0x6a2   :  { %v2230_v62 = vpop.permute.xlu0 %2229  ;;  %v2186_v63 = vpop.permute.xlu1 %2185 }
 0x6a3   :  { %v2187_v9 = vsel %vm1933_vm5, %v2184_v61, %v2186_v63 }
 0x6a6   :  { %v2241_v0 = vpop.permute.xlu0 %2240  ;;  %v2195_v6 = vpop.permute.xlu1 %2194  ;;  %v2281_v26 = vld [vmem:[#allocation3 + $0x68] sm:$0xff] }
 0x6a7   :  { %2202 = vst.msk [vmem:[#allocation3 + $0x28] sm:$0xff] %vm1951_vm2, %v2195_v6  ;;  %v2275_v16 = vld [vmem:[#allocation3 + $0x8] sm:$0xff] }
 0x6aa   :  { %v2252_v7 = vpop.permute.xlu0 %2251  ;;  %v2197_v8 = vpop.permute.xlu1 %2196 }
 0x6ab   :  { %v2198_v11 = vsel %vm1946_vm6, %v2195_v6, %v2197_v8 }
 0x6ac   :  { %v9349_v12 = vpack.c.bf16 %v2198_v11, %v2187_v9 }
 0x6ae   :  { %v2263_v14 = vpop.permute.xlu0 %2262  ;;  %v2206_v15 = vpop.permute.xlu1 %2205  ;;  %9350 = vmatprep.subr.bf16.mxu0 %v9349_v12  ;;  %v2277_v17 = vld [vmem:[#allocation3 + $0x28] sm:$0xff] }
 0x6af   :  { %2213 = vst.msk [vmem:[#allocation3 + $0x48] sm:$0xff] %vm1964_vm4, %v2206_v15  ;;  %v9351_v18 = vpack.c.bf16 %v2277_v17, %v2275_v16 }
 0x6b1   :  { %9352 = vmatpush1.bf16.msra.mxu0 %v9351_v18 }
 0x6b2   :  { %v2208_v19 = vpop.permute.xlu1 %2207 }
 0x6b3   :  { %v2209_v25 = vsel %vm1959_vm1, %v2206_v15, %v2208_v19 }
 0x6b6   :  { %v2219_v21 = vpop.permute.xlu1 %2218  ;;  %v2279_v24 = vld [vmem:[#allocation3 + $0x48] sm:$0xff] }
 0x6b7   :  { %v2220_v4 = vsel %vm191_vm8, %v2217_v59, %v2219_v21  ;;  %v9355_v28 = vpack.c.bf16 %v2281_v26, %v2279_v24  ;;  %v2409_v24 = vstv %s8657_s24  ;;  %s9935_s24 = smov 47  }
 0x6b8   :  { %v9353_v3 = vpack.c.bf16 %v2220_v4, %v2209_v25 }
 0x6ba   :  { %v2232_v2 = vpop.permute.xlu1 %2231  ;;  %9354 = vmatprep.subr.bf16.mxu0 %v9353_v3 }
 0x6bb   :  { %2239 = vst.msk [vmem:[#allocation3 + $0xb0] sm:$0xff] %vm224_vm10, %v2232_v2  ;;  %9356 = vmatpush1.bf16.msra.mxu0 %v9355_v28  ;;  %v2233_v31 = vsel %vm224_vm10, %v2230_v62, %v2232_v2 }
 0x6bc   :  { %v9359_v52 = vpack.c.bf16 %v2233_v31, %v10463_v57  ;;  %v9929_v57 = vmov 1  }
 0x6bd   :  { %9819 = vset.pattern.permute.xlu0 %v9929_v57  ;;  %9820 = vset.pattern.permute.xlu1 %v9929_v57 }
 0x6be   :  { %v2243_v29 = vpop.permute.xlu1 %2242 }
 0x6bf   :  { %2250 = vst.msk [vmem:[#allocation3 + $0xd0] sm:$0xff] %vm1996_vm12, %v2243_v29  ;;  %v2244_v39 = vsel %vm1996_vm12, %v2241_v0, %v2243_v29 }
 0x6c2   :  { %v2254_v50 = vpop.permute.xlu1 %2253  ;;  %v2286_v32 = vld [vmem:[#allocation3 + $0xb0] sm:$0xff] }
 0x6c3   :  { %2261 = vst.msk [vmem:[#allocation3 + $0xf0] sm:$0xff] %vm2009_vm7, %v2254_v50  ;;  %v9357_v49 = vpack.c.bf16 %v2286_v32, %v2180_v58  ;;  %v2255_v35 = vsel %vm2009_vm7, %v2252_v7, %v2254_v50 }
 0x6c4   :  { %v9363_v41 = vpack.c.bf16 %v2255_v35, %v2244_v39 }
 0x6c5   :  { %9358 = vmatprep.subr.bf16.mxu0 %v9357_v49 }
 0x6c6   :  { %v2265_v33 = vpop.permute.xlu1 %2264  ;;  %9360 = vmatpush1.bf16.msra.mxu0 %v9359_v52  ;;  %v2288_v34 = vld [vmem:[#allocation3 + $0xd0] sm:$0xff] }
 0x6c7   :  { %2272 = vst.msk [vmem:[#allocation3 + $0x110] sm:$0xff] %vm2022_vm3, %v2265_v33  ;;  %v2266_v44 = vsel %vm2022_vm3, %v2263_v14, %v2265_v33 }
 0x6ca   :  { %v2290_v38 = vld [vmem:[#allocation3 + $0xf0] sm:$0xff] }
 0x6cb   :  { %v9361_v40 = vpack.c.bf16 %v2290_v38, %v2288_v34 }
 0x6cd   :  { %9362 = vmatprep.subr.bf16.mxu0 %v9361_v40 }
 0x6ce   :  { %9364 = vmatpush1.bf16.msra.mxu0 %v9363_v41  ;;  %v2292_v42 = vld [vmem:[#allocation3 + $0x110] sm:$0xff] }
 0x6cf   :  { %2312 = vmatprep.subr.mxu0 %v2292_v42 }
 0x6d2   :  { %2313 = vmatpush1.msra.mxu0 %v2266_v44 }
 0x6d3   :  { %8656 = vmatmul.mubr.msk.f32.vlgmr.msra.gmra.mrb[20].mxu0 %vm372_vm15, %v8655_v43 }
 0x6d4   :  { %2824 = vmatprep.mubr.f32.mxu0 %v10433_v20 }
 0x7a6   :  { %v2362_v45 = vpop.f32.mrb[20].mxu0 }
 0x7a7   :  { %v2367_v5 = vmul.f32 %v2362_v45, %v10441_v22  ;;  %v2364_v46 = vpop.f32.mrb[21].mxu0 }
 0x7a8   :  { %v2368_v47 = vmul.f32 %v2364_v46, %v10445_v23 }
 0x7a9   :  { %v2375_v48 = vmul.f32 %v2367_v5, %v2367_v5 }
 0x7aa   :  { %v2376_v51 = vmul.f32 %v2368_v47, %v2368_v47  ;;  %v2371_v55 = vadd.f32 %v2368_v47, %v2367_v5 }
 0x7ac   :  { %2372 = vadd.xlane.f32.xlu0 %v2371_v55  ;;  %v2377_v56 = vadd.f32 %v2376_v51, %v2375_v48 }
 0x7ae   :  { %2378 = vadd.xlane.f32.xlu1 %v2377_v56 }
 0x839   :  { %v2373_v58 = vpop.xlane.xlu0 %2372 }
 0x83a   :  { %v2374_v59 = vmul.f32 0.0078125, %v2373_v58 }
 0x83b   :  { %v2379_v61 = vpop.xlane.xlu1 %2378 }
 0x83c   :  { %v2381_v62 = vmul.f32 %v2374_v59, %v2374_v59  ;;  %v2380_v63 = vmul.f32 0.0078125, %v2379_v61 }
 0x83e   :  { %v2382_v0 = vsub.f32 %v2380_v63, %v2381_v62 }
 0x840   :  { %v2383_v6 = vadd.f32 1e-05, %v2382_v0 }
 0x842   :  { %9845 = vrsqrt.f32 %v2383_v6 }
 0x84c   :  { %v9846_v7 = vpop.eup %9845 }
 0x84d   :  { %v2385_v8 = vmul.f32 %v9846_v7, %v10452_v36 }
 0x84f   :  { %2390 = vperm.xlu0 %9819, %v2385_v8   ;;  %v2386_v9 = vmul.f32 %v2385_v8, %v2374_v59 }
 0x851   :  { %v2387_v11 = vsub.f32 %v10458_v37, %v2386_v9 }
 0x853   :  { %2397 = vperm.xlu1 %9820, %v2387_v11  }
 0x8ce   :  { %v2391_v12 = vpop.permute.xlu0 %2390 }
 0x8cf   :  { %v2393_v14 = vmul.f32 %v2391_v12, %v2367_v5  ;;  %v2394_v15 = vmul.f32 %v2391_v12, %v2368_v47 }
 0x8d2   :  { %v2398_v16 = vpop.permute.xlu1 %2397 }
 0x8d3   :  { %v2400_v17 = vadd.f32 %v2398_v16, %v2393_v14  ;;  %v2401_v18 = vadd.f32 %v2398_v16, %v2394_v15  ;;  %v8658_v14 = vld [vmem:[%s12266_s1 + $0x18] sm:$0xff] }
 0x8d5   :  { %v2402_v19 = vmul.f32 %v2400_v17, %v10441_v22  ;;  %v2403_v21 = vmul.f32 %v2401_v18, %v10445_v23 }
 0x8d7   :  { %v2404_v25 = vadd.f32 %v2402_v19, %v10375_v27  ;;  %v2405_v4 = vadd.f32 %v2403_v21, %v10383_v30 }
 0x8d9   :  { %vm2407_vm11 = vcmp.ge.f32.partialorder %v2404_v25, 0.0  ;;  %vm2408_vm14 = vcmp.ge.f32.partialorder %v2405_v4, 0.0  ;;  %v2410_v3 = vmul.f32 %v2409_v24, %v2404_v25  ;;  %v2411_v26 = vmul.f32 %v2409_v24, %v2405_v4 }
 0x8db   :  { %v10519_v28 = vsel %vm2407_vm11, %v2404_v25, %v2410_v3  ;;  %v10521_v2 = vsel %vm2408_vm14, %v2405_v4, %v2411_v26  ;;  %v9930_v3 = vmov 2  }
 0x8dc   :  { %2440 = vrot.lane.b32.xlu0 %v10521_v2, %s9924_s22  ;;  %2416 = vrot.lane.b32.xlu1 %v10519_v28, %s9911_s14 }
 0x8dd   :  { %9821 = vset.pattern.permute.xlu0 %v9930_v3  ;;  %9822 = vset.pattern.permute.xlu1 %v9930_v3 }
 0x8e0   :  { %2451 = vrot.lane.b32.xlu0 %v10521_v2, %s9890_s20  ;;  %2418 = vrot.lane.b32.xlu1 %v10521_v2, %s9911_s14 }
 0x8e4   :  { %2464 = vrot.lane.b32.xlu0 %v10521_v2, %s9891_s23  ;;  %2427 = vrot.lane.b32.xlu1 %v10519_v28, %s9923_s10 }
 0x8e8   :  { %2475 = vrot.lane.b32.xlu0 %v10521_v2, %s9925_s27  ;;  %2429 = vrot.lane.b32.xlu1 %v10521_v2, %s9923_s10 }
 0x8ec   :  { %2486 = vrot.lane.b32.xlu0 %v10521_v2, %s9926_s12  ;;  %2438 = vrot.lane.b32.xlu1 %v10519_v28, %s9924_s22 }
 0x8f0   :  { %2497 = vrot.lane.b32.xlu0 %v10521_v2, %s9927_s13  ;;  %2449 = vrot.lane.b32.xlu1 %v10519_v28, %s9890_s20 }
 0x8f4   :  { %2462 = vrot.lane.b32.xlu1 %v10519_v28, %s9891_s23 }
 0x8f8   :  { %2473 = vrot.lane.b32.xlu1 %v10519_v28, %s9925_s27 }
 0x8fc   :  { %2484 = vrot.lane.b32.xlu1 %v10519_v28, %s9926_s12 }
 0x900   :  { %2495 = vrot.lane.b32.xlu1 %v10519_v28, %s9927_s13 }
 0x94e   :  { %v2441_v27 = vpop.permute.xlu0 %2440  ;;  %v2417_v30 = vpop.permute.xlu1 %2416 }
 0x94f   :  { %2424 = vst.msk [vmem:[#allocation3 + $0x8] sm:$0xff] %vm1938_vm13, %v2417_v30 }
 0x952   :  { %v2452_v29 = vpop.permute.xlu0 %2451  ;;  %v2419_v31 = vpop.permute.xlu1 %2418 }
 0x953   :  { %v2420_v33 = vsel %vm1933_vm5, %v2417_v30, %v2419_v31 }
 0x956   :  { %v2465_v50 = vpop.permute.xlu0 %2464  ;;  %v2428_v32 = vpop.permute.xlu1 %2427  ;;  %v2508_v40 = vld [vmem:[#allocation3 + $0x8] sm:$0xff] }
 0x957   :  { %2472 = vst.msk [vmem:[#allocation3 + $0xb0] sm:$0xff] %vm224_vm10, %v2465_v50 }
 0x958   :  { %2435 = vst.msk [vmem:[#allocation3 + $0x28] sm:$0xff] %vm1951_vm2, %v2428_v32 }
 0x95a   :  { %v2476_v49 = vpop.permute.xlu0 %2475  ;;  %v2430_v52 = vpop.permute.xlu1 %2429 }
 0x95b   :  { %2483 = vst.msk [vmem:[#allocation3 + $0xd0] sm:$0xff] %vm1996_vm12, %v2476_v49  ;;  %v2431_v35 = vsel %vm1946_vm6, %v2428_v32, %v2430_v52 }
 0x95c   :  { %v9365_v34 = vpack.c.bf16 %v2431_v35, %v2420_v33 }
 0x95e   :  { %v2487_v38 = vpop.permute.xlu0 %2486  ;;  %v2439_v39 = vpop.permute.xlu1 %2438  ;;  %9366 = vmatprep.subr.bf16.mxu1 %v9365_v34  ;;  %v2519_v48 = vld [vmem:[#allocation3 + $0xb0] sm:$0xff] }
 0x95f   :  { %v2510_v41 = vld [vmem:[#allocation3 + $0x28] sm:$0xff]  ;;  %2494 = vst.msk [vmem:[#allocation3 + $0xf0] sm:$0xff] %vm2009_vm7, %v2487_v38  ;;  %v2442_v45 = vsel %vm1959_vm1, %v2439_v39, %v2441_v27  ;;  %v9373_v59 = vpack.c.bf16 %v2519_v48, %v10521_v2 }
 0x960   :  { %2446 = vst.msk [vmem:[#allocation3 + $0x48] sm:$0xff] %vm1964_vm4, %v2439_v39  ;;  %v9367_v42 = vpack.c.bf16 %v2510_v41, %v2508_v40 }
 0x962   :  { %9368 = vmatpush1.bf16.msra.mxu1 %v9367_v42  ;;  %v2498_v43 = vpop.permute.xlu0 %2497  ;;  %v2450_v44 = vpop.permute.xlu1 %2449  ;;  %v2521_v0 = vld [vmem:[#allocation3 + $0xd0] sm:$0xff] }
 0x963   :  { %2505 = vst.msk [vmem:[#allocation3 + $0x110] sm:$0xff] %vm2022_vm3, %v2498_v43  ;;  %v2453_v5 = vsel %vm191_vm8, %v2450_v44, %v2452_v29 }
 0x964   :  { %2457 = vst.msk [vmem:[#allocation3 + $0x68] sm:$0xff] %vm202_vm9, %v2450_v44  ;;  %v9369_v46 = vpack.c.bf16 %v2453_v5, %v2442_v45 }
 0x966   :  { %v2463_v47 = vpop.permute.xlu1 %2462  ;;  %9370 = vmatprep.subr.bf16.mxu1 %v9369_v46  ;;  %v2523_v61 = vld [vmem:[#allocation3 + $0xf0] sm:$0xff] }
 0x967   :  { %v2512_v55 = vld [vmem:[#allocation3 + $0x48] sm:$0xff]  ;;  %v2466_v58 = vsel %vm224_vm10, %v2463_v47, %v2465_v50  ;;  %v9377_v7 = vpack.c.bf16 %v2523_v61, %v2521_v0 }
 0x968   :  { %v9375_v63 = vpack.c.bf16 %v2466_v58, %v10519_v28 }
 0x96a   :  { %v2474_v51 = vpop.permute.xlu1 %2473  ;;  %v2525_v12 = vld [vmem:[#allocation3 + $0x110] sm:$0xff] }
 0x96b   :  { %v2514_v56 = vld [vmem:[#allocation3 + $0x68] sm:$0xff]  ;;  %v2477_v8 = vsel %vm1996_vm12, %v2474_v51, %v2476_v49 }
 0x96c   :  { %v9371_v57 = vpack.c.bf16 %v2514_v56, %v2512_v55 }
 0x96e   :  { %9372 = vmatpush1.bf16.msra.mxu1 %v9371_v57  ;;  %v2485_v62 = vpop.permute.xlu1 %2484 }
 0x96f   :  { %9374 = vmatprep.subr.bf16.mxu1 %v9373_v59  ;;  %v2488_v6 = vsel %vm2009_vm7, %v2485_v62, %v2487_v38 }
 0x970   :  { %v9379_v11 = vpack.c.bf16 %v2488_v6, %v2477_v8 }
 0x972   :  { %9376 = vmatpush1.bf16.msra.mxu1 %v9375_v63  ;;  %v2496_v9 = vpop.permute.xlu1 %2495 }
 0x973   :  { %9378 = vmatprep.subr.bf16.mxu1 %v9377_v7  ;;  %v2499_v15 = vsel %vm2022_vm3, %v2496_v9, %v2498_v43  ;;  %v2640_v43 = vstv %s8660_s5  ;;  %s8666_s5 = sld [smem:[#allocation6 + $0x5]] }
 0x976   :  { %9380 = vmatpush1.bf16.msra.mxu1 %v9379_v11 }
 0x977   :  { %2545 = vmatprep.subr.mxu1 %v2525_v12 }
 0x97a   :  { %2546 = vmatpush1.msra.mxu1 %v2499_v15 }
 0x97b   :  { %8659 = vmatmul.mubr.msk.f32.vlgmr.msra.gmra.mrb[20].mxu1 %vm372_vm15, %v8658_v14 }
 0x97c   :  { %3057 = vmatprep.mubr.f32.mxu1 %v10433_v20 }
 0xa4e   :  { %v2595_v16 = vpop.f32.mrb[20].mxu1 }
 0xa4f   :  { %v2600_v17 = vmul.f32 %v2595_v16, %v10441_v22  ;;  %v2597_v18 = vpop.f32.mrb[21].mxu1 }
 0xa50   :  { %v2601_v19 = vmul.f32 %v2597_v18, %v10445_v23 }
 0xa51   :  { %v2608_v21 = vmul.f32 %v2600_v17, %v2600_v17 }
 0xa52   :  { %v2609_v24 = vmul.f32 %v2601_v19, %v2601_v19  ;;  %v2604_v25 = vadd.f32 %v2601_v19, %v2600_v17 }
 0xa54   :  { %2605 = vadd.xlane.f32.xlu1 %v2604_v25  ;;  %v2610_v4 = vadd.f32 %v2609_v24, %v2608_v21 }
 0xa56   :  { %2611 = vadd.xlane.f32.xlu0 %v2610_v4 }
 0xae1   :  { %v2606_v26 = vpop.xlane.xlu1 %2605 }
 0xae2   :  { %v2607_v27 = vmul.f32 0.0078125, %v2606_v26 }
 0xae3   :  { %v2612_v30 = vpop.xlane.xlu0 %2611 }
 0xae4   :  { %v2614_v29 = vmul.f32 %v2607_v27, %v2607_v27  ;;  %v2613_v31 = vmul.f32 0.0078125, %v2612_v30 }
 0xae6   :  { %v2615_v50 = vsub.f32 %v2613_v31, %v2614_v29 }
 0xae8   :  { %v2616_v32 = vadd.f32 1e-05, %v2615_v50 }
 0xaea   :  { %9847 = vrsqrt.f32 %v2616_v32 }
 0xaf4   :  { %v9848_v49 = vpop.eup %9847 }
 0xaf5   :  { %v2618_v52 = vmul.f32 %v9848_v49, %v10452_v36 }
 0xaf7   :  { %2623 = vperm.xlu0 %9821, %v2618_v52   ;;  %v2619_v33 = vmul.f32 %v2618_v52, %v2607_v27 }
 0xaf9   :  { %v2620_v35 = vsub.f32 %v10458_v37, %v2619_v33 }
 0xafb   :  { %2630 = vperm.xlu1 %9822, %v2620_v35  }
 0xb76   :  { %v2624_v34 = vpop.permute.xlu0 %2623 }
 0xb77   :  { %v2626_v38 = vmul.f32 %v2624_v34, %v2600_v17  ;;  %v2627_v39 = vmul.f32 %v2624_v34, %v2601_v19 }
 0xb7a   :  { %v2631_v40 = vpop.permute.xlu1 %2630 }
 0xb7b   :  { %v2633_v41 = vadd.f32 %v2631_v40, %v2626_v38  ;;  %v2634_v42 = vadd.f32 %v2631_v40, %v2627_v39  ;;  %v8661_v38 = vld [vmem:[%s12266_s1 + $0x20] sm:$0xff] }
 0xb7d   :  { %v2635_v44 = vmul.f32 %v2633_v41, %v10441_v22  ;;  %v2636_v45 = vmul.f32 %v2634_v42, %v10445_v23 }
 0xb7f   :  { %vm2638_vm11 = vcmp.ge.f32.partialorder %v2635_v44, 0.0  ;;  %vm2639_vm14 = vcmp.ge.f32.partialorder %v2636_v45, 0.0  ;;  %v2641_v5 = vmul.f32 %v2640_v43, %v2635_v44  ;;  %v2642_v46 = vmul.f32 %v2640_v43, %v2636_v45 }
 0xb81   :  { %v10584_v47 = vsel %vm2638_vm11, %v2635_v44, %v2641_v5  ;;  %v2644_v48 = vsel %vm2639_vm14, %v2636_v45, %v2642_v46 }
 0xb82   :  { %2682 = vrot.lane.b32.xlu0 %v2644_v48, %s9890_s20  ;;  %2647 = vrot.lane.b32.xlu1 %v10584_v47, %s9911_s14 }
 0xb86   :  { %2695 = vrot.lane.b32.xlu0 %v2644_v48, %s9891_s23  ;;  %2649 = vrot.lane.b32.xlu1 %v2644_v48, %s9911_s14 }
 0xb8a   :  { %2706 = vrot.lane.b32.xlu0 %v2644_v48, %s9925_s27  ;;  %2658 = vrot.lane.b32.xlu1 %v10584_v47, %s9923_s10 }
 0xb8e   :  { %2717 = vrot.lane.b32.xlu0 %v2644_v48, %s9926_s12  ;;  %2660 = vrot.lane.b32.xlu1 %v2644_v48, %s9923_s10 }
 0xb92   :  { %2728 = vrot.lane.b32.xlu0 %v2644_v48, %s9927_s13  ;;  %2669 = vrot.lane.b32.xlu1 %v10584_v47, %s9924_s22 }
 0xb96   :  { %2671 = vrot.lane.b32.xlu1 %v2644_v48, %s9924_s22 }
 0xb9a   :  { %2680 = vrot.lane.b32.xlu1 %v10584_v47, %s9890_s20 }
 0xb9e   :  { %2693 = vrot.lane.b32.xlu1 %v10584_v47, %s9891_s23 }
 0xba2   :  { %2704 = vrot.lane.b32.xlu1 %v10584_v47, %s9925_s27 }
 0xba6   :  { %2715 = vrot.lane.b32.xlu1 %v10584_v47, %s9926_s12 }
 0xbaa   :  { %2726 = vrot.lane.b32.xlu1 %v10584_v47, %s9927_s13 }
 0xbf4   :  { %v2683_v51 = vpop.permute.xlu0 %2682  ;;  %v2648_v55 = vpop.permute.xlu1 %2647 }
 0xbf5   :  { %2655 = vst.msk [vmem:[#allocation3 + $0x8] sm:$0xff] %vm1938_vm13, %v2648_v55 }
 0xbf8   :  { %v2696_v56 = vpop.permute.xlu0 %2695  ;;  %v2650_v57 = vpop.permute.xlu1 %2649 }
 0xbf9   :  { %2703 = vst.msk [vmem:[#allocation3 + $0xb0] sm:$0xff] %vm224_vm10, %v2696_v56  ;;  %v2651_v63 = vsel %vm1933_vm5, %v2648_v55, %v2650_v57 }
 0xbfc   :  { %v2707_v58 = vpop.permute.xlu0 %2706  ;;  %v2659_v59 = vpop.permute.xlu1 %2658  ;;  %v2739_v9 = vld [vmem:[#allocation3 + $0x8] sm:$0xff] }
 0xbfd   :  { %2714 = vst.msk [vmem:[#allocation3 + $0xd0] sm:$0xff] %vm1996_vm12, %v2707_v58 }
 0xbfe   :  { %2666 = vst.msk [vmem:[#allocation3 + $0x28] sm:$0xff] %vm1951_vm2, %v2659_v59 }
 0xc00   :  { %v2718_v61 = vpop.permute.xlu0 %2717  ;;  %v2661_v62 = vpop.permute.xlu1 %2660  ;;  %v2750_v21 = vld [vmem:[#allocation3 + $0xb0] sm:$0xff] }
 0xc01   :  { %2725 = vst.msk [vmem:[#allocation3 + $0xf0] sm:$0xff] %vm2009_vm7, %v2718_v61  ;;  %v2662_v0 = vsel %vm1946_vm6, %v2659_v59, %v2661_v62  ;;  %v9389_v27 = vpack.c.bf16 %v2750_v21, %v2644_v48 }
 0xc02   :  { %v9381_v6 = vpack.c.bf16 %v2662_v0, %v2651_v63 }
 0xc04   :  { %v2729_v7 = vpop.permute.xlu0 %2728  ;;  %v2670_v8 = vpop.permute.xlu1 %2669  ;;  %9382 = vmatprep.subr.bf16.mxu0 %v9381_v6  ;;  %v2752_v50 = vld [vmem:[#allocation3 + $0xd0] sm:$0xff] }
 0xc05   :  { %v2741_v11 = vld [vmem:[#allocation3 + $0x28] sm:$0xff]  ;;  %2736 = vst.msk [vmem:[#allocation3 + $0x110] sm:$0xff] %vm2022_vm3, %v2729_v7 }
 0xc06   :  { %2677 = vst.msk [vmem:[#allocation3 + $0x48] sm:$0xff] %vm1964_vm4, %v2670_v8  ;;  %v9383_v12 = vpack.c.bf16 %v2741_v11, %v2739_v9 }
 0xc08   :  { %9384 = vmatpush1.bf16.msra.mxu0 %v9383_v12  ;;  %v2672_v14 = vpop.permute.xlu1 %2671  ;;  %v2754_v30 = vld [vmem:[#allocation3 + $0xf0] sm:$0xff] }
 0xc09   :  { %v2673_v16 = vsel %vm1959_vm1, %v2670_v8, %v2672_v14  ;;  %v9393_v49 = vpack.c.bf16 %v2754_v30, %v2752_v50 }
 0xc0c   :  { %v2681_v15 = vpop.permute.xlu1 %2680  ;;  %v2756_v34 = vld [vmem:[#allocation3 + $0x110] sm:$0xff] }
 0xc0d   :  { %v2684_v17 = vsel %vm191_vm8, %v2681_v15, %v2683_v51  ;;  %2688 = vst.msk [vmem:[#allocation3 + $0x68] sm:$0xff] %vm202_vm9, %v2681_v15  ;;  %v2743_v25 = vld [vmem:[#allocation3 + $0x48] sm:$0xff]  ;;  %v2873_v15 = vstv %s8663_s25  ;;  %s9936_s25 = smov 107  }
 0xc0e   :  { %v9385_v18 = vpack.c.bf16 %v2684_v17, %v2673_v16 }
 0xc10   :  { %v2694_v19 = vpop.permute.xlu1 %2693  ;;  %9386 = vmatprep.subr.bf16.mxu0 %v9385_v18 }
 0xc11   :  { %v2697_v26 = vsel %vm224_vm10, %v2694_v19, %v2696_v56 }
 0xc12   :  { %v9391_v31 = vpack.c.bf16 %v2697_v26, %v10584_v47  ;;  %v9931_v47 = vmov 3  }
 0xc13   :  { %9823 = vset.pattern.permute.xlu0 %v9931_v47  ;;  %9824 = vset.pattern.permute.xlu1 %v9931_v47 }
 0xc14   :  { %v2705_v24 = vpop.permute.xlu1 %2704  ;;  %v2745_v4 = vld [vmem:[#allocation3 + $0x68] sm:$0xff] }
 0xc15   :  { %v9387_v3 = vpack.c.bf16 %v2745_v4, %v2743_v25  ;;  %v2708_v52 = vsel %vm1996_vm12, %v2705_v24, %v2707_v58 }
 0xc17   :  { %9388 = vmatpush1.bf16.msra.mxu0 %v9387_v3 }
 0xc18   :  { %v2716_v29 = vpop.permute.xlu1 %2715  ;;  %9390 = vmatprep.subr.bf16.mxu0 %v9389_v27 }
 0xc19   :  { %v2719_v32 = vsel %vm2009_vm7, %v2716_v29, %v2718_v61 }
 0xc1a   :  { %v9395_v35 = vpack.c.bf16 %v2719_v32, %v2708_v52 }
 0xc1b   :  { %9392 = vmatpush1.bf16.msra.mxu0 %v9391_v31 }
 0xc1c   :  { %v2727_v33 = vpop.permute.xlu1 %2726  ;;  %9394 = vmatprep.subr.bf16.mxu0 %v9393_v49 }
 0xc1d   :  { %v2730_v39 = vsel %vm2022_vm3, %v2727_v33, %v2729_v7 }
 0xc1f   :  { %9396 = vmatpush1.bf16.msra.mxu0 %v9395_v35 }
 0xc20   :  { %2776 = vmatprep.subr.mxu0 %v2756_v34 }
 0xc23   :  { %2777 = vmatpush1.msra.mxu0 %v2730_v39 }
 0xc24   :  { %8662 = vmatmul.mubr.msk.f32.vlgmr.msra.gmra.mrb[22].mxu0 %vm372_vm15, %v8661_v38 }
 0xc25   :  { %3288 = vmatprep.mubr.f32.mxu0 %v10433_v20 }
 0xcf7   :  { %v2826_v40 = vpop.f32.mrb[22].mxu0 }
 0xcf8   :  { %v2831_v41 = vmul.f32 %v2826_v40, %v10441_v22  ;;  %v2828_v42 = vpop.f32.mrb[23].mxu0 }
 0xcf9   :  { %v2832_v43 = vmul.f32 %v2828_v42, %v10445_v23 }
 0xcfa   :  { %v2839_v44 = vmul.f32 %v2831_v41, %v2831_v41 }
 0xcfb   :  { %v2840_v45 = vmul.f32 %v2832_v43, %v2832_v43  ;;  %v2835_v5 = vadd.f32 %v2832_v43, %v2831_v41 }
 0xcfd   :  { %2836 = vadd.xlane.f32.xlu1 %v2835_v5  ;;  %v2841_v46 = vadd.f32 %v2840_v45, %v2839_v44 }
 0xcff   :  { %2842 = vadd.xlane.f32.xlu0 %v2841_v46 }
 0xd8a   :  { %v2837_v48 = vpop.xlane.xlu1 %2836 }
 0xd8b   :  { %v2838_v51 = vmul.f32 0.0078125, %v2837_v48 }
 0xd8c   :  { %v2843_v55 = vpop.xlane.xlu0 %2842 }
 0xd8d   :  { %v2845_v56 = vmul.f32 %v2838_v51, %v2838_v51  ;;  %v2844_v20 = vmul.f32 0.0078125, %v2843_v55 }
 0xd8f   :  { %v2846_v57 = vsub.f32 %v2844_v20, %v2845_v56 }
 0xd91   :  { %v2847_v58 = vadd.f32 1e-05, %v2846_v57 }
 0xd93   :  { %9849 = vrsqrt.f32 %v2847_v58 }
 0xd9d   :  { %v9850_v59 = vpop.eup %9849 }
 0xd9e   :  { %v2849_v61 = vmul.f32 %v9850_v59, %v10452_v36 }
 0xda0   :  { %2854 = vperm.xlu0 %9823, %v2849_v61   ;;  %v2850_v62 = vmul.f32 %v2849_v61, %v2838_v51 }
 0xda2   :  { %v2851_v63 = vsub.f32 %v10458_v37, %v2850_v62  ;;  %v8664_v62 = vld [vmem:[%s12266_s1 + $0x28] sm:$0xff] }
 0xda4   :  { %2861 = vperm.xlu1 %9824, %v2851_v63  }
 0xe1f   :  { %v2855_v0 = vpop.permute.xlu0 %2854 }
 0xe20   :  { %v2857_v6 = vmul.f32 %v2855_v0, %v2831_v41  ;;  %v2858_v7 = vmul.f32 %v2855_v0, %v2832_v43  ;;  %v10698_v0 = vld [vmem:[#allocation4] sm:$0xff] }
 0xe23   :  { %v2862_v8 = vpop.permute.xlu1 %2861 }
 0xe24   :  { %v2864_v9 = vadd.f32 %v2862_v8, %v2857_v6  ;;  %v2865_v11 = vadd.f32 %v2862_v8, %v2858_v7 }
 0xe26   :  { %v2866_v12 = vmul.f32 %v2864_v9, %v10441_v22  ;;  %v2867_v14 = vmul.f32 %v2865_v11, %v10445_v23 }
 0xe28   :  { %v2868_v16 = vadd.f32 %v2866_v12, %v10519_v28  ;;  %v2869_v36 = vadd.f32 %v2867_v14, %v10521_v2 }
 0xe2a   :  { %vm2871_vm11 = vcmp.ge.f32.partialorder %v2868_v16, 0.0  ;;  %v2874_v17 = vmul.f32 %v2873_v15, %v2868_v16  ;;  %v2875_v37 = vmul.f32 %v2873_v15, %v2869_v36  ;;  %vm2872_vm14 = vcmp.ge.f32.partialorder %v2869_v36, 0.0 }
 0xe2c   :  { %v10640_v18 = vsel %vm2871_vm11, %v2868_v16, %v2874_v17  ;;  %v10646_v19 = vsel %vm2872_vm14, %v2869_v36, %v2875_v37  ;;  %v9932_v16 = vmov 4  }
 0xe2d   :  { %2913 = vrot.lane.b32.xlu0 %v10640_v18, %s9890_s20  ;;  %2880 = vrot.lane.b32.xlu1 %v10640_v18, %s9911_s14 }
 0xe2e   :  { %9825 = vset.pattern.permute.xlu0 %v9932_v16  ;;  %9826 = vset.pattern.permute.xlu1 %v9932_v16 }
 0xe31   :  { %2926 = vrot.lane.b32.xlu0 %v10640_v18, %s9891_s23  ;;  %2882 = vrot.lane.b32.xlu1 %v10646_v19, %s9911_s14 }
 0xe35   :  { %2937 = vrot.lane.b32.xlu0 %v10640_v18, %s9925_s27  ;;  %2891 = vrot.lane.b32.xlu1 %v10640_v18, %s9923_s10 }
 0xe39   :  { %2948 = vrot.lane.b32.xlu0 %v10640_v18, %s9926_s12  ;;  %2893 = vrot.lane.b32.xlu1 %v10646_v19, %s9923_s10 }
 0xe3d   :  { %2959 = vrot.lane.b32.xlu0 %v10640_v18, %s9927_s13  ;;  %2902 = vrot.lane.b32.xlu1 %v10640_v18, %s9924_s22 }
 0xe41   :  { %2904 = vrot.lane.b32.xlu1 %v10646_v19, %s9924_s22 }
 0xe45   :  { %2915 = vrot.lane.b32.xlu1 %v10646_v19, %s9890_s20 }
 0xe49   :  { %2928 = vrot.lane.b32.xlu1 %v10646_v19, %s9891_s23 }
 0xe4d   :  { %2939 = vrot.lane.b32.xlu1 %v10646_v19, %s9925_s27 }
 0xe51   :  { %2950 = vrot.lane.b32.xlu1 %v10646_v19, %s9926_s12 }
 0xe55   :  { %2961 = vrot.lane.b32.xlu1 %v10646_v19, %s9927_s13 }
 0xe9f   :  { %v2914_v28 = vpop.permute.xlu0 %2913  ;;  %v2881_v2 = vpop.permute.xlu1 %2880 }
 0xea0   :  { %2921 = vst.msk [vmem:[#allocation3 + $0x68] sm:$0xff] %vm202_vm9, %v2914_v28 }
 0xea1   :  { %2888 = vst.msk [vmem:[#allocation3 + $0x8] sm:$0xff] %vm1938_vm13, %v2881_v2 }
 0xea3   :  { %v2927_v21 = vpop.permute.xlu0 %2926  ;;  %v2883_v24 = vpop.permute.xlu1 %2882 }
 0xea4   :  { %v2884_v27 = vsel %vm1933_vm5, %v2881_v2, %v2883_v24 }
 0xea7   :  { %v2938_v25 = vpop.permute.xlu0 %2937  ;;  %v2892_v4 = vpop.permute.xlu1 %2891  ;;  %v2978_v41 = vld [vmem:[#allocation3 + $0x68] sm:$0xff] }
 0xea8   :  { %2899 = vst.msk [vmem:[#allocation3 + $0x28] sm:$0xff] %vm1951_vm2, %v2892_v4  ;;  %v2972_v32 = vld [vmem:[#allocation3 + $0x8] sm:$0xff] }
 0xeab   :  { %v2949_v3 = vpop.permute.xlu0 %2948  ;;  %v2894_v26 = vpop.permute.xlu1 %2893 }
 0xeac   :  { %v2895_v30 = vsel %vm1946_vm6, %v2892_v4, %v2894_v26  ;;  %v10714_v26 = vld [vmem:[%s12268_s3] sm:$0xff] }
 0xead   :  { %v9397_v29 = vpack.c.bf16 %v2895_v30, %v2884_v27 }
 0xeaf   :  { %v2960_v31 = vpop.permute.xlu0 %2959  ;;  %v2903_v50 = vpop.permute.xlu1 %2902  ;;  %9398 = vmatprep.subr.bf16.mxu1 %v9397_v29  ;;  %v2974_v49 = vld [vmem:[#allocation3 + $0x28] sm:$0xff] }
 0xeb0   :  { %2910 = vst.msk [vmem:[#allocation3 + $0x48] sm:$0xff] %vm1964_vm4, %v2903_v50  ;;  %v9399_v52 = vpack.c.bf16 %v2974_v49, %v2972_v32 }
 0xeb2   :  { %9400 = vmatpush1.bf16.msra.mxu1 %v9399_v52 }
 0xeb3   :  { %v2905_v33 = vpop.permute.xlu1 %2904 }
 0xeb4   :  { %v2906_v38 = vsel %vm1959_vm1, %v2903_v50, %v2905_v33  ;;  %v3104_v33 = vstv %s8666_s5  ;;  %s9938_s5 = smov 87  }
 0xeb7   :  { %v2916_v35 = vpop.permute.xlu1 %2915  ;;  %v2976_v34 = vld [vmem:[#allocation3 + $0x48] sm:$0xff] }
 0xeb8   :  { %v2917_v39 = vsel %vm191_vm8, %v2914_v28, %v2916_v35  ;;  %v9403_v42 = vpack.c.bf16 %v2978_v41, %v2976_v34 }
 0xeb9   :  { %v9401_v40 = vpack.c.bf16 %v2917_v39, %v2906_v38 }
 0xebb   :  { %v2929_v43 = vpop.permute.xlu1 %2928  ;;  %9402 = vmatprep.subr.bf16.mxu1 %v9401_v40 }
 0xebc   :  { %2936 = vst.msk [vmem:[#allocation3 + $0xb0] sm:$0xff] %vm224_vm10, %v2929_v43  ;;  %9404 = vmatpush1.bf16.msra.mxu1 %v9403_v42  ;;  %v2930_v45 = vsel %vm224_vm10, %v2927_v21, %v2929_v43 }
 0xebd   :  { %v9407_v48 = vpack.c.bf16 %v2930_v45, %v10640_v18 }
 0xebf   :  { %v2940_v44 = vpop.permute.xlu1 %2939 }
 0xec0   :  { %2947 = vst.msk [vmem:[#allocation3 + $0xd0] sm:$0xff] %vm1996_vm12, %v2940_v44  ;;  %v2941_v57 = vsel %vm1996_vm12, %v2938_v25, %v2940_v44  ;;  %v10708_v25 = vld [vmem:[%s12267_s2] sm:$0xff] }
 0xec3   :  { %v2951_v5 = vpop.permute.xlu1 %2950  ;;  %v2983_v46 = vld [vmem:[#allocation3 + $0xb0] sm:$0xff] }
 0xec4   :  { %2958 = vst.msk [vmem:[#allocation3 + $0xf0] sm:$0xff] %vm2009_vm7, %v2951_v5  ;;  %v9405_v47 = vpack.c.bf16 %v2983_v46, %v10646_v19  ;;  %v2952_v55 = vsel %vm2009_vm7, %v2949_v3, %v2951_v5 }
 0xec5   :  { %v9411_v59 = vpack.c.bf16 %v2952_v55, %v2941_v57 }
 0xec6   :  { %9406 = vmatprep.subr.bf16.mxu1 %v9405_v47 }
 0xec7   :  { %v2962_v51 = vpop.permute.xlu1 %2961  ;;  %9408 = vmatpush1.bf16.msra.mxu1 %v9407_v48  ;;  %v2985_v56 = vld [vmem:[#allocation3 + $0xd0] sm:$0xff] }
 0xec8   :  { %2969 = vst.msk [vmem:[#allocation3 + $0x110] sm:$0xff] %vm2022_vm3, %v2962_v51  ;;  %v2963_v63 = vsel %vm2022_vm3, %v2960_v31, %v2962_v51 }
 0xecb   :  { %v2987_v20 = vld [vmem:[#allocation3 + $0xf0] sm:$0xff] }
 0xecc   :  { %v9409_v58 = vpack.c.bf16 %v2987_v20, %v2985_v56 }
 0xece   :  { %9410 = vmatprep.subr.bf16.mxu1 %v9409_v58 }
 0xecf   :  { %9412 = vmatpush1.bf16.msra.mxu1 %v9411_v59  ;;  %v2989_v61 = vld [vmem:[#allocation3 + $0x110] sm:$0xff] }
 0xed0   :  { %3009 = vmatprep.subr.mxu1 %v2989_v61 }
 0xed3   :  { %3010 = vmatpush1.msra.mxu1 %v2963_v63 }
 0xed4   :  { %8665 = vmatmul.mubr.msk.f32.vlgmr.msra.gmra.mrb[22].mxu1 %vm372_vm15, %v8664_v62  ;;  %9014 = vmatprep.subr.mxu1 %v10698_v0 }
 0xed5   :  { %9016 = vmatprep.mubr.msk.f32.mxu1 %vm9896_vm0, %v10698_v0 }
 0xfa7   :  { %v3059_v6 = vpop.f32.mrb[22].mxu1 }
 0xfa8   :  { %v3064_v7 = vmul.f32 %v3059_v6, %v10441_v22  ;;  %v3061_v8 = vpop.f32.mrb[23].mxu1 }
 0xfa9   :  { %v3065_v9 = vmul.f32 %v3061_v8, %v10445_v23 }
 0xfaa   :  { %v3072_v11 = vmul.f32 %v3064_v7, %v3064_v7 }
 0xfab   :  { %v3073_v12 = vmul.f32 %v3065_v9, %v3065_v9  ;;  %v3068_v14 = vadd.f32 %v3065_v9, %v3064_v7 }
 0xfad   :  { %3069 = vadd.xlane.f32.xlu0 %v3068_v14  ;;  %v3074_v15 = vadd.f32 %v3073_v12, %v3072_v11 }
 0xfaf   :  { %3075 = vadd.xlane.f32.xlu1 %v3074_v15 }
0x103a   :  { %v3070_v36 = vpop.xlane.xlu0 %3069 }
0x103b   :  { %v3071_v17 = vmul.f32 0.0078125, %v3070_v36 }
0x103c   :  { %v3076_v37 = vpop.xlane.xlu1 %3075 }
0x103d   :  { %v3078_v28 = vmul.f32 %v3071_v17, %v3071_v17  ;;  %v3077_v2 = vmul.f32 0.0078125, %v3076_v37 }
0x103f   :  { %v3079_v21 = vsub.f32 %v3077_v2, %v3078_v28 }
0x1041   :  { %v3080_v24 = vadd.f32 1e-05, %v3079_v21 }
0x1043   :  { %9851 = vrsqrt.f32 %v3080_v24 }
0x104d   :  { %v9852_v4 = vpop.eup %9851 }
0x104e   :  { %v3082_v3 = vmul.f32 %v9852_v4, %v10708_v25 }
0x1050   :  { %3087 = vperm.xlu0 %9825, %v3082_v3   ;;  %v3083_v27 = vmul.f32 %v3082_v3, %v3071_v17 }
0x1052   :  { %v3084_v30 = vsub.f32 %v10714_v26, %v3083_v27 }
0x1054   :  { %3094 = vperm.xlu1 %9826, %v3084_v30  }
0x10cf   :  { %v3088_v29 = vpop.permute.xlu0 %3087 }
0x10d0   :  { %v3090_v31 = vmul.f32 %v3088_v29, %v3064_v7  ;;  %v3091_v50 = vmul.f32 %v3088_v29, %v3065_v9 }
0x10d3   :  { %v3095_v32 = vpop.permute.xlu1 %3094 }
0x10d4   :  { %v3097_v49 = vadd.f32 %v3095_v32, %v3090_v31  ;;  %v3098_v52 = vadd.f32 %v3095_v32, %v3091_v50  ;;  %v8667_v50 = vld [vmem:[%s12266_s1 + $0x30] sm:$0xff] }
0x10d6   :  { %v3099_v35 = vmul.f32 %v3097_v49, %v10441_v22  ;;  %v3100_v34 = vmul.f32 %v3098_v52, %v10445_v23 }
0x10d8   :  { %vm3102_vm11 = vcmp.ge.f32.partialorder %v3099_v35, 0.0  ;;  %vm3103_vm14 = vcmp.ge.f32.partialorder %v3100_v34, 0.0  ;;  %v3105_v38 = vmul.f32 %v3104_v33, %v3099_v35  ;;  %v3106_v39 = vmul.f32 %v3104_v33, %v3100_v34 }
0x10da   :  { %v10719_v40 = vsel %vm3102_vm11, %v3099_v35, %v3105_v38  ;;  %v3108_v41 = vsel %vm3103_vm14, %v3100_v34, %v3106_v39  ;;  %vm3684_vm11 = vcmask 121856   ;;  %vm3518_vm14 = vcmask 728648  }
0x10db   :  { %3144 = vrot.lane.b32.xlu0 %v10719_v40, %s9890_s20  ;;  %3111 = vrot.lane.b32.xlu1 %v10719_v40, %s9911_s14 }
0x10df   :  { %3157 = vrot.lane.b32.xlu0 %v10719_v40, %s9891_s23  ;;  %3113 = vrot.lane.b32.xlu1 %v3108_v41, %s9911_s14 }
0x10e3   :  { %3168 = vrot.lane.b32.xlu0 %v10719_v40, %s9925_s27  ;;  %3122 = vrot.lane.b32.xlu1 %v10719_v40, %s9923_s10 }
0x10e7   :  { %3179 = vrot.lane.b32.xlu0 %v10719_v40, %s9926_s12  ;;  %3124 = vrot.lane.b32.xlu1 %v3108_v41, %s9923_s10  ;;  %s9940_s10 = smov 95  }
0x10eb   :  { %3190 = vrot.lane.b32.xlu0 %v10719_v40, %s9927_s13  ;;  %3133 = vrot.lane.b32.xlu1 %v10719_v40, %s9924_s22 }
0x10ef   :  { %3135 = vrot.lane.b32.xlu1 %v3108_v41, %s9924_s22  ;;  %s9941_s22 = smov 27  }
0x10f3   :  { %3146 = vrot.lane.b32.xlu1 %v3108_v41, %s9890_s20 }
0x10f7   :  { %3159 = vrot.lane.b32.xlu1 %v3108_v41, %s9891_s23 }
0x10fb   :  { %3170 = vrot.lane.b32.xlu1 %v3108_v41, %s9925_s27  ;;  %s9942_s27 = smov 125  }
0x10ff   :  { %3181 = vrot.lane.b32.xlu1 %v3108_v41, %s9926_s12  ;;  %s9943_s12 = smov 105  }
0x1103   :  { %3192 = vrot.lane.b32.xlu1 %v3108_v41, %s9927_s13 }
0x114d   :  { %v3145_v42 = vpop.permute.xlu0 %3144  ;;  %v3112_v43 = vpop.permute.xlu1 %3111 }
0x114e   :  { %3152 = vst.msk [vmem:[#allocation3 + $0x68] sm:$0xff] %vm202_vm9, %v3145_v42 }
0x114f   :  { %3119 = vst.msk [vmem:[#allocation3 + $0x8] sm:$0xff] %vm1938_vm13, %v3112_v43 }
0x1151   :  { %v3158_v44 = vpop.permute.xlu0 %3157  ;;  %v3114_v45 = vpop.permute.xlu1 %3113 }
0x1152   :  { %v3115_v5 = vsel %vm1933_vm5, %v3112_v43, %v3114_v45 }
0x1155   :  { %v3169_v46 = vpop.permute.xlu0 %3168  ;;  %v3123_v47 = vpop.permute.xlu1 %3122  ;;  %v3209_v11 = vld [vmem:[#allocation3 + $0x68] sm:$0xff] }
0x1156   :  { %3130 = vst.msk [vmem:[#allocation3 + $0x28] sm:$0xff] %vm1951_vm2, %v3123_v47  ;;  %v3203_v58 = vld [vmem:[#allocation3 + $0x8] sm:$0xff]  ;;  %vm3351_vm2 = vcmask 64512  }
0x1159   :  { %v3180_v48 = vpop.permute.xlu0 %3179  ;;  %v3125_v51 = vpop.permute.xlu1 %3124 }
0x115a   :  { %v3126_v55 = vsel %vm1946_vm6, %v3123_v47, %v3125_v51  ;;  %vm3428_vm6 = vcmask 285848  }
0x115b   :  { %v9413_v56 = vpack.c.bf16 %v3126_v55, %v3115_v5 }
0x115d   :  { %v3191_v20 = vpop.permute.xlu0 %3190  ;;  %v3134_v57 = vpop.permute.xlu1 %3133  ;;  %9414 = vmatprep.subr.bf16.mxu0 %v9413_v56  ;;  %v3205_v59 = vld [vmem:[#allocation3 + $0x28] sm:$0xff] }
0x115e   :  { %3141 = vst.msk [vmem:[#allocation3 + $0x48] sm:$0xff] %vm1964_vm4, %v3134_v57  ;;  %v9415_v61 = vpack.c.bf16 %v3205_v59, %v3203_v58  ;;  %v10776_v56 = vld [vmem:[%s12272_s7] sm:$0xff]  ;;  %s9934_s7 = smov 67   ;;  %vm12292_vm4 = vcmask 56320  }
0x115f   :  { %9015 = vmatpush3.msra.mxu1 %v10776_v56 }
0x1160   :  { %9416 = vmatpush1.bf16.msra.mxu0 %v9415_v61  ;;  %9024 = vmatprep.subr.mxu1 %v10698_v0  ;;  %v3337_v61 = vstv %s8669_s16  ;;  %s9944_s16 = smov 85  }
0x1161   :  { %v3136_v62 = vpop.permute.xlu1 %3135 }
0x1162   :  { %v3137_v63 = vsel %vm1959_vm1, %v3134_v57, %v3136_v62 }
0x1165   :  { %v3147_v6 = vpop.permute.xlu1 %3146  ;;  %v3207_v7 = vld [vmem:[#allocation3 + $0x48] sm:$0xff] }
0x1166   :  { %v3148_v8 = vsel %vm191_vm8, %v3145_v42, %v3147_v6  ;;  %v9419_v12 = vpack.c.bf16 %v3209_v11, %v3207_v7 }
0x1167   :  { %v9417_v9 = vpack.c.bf16 %v3148_v8, %v3137_v63 }
0x1169   :  { %v3160_v14 = vpop.permute.xlu1 %3159  ;;  %9418 = vmatprep.subr.bf16.mxu0 %v9417_v9 }
0x116a   :  { %v3161_v15 = vsel %vm224_vm10, %v3158_v44, %v3160_v14  ;;  %3167 = vst.msk [vmem:[#allocation3 + $0xb0] sm:$0xff] %vm224_vm10, %v3160_v14  ;;  %9420 = vmatpush1.bf16.msra.mxu0 %v9419_v12 }
0x116b   :  { %v9423_v21 = vpack.c.bf16 %v3161_v15, %v10719_v40  ;;  %v9933_v40 = vmov 5  }
0x116c   :  { %9827 = vset.pattern.permute.xlu0 %v9933_v40  ;;  %9828 = vset.pattern.permute.xlu1 %v9933_v40 }
0x116d   :  { %v3171_v16 = vpop.permute.xlu1 %3170 }
0x116e   :  { %v3172_v36 = vsel %vm1996_vm12, %v3169_v46, %v3171_v16  ;;  %3178 = vst.msk [vmem:[#allocation3 + $0xd0] sm:$0xff] %vm1996_vm12, %v3171_v16  ;;  %vm3433_vm12 = vcmask 433448  }
0x1171   :  { %v3182_v17 = vpop.permute.xlu1 %3181  ;;  %v3214_v37 = vld [vmem:[#allocation3 + $0xb0] sm:$0xff] }
0x1172   :  { %v3183_v28 = vsel %vm2009_vm7, %v3180_v48, %v3182_v17  ;;  %3189 = vst.msk [vmem:[#allocation3 + $0xf0] sm:$0xff] %vm2009_vm7, %v3182_v17  ;;  %v9421_v2 = vpack.c.bf16 %v3214_v37, %v3108_v41  ;;  %vm3513_vm7 = vcmask 581048  }
0x1173   :  { %v9427_v29 = vpack.c.bf16 %v3183_v28, %v3172_v36 }
0x1174   :  { %9422 = vmatprep.subr.bf16.mxu0 %v9421_v2 }
0x1175   :  { %v3193_v24 = vpop.permute.xlu1 %3192  ;;  %9424 = vmatpush1.bf16.msra.mxu0 %v9423_v21  ;;  %v3216_v3 = vld [vmem:[#allocation3 + $0xd0] sm:$0xff] }
0x1176   :  { %v3194_v4 = vsel %vm2022_vm3, %v3191_v20, %v3193_v24  ;;  %3200 = vst.msk [vmem:[#allocation3 + $0x110] sm:$0xff] %vm2022_vm3, %v3193_v24 }
0x1179   :  { %v3218_v27 = vld [vmem:[#allocation3 + $0xf0] sm:$0xff] }
0x117a   :  { %v9425_v30 = vpack.c.bf16 %v3218_v27, %v3216_v3 }
0x117c   :  { %9426 = vmatprep.subr.bf16.mxu0 %v9425_v30 }
0x117d   :  { %9428 = vmatpush1.bf16.msra.mxu0 %v9427_v29  ;;  %v3220_v31 = vld [vmem:[#allocation3 + $0x110] sm:$0xff] }
0x117e   :  { %3240 = vmatprep.subr.mxu0 %v3220_v31 }
0x1181   :  { %3241 = vmatpush1.msra.mxu0 %v3194_v4 }
0x1182   :  { %8668 = vmatmul.mubr.msk.f32.vlgmr.msra.gmra.mrb[24].mxu0 %vm372_vm15, %v8667_v50  ;;  %9019 = vmatprep.subr.mxu0 %v10698_v0 }
0x1183   :  { %9021 = vmatprep.mubr.msk.f32.mxu0 %vm9896_vm0, %v10698_v0  ;;  %9020 = vmatpush3.msra.mxu0 %v10776_v56 }
0x1184   :  { %9029 = vmatprep.subr.mxu0 %v10698_v0 }
0x1255   :  { %v3290_v32 = vpop.f32.mrb[24].mxu0 }
0x1256   :  { %v3295_v49 = vmul.f32 %v3290_v32, %v10441_v22  ;;  %v3292_v52 = vpop.f32.mrb[25].mxu0 }
0x1257   :  { %v3296_v33 = vmul.f32 %v3292_v52, %v10445_v23 }
0x1258   :  { %v3303_v35 = vmul.f32 %v3295_v49, %v3295_v49 }
0x1259   :  { %v3304_v34 = vmul.f32 %v3296_v33, %v3296_v33  ;;  %v3299_v38 = vadd.f32 %v3296_v33, %v3295_v49 }
0x125b   :  { %3300 = vadd.xlane.f32.xlu0 %v3299_v38  ;;  %v3305_v39 = vadd.f32 %v3304_v34, %v3303_v35 }
0x125d   :  { %3306 = vadd.xlane.f32.xlu1 %v3305_v39 }
0x12e8   :  { %v3301_v41 = vpop.xlane.xlu0 %3300 }
0x12e9   :  { %v3302_v42 = vmul.f32 0.0078125, %v3301_v41 }
0x12ea   :  { %v3307_v43 = vpop.xlane.xlu1 %3306 }
0x12eb   :  { %v3309_v44 = vmul.f32 %v3302_v42, %v3302_v42  ;;  %v3308_v45 = vmul.f32 0.0078125, %v3307_v43 }
0x12ed   :  { %v3310_v5 = vsub.f32 %v3308_v45, %v3309_v44 }
0x12ef   :  { %v3311_v46 = vadd.f32 1e-05, %v3310_v5 }
0x12f1   :  { %9853 = vrsqrt.f32 %v3311_v46 }
0x12fb   :  { %v9854_v47 = vpop.eup %9853 }
0x12fc   :  { %v3313_v48 = vmul.f32 %v9854_v47, %v10708_v25 }
0x12fe   :  { %3318 = vperm.xlu0 %9827, %v3313_v48   ;;  %v3314_v51 = vmul.f32 %v3313_v48, %v3302_v42 }
0x1300   :  { %v3315_v55 = vsub.f32 %v10714_v26, %v3314_v51 }
0x1302   :  { %3325 = vperm.xlu1 %9828, %v3315_v55  }
0x137d   :  { %v3319_v20 = vpop.permute.xlu0 %3318 }
0x137e   :  { %v3321_v25 = vmul.f32 %v3319_v20, %v3295_v49  ;;  %v3322_v26 = vmul.f32 %v3319_v20, %v3296_v33 }
0x1381   :  { %v3326_v57 = vpop.permute.xlu1 %3325 }
0x1382   :  { %v3328_v58 = vadd.f32 %v3326_v57, %v3321_v25  ;;  %v3329_v62 = vadd.f32 %v3326_v57, %v3322_v26 }
0x1384   :  { %v3330_v59 = vmul.f32 %v3328_v58, %v10441_v22  ;;  %v3331_v7 = vmul.f32 %v3329_v62, %v10445_v23 }
0x1386   :  { %v3332_v63 = vadd.f32 %v3330_v59, %v10640_v18  ;;  %v3333_v9 = vadd.f32 %v3331_v7, %v10646_v19 }
0x1388   :  { %vm3335_vm3 = vcmp.ge.f32.partialorder %v3332_v63, 0.0  ;;  %v3338_v6 = vmul.f32 %v3337_v61, %v3332_v63  ;;  %v3339_v22 = vmul.f32 %v3337_v61, %v3333_v9  ;;  %vm3336_vm13 = vcmp.ge.f32.partialorder %v3333_v9, 0.0 }
0x138a   :  { %v3340_v8 = vsel %vm3335_vm3, %v3332_v63, %v3338_v6  ;;  %v3341_v23 = vsel %vm3336_vm13, %v3333_v9, %v3339_v22  ;;  %vm3689_vm3 = vcmask 269448   ;;  %vm3598_vm13 = vcmask 876248  }
0x138b   :  { %3776 = vrot.lane.b32.xlu0 %v3340_v8, %s9934_s7  ;;  %3349 = vrot.lane.b32.xlu1 %v3340_v8, %s9927_s13  ;;  %s9939_s13 = smov 77  }
0x138f   :  { %3948 = vrot.lane.b32.xlu0 %v3340_v8, %s9935_s24  ;;  %3435 = vrot.lane.b32.xlu1 %v3340_v8, %s9936_s25 }
0x1393   :  { %4118 = vrot.lane.b32.xlu0 %v3340_v8, %s9889_s19  ;;  %3520 = vrot.lane.b32.xlu1 %v3340_v8, %s9937_s29  ;;  %s9950_s29 = smov 123  }
0x1397   :  { %4207 = vrot.lane.b32.xlu0 %v3341_v23, %s9908_s11  ;;  %3605 = vrot.lane.b32.xlu1 %v3340_v8, %s9938_s5 }
0x139b   :  { %4378 = vrot.lane.b32.xlu0 %v3341_v23, %s9905_s30  ;;  %3691 = vrot.lane.b32.xlu1 %v3340_v8, %s9939_s13  ;;  %s9946_s30 = smov 91   ;;  %s9956_s13 = smov 29  }
0x139f   :  { %4548 = vrot.lane.b32.xlu0 %v3341_v23, %s9940_s10  ;;  %3861 = vrot.lane.b32.xlu1 %v3340_v8, %s9900_s21  ;;  %s9945_s21 = smov 55  }
0x13a3   :  { %4033 = vrot.lane.b32.xlu1 %v3340_v8, %s9941_s22 }
0x13a7   :  { %4205 = vrot.lane.b32.xlu1 %v3340_v8, %s9908_s11  ;;  %s9949_s11 = smov 89  }
0x13ab   :  { %4293 = vrot.lane.b32.xlu1 %v3341_v23, %s9942_s27 }
0x13af   :  { %4463 = vrot.lane.b32.xlu1 %v3341_v23, %s9943_s12 }
0x13b3   :  { %4633 = vrot.lane.b32.xlu1 %v3341_v23, %s9944_s16 }
0x13fd   :  { %v3350_v18 = vpop.permute.xlu1 %3349  ;;  %v3777_v11 = vpop.permute.xlu0 %3776 }
0x13fe   :  { %9017 = vmatmul.mubr.msk.f32.vlgmr.msra.gmra.mrb[24].mxu1 %vm3351_vm2, %v3350_v18 }
0x13ff   :  { %9025 = vmatpush3.msra.mxu1 %v10776_v56  ;;  %9026 = vmatprep.mubr.msk.f32.mxu1 %vm9896_vm0, %v10698_v0 }
0x1400   :  { %9034 = vmatprep.subr.mxu1 %v10698_v0 }
0x1401   :  { %v3436_v19 = vpop.permute.xlu1 %3435  ;;  %v3949_v15 = vpop.permute.xlu0 %3948 }
0x1402   :  { %9022 = vmatmul.mubr.msk.f32.vlgmr.msra.gmra.mrb[26].mxu0 %vm3351_vm2, %v3436_v19 }
0x1403   :  { %9030 = vmatpush3.msra.mxu0 %v10776_v56  ;;  %9031 = vmatprep.mubr.msk.f32.mxu0 %vm9896_vm0, %v10698_v0 }
0x1404   :  { %9039 = vmatprep.subr.mxu0 %v10698_v0 }
0x1405   :  { %v3521_v12 = vpop.permute.xlu1 %3520  ;;  %v4119_v36 = vpop.permute.xlu0 %4118 }
0x1406   :  { %9027 = vmatmul.mubr.msk.f32.vlgmr.msra.gmra.mrb[26].mxu1 %vm3351_vm2, %v3521_v12 }
0x1407   :  { %9035 = vmatpush3.msra.mxu1 %v10776_v56  ;;  %9036 = vmatprep.mubr.msk.f32.mxu1 %vm9896_vm0, %v10698_v0 }
0x1408   :  { %9044 = vmatprep.subr.mxu1 %v10698_v0 }
0x1409   :  { %v3606_v14 = vpop.permute.xlu1 %3605  ;;  %v4208_v28 = vpop.permute.xlu0 %4207 }
0x140a   :  { %9032 = vmatmul.mubr.msk.f32.vlgmr.msra.gmra.mrb[28].mxu0 %vm3351_vm2, %v3606_v14 }
0x140b   :  { %9040 = vmatpush3.msra.mxu0 %v10776_v56  ;;  %9041 = vmatprep.mubr.msk.f32.mxu0 %vm9896_vm0, %v10698_v0 }
0x140c   :  { %9049 = vmatprep.subr.mxu0 %v10698_v0 }
0x140d   :  { %v3692_v16 = vpop.permute.xlu1 %3691  ;;  %v4379_v24 = vpop.permute.xlu0 %4378 }
0x140e   :  { %9037 = vmatmul.mubr.msk.f32.vlgmr.msra.gmra.mrb[28].mxu1 %vm3351_vm2, %v3692_v16  ;;  %9042 = vmatmul.mubr.msk.f32.vlgmr.msra.gmra.mrb[30].mxu0 %vm3351_vm2, %v3777_v11 }
0x140f   :  { %9045 = vmatpush3.msra.mxu1 %v10776_v56  ;;  %9046 = vmatprep.mubr.msk.f32.mxu1 %vm9896_vm0, %v10698_v0 }
0x1410   :  { %9050 = vmatpush3.msra.mxu0 %v10776_v56  ;;  %9051 = vmatprep.mubr.msk.f32.mxu0 %vm9896_vm0, %v10698_v0 }
0x1411   :  { %v3862_v17 = vpop.permute.xlu1 %3861  ;;  %9054 = vmatprep.subr.mxu1 %v10698_v0  ;;  %9059 = vmatprep.subr.mxu0 %v10698_v0  ;;  %v4549_v27 = vpop.permute.xlu0 %4548 }
0x1412   :  { %9047 = vmatmul.mubr.msk.f32.vlgmr.msra.gmra.mrb[30].mxu1 %vm3351_vm2, %v3862_v17  ;;  %9052 = vmatmul.mubr.msk.f32.vlgmr.msra.gmra.mrb[32].mxu0 %vm3351_vm2, %v3949_v15 }
0x1413   :  { %9055 = vmatpush3.msra.mxu1 %v10776_v56  ;;  %9056 = vmatprep.mubr.msk.f32.mxu1 %vm9896_vm0, %v10698_v0 }
0x1414   :  { %9060 = vmatpush3.msra.mxu0 %v10776_v56  ;;  %9061 = vmatprep.mubr.msk.f32.mxu0 %vm9896_vm0, %v10698_v0 }
0x1415   :  { %v4034_v37 = vpop.permute.xlu1 %4033  ;;  %9064 = vmatprep.subr.mxu1 %v10698_v0  ;;  %9069 = vmatprep.subr.mxu0 %v10698_v0 }
0x1416   :  { %9057 = vmatmul.mubr.msk.f32.vlgmr.msra.gmra.mrb[32].mxu1 %vm3351_vm2, %v4034_v37  ;;  %9062 = vmatmul.mubr.msk.f32.vlgmr.msra.gmra.mrb[34].mxu0 %vm3351_vm2, %v4119_v36 }
0x1417   :  { %9065 = vmatpush3.msra.mxu1 %v10776_v56  ;;  %9066 = vmatprep.mubr.msk.f32.mxu1 %vm9896_vm0, %v10698_v0 }
0x1418   :  { %9070 = vmatpush3.msra.mxu0 %v10776_v56  ;;  %9071 = vmatprep.mubr.msk.f32.mxu0 %vm9896_vm0, %v10698_v0 }
0x1419   :  { %v4206_v2 = vpop.permute.xlu1 %4205  ;;  %9074 = vmatprep.subr.mxu1 %v10698_v0  ;;  %9079 = vmatprep.subr.mxu0 %v10698_v0 }
0x141a   :  { %v4209_v21 = vsel %vm12292_vm4, %v4206_v2, %v4208_v28  ;;  %vm3603_vm4 = vcmask 1023848  }
0x141b   :  { %9067 = vmatmul.mubr.msk.f32.vlgmr.msra.gmra.mrb[34].mxu1 %vm3351_vm2, %v4209_v21 }
0x141c   :  { %9075 = vmatpush3.msra.mxu1 %v10776_v56  ;;  %9076 = vmatprep.mubr.msk.f32.mxu1 %vm9896_vm0, %v10698_v0 }
0x141d   :  { %v4294_v4 = vpop.permute.xlu1 %4293  ;;  %9084 = vmatprep.subr.mxu1 %v10698_v0 }
0x141e   :  { %9072 = vmatmul.mubr.msk.f32.vlgmr.msra.gmra.mrb[36].mxu0 %vm3351_vm2, %v4294_v4 }
0x141f   :  { %9077 = vmatmul.mubr.msk.f32.vlgmr.msra.gmra.mrb[36].mxu1 %vm3351_vm2, %v4379_v24  ;;  %9080 = vmatpush3.msra.mxu0 %v10776_v56 }
0x1420   :  { %9081 = vmatprep.mubr.msk.f32.mxu0 %vm9896_vm0, %v10698_v0  ;;  %9085 = vmatpush3.msra.mxu1 %v10776_v56 }
0x1421   :  { %v4464_v3 = vpop.permute.xlu1 %4463  ;;  %9086 = vmatprep.mubr.msk.f32.mxu1 %vm9896_vm0, %v10698_v0  ;;  %9089 = vmatprep.subr.mxu0 %v10698_v0 }
0x1422   :  { %9082 = vmatmul.mubr.msk.f32.vlgmr.msra.gmra.mrb[38].mxu0 %vm3351_vm2, %v4464_v3 }
0x1423   :  { %9087 = vmatmul.mubr.msk.f32.vlgmr.msra.gmra.mrb[38].mxu1 %vm3351_vm2, %v4549_v27  ;;  %9090 = vmatpush3.msra.mxu0 %v10776_v56 }
0x1424   :  { %9091 = vmatprep.mubr.msk.f32.mxu0 %vm9896_vm0, %v10698_v0  ;;  %5055 = vmatprep.mubr.f32.mxu1 %v10698_v0 }
0x1425   :  { %v4634_v30 = vpop.permute.xlu1 %4633 }
0x1426   :  { %9092 = vmatmul.mubr.msk.f32.vlgmr.msra.gmra.mrb[40].mxu0 %vm3351_vm2, %v4634_v30  ;;  %vm3769_vm2 = vcmask 417048  }
0x1427   :  { %5126 = vmatprep.mubr.f32.mxu0 %v10698_v0 }
0x14d1   :  { %v3420_v29 = vpop.f32.mrb[24].mxu1 }
0x14d2   :  { %3425 = vrot.lane.b32.xlu1 %v3420_v29, %s9887_s8  ;;  %v9018_v31 = vpop.f32.mrb[25].mxu1 }
0x14d5   :  { %v3505_v50 = vpop.f32.mrb[26].mxu0 }
0x14d6   :  { %3430 = vrot.lane.b32.xlu1 %v3420_v29, %s9897_s6  ;;  %v9023_v32 = vpop.f32.mrb[27].mxu0  ;;  %s9947_s6 = smov 35  }
0x14d9   :  { %v3590_v49 = vpop.f32.mrb[26].mxu1 }
0x14da   :  { %3510 = vrot.lane.b32.xlu1 %v3505_v50, %s9945_s21  ;;  %v9028_v52 = vpop.f32.mrb[27].mxu1  ;;  %s8690_s21 = sld [smem:[#allocation6 + $0x7]] }
0x14dd   :  { %v3675_v33 = vpop.f32.mrb[28].mxu0 }
0x14de   :  { %3515 = vrot.lane.b32.xlu1 %v3505_v50, %s9898_s4  ;;  %3680 = vrot.lane.b32.xlu0 %v3675_v33, %s9891_s23  ;;  %v9033_v35 = vpop.f32.mrb[29].mxu0  ;;  %s9948_s4 = smov 53  }
0x14e1   :  { %v3761_v34 = vpop.f32.mrb[28].mxu1  ;;  %v3846_v38 = vpop.f32.mrb[30].mxu0 }
0x14e2   :  { %3595 = vrot.lane.b32.xlu1 %v3590_v49, %s9946_s30  ;;  %3686 = vrot.lane.b32.xlu0 %v3675_v33, %s9889_s19  ;;  %v9038_v39 = vpop.f32.mrb[29].mxu1  ;;  %v9043_v40 = vpop.f32.mrb[31].mxu0  ;;  %s8710_s30 = sld [smem:[#allocation6 + $0xb]] }
0x14e5   :  { %v3931_v41 = vpop.f32.mrb[30].mxu1  ;;  %v4018_v42 = vpop.f32.mrb[32].mxu0 }
0x14e6   :  { %3600 = vrot.lane.b32.xlu1 %v3590_v49, %s9894_s28  ;;  %v9053_v43 = vpop.f32.mrb[33].mxu0  ;;  %3766 = vrot.lane.b32.xlu0 %v3761_v34, %s9947_s6  ;;  %v9048_v44 = vpop.f32.mrb[31].mxu1 }
0x14e9   :  { %v4103_v45 = vpop.f32.mrb[32].mxu1  ;;  %v4188_v5 = vpop.f32.mrb[34].mxu0 }
0x14ea   :  { %v9063_v46 = vpop.f32.mrb[35].mxu0  ;;  %3771 = vrot.lane.b32.xlu0 %v3761_v34, %s9948_s4  ;;  %3941 = vrot.lane.b32.xlu1 %v3931_v41, %s9942_s27  ;;  %v9058_v47 = vpop.f32.mrb[33].mxu1  ;;  %s8695_s4 = sld [smem:[#allocation6 + $0x8]] }
0x14ee   :  { %3851 = vrot.lane.b32.xlu0 %v3846_v38, %s9916_s26  ;;  %4028 = vrot.lane.b32.xlu1 %v4018_v42, %s9922_s18  ;;  %v4278_v48 = vpop.f32.mrb[34].mxu1  ;;  %s9951_s26 = smov 15   ;;  %s9952_s18 = smov 69  }
0x14ef   :  { %v9068_v51 = vpop.f32.mrb[35].mxu1 }
0x14f1   :  { %v4363_v55 = vpop.f32.mrb[36].mxu0 }
0x14f2   :  { %3856 = vrot.lane.b32.xlu0 %v3846_v38, %s9949_s11  ;;  %4113 = vrot.lane.b32.xlu1 %v4103_v45, %s9938_s5  ;;  %v9073_v56 = vpop.f32.mrb[37].mxu0  ;;  %v4448_v20 = vpop.f32.mrb[36].mxu1  ;;  %s9953_s5 = smov 103   ;;  %s8715_s11 = sld [smem:[#allocation6 + $0xc]] }
0x14f3   :  { %v9078_v25 = vpop.f32.mrb[37].mxu1 }
0x14f5   :  { %v4533_v57 = vpop.f32.mrb[38].mxu0 }
0x14f6   :  { %3936 = vrot.lane.b32.xlu0 %v3931_v41, %s9936_s25  ;;  %4198 = vrot.lane.b32.xlu1 %v4188_v5, %s9950_s29  ;;  %v9083_v58 = vpop.f32.mrb[39].mxu0  ;;  %v4618_v26 = vpop.f32.mrb[38].mxu1  ;;  %s9954_s25 = smov 49  }
0x14f7   :  { %v9088_v59 = vpop.f32.mrb[39].mxu1 }
0x14f9   :  { %v4703_v61 = vpop.f32.mrb[40].mxu0 }
0x14fa   :  { %4023 = vrot.lane.b32.xlu0 %v4018_v42, %s9951_s26  ;;  %4288 = vrot.lane.b32.xlu1 %v4278_v48, %s9912_s15  ;;  %v9093_v62 = vpop.f32.mrb[41].mxu0  ;;  %s9955_s15 = smov 83  }
0x14fe   :  { %4108 = vrot.lane.b32.xlu0 %v4103_v45, %s9952_s18  ;;  %4373 = vrot.lane.b32.xlu1 %v4363_v55, %s9934_s7  ;;  %s9957_s7 = smov 65  }
0x1502   :  { %4193 = vrot.lane.b32.xlu0 %v4188_v5, %s9943_s12  ;;  %4458 = vrot.lane.b32.xlu1 %v4448_v20, %s9953_s5 }
0x1506   :  { %4283 = vrot.lane.b32.xlu0 %v4278_v48, %s9921_s17  ;;  %4543 = vrot.lane.b32.xlu1 %v4533_v57, %s9911_s14  ;;  %s12294_s14 = smov 111   ;;  %s12296_s17 = smov 110  }
0x150a   :  { %4368 = vrot.lane.b32.xlu0 %v4363_v55, %s9954_s25  ;;  %4628 = vrot.lane.b32.xlu1 %v4618_v26, %s9935_s24  ;;  %s8705_s24 = sld [smem:[#allocation6 + $0xa]] }
0x150e   :  { %4453 = vrot.lane.b32.xlu0 %v4448_v20, %s9944_s16  ;;  %4713 = vrot.lane.b32.xlu1 %v4703_v61, %s9955_s15  ;;  %s8700_s15 = sld [smem:[#allocation6 + $0x9]] }
0x1512   :  { %4538 = vrot.lane.b32.xlu0 %v4533_v57, %s9918_s0  ;;  %s12295_s0 = smov 18  }
0x1516   :  { %4623 = vrot.lane.b32.xlu0 %v4618_v26, %s9956_s13 }
0x151a   :  { %4708 = vrot.lane.b32.xlu0 %v4703_v61, %s9957_s7 }
0x1544   :  { %v3426_v63 = vpop.permute.xlu1 %3425 }
0x1545   :  { %3429 = vst.msk [vmem:[#allocation4] sm:$0xff] %vm3428_vm6, %v3426_v63  ;;  %vm12293_vm6 = vcmask 1048568  }
0x1548   :  { %v3431_v6 = vpop.permute.xlu1 %3430 }
0x1549   :  { %3434 = vst.msk [vmem:[#allocation4] sm:$0xff] %vm3433_vm12, %v3431_v6  ;;  %vm3774_vm12 = vcmask 564648  }
0x154c   :  { %v3511_v7 = vpop.permute.xlu1 %3510 }
0x154d   :  { %3514 = vst.msk [vmem:[#allocation4] sm:$0xff] %vm3513_vm7, %v3511_v7  ;;  %vm3946_vm7 = vcmask 105472  }
0x1550   :  { %v3681_v8 = vpop.permute.xlu0 %3680  ;;  %v3516_v9 = vpop.permute.xlu1 %3515 }
0x1551   :  { %3685 = vst.msk [vmem:[#allocation4 + $0x8] sm:$0xff] %vm3684_vm11, %v3681_v8  ;;  %vm3854_vm11 = vcmask 712248  }
0x1552   :  { %3519 = vst.msk [vmem:[#allocation4] sm:$0xff] %vm3518_vm14, %v3516_v9  ;;  %vm3859_vm14 = vcmask 859848  }
0x1554   :  { %v3687_v22 = vpop.permute.xlu0 %3686  ;;  %v3596_v23 = vpop.permute.xlu1 %3595 }
0x1555   :  { %3690 = vst.msk [vmem:[#allocation4 + $0x8] sm:$0xff] %vm3689_vm3, %v3687_v22  ;;  %vm3939_vm3 = vcmask 1007448  }
0x1556   :  { %3599 = vst.msk [vmem:[#allocation4] sm:$0xff] %vm3598_vm13, %v3596_v23  ;;  %vm3944_vm13 = vcmask 1048552  }
0x1558   :  { %v3767_v18 = vpop.permute.xlu0 %3766  ;;  %v3601_v19 = vpop.permute.xlu1 %3600 }
0x1559   :  { %3770 = vst.msk [vmem:[#allocation4 + $0x8] sm:$0xff] %vm3769_vm2, %v3767_v18  ;;  %vm4026_vm2 = vcmask 253048  }
0x155a   :  { %3604 = vst.msk [vmem:[#allocation4] sm:$0xff] %vm3603_vm4, %v3601_v19  ;;  %vm4031_vm4 = vcmask 400648  }
0x155b   :  { %3683 = vst.msk [vmem:[#allocation4] sm:$0xff] %vm12293_vm6, %v3681_v8  ;;  %vm4111_vm6 = vcmask 695848  }
0x155c   :  { %v3772_v11 = vpop.permute.xlu0 %3771  ;;  %v3942_v12 = vpop.permute.xlu1 %3941 }
0x155d   :  { %3775 = vst.msk [vmem:[#allocation4 + $0x8] sm:$0xff] %vm3774_vm12, %v3772_v11  ;;  %vm4116_vm12 = vcmask 843448  }
0x155e   :  { %3947 = vst.msk [vmem:[#allocation4 + $0x10] sm:$0xff] %vm3946_vm7, %v3942_v12  ;;  %vm4201_vm7 = vcmask 1048536  }
0x1560   :  { %v3852_v14 = vpop.permute.xlu0 %3851  ;;  %v4029_v15 = vpop.permute.xlu1 %4028 }
0x1561   :  { %3855 = vst.msk [vmem:[#allocation4 + $0x8] sm:$0xff] %vm3854_vm11, %v3852_v14  ;;  %vm4286_vm11 = vcmask 236648  }
0x1562   :  { %v10892_v16 = vld [vmem:[#allocation4] sm:$0xff] }
0x1563   :  { %4863 = vrot.lane.b32.xlu1 %v10892_v16, %s12294_s14  ;;  %4728 = vrot.lane.b32.xlu0 %v10892_v16, %s9887_s8 }
0x1564   :  { %v3857_v36 = vpop.permute.xlu0 %3856  ;;  %v4114_v17 = vpop.permute.xlu1 %4113 }
0x1565   :  { %3860 = vst.msk [vmem:[#allocation4 + $0x8] sm:$0xff] %vm3859_vm14, %v3857_v36  ;;  %vm4291_vm14 = vcmask 384248  }
0x1567   :  { %4915 = vrot.lane.b32.xlu1 %v10892_v16, %s9894_s28  ;;  %4754 = vrot.lane.b32.xlu0 %v10892_v16, %s12295_s0 }
0x1568   :  { %v3937_v37 = vpop.permute.xlu0 %3936  ;;  %v4199_v28 = vpop.permute.xlu1 %4198 }
0x1569   :  { %3940 = vst.msk [vmem:[#allocation4 + $0x8] sm:$0xff] %vm3939_vm3, %v3937_v37  ;;  %vm4371_vm3 = vcmask 531848  }
0x156a   :  { %4203 = vst.msk [vmem:[#allocation4 + $0x18] sm:$0xff] %vm1933_vm5, %v4199_v28  ;;  %vm4196_vm5 = vcmask 991048  }
0x156b   :  { %3945 = vst.msk [vmem:[#allocation4 + $0x8] sm:$0xff] %vm3944_vm13, %v3942_v12  ;;  %4780 = vrot.lane.b32.xlu0 %v10892_v16, %s9889_s19  ;;  %vm4376_vm13 = vcmask 679448  }
0x156c   :  { %v4024_v2 = vpop.permute.xlu0 %4023  ;;  %v4289_v21 = vpop.permute.xlu1 %4288 }
0x156d   :  { %4027 = vst.msk [vmem:[#allocation4 + $0x10] sm:$0xff] %vm4026_vm2, %v4024_v2  ;;  %vm4456_vm2 = vcmask 827048  }
0x156e   :  { %4032 = vst.msk [vmem:[#allocation4 + $0x10] sm:$0xff] %vm4031_vm4, %v4029_v15  ;;  %vm4461_vm4 = vcmask 974648  }
0x156f   :  { %4806 = vrot.lane.b32.xlu0 %v10892_v16, %s9890_s20 }
0x1570   :  { %v4109_v24 = vpop.permute.xlu0 %4108  ;;  %v4374_v27 = vpop.permute.xlu1 %4373 }
0x1571   :  { %4112 = vst.msk [vmem:[#allocation4 + $0x10] sm:$0xff] %vm4111_vm6, %v4109_v24  ;;  %vm4546_vm6 = vcmask 220248  }
0x1572   :  { %v10907_v4 = vld [vmem:[#allocation4 + $0x8] sm:$0xff]  ;;  %4117 = vst.msk [vmem:[#allocation4 + $0x10] sm:$0xff] %vm4116_vm12, %v4114_v17  ;;  %vm12297_vm12 = vcmask 1048520  }
0x1573   :  { %4837 = vrot.lane.b32.xlu0 %v10892_v16, %s9891_s23  ;;  %4730 = vrot.lane.b32.xlu1 %v10907_v4, %s9887_s8 }
0x1574   :  { %v4194_v3 = vpop.permute.xlu0 %4193  ;;  %v4459_v29 = vpop.permute.xlu1 %4458 }
0x1575   :  { %4197 = vst.msk [vmem:[#allocation4 + $0x10] sm:$0xff] %vm4196_vm5, %v4194_v3  ;;  %vm4626_vm5 = vcmask 367848  }
0x1576   :  { %4202 = vst.msk [vmem:[#allocation4 + $0x10] sm:$0xff] %vm4201_vm7, %v4199_v28  ;;  %vm4631_vm7 = vcmask 515448  }
0x1577   :  { %4889 = vrot.lane.b32.xlu0 %v10892_v16, %s12296_s17  ;;  %4756 = vrot.lane.b32.xlu1 %v10907_v4, %s12295_s0 }
0x1578   :  { %v4284_v30 = vpop.permute.xlu0 %4283  ;;  %v4544_v49 = vpop.permute.xlu1 %4543 }
0x1579   :  { %4287 = vst.msk [vmem:[#allocation4 + $0x18] sm:$0xff] %vm4286_vm11, %v4284_v30  ;;  %vm4711_vm11 = vcmask 663048  }
0x157a   :  { %4292 = vst.msk [vmem:[#allocation4 + $0x18] sm:$0xff] %vm4291_vm14, %v4289_v21  ;;  %vm4716_vm14 = vcmask 810648  }
0x157b   :  { %4839 = vrot.lane.b32.xlu0 %v10907_v4, %s9891_s23  ;;  %4782 = vrot.lane.b32.xlu1 %v10907_v4, %s9889_s19 }
0x157c   :  { %v4369_v31 = vpop.permute.xlu0 %4368  ;;  %v4629_v33 = vpop.permute.xlu1 %4628 }
0x157d   :  { %4372 = vst.msk [vmem:[#allocation4 + $0x18] sm:$0xff] %vm4371_vm3, %v4369_v31  ;;  %v10921_v50 = vld [vmem:[#allocation4 + $0x10] sm:$0xff]  ;;  %vm12299_vm3 = vcmask 1047696  }
0x157e   :  { %4377 = vst.msk [vmem:[#allocation4 + $0x18] sm:$0xff] %vm4376_vm13, %v4374_v27  ;;  %vm12300_vm13 = vcmask 1047688  }
0x157f   :  { %4808 = vrot.lane.b32.xlu1 %v10907_v4, %s9890_s20  ;;  %4867 = vrot.lane.b32.xlu0 %v10921_v50, %s12294_s14 }
0x1580   :  { %v4454_v32 = vpop.permute.xlu0 %4453  ;;  %v4714_v39 = vpop.permute.xlu1 %4713 }
0x1581   :  { %4457 = vst.msk [vmem:[#allocation4 + $0x18] sm:$0xff] %vm4456_vm2, %v4454_v32  ;;  %vm12301_vm2 = vcmask 154624  }
0x1582   :  { %4462 = vst.msk [vmem:[#allocation4 + $0x18] sm:$0xff] %vm4461_vm4, %v4459_v29  ;;  %vm12302_vm4 = vcmask 146432  }
0x1583   :  { %4865 = vrot.lane.b32.xlu1 %v10907_v4, %s12294_s14  ;;  %4893 = vrot.lane.b32.xlu0 %v10921_v50, %s12296_s17 }
0x1584   :  { %v4539_v52 = vpop.permute.xlu0 %4538 }
0x1585   :  { %4541 = vst.msk [vmem:[#allocation4 + $0x18] sm:$0xff] %vm12297_vm12, %v4539_v52  ;;  %vm12304_vm12 = vcmask 900096  }
0x1586   :  { %4542 = vst.msk [vmem:[#allocation4 + $0x20] sm:$0xff] %vm1959_vm1, %v4539_v52  ;;  %vm12298_vm1 = vcmask 1047704  }
0x1587   :  { %4891 = vrot.lane.b32.xlu1 %v10907_v4, %s12296_s17  ;;  %4919 = vrot.lane.b32.xlu0 %v10921_v50, %s9894_s28  ;;  %4547 = vst.msk [vmem:[#allocation4 + $0x20] sm:$0xff] %vm4546_vm6, %v4544_v49  ;;  %vm12303_vm6 = vcmask 138240  }
0x1588   :  { %v4624_v35 = vpop.permute.xlu0 %4623 }
0x1589   :  { %4627 = vst.msk [vmem:[#allocation4 + $0x20] sm:$0xff] %vm4626_vm5, %v4624_v35  ;;  %vm12305_vm5 = vcmask 908288  }
0x158a   :  { %4632 = vst.msk [vmem:[#allocation4 + $0x20] sm:$0xff] %vm4631_vm7, %v4629_v33  ;;  %vm12306_vm7 = vmmov %vm12304_vm12 }
0x158b   :  { %4917 = vrot.lane.b32.xlu1 %v10907_v4, %s9894_s28 }
0x158c   :  { %v4709_v34 = vpop.permute.xlu0 %4708  ;;  %v10939_v38 = vld [vmem:[#allocation4 + $0x18] sm:$0xff] }
0x158d   :  { %4712 = vst.msk [vmem:[#allocation4 + $0x20] sm:$0xff] %vm4711_vm11, %v4709_v34  ;;  %4734 = vrot.lane.b32.xlu0 %v10939_v38, %s9887_s8  ;;  %vm12307_vm11 = vmmov %vm12305_vm5 }
0x158e   :  { %4717 = vst.msk [vmem:[#allocation4 + $0x20] sm:$0xff] %vm4716_vm14, %v4714_v39  ;;  %vm12308_vm14 = vcmask 891904  }
0x158f   :  { %4841 = vrot.lane.b32.xlu1 %v10921_v50, %s9891_s23 }
0x1591   :  { %4760 = vrot.lane.b32.xlu0 %v10939_v38, %s12295_s0 }
0x1593   :  { %4732 = vrot.lane.b32.xlu1 %v10921_v50, %s9887_s8 }
0x1595   :  { %4786 = vrot.lane.b32.xlu0 %v10939_v38, %s9889_s19  ;;  %v10963_v40 = vld [vmem:[#allocation4 + $0x20] sm:$0xff] }
0x1597   :  { %4758 = vrot.lane.b32.xlu1 %v10921_v50, %s12295_s0 }
0x1599   :  { %4812 = vrot.lane.b32.xlu0 %v10939_v38, %s9890_s20 }
0x159b   :  { %4784 = vrot.lane.b32.xlu1 %v10921_v50, %s9889_s19 }
0x159d   :  { %4843 = vrot.lane.b32.xlu0 %v10939_v38, %s9891_s23 }
0x159f   :  { %4810 = vrot.lane.b32.xlu1 %v10921_v50, %s9890_s20 }
0x15a1   :  { %4869 = vrot.lane.b32.xlu0 %v10939_v38, %s12294_s14 }
0x15a3   :  { %4736 = vrot.lane.b32.xlu1 %v10963_v40, %s9887_s8 }
0x15a5   :  { %4762 = vrot.lane.b32.xlu0 %v10963_v40, %s12295_s0 }
0x15a7   :  { %4845 = vrot.lane.b32.xlu1 %v10963_v40, %s9891_s23 }
0x15a9   :  { %4788 = vrot.lane.b32.xlu0 %v10963_v40, %s9889_s19 }
0x15ab   :  { %4814 = vrot.lane.b32.xlu1 %v10963_v40, %s9890_s20 }
0x15ad   :  { %4895 = vrot.lane.b32.xlu0 %v10939_v38, %s12296_s17 }
0x15af   :  { %4871 = vrot.lane.b32.xlu1 %v10963_v40, %s12294_s14 }
0x15b1   :  { %4921 = vrot.lane.b32.xlu0 %v10939_v38, %s9894_s28 }
0x15b3   :  { %4897 = vrot.lane.b32.xlu1 %v10963_v40, %s12296_s17 }
0x15b7   :  { %4923 = vrot.lane.b32.xlu1 %v10963_v40, %s9894_s28 }
0x15d5   :  { %v4729_v41 = vpop.permute.xlu0 %4728  ;;  %v4864_v42 = vpop.permute.xlu1 %4863 }
0x15d6   :  { %4748 = vst.msk [vmem:[#allocation2 + $0x8] sm:$0xff] %vm12298_vm1, %v4729_v41  ;;  %vm12309_vm1 = vmmov %vm12301_vm2 }
0x15d9   :  { %v4755_v43 = vpop.permute.xlu0 %4754  ;;  %v10986_v44 = vpop.permute.xlu1 %4915 }
0x15da   :  { %4774 = vst.msk [vmem:[#allocation2 + $0x40] sm:$0xff] %vm12299_vm3, %v4755_v43  ;;  %vm12310_vm3 = vmmov %vm12309_vm1 }
0x15dd   :  { %v4781_v45 = vpop.permute.xlu0 %4780  ;;  %v4943_v57 = vld [vmem:[#allocation2 + $0x8] sm:$0xff] }
0x15de   :  { %4800 = vst.msk [vmem:[#allocation2 + $0x78] sm:$0xff] %vm12300_vm13, %v4781_v45  ;;  %vm12311_vm13 = vmmov %vm12302_vm4 }
0x15e1   :  { %v4807_v5 = vpop.permute.xlu0 %4806  ;;  %v4948_v55 = vld [vmem:[#allocation2 + $0x40] sm:$0xff] }
0x15e2   :  { %4826 = vst.msk [vmem:[#allocation2 + $0xb0] sm:$0xff] %vm202_vm9, %v4807_v5  ;;  %v9431_v58 = vpack.c.bf16 %v4948_v55, %v4943_v57 }
0x15e5   :  { %v4838_v46 = vpop.permute.xlu0 %4837  ;;  %v4731_v47 = vpop.permute.xlu1 %4730  ;;  %v4953_v9 = vld [vmem:[#allocation2 + $0x78] sm:$0xff] }
0x15e6   :  { %v4738_v56 = vsel %vm12301_vm2, %v4729_v41, %v4731_v47  ;;  %vm12312_vm2 = vmmov %vm12302_vm4 }
0x15e9   :  { %v4890_v48 = vpop.permute.xlu0 %4889  ;;  %v4757_v51 = vpop.permute.xlu1 %4756  ;;  %v4958_v63 = vld [vmem:[#allocation2 + $0xb0] sm:$0xff] }
0x15ea   :  { %v4764_v20 = vsel %vm12302_vm4, %v4755_v43, %v4757_v51  ;;  %v9435_v22 = vpack.c.bf16 %v4958_v63, %v4953_v9  ;;  %vm12313_vm4 = vmmov %vm12308_vm14 }
0x15eb   :  { %v9429_v25 = vpack.c.bf16 %v4764_v20, %v4738_v56 }
0x15ed   :  { %v4840_v26 = vpop.permute.xlu0 %4839  ;;  %v4783_v59 = vpop.permute.xlu1 %4782  ;;  %9430 = vmatprep.subr.bf16.mxu1 %v9429_v25 }
0x15ee   :  { %9432 = vmatpush1.bf16.msra.mxu1 %v9431_v58  ;;  %v4790_v6 = vsel %vm12303_vm6, %v4781_v45, %v4783_v59  ;;  %v4847_v15 = vsel %vm224_vm10, %v4838_v46, %v4840_v26 }
0x15ef   :  { %v9439_v24 = vpack.c.bf16 %v4847_v15, %v10892_v16 }
0x15f1   :  { %v10993_v61 = vpop.permute.xlu0 %4867  ;;  %v4809_v62 = vpop.permute.xlu1 %4808 }
0x15f2   :  { %v4816_v7 = vsel %vm191_vm8, %v4807_v5, %v4809_v62 }
0x15f3   :  { %v9433_v8 = vpack.c.bf16 %v4816_v7, %v4790_v6 }
0x15f5   :  { %v4866_v23 = vpop.permute.xlu1 %4865  ;;  %9434 = vmatprep.subr.bf16.mxu1 %v9433_v8  ;;  %v10997_v18 = vpop.permute.xlu0 %4893 }
0x15f6   :  { %9436 = vmatpush1.bf16.msra.mxu1 %v9435_v22  ;;  %v4874_v2 = vsel %vm12305_vm5, %v4866_v23, %v10993_v61  ;;  %v4873_v29 = vsel %vm12307_vm11, %v4864_v42, %v4866_v23  ;;  %v11020_v42 = vld [vmem:[%s12266_s1 + $0x38] sm:$0xff]  ;;  %vm12315_vm5 = vmmov %vm12309_vm1 }
0x15f7   :  { %vm12317_vm11 = vmmov %vm12303_vm6 }
0x15f9   :  { %v4892_v19 = vpop.permute.xlu1 %4891  ;;  %v10999_v11 = vpop.permute.xlu0 %4919 }
0x15fa   :  { %v4900_v17 = vsel %vm12304_vm12, %v4892_v19, %v10997_v18  ;;  %v4899_v3 = vsel %vm12306_vm7, %v4890_v48, %v4892_v19  ;;  %vm12314_vm12 = vmmov %vm12303_vm6 }
0x15fb   :  { %v9441_v30 = vpack.c.bf16 %v4900_v17, %v4874_v2  ;;  %v9443_v32 = vpack.c.bf16 %v4899_v3, %v4873_v29  ;;  %vm12316_vm7 = vmmov %vm12312_vm2 }
0x15fd   :  { %v4918_v12 = vpop.permute.xlu1 %4917 }
0x15fe   :  { %v4925_v43 = vsel %vm12313_vm4, %v10986_v44, %v4918_v12 }
0x15ff   :  { %v4735_v14 = vpop.permute.xlu0 %4734 }
0x1601   :  { %v4842_v36 = vpop.permute.xlu1 %4841 }
0x1602   :  { %v4848_v37 = vsel %vm224_vm10, %v4840_v26, %v4842_v36 }
0x1603   :  { %v9437_v28 = vpack.c.bf16 %v4848_v37, %v10907_v4  ;;  %v4761_v21 = vpop.permute.xlu0 %4760  ;;  %v4926_v4 = vsel %vm12308_vm14, %v4918_v12, %v10999_v11  ;;  %vm12318_vm14 = vcmask 908288  }
0x1605   :  { %v4733_v27 = vpop.permute.xlu1 %4732  ;;  %9438 = vmatprep.subr.bf16.mxu1 %v9437_v28 }
0x1606   :  { %9440 = vmatpush1.bf16.msra.mxu1 %v9439_v24  ;;  %v4739_v52 = vsel %vm12309_vm1, %v4731_v47, %v4733_v27  ;;  %v4740_v33 = vsel %vm12310_vm3, %v4733_v27, %v4735_v14  ;;  %vm12319_vm1 = vcmask 900096   ;;  %vm12320_vm3 = vmmov %vm12318_vm14 }
0x1607   :  { %9442 = vmatprep.subr.bf16.mxu1 %v9441_v30  ;;  %v4787_v31 = vpop.permute.xlu0 %4786  ;;  %vm12323_vm4 = vmmov %vm12320_vm3 }
0x1609   :  { %v4759_v49 = vpop.permute.xlu1 %4758 }
0x160a   :  { %v4765_v16 = vsel %vm12311_vm13, %v4757_v51, %v4759_v49  ;;  %v4766_v35 = vsel %vm12312_vm2, %v4759_v49, %v4761_v21  ;;  %9444 = vmatpush1.bf16.msra.mxu1 %v9443_v32  ;;  %vm12321_vm13 = vmmov %vm12319_vm1 }
0x160b   :  { %5007 = vmatprep.subr.mxu1 %v4926_v4  ;;  %v9445_v34 = vpack.c.bf16 %v4766_v35, %v4740_v33  ;;  %v9447_v39 = vpack.c.bf16 %v4765_v16, %v4739_v52  ;;  %v4813_v41 = vpop.permute.xlu0 %4812  ;;  %vm12322_vm2 = vmmov %vm12319_vm1 }
0x160d   :  { %v4785_v45 = vpop.permute.xlu1 %4784  ;;  %9446 = vmatprep.subr.bf16.mxu0 %v9445_v34 }
0x160e   :  { %5008 = vmatpush1.msra.mxu1 %v4925_v43  ;;  %9448 = vmatpush1.bf16.msra.mxu0 %v9447_v39  ;;  %v4791_v47 = vsel %vm12303_vm6, %v4783_v59, %v4785_v45  ;;  %v4792_v48 = vsel %vm12314_vm12, %v4785_v45, %v4787_v31  ;;  %vm12324_vm6 = vcmask 891904  }
0x160f   :  { %9461 = vmatprep.subr.bf16.mxu1 %v9895_v13  ;;  %8687 = vmatmul.mubr.msk.f32.vlgmr.msra.gmra.mrb[40].mxu1 %vm372_vm15, %v11020_v42  ;;  %v4844_v5 = vpop.permute.xlu0 %4843  ;;  %vm12325_vm12 = vmmov %vm12324_vm6 }
0x1610   :  { %9112 = vmatprep.mubr.msk.f32.mxu1 %vm9896_vm0, %v10698_v0  ;;  %v4849_v58 = vsel %vm224_vm10, %v4842_v36, %v4844_v5 }
0x1611   :  { %v4811_v46 = vpop.permute.xlu1 %4810  ;;  %v9455_v9 = vpack.c.bf16 %v4849_v58, %v10921_v50 }
0x1612   :  { %v4817_v44 = vsel %vm191_vm8, %v4809_v62, %v4811_v46  ;;  %v4818_v51 = vsel %vm191_vm8, %v4811_v46, %v4813_v41 }
0x1613   :  { %v9449_v55 = vpack.c.bf16 %v4818_v51, %v4792_v48  ;;  %v9451_v56 = vpack.c.bf16 %v4817_v44, %v4791_v47  ;;  %v4870_v20 = vpop.permute.xlu0 %4869 }
0x1614   :  { %v4875_v2 = vsel %vm12323_vm4, %v10993_v61, %v4870_v20  ;;  %vm12329_vm4 = vcmask 154624  }
0x1615   :  { %v4737_v25 = vpop.permute.xlu1 %4736  ;;  %9450 = vmatprep.subr.bf16.mxu0 %v9449_v55 }
0x1616   :  { %9452 = vmatpush1.bf16.msra.mxu0 %v9451_v56  ;;  %v4741_v26 = vsel %vm12315_vm5, %v4735_v14, %v4737_v25  ;;  %vm12326_vm5 = vmmov %vm12324_vm6 }
0x1617   :  { %v4763_v57 = vpop.permute.xlu0 %4762 }
0x1618   :  { %v4767_v63 = vsel %vm12316_vm7, %v4761_v21, %v4763_v57  ;;  %v9958_v57 = vmov 6  }
0x1619   :  { %v4846_v59 = vpop.permute.xlu1 %4845  ;;  %v9462_v62 = vpack.c.bf16 %v4767_v63, %v4741_v26  ;;  %9829 = vset.pattern.permute.xlu0 %v9958_v57  ;;  %9830 = vset.pattern.permute.xlu1 %v9958_v57 }
0x161a   :  { %v4850_v6 = vsel %vm224_vm10, %v4844_v5, %v4846_v59  ;;  %4862 = vst.msk [vmem:[#allocation2 + $0x140] sm:$0xff] %vm224_vm10, %v4846_v59 }
0x161b   :  { %v9453_v7 = vpack.c.bf16 %v4850_v6, %v10939_v38  ;;  %v4789_v8 = vpop.permute.xlu0 %4788  ;;  %9463 = vmatpush3.bf16.msra.mxu1 %v9462_v62 }
0x161c   :  { %v4793_v22 = vsel %vm12317_vm11, %v4787_v31, %v4789_v8  ;;  %9464 = vmatprep.subr.bf16.mxu1 %v9895_v13  ;;  %v11078_v8 = vld [vmem:[%s12267_s2] sm:$0xff] }
0x161d   :  { %v4815_v23 = vpop.permute.xlu1 %4814  ;;  %9454 = vmatprep.subr.bf16.mxu0 %v9453_v7 }
0x161e   :  { %v4819_v19 = vsel %vm191_vm8, %v4813_v41, %v4815_v23  ;;  %9456 = vmatpush1.bf16.msra.mxu0 %v9455_v9  ;;  %v11084_v23 = vld [vmem:[%s12268_s3] sm:$0xff] }
0x161f   :  { %v9465_v12 = vpack.c.bf16 %v4819_v19, %v4793_v22  ;;  %v4896_v36 = vpop.permute.xlu0 %4895 }
0x1620   :  { %v4901_v38 = vsel %vm12319_vm1, %v10997_v18, %v4896_v36 }
0x1621   :  { %v4872_v14 = vpop.permute.xlu1 %4871  ;;  %9466 = vmatpush3.bf16.msra.mxu1 %v9465_v12  ;;  %v4972_v15 = vld [vmem:[#allocation2 + $0x140] sm:$0xff]  ;;  %v9459_v24 = vpack.c.bf16 %v4901_v38, %v4875_v2 }
0x1622   :  { %4888 = vst.msk [vmem:[#allocation2 + $0x178] sm:$0xff] %vm12318_vm14, %v4872_v14  ;;  %9467 = vmatprep.subr.bf16.mxu1 %v9895_v13  ;;  %v9468_v50 = vpack.c.bf16 %v4972_v15, %v10963_v40  ;;  %v4876_v37 = vsel %vm12320_vm3, %v4870_v20, %v4872_v14 }
0x1623   :  { %v4922_v3 = vpop.permute.xlu0 %4921 }
0x1624   :  { %v4927_v27 = vsel %vm12326_vm5, %v10999_v11, %v4922_v3  ;;  %vm12332_vm5 = vcmask 138240  }
0x1625   :  { %v4898_v17 = vpop.permute.xlu1 %4897  ;;  %9469 = vmatpush3.bf16.msra.mxu1 %v9468_v50 }
0x1626   :  { %v4902_v28 = vsel %vm12321_vm13, %v4896_v36, %v4898_v17  ;;  %4914 = vst.msk [vmem:[#allocation2 + $0x1b0] sm:$0xff] %vm12322_vm2, %v4898_v17  ;;  %9470 = vmatprep.subr.bf16.mxu1 %v9895_v13  ;;  %vm12327_vm13 = vcmask 1047704   ;;  %vm12328_vm2 = vcmask 1047696  }
0x1627   :  { %v9457_v21 = vpack.c.bf16 %v4902_v28, %v4876_v37  ;;  %v5267_v37 = vstv %s8690_s21 }
0x1629   :  { %v4924_v40 = vpop.permute.xlu1 %4923  ;;  %9458 = vmatprep.subr.bf16.mxu0 %v9457_v21  ;;  %v4977_v30 = vld [vmem:[#allocation2 + $0x178] sm:$0xff] }
0x162a   :  { %v4928_v18 = vsel %vm12324_vm6, %v4922_v3, %v4924_v40  ;;  %4940 = vst.msk [vmem:[#allocation2 + $0x1e8] sm:$0xff] %vm12325_vm12, %v4924_v40  ;;  %9460 = vmatpush1.bf16.msra.mxu0 %v9459_v24  ;;  %vm12330_vm6 = vcmask 146432   ;;  %vm12331_vm12 = vcmask 1047688  }
0x162b   :  { %5078 = vmatprep.subr.mxu0 %v4928_v18 }
0x162d   :  { %v4982_v29 = vld [vmem:[#allocation2 + $0x1b0] sm:$0xff] }
0x162e   :  { %v9471_v31 = vpack.c.bf16 %v4982_v29, %v4977_v30  ;;  %5079 = vmatpush1.msra.mxu0 %v4927_v27 }
0x162f   :  { %8688 = vmatmul.mubr.msk.f32.vlgmr.msra.gmra.mrb[42].mxu0 %vm372_vm15, %v11020_v42 }
0x1630   :  { %9472 = vmatpush3.bf16.msra.mxu1 %v9471_v31  ;;  %5610 = vmatprep.mubr.f32.mxu0 %v10698_v0 }
0x1631   :  { %9110 = vmatprep.subr.mxu1 %v10698_v0  ;;  %v4987_v61 = vld [vmem:[#allocation2 + $0x1e8] sm:$0xff] }
0x1634   :  { %9111 = vmatpush3.msra.mxu1 %v4987_v61 }
0x1635   :  { %9113 = vmatmul.mubr.msk.f32.vlgmr.msra.gmra.mrb[42].mxu1 %vm372_vm15, %v11020_v42 }
0x1636   :  { %5681 = vmatprep.mubr.f32.mxu1 %v10698_v0 }
0x16e2   :  { %v5057_v11 = vpop.f32.mrb[40].mxu1 }
0x16e3   :  { %v5059_v32 = vpop.f32.mrb[41].mxu1  ;;  %v5203_v4 = vmul.f32 %v5057_v11, %v10246_v53 }
0x16e4   :  { %v5204_v49 = vmul.f32 %v5059_v32, %v10250_v54 }
0x16e5   :  { %v5217_v52 = vmul.f32 %v5203_v4, %v5203_v4 }
0x16e6   :  { %v5218_v33 = vmul.f32 %v5204_v49, %v5204_v49  ;;  %v5210_v35 = vadd.f32 %v5204_v49, %v5203_v4 }
0x16e8   :  { %v5222_v43 = vadd.f32 %v5218_v33, %v5217_v52 }
0x1702   :  { %v5128_v16 = vpop.f32.mrb[42].mxu0 }
0x1703   :  { %v5205_v34 = vmul.f32 %v5128_v16, %v10261_v60  ;;  %v5130_v39 = vpop.f32.mrb[43].mxu0 }
0x1704   :  { %v5206_v41 = vmul.f32 %v5130_v39, %v10265_v1 }
0x1705   :  { %v5211_v45 = vadd.f32 %v5210_v35, %v5205_v34  ;;  %v5219_v42 = vmul.f32 %v5205_v34, %v5205_v34 }
0x1706   :  { %v5220_v46 = vmul.f32 %v5206_v41, %v5206_v41 }
0x1707   :  { %v5223_v5 = vadd.f32 %v5222_v43, %v5219_v42  ;;  %v5212_v48 = vadd.f32 %v5211_v45, %v5206_v41 }
0x1708   :  { %v5199_v47 = vpop.f32.mrb[42].mxu1 }
0x1709   :  { %v11070_v44 = vmul.f32 %v5199_v47, %v10272_v10  ;;  %v9114_v51 = vpop.f32.mrb[43].mxu1  ;;  %v5224_v20 = vadd.f32 %v5223_v5, %v5220_v46 }
0x170b   :  { %v5221_v55 = vmul.f32 %v11070_v44, %v11070_v44  ;;  %v5213_v56 = vadd.f32 %v5212_v48, %v11070_v44 }
0x170d   :  { %5214 = vadd.xlane.f32.xlu0 %v5213_v56  ;;  %v5225_v25 = vadd.f32 %v5224_v20, %v5221_v55 }
0x170f   :  { %5226 = vadd.xlane.f32.xlu1 %v5225_v25 }
0x179a   :  { %v5215_v58 = vpop.xlane.xlu0 %5214 }
0x179b   :  { %v5216_v26 = vmul.f32 0.001953125, %v5215_v58 }
0x179c   :  { %v5227_v63 = vpop.xlane.xlu1 %5226 }
0x179d   :  { %v5229_v59 = vmul.f32 %v5216_v26, %v5216_v26  ;;  %v5228_v6 = vmul.f32 0.001953125, %v5227_v63 }
0x179f   :  { %v5230_v62 = vsub.f32 %v5228_v6, %v5229_v59 }
0x17a1   :  { %v5231_v7 = vadd.f32 1e-05, %v5230_v62 }
0x17a3   :  { %9855 = vrsqrt.f32 %v5231_v7 }
0x17ad   :  { %v9856_v9 = vpop.eup %9855 }
0x17ae   :  { %v5233_v22 = vmul.f32 %v9856_v9, %v11078_v8 }
0x17b0   :  { %5238 = vperm.xlu0 %9829, %v5233_v22   ;;  %v5234_v19 = vmul.f32 %v5233_v22, %v5216_v26 }
0x17b2   :  { %v5235_v12 = vsub.f32 %v11084_v23, %v5234_v19 }
0x17b4   :  { %5248 = vperm.xlu1 %9830, %v5235_v12  }
0x182f   :  { %v5239_v14 = vpop.permute.xlu0 %5238 }
0x1830   :  { %v5241_v15 = vmul.f32 %v5239_v14, %v5203_v4  ;;  %v5242_v36 = vmul.f32 %v5239_v14, %v5204_v49  ;;  %v5243_v21 = vmul.f32 %v5239_v14, %v5205_v34  ;;  %v5244_v31 = vmul.f32 %v5239_v14, %v5206_v41 }
0x1831   :  { %v5245_v52 = vmul.f32 %v5239_v14, %v11070_v44 }
0x1833   :  { %v5249_v50 = vpop.permute.xlu1 %5248 }
0x1834   :  { %v5251_v38 = vadd.f32 %v5249_v50, %v5241_v15  ;;  %v5252_v17 = vadd.f32 %v5249_v50, %v5242_v36  ;;  %v5253_v3 = vadd.f32 %v5249_v50, %v5243_v21  ;;  %v5254_v61 = vadd.f32 %v5249_v50, %v5244_v31 }
0x1835   :  { %v5255_v33 = vadd.f32 %v5249_v50, %v5245_v52 }
0x1836   :  { %v5256_v28 = vmul.f32 %v5251_v38, %v10246_v53  ;;  %v5257_v2 = vmul.f32 %v5252_v17, %v10250_v54  ;;  %v5258_v27 = vmul.f32 %v5253_v3, %v10261_v60  ;;  %v5259_v32 = vmul.f32 %v5254_v61, %v10265_v1 }
0x1837   :  { %v5260_v16 = vmul.f32 %v5255_v33, %v10272_v10 }
0x1838   :  { %vm5262_vm7 = vcmp.ge.f32.partialorder %v5256_v28, 0.0  ;;  %v5268_v24 = vmul.f32 %v5267_v37, %v5256_v28  ;;  %v5269_v40 = vmul.f32 %v5267_v37, %v5257_v2  ;;  %vm5263_vm11 = vcmp.ge.f32.partialorder %v5257_v2, 0.0 }
0x1839   :  { %v5270_v29 = vmul.f32 %v5267_v37, %v5258_v27  ;;  %vm5264_vm14 = vcmp.ge.f32.partialorder %v5258_v27, 0.0  ;;  %v5271_v4 = vmul.f32 %v5267_v37, %v5259_v32  ;;  %vm5265_vm1 = vcmp.ge.f32.partialorder %v5259_v32, 0.0 }
0x183a   :  { %v11089_v18 = vsel %vm5262_vm7, %v5256_v28, %v5268_v24  ;;  %v11096_v30 = vsel %vm5263_vm11, %v5257_v2, %v5269_v40  ;;  %v5272_v35 = vmul.f32 %v5267_v37, %v5260_v16  ;;  %vm5266_vm3 = vcmp.ge.f32.partialorder %v5260_v16, 0.0 }
0x183b   :  { %5361 = vrot.lane.b32.xlu0 %v11089_v18, %s9890_s20  ;;  %5283 = vrot.lane.b32.xlu1 %v11089_v18, %s9887_s8  ;;  %v11106_v11 = vsel %vm5264_vm14, %v5258_v27, %v5270_v29  ;;  %v11121_v49 = vsel %vm5265_vm1, %v5259_v32, %v5271_v4  ;;  %vm12333_vm7 = vcmask 908288   ;;  %vm12334_vm11 = vcmask 900096  }
0x183c   :  { %v11145_v34 = vsel %vm5266_vm3, %v5260_v16, %v5272_v35  ;;  %vm12335_vm14 = vmmov %vm12334_vm11 }
0x183d   :  { %vm12336_vm1 = vmmov %vm12333_vm7 }
0x183e   :  { %vm12337_vm3 = vmmov %vm12329_vm4 }
0x183f   :  { %5394 = vrot.lane.b32.xlu0 %v11096_v30, %s9891_s23  ;;  %5285 = vrot.lane.b32.xlu1 %v11096_v30, %s9887_s8 }
0x1843   :  { %5392 = vrot.lane.b32.xlu0 %v11089_v18, %s9891_s23  ;;  %5309 = vrot.lane.b32.xlu1 %v11089_v18, %s12295_s0 }
0x1847   :  { %5422 = vrot.lane.b32.xlu0 %v11106_v11, %s12294_s14  ;;  %5311 = vrot.lane.b32.xlu1 %v11096_v30, %s12295_s0 }
0x184b   :  { %5448 = vrot.lane.b32.xlu0 %v11106_v11, %s12296_s17  ;;  %5335 = vrot.lane.b32.xlu1 %v11089_v18, %s9889_s19 }
0x184f   :  { %5444 = vrot.lane.b32.xlu0 %v11089_v18, %s12296_s17  ;;  %5337 = vrot.lane.b32.xlu1 %v11096_v30, %s9889_s19 }
0x1853   :  { %5289 = vrot.lane.b32.xlu0 %v11121_v49, %s9887_s8  ;;  %5363 = vrot.lane.b32.xlu1 %v11096_v30, %s9890_s20 }
0x1857   :  { %5315 = vrot.lane.b32.xlu0 %v11121_v49, %s12295_s0  ;;  %5396 = vrot.lane.b32.xlu1 %v11106_v11, %s9891_s23 }
0x185b   :  { %5341 = vrot.lane.b32.xlu0 %v11121_v49, %s9889_s19  ;;  %5420 = vrot.lane.b32.xlu1 %v11096_v30, %s12294_s14 }
0x185f   :  { %5367 = vrot.lane.b32.xlu0 %v11121_v49, %s9890_s20  ;;  %5446 = vrot.lane.b32.xlu1 %v11096_v30, %s12296_s17 }
0x1863   :  { %5474 = vrot.lane.b32.xlu0 %v11106_v11, %s9894_s28  ;;  %5418 = vrot.lane.b32.xlu1 %v11089_v18, %s12294_s14 }
0x1867   :  { %5317 = vrot.lane.b32.xlu0 %v11145_v34, %s12295_s0  ;;  %5287 = vrot.lane.b32.xlu1 %v11106_v11, %s9887_s8 }
0x186b   :  { %5398 = vrot.lane.b32.xlu0 %v11121_v49, %s9891_s23  ;;  %5313 = vrot.lane.b32.xlu1 %v11106_v11, %s12295_s0 }
0x186f   :  { %5343 = vrot.lane.b32.xlu0 %v11145_v34, %s9889_s19  ;;  %5339 = vrot.lane.b32.xlu1 %v11106_v11, %s9889_s19 }
0x1873   :  { %5424 = vrot.lane.b32.xlu0 %v11121_v49, %s12294_s14  ;;  %5365 = vrot.lane.b32.xlu1 %v11106_v11, %s9890_s20 }
0x1877   :  { %5450 = vrot.lane.b32.xlu0 %v11121_v49, %s12296_s17  ;;  %5472 = vrot.lane.b32.xlu1 %v11096_v30, %s9894_s28 }
0x187b   :  { %5476 = vrot.lane.b32.xlu0 %v11121_v49, %s9894_s28  ;;  %5291 = vrot.lane.b32.xlu1 %v11145_v34, %s9887_s8 }
0x187f   :  { %5470 = vrot.lane.b32.xlu1 %v11089_v18, %s9894_s28 }
0x1883   :  { %5400 = vrot.lane.b32.xlu1 %v11145_v34, %s9891_s23 }
0x1887   :  { %5369 = vrot.lane.b32.xlu1 %v11145_v34, %s9890_s20 }
0x188b   :  { %5426 = vrot.lane.b32.xlu1 %v11145_v34, %s12294_s14 }
0x188f   :  { %5452 = vrot.lane.b32.xlu1 %v11145_v34, %s12296_s17 }
0x1893   :  { %5478 = vrot.lane.b32.xlu1 %v11145_v34, %s9894_s28 }
0x18ad   :  { %v5362_v39 = vpop.permute.xlu0 %5361  ;;  %v5284_v41 = vpop.permute.xlu1 %5283 }
0x18ae   :  { %5381 = vst.msk [vmem:[#allocation2 + $0xb0] sm:$0xff] %vm202_vm9, %v5362_v39 }
0x18af   :  { %5303 = vst.msk [vmem:[#allocation2 + $0x8] sm:$0xff] %vm12327_vm13, %v5284_v41  ;;  %vm12338_vm13 = vmmov %vm12337_vm3 }
0x18b1   :  { %v5395_v43 = vpop.permute.xlu0 %5394  ;;  %v5286_v45 = vpop.permute.xlu1 %5285 }
0x18b2   :  { %v5293_v48 = vsel %vm12329_vm4, %v5284_v41, %v5286_v45 }
0x18b5   :  { %v5393_v42 = vpop.permute.xlu0 %5392  ;;  %v5310_v5 = vpop.permute.xlu1 %5309  ;;  %v5513_v22 = vld [vmem:[#allocation2 + $0xb0] sm:$0xff] }
0x18b6   :  { %5329 = vst.msk [vmem:[#allocation2 + $0x40] sm:$0xff] %vm12328_vm2, %v5310_v5  ;;  %v5498_v20 = vld [vmem:[#allocation2 + $0x8] sm:$0xff]  ;;  %v5402_v12 = vsel %vm224_vm10, %v5393_v42, %v5395_v43  ;;  %vm12339_vm2 = vmmov %vm12330_vm6 }
0x18b7   :  { %v9483_v38 = vpack.c.bf16 %v5402_v12, %v11089_v18  ;;  %vm12340_vm4 = vmmov %vm12339_vm2 }
0x18b9   :  { %v11186_v46 = vpop.permute.xlu0 %5422  ;;  %v5312_v47 = vpop.permute.xlu1 %5311 }
0x18ba   :  { %v5319_v44 = vsel %vm12330_vm6, %v5310_v5, %v5312_v47  ;;  %vm12341_vm6 = vmmov %vm12332_vm5 }
0x18bb   :  { %v9473_v51 = vpack.c.bf16 %v5319_v44, %v5293_v48 }
0x18bd   :  { %v11190_v55 = vpop.permute.xlu0 %5448  ;;  %v5336_v56 = vpop.permute.xlu1 %5335  ;;  %9474 = vmatprep.subr.bf16.mxu0 %v9473_v51  ;;  %v5503_v25 = vld [vmem:[#allocation2 + $0x40] sm:$0xff] }
0x18be   :  { %5355 = vst.msk [vmem:[#allocation2 + $0x78] sm:$0xff] %vm12331_vm12, %v5336_v56  ;;  %v9475_v57 = vpack.c.bf16 %v5503_v25, %v5498_v20  ;;  %vm12342_vm12 = vmmov %vm12332_vm5 }
0x18c0   :  { %9476 = vmatpush1.bf16.msra.mxu0 %v9475_v57 }
0x18c1   :  { %v5445_v58 = vpop.permute.xlu0 %5444  ;;  %v5338_v26 = vpop.permute.xlu1 %5337 }
0x18c2   :  { %v5345_v62 = vsel %vm12332_vm5, %v5336_v56, %v5338_v26  ;;  %vm12343_vm5 = vcmask 891904  }
0x18c5   :  { %v5290_v63 = vpop.permute.xlu0 %5289  ;;  %v5364_v59 = vpop.permute.xlu1 %5363  ;;  %v5508_v6 = vld [vmem:[#allocation2 + $0x78] sm:$0xff] }
0x18c6   :  { %v5371_v7 = vsel %vm191_vm8, %v5362_v39, %v5364_v59  ;;  %v9479_v19 = vpack.c.bf16 %v5513_v22, %v5508_v6 }
0x18c7   :  { %v9477_v9 = vpack.c.bf16 %v5371_v7, %v5345_v62  ;;  %v8691_v7 = vld [vmem:[%s12266_s1 + $0x40] sm:$0xff] }
0x18c9   :  { %v5316_v14 = vpop.permute.xlu0 %5315  ;;  %v5397_v15 = vpop.permute.xlu1 %5396  ;;  %9478 = vmatprep.subr.bf16.mxu0 %v9477_v9 }
0x18ca   :  { %v5403_v36 = vsel %vm224_vm10, %v5395_v43, %v5397_v15  ;;  %9480 = vmatpush1.bf16.msra.mxu0 %v9479_v19 }
0x18cb   :  { %v9481_v50 = vpack.c.bf16 %v5403_v36, %v11096_v30 }
0x18cd   :  { %v11199_v17 = vpop.permute.xlu0 %5341  ;;  %v5421_v37 = vpop.permute.xlu1 %5420  ;;  %9482 = vmatprep.subr.bf16.mxu0 %v9481_v50 }
0x18ce   :  { %9484 = vmatpush1.bf16.msra.mxu0 %v9483_v38  ;;  %v5429_v21 = vsel %vm12333_vm7, %v5421_v37, %v11186_v46  ;;  %vm12344_vm7 = vmmov %vm12337_vm3 }
0x18d1   :  { %v5368_v28 = vpop.permute.xlu0 %5367  ;;  %v5447_v2 = vpop.permute.xlu1 %5446 }
0x18d2   :  { %v5455_v24 = vsel %vm12334_vm11, %v5447_v2, %v11190_v55  ;;  %v5454_v29 = vsel %vm12335_vm14, %v5445_v58, %v5447_v2  ;;  %vm12345_vm11 = vmmov %vm12339_vm2 }
0x18d3   :  { %v9485_v3 = vpack.c.bf16 %v5455_v24, %v5429_v21  ;;  %vm12346_vm14 = vmmov %vm12343_vm5 }
0x18d5   :  { %v11205_v40 = vpop.permute.xlu0 %5474  ;;  %v5419_v27 = vpop.permute.xlu1 %5418  ;;  %9486 = vmatprep.subr.bf16.mxu0 %v9485_v3 }
0x18d6   :  { %v5428_v31 = vsel %vm12336_vm1, %v5419_v27, %v5421_v37  ;;  %vm12347_vm1 = vmmov %vm12341_vm6 }
0x18d7   :  { %v9487_v61 = vpack.c.bf16 %v5454_v29, %v5428_v31 }
0x18d9   :  { %v5318_v32 = vpop.permute.xlu0 %5317  ;;  %v5288_v4 = vpop.permute.xlu1 %5287  ;;  %9488 = vmatpush1.bf16.msra.mxu0 %v9487_v61 }
0x18da   :  { %v5294_v16 = vsel %vm12337_vm3, %v5286_v45, %v5288_v4  ;;  %v5295_v35 = vsel %vm12338_vm13, %v5288_v4, %v5290_v63  ;;  %vm12348_vm3 = vcmask 908288   ;;  %vm12349_vm13 = vcmask 900096  }
0x18dd   :  { %v5399_v52 = vpop.permute.xlu0 %5398  ;;  %v5314_v33 = vpop.permute.xlu1 %5313 }
0x18de   :  { %v5320_v39 = vsel %vm12339_vm2, %v5312_v47, %v5314_v33  ;;  %v5321_v41 = vsel %vm12340_vm4, %v5314_v33, %v5316_v14  ;;  %v5404_v19 = vsel %vm224_vm10, %v5397_v15, %v5399_v52  ;;  %vm12350_vm2 = vmmov %vm12348_vm3 }
0x18df   :  { %v9489_v43 = vpack.c.bf16 %v5321_v41, %v5295_v35  ;;  %v9491_v42 = vpack.c.bf16 %v5320_v39, %v5294_v16  ;;  %v9499_v50 = vpack.c.bf16 %v5404_v19, %v11106_v11  ;;  %vm12351_vm4 = vmmov %vm12349_vm13 }
0x18e1   :  { %v5344_v5 = vpop.permute.xlu0 %5343  ;;  %v5340_v48 = vpop.permute.xlu1 %5339  ;;  %9490 = vmatprep.subr.bf16.mxu1 %v9489_v43 }
0x18e2   :  { %9492 = vmatpush1.bf16.msra.mxu1 %v9491_v42  ;;  %v5346_v51 = vsel %vm12341_vm6, %v5338_v26, %v5340_v48  ;;  %v5347_v56 = vsel %vm12342_vm12, %v5340_v48, %v11199_v17  ;;  %v5348_v15 = vsel %vm12347_vm1, %v11199_v17, %v5344_v5  ;;  %vm12352_vm6 = vmmov %vm12351_vm4 }
0x18e3   :  { %vm12353_vm12 = vmmov %vm12350_vm2 }
0x18e5   :  { %v5366_v44 = vpop.permute.xlu1 %5365  ;;  %v5425_v36 = vpop.permute.xlu0 %5424 }
0x18e6   :  { %v5372_v45 = vsel %vm191_vm8, %v5364_v59, %v5366_v44  ;;  %v5373_v20 = vsel %vm191_vm8, %v5366_v44, %v5368_v28  ;;  %v5322_v59 = vsel %vm12345_vm11, %v5316_v14, %v5318_v32  ;;  %v5430_v61 = vsel %vm12353_vm12, %v11186_v46, %v5425_v36  ;;  %vm12355_vm11 = vmmov %vm12343_vm5 }
0x18e7   :  { %v9493_v25 = vpack.c.bf16 %v5373_v20, %v5347_v56  ;;  %v9495_v47 = vpack.c.bf16 %v5372_v45, %v5346_v51  ;;  %vm12358_vm12 = vcmask 154624  }
0x18e9   :  { %v5473_v57 = vpop.permute.xlu1 %5472  ;;  %9494 = vmatprep.subr.bf16.mxu1 %v9493_v25  ;;  %v5451_v3 = vpop.permute.xlu0 %5450 }
0x18ea   :  { %v5481_v58 = vsel %vm12343_vm5, %v5473_v57, %v11205_v40  ;;  %9496 = vmatpush1.bf16.msra.mxu1 %v9495_v47  ;;  %v5456_v29 = vsel %vm12349_vm13, %v11190_v55, %v5451_v3 }
0x18eb   :  { %5562 = vmatprep.subr.mxu0 %v5481_v58  ;;  %v9503_v4 = vpack.c.bf16 %v5456_v29, %v5430_v61 }
0x18ed   :  { %v5292_v6 = vpop.permute.xlu1 %5291 }
0x18ee   :  { %v5296_v62 = vsel %vm12344_vm7, %v5290_v63, %v5292_v6  ;;  %vm12354_vm7 = vmmov %vm12343_vm5 }
0x18ef   :  { %v9506_v22 = vpack.c.bf16 %v5322_v59, %v5296_v62 }
0x18f1   :  { %v5471_v26 = vpop.permute.xlu1 %5470 }
0x18f2   :  { %v5480_v9 = vsel %vm12346_vm14, %v5471_v26, %v5473_v57 }
0x18f3   :  { %5563 = vmatpush1.msra.mxu0 %v5480_v9 }
0x18f4   :  { %9505 = vmatprep.subr.bf16.mxu0 %v9895_v13  ;;  %8692 = vmatmul.mubr.msk.f32.vlgmr.msra.gmra.mrb[44].mxu0 %vm372_vm15, %v8691_v7 }
0x18f5   :  { %v5401_v12 = vpop.permute.xlu1 %5400  ;;  %9507 = vmatpush3.bf16.msra.mxu0 %v9506_v22  ;;  %9133 = vmatprep.mubr.msk.f32.mxu0 %vm9896_vm0, %v10698_v0 }
0x18f6   :  { %v5405_v63 = vsel %vm224_vm10, %v5399_v52, %v5401_v12  ;;  %5417 = vst.msk [vmem:[#allocation2 + $0x140] sm:$0xff] %vm224_vm10, %v5401_v12  ;;  %9508 = vmatprep.subr.bf16.mxu0 %v9895_v13  ;;  %v5477_v52 = vpop.permute.xlu0 %5476 }
0x18f7   :  { %v9497_v14 = vpack.c.bf16 %v5405_v63, %v11121_v49  ;;  %v5482_v16 = vsel %vm12355_vm11, %v11205_v40, %v5477_v52  ;;  %vm12361_vm11 = vcmask 138240  }
0x18f9   :  { %v5370_v38 = vpop.permute.xlu1 %5369  ;;  %9498 = vmatprep.subr.bf16.mxu1 %v9497_v14  ;;  %v9959_v14 = vmov 7  }
0x18fa   :  { %v5374_v37 = vsel %vm191_vm8, %v5368_v28, %v5370_v38  ;;  %9500 = vmatpush1.bf16.msra.mxu1 %v9499_v50  ;;  %9831 = vset.pattern.permute.xlu0 %v9959_v14 }
0x18fb   :  { %v9509_v2 = vpack.c.bf16 %v5374_v37, %v5348_v15  ;;  %9832 = vset.pattern.permute.xlu1 %v9959_v14 }
0x18fd   :  { %v5427_v21 = vpop.permute.xlu1 %5426  ;;  %9510 = vmatpush3.bf16.msra.mxu0 %v9509_v2  ;;  %v5527_v24 = vld [vmem:[#allocation2 + $0x140] sm:$0xff] }
0x18fe   :  { %5443 = vst.msk [vmem:[#allocation2 + $0x178] sm:$0xff] %vm12348_vm3, %v5427_v21  ;;  %9511 = vmatprep.subr.bf16.mxu0 %v9895_v13  ;;  %v9512_v27 = vpack.c.bf16 %v5527_v24, %v11145_v34  ;;  %v5431_v17 = vsel %vm12350_vm2, %v5425_v36, %v5427_v21 }
0x1901   :  { %v5453_v31 = vpop.permute.xlu1 %5452  ;;  %9513 = vmatpush3.bf16.msra.mxu0 %v9512_v27 }
0x1902   :  { %v5457_v28 = vsel %vm12351_vm4, %v5451_v3, %v5453_v31  ;;  %5469 = vst.msk [vmem:[#allocation2 + $0x1b0] sm:$0xff] %vm12352_vm6, %v5453_v31  ;;  %9514 = vmatprep.subr.bf16.mxu0 %v9895_v13  ;;  %vm12356_vm4 = vcmask 1047704   ;;  %vm12357_vm6 = vcmask 1047696  }
0x1903   :  { %v9501_v32 = vpack.c.bf16 %v5457_v28, %v5431_v17 }
0x1905   :  { %v5479_v33 = vpop.permute.xlu1 %5478  ;;  %9502 = vmatprep.subr.bf16.mxu1 %v9501_v32  ;;  %v5532_v35 = vld [vmem:[#allocation2 + $0x178] sm:$0xff] }
0x1906   :  { %v5483_v55 = vsel %vm12343_vm5, %v5477_v52, %v5479_v33  ;;  %5495 = vst.msk [vmem:[#allocation2 + $0x1e8] sm:$0xff] %vm12354_vm7, %v5479_v33  ;;  %9504 = vmatpush1.bf16.msra.mxu1 %v9503_v4  ;;  %v5822_v33 = vstv %s8695_s4  ;;  %vm12359_vm5 = vcmask 146432   ;;  %vm12360_vm7 = vcmask 1047688  }
0x1907   :  { %5633 = vmatprep.subr.mxu1 %v5483_v55 }
0x1909   :  { %v5537_v39 = vld [vmem:[#allocation2 + $0x1b0] sm:$0xff] }
0x190a   :  { %v9515_v41 = vpack.c.bf16 %v5537_v39, %v5532_v35  ;;  %5634 = vmatpush1.msra.mxu1 %v5482_v16 }
0x190b   :  { %8693 = vmatmul.mubr.msk.f32.vlgmr.msra.gmra.mrb[44].mxu1 %vm372_vm15, %v8691_v7 }
0x190c   :  { %9516 = vmatpush3.bf16.msra.mxu0 %v9515_v41  ;;  %6165 = vmatprep.mubr.f32.mxu1 %v10698_v0 }
0x190d   :  { %9131 = vmatprep.subr.mxu0 %v10698_v0  ;;  %v5542_v46 = vld [vmem:[#allocation2 + $0x1e8] sm:$0xff] }
0x1910   :  { %9132 = vmatpush3.msra.mxu0 %v5542_v46 }
0x1911   :  { %9134 = vmatmul.mubr.msk.f32.vlgmr.msra.gmra.mrb[46].mxu0 %vm372_vm15, %v8691_v7 }
0x1912   :  { %6236 = vmatprep.mubr.f32.mxu0 %v10698_v0 }
0x19c7   :  { %v5612_v43 = vpop.f32.mrb[44].mxu0 }
0x19c8   :  { %v5614_v42 = vpop.f32.mrb[45].mxu0  ;;  %v5758_v40 = vmul.f32 %v5612_v43, %v10246_v53 }
0x19c9   :  { %v5759_v5 = vmul.f32 %v5614_v42, %v10250_v54 }
0x19ca   :  { %v5772_v48 = vmul.f32 %v5758_v40, %v5758_v40 }
0x19cb   :  { %v5773_v44 = vmul.f32 %v5759_v5, %v5759_v5  ;;  %v5765_v56 = vadd.f32 %v5759_v5, %v5758_v40 }
0x19cd   :  { %v5777_v47 = vadd.f32 %v5773_v44, %v5772_v48 }
0x19de   :  { %v5683_v51 = vpop.f32.mrb[44].mxu1 }
0x19df   :  { %v5760_v45 = vmul.f32 %v5683_v51, %v10261_v60  ;;  %v5685_v20 = vpop.f32.mrb[45].mxu1 }
0x19e0   :  { %v11263_v25 = vmul.f32 %v5685_v20, %v10265_v1 }
0x19e1   :  { %v5766_v57 = vadd.f32 %v5765_v56, %v5760_v45  ;;  %v5774_v58 = vmul.f32 %v5760_v45, %v5760_v45 }
0x19e2   :  { %v5775_v62 = vmul.f32 %v11263_v25, %v11263_v25 }
0x19e3   :  { %v5778_v6 = vadd.f32 %v5777_v47, %v5774_v58  ;;  %v5767_v7 = vadd.f32 %v5766_v57, %v11263_v25 }
0x19e4   :  { %v5754_v26 = vpop.f32.mrb[46].mxu0 }
0x19e5   :  { %v11269_v59 = vmul.f32 %v5754_v26, %v10272_v10  ;;  %v9135_v9 = vpop.f32.mrb[47].mxu0  ;;  %v5779_v12 = vadd.f32 %v5778_v6, %v5775_v62 }
0x19e7   :  { %v5776_v22 = vmul.f32 %v11269_v59, %v11269_v59  ;;  %v5768_v19 = vadd.f32 %v5767_v7, %v11269_v59 }
0x19e9   :  { %5769 = vadd.xlane.f32.xlu0 %v5768_v19  ;;  %v5780_v63 = vadd.f32 %v5779_v12, %v5776_v22 }
0x19eb   :  { %5781 = vadd.xlane.f32.xlu1 %v5780_v63 }
0x1a76   :  { %v5770_v36 = vpop.xlane.xlu0 %5769 }
0x1a77   :  { %v5771_v50 = vmul.f32 0.001953125, %v5770_v36 }
0x1a78   :  { %v5782_v38 = vpop.xlane.xlu1 %5781 }
0x1a79   :  { %v5784_v15 = vmul.f32 %v5771_v50, %v5771_v50  ;;  %v5783_v37 = vmul.f32 0.001953125, %v5782_v38 }
0x1a7b   :  { %v5785_v2 = vsub.f32 %v5783_v37, %v5784_v15 }
0x1a7d   :  { %v5786_v21 = vadd.f32 1e-05, %v5785_v2 }
0x1a7f   :  { %9857 = vrsqrt.f32 %v5786_v21 }
0x1a89   :  { %v9858_v24 = vpop.eup %9857 }
0x1a8a   :  { %v5788_v3 = vmul.f32 %v9858_v24, %v11078_v8 }
0x1a8c   :  { %5793 = vperm.xlu0 %9831, %v5788_v3   ;;  %v5789_v27 = vmul.f32 %v5788_v3, %v5771_v50 }
0x1a8e   :  { %v5790_v29 = vsub.f32 %v11084_v23, %v5789_v27 }
0x1a90   :  { %5803 = vperm.xlu1 %9832, %v5790_v29  }
0x1b0b   :  { %v5794_v31 = vpop.permute.xlu0 %5793 }
0x1b0c   :  { %v5796_v17 = vmul.f32 %v5794_v31, %v5758_v40  ;;  %v5797_v28 = vmul.f32 %v5794_v31, %v5759_v5  ;;  %v5798_v52 = vmul.f32 %v5794_v31, %v5760_v45  ;;  %v5799_v40 = vmul.f32 %v5794_v31, %v11263_v25 }
0x1b0d   :  { %v5800_v5 = vmul.f32 %v5794_v31, %v11269_v59 }
0x1b0f   :  { %v5804_v61 = vpop.permute.xlu1 %5803 }
0x1b10   :  { %v5806_v32 = vadd.f32 %v5804_v61, %v5796_v17  ;;  %v5807_v4 = vadd.f32 %v5804_v61, %v5797_v28  ;;  %v5808_v35 = vadd.f32 %v5804_v61, %v5798_v52  ;;  %v5809_v48 = vadd.f32 %v5804_v61, %v5799_v40 }
0x1b11   :  { %v5810_v44 = vadd.f32 %v5804_v61, %v5800_v5 }
0x1b12   :  { %v5811_v55 = vmul.f32 %v5806_v32, %v10246_v53  ;;  %v5812_v16 = vmul.f32 %v5807_v4, %v10250_v54  ;;  %v5813_v23 = vmul.f32 %v5808_v35, %v10261_v60  ;;  %v5814_v51 = vmul.f32 %v5809_v48, %v10265_v1 }
0x1b13   :  { %v5815_v56 = vmul.f32 %v5810_v44, %v10272_v10 }
0x1b14   :  { %vm5817_vm14 = vcmp.ge.f32.partialorder %v5811_v55, 0.0  ;;  %vm5818_vm1 = vcmp.ge.f32.partialorder %v5812_v16, 0.0  ;;  %v5823_v8 = vmul.f32 %v5822_v33, %v5811_v55  ;;  %v5824_v39 = vmul.f32 %v5822_v33, %v5812_v16 }
0x1b15   :  { %v5825_v43 = vmul.f32 %v5822_v33, %v5813_v23  ;;  %vm5819_vm3 = vcmp.ge.f32.partialorder %v5813_v23, 0.0  ;;  %v5826_v45 = vmul.f32 %v5822_v33, %v5814_v51  ;;  %v5827_v20 = vmul.f32 %v5822_v33, %v5815_v56 }
0x1b16   :  { %v11279_v41 = vsel %vm5817_vm14, %v5811_v55, %v5823_v8  ;;  %v11281_v46 = vsel %vm5818_vm1, %v5812_v16, %v5824_v39  ;;  %vm5820_vm13 = vcmp.ge.f32.partialorder %v5814_v51, 0.0  ;;  %vm5821_vm2 = vcmp.ge.f32.partialorder %v5815_v56, 0.0 }
0x1b17   :  { %5892 = vrot.lane.b32.xlu0 %v11281_v46, %s9889_s19  ;;  %5838 = vrot.lane.b32.xlu1 %v11279_v41, %s9887_s8  ;;  %v11291_v42 = vsel %vm5819_vm3, %v5813_v23, %v5825_v43  ;;  %v11333_v25 = vsel %vm5820_vm13, %v5814_v51, %v5826_v45  ;;  %v11335_v47 = vsel %vm5821_vm2, %v5815_v56, %v5827_v20  ;;  %vm12362_vm14 = vcmask 908288   ;;  %vm12366_vm2 = vmmov %vm12359_vm5 }
0x1b18   :  { %vm12363_vm1 = vcmask 900096   ;;  %vm12364_vm3 = vmmov %vm12362_vm14 }
0x1b19   :  { %vm12365_vm13 = vmmov %vm12363_vm1 }
0x1b1b   :  { %5918 = vrot.lane.b32.xlu0 %v11281_v46, %s9890_s20  ;;  %5840 = vrot.lane.b32.xlu1 %v11281_v46, %s9887_s8 }
0x1b1f   :  { %5951 = vrot.lane.b32.xlu0 %v11291_v42, %s9891_s23  ;;  %5864 = vrot.lane.b32.xlu1 %v11279_v41, %s12295_s0 }
0x1b23   :  { %5975 = vrot.lane.b32.xlu0 %v11281_v46, %s12294_s14  ;;  %5866 = vrot.lane.b32.xlu1 %v11281_v46, %s12295_s0 }
0x1b27   :  { %6001 = vrot.lane.b32.xlu0 %v11281_v46, %s12296_s17  ;;  %5890 = vrot.lane.b32.xlu1 %v11279_v41, %s9889_s19 }
0x1b2b   :  { %5973 = vrot.lane.b32.xlu0 %v11279_v41, %s12294_s14  ;;  %5916 = vrot.lane.b32.xlu1 %v11279_v41, %s9890_s20 }
0x1b2f   :  { %5842 = vrot.lane.b32.xlu0 %v11291_v42, %s9887_s8  ;;  %5949 = vrot.lane.b32.xlu1 %v11281_v46, %s9891_s23 }
0x1b33   :  { %5868 = vrot.lane.b32.xlu0 %v11291_v42, %s12295_s0  ;;  %5947 = vrot.lane.b32.xlu1 %v11279_v41, %s9891_s23 }
0x1b37   :  { %5894 = vrot.lane.b32.xlu0 %v11291_v42, %s9889_s19  ;;  %5977 = vrot.lane.b32.xlu1 %v11291_v42, %s12294_s14 }
0x1b3b   :  { %5920 = vrot.lane.b32.xlu0 %v11291_v42, %s9890_s20  ;;  %6003 = vrot.lane.b32.xlu1 %v11291_v42, %s12296_s17 }
0x1b3f   :  { %6027 = vrot.lane.b32.xlu0 %v11281_v46, %s9894_s28  ;;  %5999 = vrot.lane.b32.xlu1 %v11279_v41, %s12296_s17 }
0x1b43   :  { %5846 = vrot.lane.b32.xlu0 %v11335_v47, %s9887_s8  ;;  %5844 = vrot.lane.b32.xlu1 %v11333_v25, %s9887_s8 }
0x1b47   :  { %6025 = vrot.lane.b32.xlu0 %v11279_v41, %s9894_s28  ;;  %5870 = vrot.lane.b32.xlu1 %v11333_v25, %s12295_s0 }
0x1b4b   :  { %5955 = vrot.lane.b32.xlu0 %v11335_v47, %s9891_s23  ;;  %5896 = vrot.lane.b32.xlu1 %v11333_v25, %s9889_s19 }
0x1b4f   :  { %5924 = vrot.lane.b32.xlu0 %v11335_v47, %s9890_s20  ;;  %5922 = vrot.lane.b32.xlu1 %v11333_v25, %s9890_s20 }
0x1b53   :  { %5981 = vrot.lane.b32.xlu0 %v11335_v47, %s12294_s14  ;;  %6029 = vrot.lane.b32.xlu1 %v11291_v42, %s9894_s28 }
0x1b57   :  { %6007 = vrot.lane.b32.xlu0 %v11335_v47, %s12296_s17  ;;  %5872 = vrot.lane.b32.xlu1 %v11335_v47, %s12295_s0 }
0x1b5b   :  { %6033 = vrot.lane.b32.xlu0 %v11335_v47, %s9894_s28  ;;  %5953 = vrot.lane.b32.xlu1 %v11333_v25, %s9891_s23 }
0x1b5f   :  { %5898 = vrot.lane.b32.xlu1 %v11335_v47, %s9889_s19 }
0x1b63   :  { %5979 = vrot.lane.b32.xlu1 %v11333_v25, %s12294_s14 }
0x1b67   :  { %6005 = vrot.lane.b32.xlu1 %v11333_v25, %s12296_s17 }
0x1b6b   :  { %6031 = vrot.lane.b32.xlu1 %v11333_v25, %s9894_s28 }
0x1b89   :  { %v11373_v57 = vpop.permute.xlu0 %5892  ;;  %v5839_v58 = vpop.permute.xlu1 %5838 }
0x1b8a   :  { %5858 = vst.msk [vmem:[#allocation2 + $0x8] sm:$0xff] %vm12356_vm4, %v5839_v58  ;;  %vm12367_vm4 = vmmov %vm12358_vm12 }
0x1b8d   :  { %v11376_v6 = vpop.permute.xlu0 %5918  ;;  %v5841_v62 = vpop.permute.xlu1 %5840 }
0x1b8e   :  { %v5848_v22 = vsel %vm12358_vm12, %v5839_v58, %v5841_v62  ;;  %vm12369_vm12 = vmmov %vm12367_vm4 }
0x1b91   :  { %v11378_v26 = vpop.permute.xlu0 %5951  ;;  %v5865_v7 = vpop.permute.xlu1 %5864  ;;  %v6053_v36 = vld [vmem:[#allocation2 + $0x8] sm:$0xff] }
0x1b92   :  { %5884 = vst.msk [vmem:[#allocation2 + $0x40] sm:$0xff] %vm12357_vm6, %v5865_v7  ;;  %vm12368_vm6 = vmmov %vm12366_vm2 }
0x1b95   :  { %v5976_v59 = vpop.permute.xlu0 %5975  ;;  %v5867_v9 = vpop.permute.xlu1 %5866 }
0x1b96   :  { %v5874_v19 = vsel %vm12359_vm5, %v5865_v7, %v5867_v9  ;;  %vm12370_vm5 = vmmov %vm12361_vm11 }
0x1b97   :  { %v9517_v12 = vpack.c.bf16 %v5874_v19, %v5848_v22 }
0x1b99   :  { %v6002_v63 = vpop.permute.xlu0 %6001  ;;  %v5891_v14 = vpop.permute.xlu1 %5890  ;;  %9518 = vmatprep.subr.bf16.mxu1 %v9517_v12  ;;  %v6058_v50 = vld [vmem:[#allocation2 + $0x40] sm:$0xff] }
0x1b9a   :  { %5910 = vst.msk [vmem:[#allocation2 + $0x78] sm:$0xff] %vm12360_vm7, %v5891_v14  ;;  %v9519_v38 = vpack.c.bf16 %v6058_v50, %v6053_v36  ;;  %v5900_v2 = vsel %vm12361_vm11, %v5891_v14, %v11373_v57  ;;  %vm12371_vm7 = vmmov %vm12370_vm5 }
0x1b9b   :  { %vm12372_vm11 = vmmov %vm12364_vm3 }
0x1b9c   :  { %9520 = vmatpush1.bf16.msra.mxu1 %v9519_v38 }
0x1b9d   :  { %v5974_v15 = vpop.permute.xlu0 %5973  ;;  %v5917_v37 = vpop.permute.xlu1 %5916 }
0x1b9e   :  { %v5926_v21 = vsel %vm191_vm8, %v5917_v37, %v11376_v6  ;;  %5936 = vst.msk [vmem:[#allocation2 + $0xb0] sm:$0xff] %vm202_vm9, %v5917_v37  ;;  %v5983_v5 = vsel %vm12364_vm3, %v5974_v15, %v5976_v59  ;;  %vm12375_vm3 = vmmov %vm12367_vm4 }
0x1b9f   :  { %v9521_v24 = vpack.c.bf16 %v5926_v21, %v5900_v2 }
0x1ba1   :  { %v5843_v3 = vpop.permute.xlu0 %5842  ;;  %v5950_v27 = vpop.permute.xlu1 %5949  ;;  %9522 = vmatprep.subr.bf16.mxu1 %v9521_v24  ;;  %v6063_v28 = vld [vmem:[#allocation2 + $0x78] sm:$0xff] }
0x1ba2   :  { %v5958_v29 = vsel %vm224_vm10, %v5950_v27, %v11378_v26  ;;  %v5849_v22 = vsel %vm12369_vm12, %v5841_v62, %v5843_v3  ;;  %vm12378_vm12 = vmmov %vm12372_vm11 }
0x1ba3   :  { %v9525_v52 = vpack.c.bf16 %v5958_v29, %v11281_v46 }
0x1ba5   :  { %v5869_v31 = vpop.permute.xlu0 %5868  ;;  %v5948_v17 = vpop.permute.xlu1 %5947  ;;  %v6068_v61 = vld [vmem:[#allocation2 + $0xb0] sm:$0xff] }
0x1ba6   :  { %v9523_v32 = vpack.c.bf16 %v6068_v61, %v6063_v28  ;;  %v5957_v4 = vsel %vm224_vm10, %v5948_v17, %v5950_v27  ;;  %v5875_v56 = vsel %vm12366_vm2, %v5867_v9, %v5869_v31 }
0x1ba7   :  { %v9527_v16 = vpack.c.bf16 %v5957_v4, %v11279_v41  ;;  %v9535_v12 = vpack.c.bf16 %v5875_v56, %v5849_v22 }
0x1ba8   :  { %9524 = vmatpush1.bf16.msra.mxu1 %v9523_v32 }
0x1ba9   :  { %v5895_v33 = vpop.permute.xlu0 %5894  ;;  %v11393_v55 = vpop.permute.xlu1 %5977  ;;  %9526 = vmatprep.subr.bf16.mxu1 %v9525_v52 }
0x1baa   :  { %v5984_v39 = vsel %vm12362_vm14, %v5976_v59, %v11393_v55  ;;  %v5901_v62 = vsel %vm12371_vm7, %v11373_v57, %v5895_v33  ;;  %vm12373_vm14 = vcmask 891904   ;;  %vm12380_vm7 = vmmov %vm12365_vm13 }
0x1bac   :  { %9528 = vmatpush1.bf16.msra.mxu1 %v9527_v16 }
0x1bad   :  { %v5921_v35 = vpop.permute.xlu0 %5920  ;;  %v11396_v8 = vpop.permute.xlu1 %6003 }
0x1bae   :  { %v6010_v23 = vsel %vm12363_vm1, %v6002_v63, %v11396_v8  ;;  %vm12374_vm1 = vmmov %vm12373_vm14 }
0x1baf   :  { %v9529_v43 = vpack.c.bf16 %v6010_v23, %v5984_v39 }
0x1bb1   :  { %v6028_v40 = vpop.permute.xlu0 %6027  ;;  %v6000_v46 = vpop.permute.xlu1 %5999  ;;  %9530 = vmatprep.subr.bf16.mxu1 %v9529_v43 }
0x1bb2   :  { %v6009_v48 = vsel %vm12365_vm13, %v6000_v46, %v6002_v63  ;;  %v5927_v63 = vsel %vm191_vm8, %v11376_v6, %v5921_v35  ;;  %v8696_v6 = vld [vmem:[%s12266_s1 + $0x48] sm:$0xff] }
0x1bb3   :  { %v9531_v44 = vpack.c.bf16 %v6009_v48, %v5983_v5  ;;  %v9539_v37 = vpack.c.bf16 %v5927_v63, %v5901_v62 }
0x1bb5   :  { %v5847_v41 = vpop.permute.xlu0 %5846  ;;  %v5845_v51 = vpop.permute.xlu1 %5844  ;;  %9532 = vmatpush1.bf16.msra.mxu1 %v9531_v44 }
0x1bb6   :  { %v5850_v58 = vsel %vm12367_vm4, %v5843_v3, %v5845_v51  ;;  %v5851_v29 = vsel %vm12375_vm3, %v5845_v51, %v5847_v41  ;;  %vm12376_vm4 = vmmov %vm12374_vm1 }
0x1bb9   :  { %v6026_v45 = vpop.permute.xlu0 %6025  ;;  %v5871_v20 = vpop.permute.xlu1 %5870 }
0x1bba   :  { %v5876_v7 = vsel %vm12368_vm6, %v5869_v31, %v5871_v20  ;;  %v6035_v3 = vsel %vm12374_vm1, %v6026_v45, %v6028_v40  ;;  %vm12377_vm6 = vmmov %vm12370_vm5 }
0x1bbb   :  { %v9533_v19 = vpack.c.bf16 %v5876_v7, %v5850_v58 }
0x1bbd   :  { %v5956_v14 = vpop.permute.xlu0 %5955  ;;  %v5897_v59 = vpop.permute.xlu1 %5896  ;;  %9534 = vmatprep.subr.bf16.mxu0 %v9533_v19 }
0x1bbe   :  { %5972 = vst.msk [vmem:[#allocation2 + $0x140] sm:$0xff] %vm224_vm10, %v5956_v14  ;;  %9536 = vmatpush1.bf16.msra.mxu0 %v9535_v12  ;;  %v5902_v50 = vsel %vm12370_vm5, %v5895_v33, %v5897_v59  ;;  %vm12379_vm5 = vmmov %vm12372_vm11 }
0x1bc1   :  { %v5925_v9 = vpop.permute.xlu0 %5924  ;;  %v5923_v36 = vpop.permute.xlu1 %5922 }
0x1bc2   :  { %v5928_v38 = vsel %vm191_vm8, %v5921_v35, %v5923_v36  ;;  %v5929_v35 = vsel %vm191_vm8, %v5923_v36, %v5925_v9 }
0x1bc3   :  { %v9537_v15 = vpack.c.bf16 %v5928_v38, %v5902_v50 }
0x1bc5   :  { %v5982_v2 = vpop.permute.xlu0 %5981  ;;  %v6030_v21 = vpop.permute.xlu1 %6029  ;;  %9538 = vmatprep.subr.bf16.mxu0 %v9537_v15  ;;  %v6082_v43 = vld [vmem:[#allocation2 + $0x140] sm:$0xff] }
0x1bc6   :  { %5998 = vst.msk [vmem:[#allocation2 + $0x178] sm:$0xff] %vm12372_vm11, %v5982_v2  ;;  %v6036_v24 = vsel %vm12373_vm14, %v6028_v40, %v6030_v21  ;;  %9540 = vmatpush1.bf16.msra.mxu0 %v9539_v37  ;;  %vm12381_vm11 = vmmov %vm12380_vm7 }
0x1bc7   :  { %6117 = vmatprep.subr.mxu1 %v6036_v24  ;;  %vm12382_vm14 = vmmov %vm12374_vm1 }
0x1bc8   :  { %6118 = vmatpush1.msra.mxu1 %v6035_v3 }
0x1bc9   :  { %v6008_v27 = vpop.permute.xlu0 %6007  ;;  %v5873_v57 = vpop.permute.xlu1 %5872  ;;  %9549 = vmatprep.subr.bf16.mxu1 %v9895_v13  ;;  %8697 = vmatmul.mubr.msk.f32.vlgmr.msra.gmra.mrb[46].mxu1 %vm372_vm15, %v8696_v6 }
0x1bca   :  { %6024 = vst.msk [vmem:[#allocation2 + $0x1b0] sm:$0xff] %vm12365_vm13, %v6008_v27  ;;  %v5877_v31 = vsel %vm12366_vm2, %v5871_v20, %v5873_v57  ;;  %9154 = vmatprep.mubr.msk.f32.mxu1 %vm9896_vm0, %v10698_v0 }
0x1bcb   :  { %v9550_v17 = vpack.c.bf16 %v5877_v31, %v5851_v29 }
0x1bcd   :  { %v6034_v28 = vpop.permute.xlu0 %6033  ;;  %v5954_v61 = vpop.permute.xlu1 %5953  ;;  %9551 = vmatpush3.bf16.msra.mxu1 %v9550_v17  ;;  %v6087_v41 = vld [vmem:[#allocation2 + $0x178] sm:$0xff]  ;;  %v9960_v17 = vmov 8  }
0x1bce   :  { %6050 = vst.msk [vmem:[#allocation2 + $0x1e8] sm:$0xff] %vm12376_vm4, %v6034_v28  ;;  %v5959_v32 = vsel %vm224_vm10, %v11378_v26, %v5954_v61  ;;  %v5960_v4 = vsel %vm224_vm10, %v5954_v61, %v5956_v14  ;;  %9552 = vmatprep.subr.bf16.mxu1 %v9895_v13  ;;  %v9556_v26 = vpack.c.bf16 %v6082_v43, %v11335_v47  ;;  %v11477_v43 = vld [vmem:[%s12268_s3] sm:$0xff] }
0x1bcf   :  { %v9541_v52 = vpack.c.bf16 %v5960_v4, %v11333_v25  ;;  %v9543_v33 = vpack.c.bf16 %v5959_v32, %v11291_v42  ;;  %9833 = vset.pattern.permute.xlu0 %v9960_v17  ;;  %9834 = vset.pattern.permute.xlu1 %v9960_v17 }
0x1bd1   :  { %v5899_v16 = vpop.permute.xlu1 %5898  ;;  %9542 = vmatprep.subr.bf16.mxu0 %v9541_v52  ;;  %v6092_v46 = vld [vmem:[#allocation2 + $0x1b0] sm:$0xff] }
0x1bd2   :  { %v5903_v39 = vsel %vm12377_vm6, %v5897_v59, %v5899_v16  ;;  %9544 = vmatpush1.bf16.msra.mxu0 %v9543_v33  ;;  %v9559_v56 = vpack.c.bf16 %v6092_v46, %v6087_v41 }
0x1bd3   :  { %v9553_v23 = vpack.c.bf16 %v5929_v35, %v5903_v39  ;;  %v11471_v35 = vld [vmem:[%s12267_s2] sm:$0xff] }
0x1bd5   :  { %v5980_v40 = vpop.permute.xlu1 %5979  ;;  %9554 = vmatpush3.bf16.msra.mxu1 %v9553_v23 }
0x1bd6   :  { %9555 = vmatprep.subr.bf16.mxu1 %v9895_v13  ;;  %v5985_v42 = vsel %vm12378_vm12, %v11393_v55, %v5980_v40  ;;  %v5986_v25 = vsel %vm12379_vm5, %v5980_v40, %v5982_v2  ;;  %v6097_v55 = vld [vmem:[#allocation2 + $0x1e8] sm:$0xff]  ;;  %vm12383_vm12 = vcmask 1047704   ;;  %vm12384_vm5 = vcmask 1047696  }
0x1bd9   :  { %v6006_v5 = vpop.permute.xlu1 %6005  ;;  %9557 = vmatpush3.bf16.msra.mxu1 %v9556_v26 }
0x1bda   :  { %v6011_v48 = vsel %vm12380_vm7, %v11396_v8, %v6006_v5  ;;  %v6012_v44 = vsel %vm12381_vm11, %v6006_v5, %v6008_v27  ;;  %9558 = vmatprep.subr.bf16.mxu1 %v9895_v13  ;;  %vm12385_vm7 = vcmask 154624   ;;  %vm12386_vm11 = vcmask 146432  }
0x1bdb   :  { %v9545_v51 = vpack.c.bf16 %v6012_v44, %v5986_v25  ;;  %v9547_v45 = vpack.c.bf16 %v6011_v48, %v5985_v42 }
0x1bdd   :  { %v6032_v47 = vpop.permute.xlu1 %6031  ;;  %9546 = vmatprep.subr.bf16.mxu0 %v9545_v51  ;;  %9560 = vmatpush3.bf16.msra.mxu1 %v9559_v56 }
0x1bde   :  { %v6038_v20 = vsel %vm12382_vm14, %v6032_v47, %v6034_v28  ;;  %9548 = vmatpush1.bf16.msra.mxu0 %v9547_v45  ;;  %9152 = vmatprep.subr.mxu1 %v10698_v0  ;;  %v6037_v8 = vsel %vm12374_vm1, %v6030_v21, %v6032_v47  ;;  %vm12387_vm14 = vcmask 1047688   ;;  %vm12388_vm1 = vcmask 138240  }
0x1bdf   :  { %6188 = vmatprep.subr.mxu0 %v6038_v20  ;;  %v6382_v20 = vstv %s8700_s15 }
0x1be1   :  { %9153 = vmatpush3.msra.mxu1 %v6097_v55 }
0x1be2   :  { %6189 = vmatpush1.msra.mxu0 %v6037_v8  ;;  %9155 = vmatmul.mubr.msk.f32.vlgmr.msra.gmra.mrb[48].mxu1 %vm372_vm15, %v8696_v6 }
0x1be3   :  { %8698 = vmatmul.mubr.msk.f32.vlgmr.msra.gmra.mrb[48].mxu0 %vm372_vm15, %v8696_v6  ;;  %6796 = vmatprep.mubr.f32.mxu1 %v10698_v0 }
0x1be4   :  { %6725 = vmatprep.mubr.f32.mxu0 %v10698_v0 }
0x1c9c   :  { %v6167_v58 = vpop.f32.mrb[46].mxu1 }
0x1c9d   :  { %v6169_v7 = vpop.f32.mrb[47].mxu1  ;;  %v6313_v22 = vmul.f32 %v6167_v58, %v10246_v53 }
0x1c9e   :  { %v6314_v19 = vmul.f32 %v6169_v7, %v10250_v54 }
0x1c9f   :  { %v6327_v12 = vmul.f32 %v6313_v22, %v6313_v22 }
0x1ca0   :  { %v6328_v14 = vmul.f32 %v6314_v19, %v6314_v19  ;;  %v6320_v36 = vadd.f32 %v6314_v19, %v6313_v22 }
0x1ca2   :  { %v6332_v37 = vadd.f32 %v6328_v14, %v6327_v12 }
0x1cb5   :  { %v6309_v59 = vpop.f32.mrb[48].mxu1 }
0x1cb6   :  { %v6238_v63 = vpop.f32.mrb[48].mxu0  ;;  %v9156_v9 = vpop.f32.mrb[49].mxu1  ;;  %v11457_v62 = vmul.f32 %v6309_v59, %v10272_v10 }
0x1cb7   :  { %v6315_v50 = vmul.f32 %v6238_v63, %v10261_v60  ;;  %v6240_v38 = vpop.f32.mrb[49].mxu0 }
0x1cb8   :  { %v11460_v15 = vmul.f32 %v6240_v38, %v10265_v1  ;;  %v6331_v27 = vmul.f32 %v11457_v62, %v11457_v62 }
0x1cb9   :  { %v6321_v2 = vadd.f32 %v6320_v36, %v6315_v50  ;;  %v6329_v21 = vmul.f32 %v6315_v50, %v6315_v50 }
0x1cba   :  { %v6330_v24 = vmul.f32 %v11460_v15, %v11460_v15 }
0x1cbb   :  { %v6333_v6 = vadd.f32 %v6332_v37, %v6329_v21  ;;  %v6322_v3 = vadd.f32 %v6321_v2, %v11460_v15 }
0x1cbd   :  { %v6323_v57 = vadd.f32 %v6322_v3, %v11457_v62  ;;  %v6334_v29 = vadd.f32 %v6333_v6, %v6330_v24 }
0x1cbf   :  { %6324 = vadd.xlane.f32.xlu1 %v6323_v57  ;;  %v6335_v31 = vadd.f32 %v6334_v29, %v6331_v27 }
0x1cc1   :  { %6336 = vadd.xlane.f32.xlu0 %v6335_v31 }
0x1d4c   :  { %v6325_v28 = vpop.xlane.xlu1 %6324 }
0x1d4d   :  { %v6326_v61 = vmul.f32 0.001953125, %v6325_v28 }
0x1d4e   :  { %v6337_v32 = vpop.xlane.xlu0 %6336 }
0x1d4f   :  { %v6339_v4 = vmul.f32 %v6326_v61, %v6326_v61  ;;  %v6338_v52 = vmul.f32 0.001953125, %v6337_v32 }
0x1d51   :  { %v6340_v33 = vsub.f32 %v6338_v52, %v6339_v4 }
0x1d53   :  { %v6341_v16 = vadd.f32 1e-05, %v6340_v33 }
0x1d55   :  { %9859 = vrsqrt.f32 %v6341_v16 }
0x1d5f   :  { %v9860_v39 = vpop.eup %9859 }
0x1d60   :  { %v6343_v23 = vmul.f32 %v9860_v39, %v11471_v35 }
0x1d62   :  { %6348 = vperm.xlu0 %9833, %v6343_v23   ;;  %v6344_v40 = vmul.f32 %v6343_v23, %v6326_v61 }
0x1d64   :  { %v6345_v26 = vsub.f32 %v11477_v43, %v6344_v40 }
0x1d66   :  { %6358 = vperm.xlu1 %9834, %v6345_v26  }
0x1de1   :  { %v6349_v46 = vpop.permute.xlu0 %6348 }
0x1de2   :  { %v6351_v5 = vmul.f32 %v6349_v46, %v6313_v22  ;;  %v6352_v42 = vmul.f32 %v6349_v46, %v6314_v19  ;;  %v6353_v25 = vmul.f32 %v6349_v46, %v6315_v50  ;;  %v6354_v63 = vmul.f32 %v6349_v46, %v11460_v15 }
0x1de5   :  { %v6359_v48 = vpop.permute.xlu1 %6358 }
0x1de6   :  { %v6361_v44 = vadd.f32 %v6359_v48, %v6351_v5  ;;  %v6362_v41 = vadd.f32 %v6359_v48, %v6352_v42  ;;  %v6363_v51 = vadd.f32 %v6359_v48, %v6353_v25  ;;  %v6364_v9 = vadd.f32 %v6359_v48, %v6354_v63 }
0x1de8   :  { %v6366_v56 = vmul.f32 %v6361_v44, %v10246_v53  ;;  %v6367_v45 = vmul.f32 %v6362_v41, %v10250_v54  ;;  %v6368_v47 = vmul.f32 %v6363_v51, %v10261_v60  ;;  %v6369_v50 = vmul.f32 %v6364_v9, %v10265_v1 }
0x1dea   :  { %v6371_v55 = vadd.f32 %v6366_v56, %v11089_v18  ;;  %v6372_v8 = vadd.f32 %v6367_v45, %v11096_v30  ;;  %v6373_v58 = vadd.f32 %v6368_v47, %v11106_v11  ;;  %v6355_v30 = vmul.f32 %v6349_v46, %v11457_v62 }
0x1deb   :  { %v6374_v62 = vadd.f32 %v6369_v50, %v11121_v49 }
0x1dec   :  { %vm6377_vm3 = vcmp.ge.f32.partialorder %v6371_v55, 0.0  ;;  %vm6378_vm13 = vcmp.ge.f32.partialorder %v6372_v8, 0.0  ;;  %v6383_v7 = vmul.f32 %v6382_v20, %v6371_v55  ;;  %v6384_v22 = vmul.f32 %v6382_v20, %v6372_v8 }
0x1ded   :  { %v6385_v19 = vmul.f32 %v6382_v20, %v6373_v58  ;;  %vm6379_vm2 = vcmp.ge.f32.partialorder %v6373_v58, 0.0  ;;  %v6365_v11 = vadd.f32 %v6359_v48, %v6355_v30  ;;  %vm6380_vm6 = vcmp.ge.f32.partialorder %v6374_v62, 0.0 }
0x1dee   :  { %v11486_v12 = vsel %vm6377_vm3, %v6371_v55, %v6383_v7  ;;  %v11488_v14 = vsel %vm6378_vm13, %v6372_v8, %v6384_v22  ;;  %vm12389_vm3 = vcmask 908288   ;;  %vm12390_vm13 = vcmask 900096  }
0x1def   :  { %6478 = vrot.lane.b32.xlu0 %v11488_v14, %s9890_s20  ;;  %6398 = vrot.lane.b32.xlu1 %v11486_v12, %s9887_s8  ;;  %v11494_v18 = vsel %vm6379_vm2, %v6373_v58, %v6385_v19  ;;  %v6370_v59 = vmul.f32 %v6365_v11, %v10272_v10  ;;  %vm12391_vm2 = vmmov %vm12389_vm3 }
0x1df1   :  { %v6375_v36 = vadd.f32 %v6370_v59, %v11145_v34  ;;  %v6386_v34 = vmul.f32 %v6382_v20, %v6374_v62 }
0x1df3   :  { %6511 = vrot.lane.b32.xlu0 %v11494_v18, %s9891_s23  ;;  %6400 = vrot.lane.b32.xlu1 %v11488_v14, %s9887_s8  ;;  %v6387_v38 = vmul.f32 %v6382_v20, %v6375_v36  ;;  %vm6381_vm4 = vcmp.ge.f32.partialorder %v6375_v36, 0.0  ;;  %v11548_v37 = vsel %vm6380_vm6, %v6374_v62, %v6386_v34  ;;  %vm12393_vm6 = vmmov %vm12386_vm11 }
0x1df5   :  { %v11538_v15 = vsel %vm6381_vm4, %v6375_v36, %v6387_v38  ;;  %vm12392_vm4 = vmmov %vm12390_vm13 }
0x1df7   :  { %6535 = vrot.lane.b32.xlu0 %v11488_v14, %s12294_s14  ;;  %6424 = vrot.lane.b32.xlu1 %v11486_v12, %s12295_s0 }
0x1dfb   :  { %6561 = vrot.lane.b32.xlu0 %v11488_v14, %s12296_s17  ;;  %6426 = vrot.lane.b32.xlu1 %v11488_v14, %s12295_s0 }
0x1dff   :  { %6533 = vrot.lane.b32.xlu0 %v11486_v12, %s12294_s14  ;;  %6450 = vrot.lane.b32.xlu1 %v11486_v12, %s9889_s19 }
0x1e03   :  { %6402 = vrot.lane.b32.xlu0 %v11494_v18, %s9887_s8  ;;  %6452 = vrot.lane.b32.xlu1 %v11488_v14, %s9889_s19 }
0x1e07   :  { %6428 = vrot.lane.b32.xlu0 %v11494_v18, %s12295_s0  ;;  %6476 = vrot.lane.b32.xlu1 %v11486_v12, %s9890_s20 }
0x1e0b   :  { %6454 = vrot.lane.b32.xlu0 %v11494_v18, %s9889_s19  ;;  %6509 = vrot.lane.b32.xlu1 %v11488_v14, %s9891_s23 }
0x1e0f   :  { %6480 = vrot.lane.b32.xlu0 %v11494_v18, %s9890_s20  ;;  %6507 = vrot.lane.b32.xlu1 %v11486_v12, %s9891_s23 }
0x1e13   :  { %6587 = vrot.lane.b32.xlu0 %v11488_v14, %s9894_s28  ;;  %6537 = vrot.lane.b32.xlu1 %v11494_v18, %s12294_s14 }
0x1e17   :  { %6406 = vrot.lane.b32.xlu0 %v11538_v15, %s9887_s8  ;;  %6563 = vrot.lane.b32.xlu1 %v11494_v18, %s12296_s17 }
0x1e1b   :  { %6585 = vrot.lane.b32.xlu0 %v11486_v12, %s9894_s28  ;;  %6559 = vrot.lane.b32.xlu1 %v11486_v12, %s12296_s17 }
0x1e1f   :  { %6515 = vrot.lane.b32.xlu0 %v11538_v15, %s9891_s23  ;;  %6404 = vrot.lane.b32.xlu1 %v11548_v37, %s9887_s8 }
0x1e23   :  { %6484 = vrot.lane.b32.xlu0 %v11538_v15, %s9890_s20  ;;  %6430 = vrot.lane.b32.xlu1 %v11548_v37, %s12295_s0 }
0x1e27   :  { %6541 = vrot.lane.b32.xlu0 %v11538_v15, %s12294_s14  ;;  %6456 = vrot.lane.b32.xlu1 %v11548_v37, %s9889_s19 }
0x1e2b   :  { %6567 = vrot.lane.b32.xlu0 %v11538_v15, %s12296_s17  ;;  %6482 = vrot.lane.b32.xlu1 %v11548_v37, %s9890_s20 }
0x1e2f   :  { %6593 = vrot.lane.b32.xlu0 %v11538_v15, %s9894_s28  ;;  %6589 = vrot.lane.b32.xlu1 %v11494_v18, %s9894_s28 }
0x1e33   :  { %6432 = vrot.lane.b32.xlu1 %v11538_v15, %s12295_s0 }
0x1e37   :  { %6513 = vrot.lane.b32.xlu1 %v11548_v37, %s9891_s23 }
0x1e3b   :  { %6458 = vrot.lane.b32.xlu1 %v11538_v15, %s9889_s19 }
0x1e3f   :  { %6539 = vrot.lane.b32.xlu1 %v11548_v37, %s12294_s14 }
0x1e43   :  { %6565 = vrot.lane.b32.xlu1 %v11548_v37, %s12296_s17 }
0x1e47   :  { %6591 = vrot.lane.b32.xlu1 %v11548_v37, %s9894_s28 }
0x1e61   :  { %v11582_v49 = vpop.permute.xlu0 %6478  ;;  %v6399_v2 = vpop.permute.xlu1 %6398 }
0x1e62   :  { %6418 = vst.msk [vmem:[#allocation2 + $0x8] sm:$0xff] %vm12383_vm12, %v6399_v2  ;;  %vm12394_vm12 = vmmov %vm12385_vm7 }
0x1e65   :  { %v11585_v21 = vpop.permute.xlu0 %6511  ;;  %v11587_v24 = vpop.permute.xlu1 %6400 }
0x1e66   :  { %v6408_v29 = vsel %vm12385_vm7, %v6399_v2, %v11587_v24 }
0x1e69   :  { %v6536_v6 = vpop.permute.xlu0 %6535  ;;  %v6425_v3 = vpop.permute.xlu1 %6424  ;;  %v6613_v32 = vld [vmem:[#allocation2 + $0x8] sm:$0xff] }
0x1e6a   :  { %6444 = vst.msk [vmem:[#allocation2 + $0x40] sm:$0xff] %vm12384_vm5, %v6425_v3  ;;  %vm12395_vm5 = vmmov %vm12393_vm6 }
0x1e6d   :  { %v6562_v27 = vpop.permute.xlu0 %6561  ;;  %v6427_v57 = vpop.permute.xlu1 %6426 }
0x1e6e   :  { %v6434_v31 = vsel %vm12386_vm11, %v6425_v3, %v6427_v57  ;;  %vm12396_vm11 = vmmov %vm12391_vm2 }
0x1e6f   :  { %v9561_v17 = vpack.c.bf16 %v6434_v31, %v6408_v29 }
0x1e71   :  { %v6534_v28 = vpop.permute.xlu0 %6533  ;;  %v6451_v61 = vpop.permute.xlu1 %6450  ;;  %9562 = vmatprep.subr.bf16.mxu0 %v9561_v17  ;;  %v6618_v4 = vld [vmem:[#allocation2 + $0x40] sm:$0xff] }
0x1e72   :  { %6470 = vst.msk [vmem:[#allocation2 + $0x78] sm:$0xff] %vm12387_vm14, %v6451_v61  ;;  %v9563_v52 = vpack.c.bf16 %v6618_v4, %v6613_v32  ;;  %v6543_v63 = vsel %vm12391_vm2, %v6534_v28, %v6536_v6  ;;  %vm12397_vm14 = vmmov %vm12388_vm1 }
0x1e74   :  { %9564 = vmatpush1.bf16.msra.mxu0 %v9563_v52 }
0x1e75   :  { %v6403_v33 = vpop.permute.xlu0 %6402  ;;  %v6453_v16 = vpop.permute.xlu1 %6452 }
0x1e76   :  { %v6460_v40 = vsel %vm12388_vm1, %v6451_v61, %v6453_v16  ;;  %v6409_v31 = vsel %vm12385_vm7, %v11587_v24, %v6403_v33  ;;  %vm12398_vm1 = vmmov %vm12392_vm4 }
0x1e79   :  { %v6429_v39 = vpop.permute.xlu0 %6428  ;;  %v6477_v23 = vpop.permute.xlu1 %6476  ;;  %v6623_v41 = vld [vmem:[#allocation2 + $0x78] sm:$0xff] }
0x1e7a   :  { %v6486_v26 = vsel %vm191_vm8, %v6477_v23, %v11582_v49  ;;  %6496 = vst.msk [vmem:[#allocation2 + $0xb0] sm:$0xff] %vm202_vm9, %v6477_v23  ;;  %v6435_v62 = vsel %vm12393_vm6, %v6427_v57, %v6429_v39  ;;  %vm12403_vm6 = vmmov %vm12385_vm7 }
0x1e7b   :  { %v9565_v46 = vpack.c.bf16 %v6486_v26, %v6460_v40  ;;  %v9579_v17 = vpack.c.bf16 %v6435_v62, %v6409_v31  ;;  %vm12406_vm7 = vmmov %vm12396_vm11 }
0x1e7d   :  { %v6455_v5 = vpop.permute.xlu0 %6454  ;;  %v6510_v42 = vpop.permute.xlu1 %6509  ;;  %9566 = vmatprep.subr.bf16.mxu0 %v9565_v46 }
0x1e7e   :  { %v6518_v25 = vsel %vm224_vm10, %v6510_v42, %v11585_v21 }
0x1e7f   :  { %v9569_v47 = vpack.c.bf16 %v6518_v25, %v11488_v14 }
0x1e81   :  { %v6481_v48 = vpop.permute.xlu0 %6480  ;;  %v6508_v44 = vpop.permute.xlu1 %6507  ;;  %v6628_v51 = vld [vmem:[#allocation2 + $0xb0] sm:$0xff] }
0x1e82   :  { %v9567_v56 = vpack.c.bf16 %v6628_v51, %v6623_v41  ;;  %v6517_v45 = vsel %vm224_vm10, %v6508_v44, %v6510_v42  ;;  %v6487_v57 = vsel %vm191_vm8, %v11582_v49, %v6481_v48  ;;  %v8701_v49 = vld [vmem:[%s12266_s1 + $0x50] sm:$0xff] }
0x1e83   :  { %v9571_v8 = vpack.c.bf16 %v6517_v45, %v11486_v12 }
0x1e84   :  { %9568 = vmatpush1.bf16.msra.mxu0 %v9567_v56 }
0x1e85   :  { %v6588_v20 = vpop.permute.xlu0 %6587  ;;  %v11602_v55 = vpop.permute.xlu1 %6537  ;;  %9570 = vmatprep.subr.bf16.mxu0 %v9569_v47 }
0x1e86   :  { %v6544_v22 = vsel %vm12389_vm3, %v6536_v6, %v11602_v55  ;;  %vm12399_vm3 = vmmov %vm12397_vm14 }
0x1e87   :  { %v6461_v24 = vsel %vm12399_vm3, %v6453_v16, %v6455_v5 }
0x1e88   :  { %9572 = vmatpush1.bf16.msra.mxu0 %v9571_v8 }
0x1e89   :  { %v6407_v58 = vpop.permute.xlu0 %6406  ;;  %v11605_v7 = vpop.permute.xlu1 %6563 }
0x1e8a   :  { %v6570_v19 = vsel %vm12390_vm13, %v6562_v27, %v11605_v7  ;;  %vm12400_vm13 = vcmask 891904  }
0x1e8b   :  { %v9573_v30 = vpack.c.bf16 %v6570_v19, %v6544_v22  ;;  %vm12401_vm2 = vmmov %vm12400_vm13 }
0x1e8d   :  { %v6586_v11 = vpop.permute.xlu0 %6585  ;;  %v6560_v59 = vpop.permute.xlu1 %6559  ;;  %9574 = vmatprep.subr.bf16.mxu0 %v9573_v30 }
0x1e8e   :  { %v6569_v9 = vsel %vm12392_vm4, %v6560_v59, %v6562_v27  ;;  %vm12402_vm4 = vmmov %vm12401_vm2 }
0x1e8f   :  { %v9575_v36 = vpack.c.bf16 %v6569_v9, %v6543_v63  ;;  %v6595_v46 = vsel %vm12402_vm4, %v6586_v11, %v6588_v20 }
0x1e91   :  { %v6516_v50 = vpop.permute.xlu0 %6515  ;;  %v6405_v38 = vpop.permute.xlu1 %6404  ;;  %9576 = vmatpush1.bf16.msra.mxu0 %v9575_v36 }
0x1e92   :  { %6532 = vst.msk [vmem:[#allocation2 + $0x140] sm:$0xff] %vm224_vm10, %v6516_v50  ;;  %v6410_v3 = vsel %vm12394_vm12, %v6403_v33, %v6405_v38  ;;  %v6411_v16 = vsel %vm12403_vm6, %v6405_v38, %v6407_v58  ;;  %vm12404_vm12 = vmmov %vm12395_vm5 }
0x1e95   :  { %v6485_v34 = vpop.permute.xlu0 %6484  ;;  %v6431_v2 = vpop.permute.xlu1 %6430 }
0x1e96   :  { %v6436_v29 = vsel %vm12395_vm5, %v6429_v39, %v6431_v2  ;;  %v9583_v39 = vpack.c.bf16 %v6487_v57, %v6461_v24  ;;  %vm12405_vm5 = vmmov %vm12399_vm3 }
0x1e97   :  { %v9577_v6 = vpack.c.bf16 %v6436_v29, %v6410_v3  ;;  %vm12409_vm3 = vmmov %vm12401_vm2 }
0x1e99   :  { %v6542_v27 = vpop.permute.xlu0 %6541  ;;  %v6457_v28 = vpop.permute.xlu1 %6456  ;;  %9578 = vmatprep.subr.bf16.mxu1 %v9577_v6  ;;  %v6642_v58 = vld [vmem:[#allocation2 + $0x140] sm:$0xff] }
0x1e9a   :  { %6558 = vst.msk [vmem:[#allocation2 + $0x178] sm:$0xff] %vm12396_vm11, %v6542_v27  ;;  %9580 = vmatpush1.bf16.msra.mxu1 %v9579_v17  ;;  %v6462_v4 = vsel %vm12397_vm14, %v6455_v5, %v6457_v28  ;;  %vm12407_vm11 = vmmov %vm12406_vm7 }
0x1e9b   :  { %vm12408_vm14 = vmmov %vm12398_vm1 }
0x1e9d   :  { %v6568_v61 = vpop.permute.xlu0 %6567  ;;  %v6483_v32 = vpop.permute.xlu1 %6482 }
0x1e9e   :  { %6584 = vst.msk [vmem:[#allocation2 + $0x1b0] sm:$0xff] %vm12398_vm1, %v6568_v61  ;;  %v6488_v52 = vsel %vm191_vm8, %v6481_v48, %v6483_v32  ;;  %v6489_v47 = vsel %vm191_vm8, %v6483_v32, %v6485_v34 }
0x1e9f   :  { %v9581_v33 = vpack.c.bf16 %v6488_v52, %v6462_v4 }
0x1ea1   :  { %v6594_v23 = vpop.permute.xlu0 %6593  ;;  %v6590_v40 = vpop.permute.xlu1 %6589  ;;  %9582 = vmatprep.subr.bf16.mxu1 %v9581_v33  ;;  %v6647_v36 = vld [vmem:[#allocation2 + $0x178] sm:$0xff] }
0x1ea2   :  { %6610 = vst.msk [vmem:[#allocation2 + $0x1e8] sm:$0xff] %vm12400_vm13, %v6594_v23  ;;  %v6596_v26 = vsel %vm12401_vm2, %v6588_v20, %v6590_v40  ;;  %9584 = vmatpush1.bf16.msra.mxu1 %v9583_v39  ;;  %vm12410_vm13 = vmmov %vm12401_vm2 }
0x1ea3   :  { %6677 = vmatprep.subr.mxu0 %v6596_v26 }
0x1ea4   :  { %6678 = vmatpush1.msra.mxu0 %v6595_v46 }
0x1ea5   :  { %v6433_v42 = vpop.permute.xlu1 %6432  ;;  %9593 = vmatprep.subr.bf16.mxu0 %v9895_v13  ;;  %8702 = vmatmul.mubr.msk.f32.vlgmr.msra.gmra.mrb[50].mxu0 %vm372_vm15, %v8701_v49  ;;  %v6652_v19 = vld [vmem:[#allocation2 + $0x1b0] sm:$0xff] }
0x1ea6   :  { %v6437_v5 = vsel %vm12404_vm12, %v6431_v2, %v6433_v42  ;;  %9175 = vmatprep.mubr.msk.f32.mxu0 %vm9896_vm0, %v10698_v0  ;;  %v9603_v38 = vpack.c.bf16 %v6652_v19, %v6647_v36  ;;  %v6937_v36 = vstv %s8705_s24 }
0x1ea7   :  { %v9594_v25 = vpack.c.bf16 %v6437_v5, %v6411_v16 }
0x1ea9   :  { %v6514_v48 = vpop.permute.xlu1 %6513  ;;  %9595 = vmatpush3.bf16.msra.mxu0 %v9594_v25 }
0x1eaa   :  { %v6519_v44 = vsel %vm224_vm10, %v11585_v21, %v6514_v48  ;;  %v6520_v41 = vsel %vm224_vm10, %v6514_v48, %v6516_v50  ;;  %9596 = vmatprep.subr.bf16.mxu0 %v9895_v13  ;;  %v9600_v21 = vpack.c.bf16 %v6642_v58, %v11538_v15  ;;  %v9961_v48 = vmov 9  }
0x1eab   :  { %v9585_v51 = vpack.c.bf16 %v6520_v41, %v11548_v37  ;;  %v9587_v56 = vpack.c.bf16 %v6519_v44, %v11494_v18  ;;  %9835 = vset.pattern.permute.xlu0 %v9961_v48  ;;  %9836 = vset.pattern.permute.xlu1 %v9961_v48 }
0x1ead   :  { %v6459_v45 = vpop.permute.xlu1 %6458  ;;  %9586 = vmatprep.subr.bf16.mxu1 %v9585_v51 }
0x1eae   :  { %v6463_v20 = vsel %vm12405_vm5, %v6457_v28, %v6459_v45  ;;  %9588 = vmatpush1.bf16.msra.mxu1 %v9587_v56 }
0x1eaf   :  { %v9597_v8 = vpack.c.bf16 %v6489_v47, %v6463_v20 }
0x1eb1   :  { %v6540_v22 = vpop.permute.xlu1 %6539  ;;  %9598 = vmatpush3.bf16.msra.mxu0 %v9597_v8 }
0x1eb2   :  { %9599 = vmatprep.subr.bf16.mxu0 %v9895_v13  ;;  %v6545_v11 = vsel %vm12406_vm7, %v11602_v55, %v6540_v22  ;;  %v6546_v59 = vsel %vm12407_vm11, %v6540_v22, %v6542_v27  ;;  %v6657_v55 = vld [vmem:[#allocation2 + $0x1e8] sm:$0xff]  ;;  %vm12411_vm7 = vcmask 1047704   ;;  %vm12412_vm11 = vcmask 1047696  }
0x1eb5   :  { %v6566_v30 = vpop.permute.xlu1 %6565  ;;  %9601 = vmatpush3.bf16.msra.mxu0 %v9600_v21 }
0x1eb6   :  { %v6571_v63 = vsel %vm12408_vm14, %v11605_v7, %v6566_v30  ;;  %v6572_v9 = vsel %vm12398_vm1, %v6566_v30, %v6568_v61  ;;  %9602 = vmatprep.subr.bf16.mxu0 %v9895_v13  ;;  %vm12413_vm14 = vcmask 154624   ;;  %vm12414_vm1 = vcmask 146432  }
0x1eb7   :  { %v9589_v50 = vpack.c.bf16 %v6572_v9, %v6546_v59  ;;  %v9591_v62 = vpack.c.bf16 %v6571_v63, %v6545_v11 }
0x1eb9   :  { %v6592_v34 = vpop.permute.xlu1 %6591  ;;  %9590 = vmatprep.subr.bf16.mxu1 %v9589_v50  ;;  %9604 = vmatpush3.bf16.msra.mxu0 %v9603_v38 }
0x1eba   :  { %v6598_v2 = vsel %vm12409_vm3, %v6592_v34, %v6594_v23  ;;  %9592 = vmatpush1.bf16.msra.mxu1 %v9591_v62  ;;  %9173 = vmatprep.subr.mxu0 %v10698_v0  ;;  %v6597_v7 = vsel %vm12410_vm13, %v6590_v40, %v6592_v34  ;;  %vm12415_vm3 = vcmask 1047688   ;;  %vm12416_vm13 = vcmask 138240  }
0x1ebb   :  { %6748 = vmatprep.subr.mxu1 %v6598_v2 }
0x1ebd   :  { %9174 = vmatpush3.msra.mxu0 %v6657_v55 }
0x1ebe   :  { %6749 = vmatpush1.msra.mxu1 %v6597_v7  ;;  %9176 = vmatmul.mubr.msk.f32.vlgmr.msra.gmra.mrb[52].mxu0 %vm372_vm15, %v8701_v49 }
0x1ebf   :  { %8703 = vmatmul.mubr.msk.f32.vlgmr.msra.gmra.mrb[50].mxu1 %vm372_vm15, %v8701_v49  ;;  %7351 = vmatprep.mubr.f32.mxu0 %v10698_v0 }
0x1ec0   :  { %7280 = vmatprep.mubr.f32.mxu1 %v10698_v0 }
0x1f78   :  { %v6727_v3 = vpop.f32.mrb[50].mxu0 }
0x1f79   :  { %v6729_v29 = vpop.f32.mrb[51].mxu0  ;;  %v6873_v31 = vmul.f32 %v6727_v3, %v10246_v53 }
0x1f7a   :  { %v6874_v6 = vmul.f32 %v6729_v29, %v10250_v54 }
0x1f7b   :  { %v6887_v17 = vmul.f32 %v6873_v31, %v6873_v31 }
0x1f7c   :  { %v6888_v27 = vmul.f32 %v6874_v6, %v6874_v6  ;;  %v6880_v32 = vadd.f32 %v6874_v6, %v6873_v31 }
0x1f7e   :  { %v6892_v39 = vadd.f32 %v6888_v27, %v6887_v17 }
0x1f91   :  { %v6869_v28 = vpop.f32.mrb[52].mxu0 }
0x1f92   :  { %v6798_v57 = vpop.f32.mrb[50].mxu1  ;;  %v9177_v61 = vpop.f32.mrb[53].mxu0  ;;  %v11666_v24 = vmul.f32 %v6869_v28, %v10272_v10 }
0x1f93   :  { %v6875_v4 = vmul.f32 %v6798_v57, %v10261_v60  ;;  %v6800_v52 = vpop.f32.mrb[51].mxu1 }
0x1f94   :  { %v6876_v33 = vmul.f32 %v6800_v52, %v10265_v1  ;;  %v6891_v42 = vmul.f32 %v11666_v24, %v11666_v24 }
0x1f95   :  { %v6881_v23 = vadd.f32 %v6880_v32, %v6875_v4  ;;  %v6889_v40 = vmul.f32 %v6875_v4, %v6875_v4 }
0x1f96   :  { %v6890_v26 = vmul.f32 %v6876_v33, %v6876_v33 }
0x1f97   :  { %v6893_v49 = vadd.f32 %v6892_v39, %v6889_v40  ;;  %v6882_v46 = vadd.f32 %v6881_v23, %v6876_v33 }
0x1f99   :  { %v6883_v16 = vadd.f32 %v6882_v46, %v11666_v24  ;;  %v6894_v5 = vadd.f32 %v6893_v49, %v6890_v26 }
0x1f9b   :  { %6884 = vadd.xlane.f32.xlu1 %v6883_v16  ;;  %v6895_v25 = vadd.f32 %v6894_v5, %v6891_v42 }
0x1f9d   :  { %6896 = vadd.xlane.f32.xlu0 %v6895_v25 }
0x2028   :  { %v6885_v44 = vpop.xlane.xlu1 %6884 }
0x2029   :  { %v6886_v41 = vmul.f32 0.001953125, %v6885_v44 }
0x202a   :  { %v6897_v51 = vpop.xlane.xlu0 %6896 }
0x202b   :  { %v6899_v56 = vmul.f32 %v6886_v41, %v6886_v41  ;;  %v6898_v45 = vmul.f32 0.001953125, %v6897_v51 }
0x202d   :  { %v6900_v47 = vsub.f32 %v6898_v45, %v6899_v56 }
0x202f   :  { %v6901_v20 = vadd.f32 1e-05, %v6900_v47 }
0x2031   :  { %9861 = vrsqrt.f32 %v6901_v20 }
0x203b   :  { %v9862_v8 = vpop.eup %9861 }
0x203c   :  { %v6903_v58 = vmul.f32 %v9862_v8, %v11471_v35 }
0x203e   :  { %6908 = vperm.xlu0 %9835, %v6903_v58   ;;  %v6904_v22 = vmul.f32 %v6903_v58, %v6886_v41 }
0x2040   :  { %v6905_v21 = vsub.f32 %v11477_v43, %v6904_v22 }
0x2042   :  { %6918 = vperm.xlu1 %9836, %v6905_v21  }
0x20bd   :  { %v6909_v19 = vpop.permute.xlu0 %6908 }
0x20be   :  { %v6911_v30 = vmul.f32 %v6909_v19, %v6873_v31  ;;  %v6912_v11 = vmul.f32 %v6909_v19, %v6874_v6  ;;  %v6913_v62 = vmul.f32 %v6909_v19, %v6875_v4  ;;  %v6914_v29 = vmul.f32 %v6909_v19, %v6876_v33 }
0x20bf   :  { %v6915_v57 = vmul.f32 %v6909_v19, %v11666_v24 }
0x20c1   :  { %v6919_v59 = vpop.permute.xlu1 %6918 }
0x20c2   :  { %v6921_v63 = vadd.f32 %v6919_v59, %v6911_v30  ;;  %v6922_v9 = vadd.f32 %v6919_v59, %v6912_v11  ;;  %v6923_v34 = vadd.f32 %v6919_v59, %v6913_v62  ;;  %v6924_v31 = vadd.f32 %v6919_v59, %v6914_v29 }
0x20c3   :  { %v6925_v61 = vadd.f32 %v6919_v59, %v6915_v57 }
0x20c4   :  { %v6926_v50 = vmul.f32 %v6921_v63, %v10246_v53  ;;  %v6927_v38 = vmul.f32 %v6922_v9, %v10250_v54  ;;  %v6928_v43 = vmul.f32 %v6923_v34, %v10261_v60  ;;  %v6929_v17 = vmul.f32 %v6924_v31, %v10265_v1 }
0x20c5   :  { %v6930_v32 = vmul.f32 %v6925_v61, %v10272_v10 }
0x20c6   :  { %vm6932_vm2 = vcmp.ge.f32.partialorder %v6926_v50, 0.0  ;;  %v6938_v35 = vmul.f32 %v6937_v36, %v6926_v50  ;;  %v6939_v2 = vmul.f32 %v6937_v36, %v6927_v38  ;;  %vm6933_vm4 = vcmp.ge.f32.partialorder %v6927_v38, 0.0 }
0x20c7   :  { %v6940_v3 = vmul.f32 %v6937_v36, %v6928_v43  ;;  %vm6934_vm6 = vcmp.ge.f32.partialorder %v6928_v43, 0.0  ;;  %v6941_v27 = vmul.f32 %v6937_v36, %v6929_v17  ;;  %vm6935_vm12 = vcmp.ge.f32.partialorder %v6929_v17, 0.0 }
0x20c8   :  { %v11676_v55 = vsel %vm6932_vm2, %v6926_v50, %v6938_v35  ;;  %v11683_v7 = vsel %vm6933_vm4, %v6927_v38, %v6939_v2  ;;  %v6942_v4 = vmul.f32 %v6937_v36, %v6930_v32  ;;  %vm6936_vm5 = vcmp.ge.f32.partialorder %v6930_v32, 0.0 }
0x20c9   :  { %7031 = vrot.lane.b32.xlu0 %v11676_v55, %s9890_s20  ;;  %6953 = vrot.lane.b32.xlu1 %v11676_v55, %s9887_s8  ;;  %v11693_v6 = vsel %vm6934_vm6, %v6928_v43, %v6940_v3  ;;  %v11708_v28 = vsel %vm6935_vm12, %v6929_v17, %v6941_v27  ;;  %vm12417_vm2 = vcmask 908288   ;;  %vm12418_vm4 = vcmask 900096  }
0x20ca   :  { %v11732_v52 = vsel %vm6936_vm5, %v6930_v32, %v6942_v4  ;;  %vm12419_vm6 = vmmov %vm12418_vm4 }
0x20cb   :  { %vm12420_vm12 = vmmov %vm12417_vm2 }
0x20cc   :  { %vm12421_vm5 = vmmov %vm12413_vm14 }
0x20cd   :  { %7064 = vrot.lane.b32.xlu0 %v11683_v7, %s9891_s23  ;;  %6955 = vrot.lane.b32.xlu1 %v11683_v7, %s9887_s8 }
0x20d1   :  { %7062 = vrot.lane.b32.xlu0 %v11676_v55, %s9891_s23  ;;  %6979 = vrot.lane.b32.xlu1 %v11676_v55, %s12295_s0 }
0x20d5   :  { %7092 = vrot.lane.b32.xlu0 %v11693_v6, %s12294_s14  ;;  %6981 = vrot.lane.b32.xlu1 %v11683_v7, %s12295_s0 }
0x20d9   :  { %7118 = vrot.lane.b32.xlu0 %v11693_v6, %s12296_s17  ;;  %7005 = vrot.lane.b32.xlu1 %v11676_v55, %s9889_s19 }
0x20dd   :  { %7114 = vrot.lane.b32.xlu0 %v11676_v55, %s12296_s17  ;;  %7007 = vrot.lane.b32.xlu1 %v11683_v7, %s9889_s19 }
0x20e1   :  { %6959 = vrot.lane.b32.xlu0 %v11708_v28, %s9887_s8  ;;  %7033 = vrot.lane.b32.xlu1 %v11683_v7, %s9890_s20 }
0x20e5   :  { %6985 = vrot.lane.b32.xlu0 %v11708_v28, %s12295_s0  ;;  %7066 = vrot.lane.b32.xlu1 %v11693_v6, %s9891_s23 }
0x20e9   :  { %7011 = vrot.lane.b32.xlu0 %v11708_v28, %s9889_s19  ;;  %7090 = vrot.lane.b32.xlu1 %v11683_v7, %s12294_s14 }
0x20ed   :  { %7037 = vrot.lane.b32.xlu0 %v11708_v28, %s9890_s20  ;;  %7116 = vrot.lane.b32.xlu1 %v11683_v7, %s12296_s17 }
0x20f1   :  { %7144 = vrot.lane.b32.xlu0 %v11693_v6, %s9894_s28  ;;  %7088 = vrot.lane.b32.xlu1 %v11676_v55, %s12294_s14 }
0x20f5   :  { %6987 = vrot.lane.b32.xlu0 %v11732_v52, %s12295_s0  ;;  %6957 = vrot.lane.b32.xlu1 %v11693_v6, %s9887_s8 }
0x20f9   :  { %7068 = vrot.lane.b32.xlu0 %v11708_v28, %s9891_s23  ;;  %6983 = vrot.lane.b32.xlu1 %v11693_v6, %s12295_s0 }
0x20fd   :  { %7013 = vrot.lane.b32.xlu0 %v11732_v52, %s9889_s19  ;;  %7009 = vrot.lane.b32.xlu1 %v11693_v6, %s9889_s19 }
0x2101   :  { %7094 = vrot.lane.b32.xlu0 %v11708_v28, %s12294_s14  ;;  %7035 = vrot.lane.b32.xlu1 %v11693_v6, %s9890_s20 }
0x2105   :  { %7120 = vrot.lane.b32.xlu0 %v11708_v28, %s12296_s17  ;;  %7142 = vrot.lane.b32.xlu1 %v11683_v7, %s9894_s28 }
0x2109   :  { %7146 = vrot.lane.b32.xlu0 %v11708_v28, %s9894_s28  ;;  %6961 = vrot.lane.b32.xlu1 %v11732_v52, %s9887_s8 }
0x210d   :  { %7140 = vrot.lane.b32.xlu1 %v11676_v55, %s9894_s28 }
0x2111   :  { %7070 = vrot.lane.b32.xlu1 %v11732_v52, %s9891_s23 }
0x2115   :  { %7039 = vrot.lane.b32.xlu1 %v11732_v52, %s9890_s20 }
0x2119   :  { %7096 = vrot.lane.b32.xlu1 %v11732_v52, %s12294_s14 }
0x211d   :  { %7122 = vrot.lane.b32.xlu1 %v11732_v52, %s12296_s17 }
0x2121   :  { %7148 = vrot.lane.b32.xlu1 %v11732_v52, %s9894_s28 }
0x213b   :  { %v7032_v24 = vpop.permute.xlu0 %7031  ;;  %v6954_v33 = vpop.permute.xlu1 %6953 }
0x213c   :  { %7051 = vst.msk [vmem:[#allocation2 + $0xb0] sm:$0xff] %vm202_vm9, %v7032_v24 }
0x213d   :  { %6973 = vst.msk [vmem:[#allocation2 + $0x8] sm:$0xff] %vm12411_vm7, %v6954_v33  ;;  %vm12422_vm7 = vmmov %vm12421_vm5 }
0x213f   :  { %v7065_v39 = vpop.permute.xlu0 %7064  ;;  %v6956_v23 = vpop.permute.xlu1 %6955 }
0x2140   :  { %v6963_v42 = vsel %vm12413_vm14, %v6954_v33, %v6956_v23  ;;  %vm12424_vm14 = vmmov %vm12414_vm1 }
0x2143   :  { %v7063_v40 = vpop.permute.xlu0 %7062  ;;  %v6980_v26 = vpop.permute.xlu1 %6979  ;;  %v7183_v19 = vld [vmem:[#allocation2 + $0xb0] sm:$0xff] }
0x2144   :  { %6999 = vst.msk [vmem:[#allocation2 + $0x40] sm:$0xff] %vm12412_vm11, %v6980_v26  ;;  %v7168_v44 = vld [vmem:[#allocation2 + $0x8] sm:$0xff]  ;;  %v7072_v11 = vsel %vm224_vm10, %v7063_v40, %v7065_v39  ;;  %vm12423_vm11 = vmmov %vm12414_vm1 }
0x2145   :  { %v9615_v50 = vpack.c.bf16 %v7072_v11, %v11676_v55 }
0x2147   :  { %v11773_v49 = vpop.permute.xlu0 %7092  ;;  %v6982_v46 = vpop.permute.xlu1 %6981 }
0x2148   :  { %v6989_v16 = vsel %vm12414_vm1, %v6980_v26, %v6982_v46  ;;  %vm12425_vm1 = vmmov %vm12416_vm13 }
0x2149   :  { %v9605_v5 = vpack.c.bf16 %v6989_v16, %v6963_v42 }
0x214b   :  { %v11777_v25 = vpop.permute.xlu0 %7118  ;;  %v7006_v48 = vpop.permute.xlu1 %7005  ;;  %9606 = vmatprep.subr.bf16.mxu1 %v9605_v5  ;;  %v7173_v41 = vld [vmem:[#allocation2 + $0x40] sm:$0xff] }
0x214c   :  { %7025 = vst.msk [vmem:[#allocation2 + $0x78] sm:$0xff] %vm12415_vm3, %v7006_v48  ;;  %v9607_v51 = vpack.c.bf16 %v7173_v41, %v7168_v44  ;;  %vm12426_vm3 = vmmov %vm12425_vm1 }
0x214e   :  { %9608 = vmatpush1.bf16.msra.mxu1 %v9607_v51 }
0x214f   :  { %v7115_v56 = vpop.permute.xlu0 %7114  ;;  %v7008_v45 = vpop.permute.xlu1 %7007 }
0x2150   :  { %v7015_v58 = vsel %vm12416_vm13, %v7006_v48, %v7008_v45  ;;  %vm12427_vm13 = vcmask 891904  }
0x2153   :  { %v6960_v47 = vpop.permute.xlu0 %6959  ;;  %v7034_v20 = vpop.permute.xlu1 %7033  ;;  %v7178_v8 = vld [vmem:[#allocation2 + $0x78] sm:$0xff] }
0x2154   :  { %v7041_v22 = vsel %vm191_vm8, %v7032_v24, %v7034_v20  ;;  %v9611_v30 = vpack.c.bf16 %v7183_v19, %v7178_v8 }
0x2155   :  { %v9609_v21 = vpack.c.bf16 %v7041_v22, %v7015_v58 }
0x2157   :  { %v6986_v59 = vpop.permute.xlu0 %6985  ;;  %v7067_v63 = vpop.permute.xlu1 %7066  ;;  %9610 = vmatprep.subr.bf16.mxu1 %v9609_v21  ;;  %v8706_v21 = vld [vmem:[%s12266_s1 + $0x58] sm:$0xff] }
0x2158   :  { %v7073_v9 = vsel %vm224_vm10, %v7065_v39, %v7067_v63  ;;  %9612 = vmatpush1.bf16.msra.mxu1 %v9611_v30 }
0x2159   :  { %v9613_v36 = vpack.c.bf16 %v7073_v9, %v11683_v7 }
0x215b   :  { %v11786_v38 = vpop.permute.xlu0 %7011  ;;  %v7091_v62 = vpop.permute.xlu1 %7090  ;;  %9614 = vmatprep.subr.bf16.mxu1 %v9613_v36 }
0x215c   :  { %9616 = vmatpush1.bf16.msra.mxu1 %v9615_v50  ;;  %v7099_v2 = vsel %vm12417_vm2, %v7091_v62, %v11773_v49  ;;  %vm12428_vm2 = vmmov %vm12421_vm5 }
0x215f   :  { %v7038_v35 = vpop.permute.xlu0 %7037  ;;  %v7117_v34 = vpop.permute.xlu1 %7116 }
0x2160   :  { %v7125_v43 = vsel %vm12418_vm4, %v7117_v34, %v11777_v25  ;;  %v7124_v55 = vsel %vm12419_vm6, %v7115_v56, %v7117_v34  ;;  %vm12429_vm4 = vmmov %vm12423_vm11 }
0x2161   :  { %v9617_v3 = vpack.c.bf16 %v7125_v43, %v7099_v2  ;;  %vm12430_vm6 = vmmov %vm12427_vm13 }
0x2163   :  { %v11792_v29 = vpop.permute.xlu0 %7144  ;;  %v7089_v31 = vpop.permute.xlu1 %7088  ;;  %9618 = vmatprep.subr.bf16.mxu1 %v9617_v3 }
0x2164   :  { %v7098_v7 = vsel %vm12420_vm12, %v7089_v31, %v7091_v62  ;;  %vm12431_vm12 = vmmov %vm12425_vm1 }
0x2165   :  { %v9619_v17 = vpack.c.bf16 %v7124_v55, %v7098_v7 }
0x2167   :  { %v6988_v27 = vpop.permute.xlu0 %6987  ;;  %v6958_v57 = vpop.permute.xlu1 %6957  ;;  %9620 = vmatpush1.bf16.msra.mxu1 %v9619_v17 }
0x2168   :  { %v6964_v4 = vsel %vm12421_vm5, %v6956_v23, %v6958_v57  ;;  %v6965_v24 = vsel %vm12422_vm7, %v6958_v57, %v6960_v47  ;;  %vm12432_vm5 = vcmask 908288   ;;  %vm12433_vm7 = vcmask 900096  }
0x216b   :  { %v7069_v61 = vpop.permute.xlu0 %7068  ;;  %v6984_v32 = vpop.permute.xlu1 %6983 }
0x216c   :  { %v6990_v33 = vsel %vm12423_vm11, %v6982_v46, %v6984_v32  ;;  %v6991_v39 = vsel %vm12424_vm14, %v6984_v32, %v6986_v59  ;;  %v7074_v11 = vsel %vm224_vm10, %v7067_v63, %v7069_v61  ;;  %vm12434_vm11 = vmmov %vm12432_vm5 }
0x216d   :  { %v9621_v40 = vpack.c.bf16 %v6991_v39, %v6965_v24  ;;  %v9623_v26 = vpack.c.bf16 %v6990_v33, %v6964_v4  ;;  %v9631_v50 = vpack.c.bf16 %v7074_v11, %v11693_v6  ;;  %vm12435_vm14 = vmmov %vm12433_vm7 }
0x216f   :  { %v7014_v42 = vpop.permute.xlu0 %7013  ;;  %v7010_v16 = vpop.permute.xlu1 %7009  ;;  %9622 = vmatprep.subr.bf16.mxu0 %v9621_v40 }
0x2170   :  { %9624 = vmatpush1.bf16.msra.mxu0 %v9623_v26  ;;  %v7016_v48 = vsel %vm12425_vm1, %v7008_v45, %v7010_v16  ;;  %v7017_v44 = vsel %vm12426_vm3, %v7010_v16, %v11786_v38  ;;  %v7018_v63 = vsel %vm12431_vm12, %v11786_v38, %v7014_v42  ;;  %vm12436_vm1 = vmmov %vm12433_vm7 }
0x2171   :  { %vm12437_vm3 = vmmov %vm12432_vm5 }
0x2173   :  { %v7036_v5 = vpop.permute.xlu1 %7035  ;;  %v7095_v36 = vpop.permute.xlu0 %7094 }
0x2174   :  { %v7042_v23 = vsel %vm191_vm8, %v7034_v20, %v7036_v5  ;;  %v7043_v41 = vsel %vm191_vm8, %v7036_v5, %v7038_v35  ;;  %v6992_v20 = vsel %vm12429_vm4, %v6986_v59, %v6988_v27  ;;  %v7100_v7 = vsel %vm12437_vm3, %v11773_v49, %v7095_v36 }
0x2175   :  { %v9625_v51 = vpack.c.bf16 %v7043_v41, %v7017_v44  ;;  %v9627_v46 = vpack.c.bf16 %v7042_v23, %v7016_v48  ;;  %vm12443_vm3 = vcmask 154624  }
0x2177   :  { %v7143_v56 = vpop.permute.xlu1 %7142  ;;  %9626 = vmatprep.subr.bf16.mxu0 %v9625_v51  ;;  %v7121_v31 = vpop.permute.xlu0 %7120 }
0x2178   :  { %v7151_v8 = vsel %vm12427_vm13, %v7143_v56, %v11792_v29  ;;  %9628 = vmatpush1.bf16.msra.mxu0 %v9627_v46  ;;  %v7126_v6 = vsel %vm12433_vm7, %v11777_v25, %v7121_v31  ;;  %vm12438_vm13 = vmmov %vm12430_vm6 }
0x2179   :  { %7232 = vmatprep.subr.mxu1 %v7151_v8  ;;  %v9635_v27 = vpack.c.bf16 %v7126_v6, %v7100_v7 }
0x217b   :  { %v6962_v58 = vpop.permute.xlu1 %6961  ;;  %v7147_v57 = vpop.permute.xlu0 %7146 }
0x217c   :  { %v6966_v22 = vsel %vm12428_vm2, %v6960_v47, %v6962_v58  ;;  %vm12439_vm2 = vmmov %vm12430_vm6 }
0x217d   :  { %v9638_v30 = vpack.c.bf16 %v6992_v20, %v6966_v22  ;;  %vm12440_vm4 = vmmov %vm12439_vm2 }
0x217f   :  { %v7141_v45 = vpop.permute.xlu1 %7140 }
0x2180   :  { %v7150_v19 = vsel %vm12430_vm6, %v7141_v45, %v7143_v56 }
0x2181   :  { %7233 = vmatpush1.msra.mxu1 %v7150_v19 }
0x2182   :  { %9637 = vmatprep.subr.bf16.mxu1 %v9895_v13  ;;  %8707 = vmatmul.mubr.msk.f32.vlgmr.msra.gmra.mrb[52].mxu1 %vm372_vm15, %v8706_v21 }
0x2183   :  { %v7071_v9 = vpop.permute.xlu1 %7070  ;;  %9639 = vmatpush3.bf16.msra.mxu1 %v9638_v30  ;;  %9196 = vmatprep.mubr.msk.f32.mxu1 %vm9896_vm0, %v10698_v0 }
0x2184   :  { %v7075_v47 = vsel %vm224_vm10, %v7069_v61, %v7071_v9  ;;  %7087 = vst.msk [vmem:[#allocation2 + $0x140] sm:$0xff] %vm224_vm10, %v7071_v9  ;;  %9640 = vmatprep.subr.bf16.mxu1 %v9895_v13  ;;  %v7152_v61 = vsel %vm12440_vm4, %v11792_v29, %v7147_v57  ;;  %v9962_v9 = vmov 10   ;;  %vm12446_vm4 = vcmask 138240  }
0x2185   :  { %v9629_v59 = vpack.c.bf16 %v7075_v47, %v11708_v28  ;;  %9837 = vset.pattern.permute.xlu0 %v9962_v9  ;;  %9838 = vset.pattern.permute.xlu1 %v9962_v9 }
0x2187   :  { %v7040_v62 = vpop.permute.xlu1 %7039  ;;  %9630 = vmatprep.subr.bf16.mxu0 %v9629_v59 }
0x2188   :  { %v7044_v34 = vsel %vm191_vm8, %v7038_v35, %v7040_v62  ;;  %9632 = vmatpush1.bf16.msra.mxu0 %v9631_v50 }
0x2189   :  { %v9641_v2 = vpack.c.bf16 %v7044_v34, %v7018_v63 }
0x218b   :  { %v7097_v43 = vpop.permute.xlu1 %7096  ;;  %9642 = vmatpush3.bf16.msra.mxu1 %v9641_v2  ;;  %v7197_v3 = vld [vmem:[#allocation2 + $0x140] sm:$0xff] }
0x218c   :  { %7113 = vst.msk [vmem:[#allocation2 + $0x178] sm:$0xff] %vm12432_vm5, %v7097_v43  ;;  %9643 = vmatprep.subr.bf16.mxu1 %v9895_v13  ;;  %v9644_v28 = vpack.c.bf16 %v7197_v3, %v11732_v52  ;;  %v7101_v38 = vsel %vm12434_vm11, %v7095_v36, %v7097_v43  ;;  %v11859_v2 = vld [vmem:[%s12267_s2] sm:$0xff] }
0x218f   :  { %v7123_v55 = vpop.permute.xlu1 %7122  ;;  %9645 = vmatpush3.bf16.msra.mxu1 %v9644_v28 }
0x2190   :  { %v7127_v35 = vsel %vm12435_vm14, %v7121_v31, %v7123_v55  ;;  %7139 = vst.msk [vmem:[#allocation2 + $0x1b0] sm:$0xff] %vm12436_vm1, %v7123_v55  ;;  %9646 = vmatprep.subr.bf16.mxu1 %v9895_v13  ;;  %v11865_v31 = vld [vmem:[%s12268_s3] sm:$0xff]  ;;  %vm12441_vm14 = vcmask 1047704   ;;  %vm12442_vm1 = vcmask 1047696  }
0x2191   :  { %v9633_v17 = vpack.c.bf16 %v7127_v35, %v7101_v38 }
0x2193   :  { %v7149_v52 = vpop.permute.xlu1 %7148  ;;  %9634 = vmatprep.subr.bf16.mxu0 %v9633_v17  ;;  %v7202_v32 = vld [vmem:[#allocation2 + $0x178] sm:$0xff] }
0x2194   :  { %v7153_v25 = vsel %vm12438_vm13, %v7147_v57, %v7149_v52  ;;  %7165 = vst.msk [vmem:[#allocation2 + $0x1e8] sm:$0xff] %vm12439_vm2, %v7149_v52  ;;  %9636 = vmatpush1.bf16.msra.mxu0 %v9635_v27  ;;  %vm12444_vm13 = vcmask 146432   ;;  %vm12445_vm2 = vcmask 1047688  }
0x2195   :  { %7303 = vmatprep.subr.mxu0 %v7153_v25 }
0x2197   :  { %v7207_v4 = vld [vmem:[#allocation2 + $0x1b0] sm:$0xff] }
0x2198   :  { %v9647_v24 = vpack.c.bf16 %v7207_v4, %v7202_v32  ;;  %7304 = vmatpush1.msra.mxu0 %v7152_v61  ;;  %v7497_v61 = vstv %s8710_s30 }
0x2199   :  { %8708 = vmatmul.mubr.msk.f32.vlgmr.msra.gmra.mrb[54].mxu0 %vm372_vm15, %v8706_v21 }
0x219a   :  { %9648 = vmatpush3.bf16.msra.mxu1 %v9647_v24  ;;  %7840 = vmatprep.mubr.f32.mxu0 %v10698_v0 }
0x219b   :  { %9194 = vmatprep.subr.mxu1 %v10698_v0  ;;  %v7212_v49 = vld [vmem:[#allocation2 + $0x1e8] sm:$0xff] }
0x219e   :  { %9195 = vmatpush3.msra.mxu1 %v7212_v49 }
0x219f   :  { %9197 = vmatmul.mubr.msk.f32.vlgmr.msra.gmra.mrb[54].mxu1 %vm372_vm15, %v8706_v21 }
0x21a0   :  { %7911 = vmatprep.mubr.f32.mxu1 %v10698_v0 }
0x2255   :  { %v7282_v33 = vpop.f32.mrb[52].mxu1 }
0x2256   :  { %v7284_v39 = vpop.f32.mrb[53].mxu1  ;;  %v7428_v29 = vmul.f32 %v7282_v33, %v10246_v53 }
0x2257   :  { %v7429_v40 = vmul.f32 %v7284_v39, %v10250_v54 }
0x2258   :  { %v7442_v26 = vmul.f32 %v7428_v29, %v7428_v29 }
0x2259   :  { %v7443_v42 = vmul.f32 %v7429_v40, %v7429_v40  ;;  %v7435_v5 = vadd.f32 %v7429_v40, %v7428_v29 }
0x225b   :  { %v7447_v41 = vadd.f32 %v7443_v42, %v7442_v26 }
0x226c   :  { %v7353_v16 = vpop.f32.mrb[54].mxu0 }
0x226d   :  { %v7430_v48 = vmul.f32 %v7353_v16, %v10261_v60  ;;  %v7355_v44 = vpop.f32.mrb[55].mxu0 }
0x226e   :  { %v7431_v23 = vmul.f32 %v7355_v44, %v10265_v1 }
0x226f   :  { %v7436_v51 = vadd.f32 %v7435_v5, %v7430_v48  ;;  %v7444_v46 = vmul.f32 %v7430_v48, %v7430_v48 }
0x2270   :  { %v7445_v8 = vmul.f32 %v7431_v23, %v7431_v23 }
0x2271   :  { %v7448_v56 = vadd.f32 %v7447_v41, %v7444_v46  ;;  %v7437_v22 = vadd.f32 %v7436_v51, %v7431_v23 }
0x2272   :  { %v7424_v58 = vpop.f32.mrb[54].mxu1 }
0x2273   :  { %v11851_v45 = vmul.f32 %v7424_v58, %v10272_v10  ;;  %v9198_v21 = vpop.f32.mrb[55].mxu1  ;;  %v7449_v30 = vadd.f32 %v7448_v56, %v7445_v8 }
0x2275   :  { %v7446_v20 = vmul.f32 %v11851_v45, %v11851_v45  ;;  %v7438_v19 = vadd.f32 %v7437_v22, %v11851_v45 }
0x2277   :  { %7439 = vadd.xlane.f32.xlu0 %v7438_v19  ;;  %v7450_v11 = vadd.f32 %v7449_v30, %v7446_v20 }
0x2279   :  { %7451 = vadd.xlane.f32.xlu1 %v7450_v11 }
0x2304   :  { %v7440_v47 = vpop.xlane.xlu0 %7439 }
0x2305   :  { %v7441_v59 = vmul.f32 0.001953125, %v7440_v47 }
0x2306   :  { %v7452_v36 = vpop.xlane.xlu1 %7451 }
0x2307   :  { %v7454_v50 = vmul.f32 %v7441_v59, %v7441_v59  ;;  %v7453_v62 = vmul.f32 0.001953125, %v7452_v36 }
0x2309   :  { %v7455_v63 = vsub.f32 %v7453_v62, %v7454_v50 }
0x230b   :  { %v7456_v34 = vadd.f32 1e-05, %v7455_v63 }
0x230d   :  { %9863 = vrsqrt.f32 %v7456_v34 }
0x2317   :  { %v9864_v43 = vpop.eup %9863 }
0x2318   :  { %v7458_v3 = vmul.f32 %v9864_v43, %v11859_v2 }
0x231a   :  { %7463 = vperm.xlu0 %9837, %v7458_v3   ;;  %v7459_v28 = vmul.f32 %v7458_v3, %v7441_v59 }
0x231c   :  { %v7460_v6 = vsub.f32 %v11865_v31, %v7459_v28 }
0x231e   :  { %7473 = vperm.xlu1 %9838, %v7460_v6  }
0x2399   :  { %v7464_v55 = vpop.permute.xlu0 %7463 }
0x239a   :  { %v7466_v38 = vmul.f32 %v7464_v55, %v7428_v29  ;;  %v7467_v35 = vmul.f32 %v7464_v55, %v7429_v40  ;;  %v7468_v25 = vmul.f32 %v7464_v55, %v7430_v48 }
0x239d   :  { %v7474_v7 = vpop.permute.xlu1 %7473 }
0x239e   :  { %v7476_v17 = vadd.f32 %v7474_v7, %v7466_v38  ;;  %v7477_v27 = vadd.f32 %v7474_v7, %v7467_v35  ;;  %v7478_v4 = vadd.f32 %v7474_v7, %v7468_v25 }
0x23a0   :  { %v7481_v57 = vmul.f32 %v7476_v17, %v10246_v53  ;;  %v7482_v52 = vmul.f32 %v7477_v27, %v10250_v54  ;;  %v7483_v33 = vmul.f32 %v7478_v4, %v10261_v60 }
0x23a2   :  { %v7486_v32 = vadd.f32 %v7481_v57, %v11486_v12  ;;  %v7487_v24 = vadd.f32 %v7482_v52, %v11488_v14  ;;  %v7488_v40 = vadd.f32 %v7483_v33, %v11494_v18  ;;  %v7469_v14 = vmul.f32 %v7464_v55, %v7431_v23 }
0x23a4   :  { %vm7492_vm6 = vcmp.ge.f32.partialorder %v7486_v32, 0.0  ;;  %v7498_v49 = vmul.f32 %v7497_v61, %v7486_v32  ;;  %v7499_v39 = vmul.f32 %v7497_v61, %v7487_v24  ;;  %vm7493_vm12 = vcmp.ge.f32.partialorder %v7487_v24, 0.0 }
0x23a5   :  { %v7479_v26 = vadd.f32 %v7474_v7, %v7469_v14  ;;  %v7500_v42 = vmul.f32 %v7497_v61, %v7488_v40  ;;  %vm7494_vm5 = vcmp.ge.f32.partialorder %v7488_v40, 0.0 }
0x23a6   :  { %v11873_v29 = vsel %vm7492_vm6, %v7486_v32, %v7498_v49  ;;  %v11880_v12 = vsel %vm7493_vm12, %v7487_v24, %v7499_v39  ;;  %vm12447_vm6 = vcmask 908288   ;;  %vm12448_vm12 = vcmask 900096  }
0x23a7   :  { %7591 = vrot.lane.b32.xlu0 %v11873_v29, %s9890_s20  ;;  %7513 = vrot.lane.b32.xlu1 %v11873_v29, %s9887_s8  ;;  %v7484_v18 = vmul.f32 %v7479_v26, %v10265_v1  ;;  %v11891_v16 = vsel %vm7494_vm5, %v7488_v40, %v7500_v42  ;;  %vm12449_vm5 = vmmov %vm12448_vm12 }
0x23a9   :  { %v7489_v5 = vadd.f32 %v7484_v18, %v11548_v37  ;;  %v7470_v37 = vmul.f32 %v7464_v55, %v11851_v45 }
0x23ab   :  { %7624 = vrot.lane.b32.xlu0 %v11880_v12, %s9891_s23  ;;  %7515 = vrot.lane.b32.xlu1 %v11880_v12, %s9887_s8  ;;  %v7501_v48 = vmul.f32 %v7497_v61, %v7489_v5  ;;  %vm7495_vm7 = vcmp.ge.f32.partialorder %v7489_v5, 0.0  ;;  %v7480_v23 = vadd.f32 %v7474_v7, %v7470_v37 }
0x23ad   :  { %v11906_v44 = vsel %vm7495_vm7, %v7489_v5, %v7501_v48  ;;  %v7485_v41 = vmul.f32 %v7480_v23, %v10272_v10  ;;  %vm12450_vm7 = vmmov %vm12447_vm6 }
0x23af   :  { %7622 = vrot.lane.b32.xlu0 %v11873_v29, %s9891_s23  ;;  %7539 = vrot.lane.b32.xlu1 %v11873_v29, %s12295_s0  ;;  %v7490_v51 = vadd.f32 %v7485_v41, %v11538_v15 }
0x23b1   :  { %v7502_v46 = vmul.f32 %v7497_v61, %v7490_v51  ;;  %vm7496_vm11 = vcmp.ge.f32.partialorder %v7490_v51, 0.0 }
0x23b3   :  { %7652 = vrot.lane.b32.xlu0 %v11891_v16, %s12294_s14  ;;  %7541 = vrot.lane.b32.xlu1 %v11880_v12, %s12295_s0  ;;  %v11931_v56 = vsel %vm7496_vm11, %v7490_v51, %v7502_v46  ;;  %vm12451_vm11 = vmmov %vm12443_vm3 }
0x23b7   :  { %7678 = vrot.lane.b32.xlu0 %v11891_v16, %s12296_s17  ;;  %7565 = vrot.lane.b32.xlu1 %v11873_v29, %s9889_s19 }
0x23bb   :  { %7674 = vrot.lane.b32.xlu0 %v11873_v29, %s12296_s17  ;;  %7567 = vrot.lane.b32.xlu1 %v11880_v12, %s9889_s19 }
0x23bf   :  { %7519 = vrot.lane.b32.xlu0 %v11906_v44, %s9887_s8  ;;  %7593 = vrot.lane.b32.xlu1 %v11880_v12, %s9890_s20 }
0x23c3   :  { %7545 = vrot.lane.b32.xlu0 %v11906_v44, %s12295_s0  ;;  %7626 = vrot.lane.b32.xlu1 %v11891_v16, %s9891_s23 }
0x23c7   :  { %7571 = vrot.lane.b32.xlu0 %v11906_v44, %s9889_s19  ;;  %7650 = vrot.lane.b32.xlu1 %v11880_v12, %s12294_s14 }
0x23cb   :  { %7597 = vrot.lane.b32.xlu0 %v11906_v44, %s9890_s20  ;;  %7676 = vrot.lane.b32.xlu1 %v11880_v12, %s12296_s17 }
0x23cf   :  { %7704 = vrot.lane.b32.xlu0 %v11891_v16, %s9894_s28  ;;  %7648 = vrot.lane.b32.xlu1 %v11873_v29, %s12294_s14 }
0x23d3   :  { %7547 = vrot.lane.b32.xlu0 %v11931_v56, %s12295_s0  ;;  %7517 = vrot.lane.b32.xlu1 %v11891_v16, %s9887_s8 }
0x23d7   :  { %7628 = vrot.lane.b32.xlu0 %v11906_v44, %s9891_s23  ;;  %7543 = vrot.lane.b32.xlu1 %v11891_v16, %s12295_s0 }
0x23db   :  { %7573 = vrot.lane.b32.xlu0 %v11931_v56, %s9889_s19  ;;  %7569 = vrot.lane.b32.xlu1 %v11891_v16, %s9889_s19 }
0x23df   :  { %7654 = vrot.lane.b32.xlu0 %v11906_v44, %s12294_s14  ;;  %7595 = vrot.lane.b32.xlu1 %v11891_v16, %s9890_s20 }
0x23e3   :  { %7680 = vrot.lane.b32.xlu0 %v11906_v44, %s12296_s17  ;;  %7702 = vrot.lane.b32.xlu1 %v11880_v12, %s9894_s28 }
0x23e7   :  { %7706 = vrot.lane.b32.xlu0 %v11906_v44, %s9894_s28  ;;  %7521 = vrot.lane.b32.xlu1 %v11931_v56, %s9887_s8 }
0x23eb   :  { %7700 = vrot.lane.b32.xlu1 %v11873_v29, %s9894_s28 }
0x23ef   :  { %7630 = vrot.lane.b32.xlu1 %v11931_v56, %s9891_s23 }
0x23f3   :  { %7599 = vrot.lane.b32.xlu1 %v11931_v56, %s9890_s20 }
0x23f7   :  { %7656 = vrot.lane.b32.xlu1 %v11931_v56, %s12294_s14 }
0x23fb   :  { %7682 = vrot.lane.b32.xlu1 %v11931_v56, %s12296_s17 }
0x23ff   :  { %7708 = vrot.lane.b32.xlu1 %v11931_v56, %s9894_s28 }
0x2419   :  { %v7592_v15 = vpop.permute.xlu0 %7591  ;;  %v7514_v8 = vpop.permute.xlu1 %7513 }
0x241a   :  { %7611 = vst.msk [vmem:[#allocation2 + $0xb0] sm:$0xff] %vm202_vm9, %v7592_v15 }
0x241b   :  { %7533 = vst.msk [vmem:[#allocation2 + $0x8] sm:$0xff] %vm12441_vm14, %v7514_v8  ;;  %vm12452_vm14 = vmmov %vm12443_vm3 }
0x241d   :  { %v7625_v58 = vpop.permute.xlu0 %7624  ;;  %v7516_v22 = vpop.permute.xlu1 %7515 }
0x241e   :  { %v7523_v30 = vsel %vm12443_vm3, %v7514_v8, %v7516_v22 }
0x2421   :  { %v7623_v45 = vpop.permute.xlu0 %7622  ;;  %v7540_v21 = vpop.permute.xlu1 %7539  ;;  %v7743_v35 = vld [vmem:[#allocation2 + $0xb0] sm:$0xff] }
0x2422   :  { %7559 = vst.msk [vmem:[#allocation2 + $0x40] sm:$0xff] %vm12442_vm1, %v7540_v21  ;;  %v7728_v36 = vld [vmem:[#allocation2 + $0x8] sm:$0xff]  ;;  %v7632_v17 = vsel %vm224_vm10, %v7623_v45, %v7625_v58  ;;  %vm12453_vm1 = vmmov %vm12444_vm13 }
0x2423   :  { %v9659_v61 = vpack.c.bf16 %v7632_v17, %v11873_v29  ;;  %vm12454_vm3 = vmmov %vm12453_vm1  ;;  %v8711_v17 = vld [vmem:[%s12266_s1 + $0x60] sm:$0xff] }
0x2425   :  { %v11972_v20 = vpop.permute.xlu0 %7652  ;;  %v7542_v19 = vpop.permute.xlu1 %7541 }
0x2426   :  { %v7549_v11 = vsel %vm12444_vm13, %v7540_v21, %v7542_v19  ;;  %vm12455_vm13 = vmmov %vm12446_vm4 }
0x2427   :  { %v9649_v9 = vpack.c.bf16 %v7549_v11, %v7523_v30 }
0x2429   :  { %v11976_v47 = vpop.permute.xlu0 %7678  ;;  %v7566_v59 = vpop.permute.xlu1 %7565  ;;  %9650 = vmatprep.subr.bf16.mxu0 %v9649_v9  ;;  %v7733_v50 = vld [vmem:[#allocation2 + $0x40] sm:$0xff] }
0x242a   :  { %7585 = vst.msk [vmem:[#allocation2 + $0x78] sm:$0xff] %vm12445_vm2, %v7566_v59  ;;  %v9651_v62 = vpack.c.bf16 %v7733_v50, %v7728_v36  ;;  %vm12456_vm2 = vmmov %vm12446_vm4 }
0x242c   :  { %9652 = vmatpush1.bf16.msra.mxu0 %v9651_v62 }
0x242d   :  { %v7675_v63 = vpop.permute.xlu0 %7674  ;;  %v7568_v34 = vpop.permute.xlu1 %7567 }
0x242e   :  { %v7575_v6 = vsel %vm12446_vm4, %v7566_v59, %v7568_v34  ;;  %vm12457_vm4 = vmmov %vm12447_vm6 }
0x2431   :  { %v11979_v43 = vpop.permute.xlu0 %7519  ;;  %v7594_v3 = vpop.permute.xlu1 %7593  ;;  %v7738_v28 = vld [vmem:[#allocation2 + $0x78] sm:$0xff] }
0x2432   :  { %v7601_v55 = vsel %vm191_vm8, %v7592_v15, %v7594_v3  ;;  %v9655_v7 = vpack.c.bf16 %v7743_v35, %v7738_v28 }
0x2433   :  { %v9653_v38 = vpack.c.bf16 %v7601_v55, %v7575_v6 }
0x2435   :  { %v7546_v27 = vpop.permute.xlu0 %7545  ;;  %v11984_v57 = vpop.permute.xlu1 %7626  ;;  %9654 = vmatprep.subr.bf16.mxu0 %v9653_v38 }
0x2436   :  { %v7633_v52 = vsel %vm224_vm10, %v7625_v58, %v11984_v57  ;;  %9656 = vmatpush1.bf16.msra.mxu0 %v9655_v7 }
0x2437   :  { %v9657_v25 = vpack.c.bf16 %v7633_v52, %v11880_v12 }
0x2439   :  { %v11990_v32 = vpop.permute.xlu0 %7571  ;;  %v7651_v4 = vpop.permute.xlu1 %7650  ;;  %9658 = vmatprep.subr.bf16.mxu0 %v9657_v25 }
0x243a   :  { %9660 = vmatpush1.bf16.msra.mxu0 %v9659_v61  ;;  %v7659_v33 = vsel %vm12447_vm6, %v7651_v4, %v11972_v20  ;;  %vm12458_vm6 = vmmov %vm12449_vm5 }
0x243d   :  { %v11992_v24 = vpop.permute.xlu0 %7597  ;;  %v7677_v49 = vpop.permute.xlu1 %7676 }
0x243e   :  { %v7685_v39 = vsel %vm12448_vm12, %v7677_v49, %v11976_v47  ;;  %v7684_v42 = vsel %vm12449_vm5, %v7675_v63, %v7677_v49  ;;  %vm12459_vm12 = vcmask 891904   ;;  %vm12460_vm5 = vmmov %vm12451_vm11 }
0x243f   :  { %v9661_v40 = vpack.c.bf16 %v7685_v39, %v7659_v33 }
0x2441   :  { %v11998_v14 = vpop.permute.xlu0 %7704  ;;  %v7649_v26 = vpop.permute.xlu1 %7648  ;;  %9662 = vmatprep.subr.bf16.mxu0 %v9661_v40 }
0x2442   :  { %v7658_v18 = vsel %vm12450_vm7, %v7649_v26, %v7651_v4  ;;  %vm12461_vm7 = vmmov %vm12453_vm1 }
0x2443   :  { %v9663_v5 = vpack.c.bf16 %v7684_v42, %v7658_v18 }
0x2445   :  { %v7548_v48 = vpop.permute.xlu0 %7547  ;;  %v7518_v37 = vpop.permute.xlu1 %7517  ;;  %9664 = vmatpush1.bf16.msra.mxu0 %v9663_v5 }
0x2446   :  { %v7524_v51 = vsel %vm12451_vm11, %v7516_v22, %v7518_v37  ;;  %v7525_v46 = vsel %vm12452_vm14, %v7518_v37, %v11979_v43  ;;  %vm12462_vm11 = vmmov %vm12459_vm12 }
0x2447   :  { %vm12463_vm14 = vmmov %vm12456_vm2 }
0x2449   :  { %v7629_v23 = vpop.permute.xlu0 %7628  ;;  %v7544_v41 = vpop.permute.xlu1 %7543 }
0x244a   :  { %v7550_v15 = vsel %vm12453_vm1, %v7542_v19, %v7544_v41  ;;  %v7551_v8 = vsel %vm12454_vm3, %v7544_v41, %v7546_v27  ;;  %v7634_v25 = vsel %vm224_vm10, %v11984_v57, %v7629_v23  ;;  %vm12464_vm1 = vmmov %vm12457_vm4 }
0x244b   :  { %v9665_v58 = vpack.c.bf16 %v7551_v8, %v7525_v46  ;;  %v9667_v45 = vpack.c.bf16 %v7550_v15, %v7524_v51  ;;  %v9675_v4 = vpack.c.bf16 %v7634_v25, %v11891_v16  ;;  %vm12465_vm3 = vmmov %vm12464_vm1 }
0x244d   :  { %v7574_v21 = vpop.permute.xlu0 %7573  ;;  %v7570_v30 = vpop.permute.xlu1 %7569  ;;  %9666 = vmatprep.subr.bf16.mxu1 %v9665_v58 }
0x244e   :  { %9668 = vmatpush1.bf16.msra.mxu1 %v9667_v45  ;;  %v7576_v59 = vsel %vm12455_vm13, %v7568_v34, %v7570_v30  ;;  %v7577_v22 = vsel %vm12456_vm2, %v7570_v30, %v11990_v32  ;;  %v7578_v57 = vsel %vm12463_vm14, %v11990_v32, %v7574_v21  ;;  %vm12466_vm13 = vmmov %vm12458_vm6 }
0x244f   :  { %vm12467_vm2 = vmmov %vm12458_vm6 }
0x2451   :  { %v7655_v11 = vpop.permute.xlu0 %7654  ;;  %v7596_v9 = vpop.permute.xlu1 %7595 }
0x2452   :  { %v7602_v36 = vsel %vm191_vm8, %v7594_v3, %v7596_v9  ;;  %v7603_v19 = vsel %vm191_vm8, %v7596_v9, %v11992_v24  ;;  %v7660_v6 = vsel %vm12457_vm4, %v11972_v20, %v7655_v11  ;;  %v7552_v20 = vsel %vm12461_vm7, %v7546_v27, %v7548_v48  ;;  %vm12468_vm4 = vmmov %vm12462_vm11 }
0x2453   :  { %v9669_v50 = vpack.c.bf16 %v7603_v19, %v7577_v22  ;;  %v9671_v62 = vpack.c.bf16 %v7602_v36, %v7576_v59 }
0x2455   :  { %v7681_v63 = vpop.permute.xlu0 %7680  ;;  %v7703_v28 = vpop.permute.xlu1 %7702  ;;  %9670 = vmatprep.subr.bf16.mxu1 %v9669_v50 }
0x2456   :  { %v7686_v55 = vsel %vm12458_vm6, %v11976_v47, %v7681_v63  ;;  %v7711_v34 = vsel %vm12459_vm12, %v7703_v28, %v11998_v14  ;;  %9672 = vmatpush1.bf16.msra.mxu1 %v9671_v62  ;;  %vm12469_vm6 = vmmov %vm12468_vm4 }
0x2457   :  { %7792 = vmatprep.subr.mxu0 %v7711_v34  ;;  %v9679_v3 = vpack.c.bf16 %v7686_v55, %v7660_v6  ;;  %vm12470_vm12 = vmmov %vm12468_vm4 }
0x2459   :  { %v7522_v38 = vpop.permute.xlu1 %7521  ;;  %v7707_v48 = vpop.permute.xlu0 %7706 }
0x245a   :  { %v7526_v35 = vsel %vm12460_vm5, %v11979_v43, %v7522_v38  ;;  %v7712_v41 = vsel %vm12470_vm12, %v11998_v14, %v7707_v48  ;;  %vm12476_vm12 = vcmask 1047688  }
0x245b   :  { %v9682_v47 = vpack.c.bf16 %v7552_v20, %v7526_v35 }
0x245d   :  { %v7701_v7 = vpop.permute.xlu1 %7700 }
0x245e   :  { %v7710_v52 = vsel %vm12462_vm11, %v7701_v7, %v7703_v28 }
0x245f   :  { %7793 = vmatpush1.msra.mxu0 %v7710_v52  ;;  %v9963_v52 = vmov 11  }
0x2460   :  { %9681 = vmatprep.subr.bf16.mxu0 %v9895_v13  ;;  %8712 = vmatmul.mubr.msk.f32.vlgmr.msra.gmra.mrb[56].mxu0 %vm372_vm15, %v8711_v17 }
0x2461   :  { %v7631_v61 = vpop.permute.xlu1 %7630  ;;  %9683 = vmatpush3.bf16.msra.mxu0 %v9682_v47  ;;  %9217 = vmatprep.mubr.msk.f32.mxu0 %vm9896_vm0, %v10698_v0 }
0x2462   :  { %v7635_v43 = vsel %vm224_vm10, %v7629_v23, %v7631_v61  ;;  %7647 = vst.msk [vmem:[#allocation2 + $0x140] sm:$0xff] %vm224_vm10, %v7631_v61  ;;  %9684 = vmatprep.subr.bf16.mxu0 %v9895_v13  ;;  %9839 = vset.pattern.permute.xlu0 %v9963_v52 }
0x2463   :  { %v9673_v27 = vpack.c.bf16 %v7635_v43, %v11906_v44  ;;  %9840 = vset.pattern.permute.xlu1 %v9963_v52 }
0x2465   :  { %v7600_v49 = vpop.permute.xlu1 %7599  ;;  %9674 = vmatprep.subr.bf16.mxu1 %v9673_v27 }
0x2466   :  { %v7604_v33 = vsel %vm191_vm8, %v11992_v24, %v7600_v49  ;;  %9676 = vmatpush1.bf16.msra.mxu1 %v9675_v4 }
0x2467   :  { %v9685_v39 = vpack.c.bf16 %v7604_v33, %v7578_v57 }
0x2469   :  { %v7657_v40 = vpop.permute.xlu1 %7656  ;;  %9686 = vmatpush3.bf16.msra.mxu0 %v9685_v39  ;;  %v7757_v26 = vld [vmem:[#allocation2 + $0x140] sm:$0xff] }
0x246a   :  { %7673 = vst.msk [vmem:[#allocation2 + $0x178] sm:$0xff] %vm12464_vm1, %v7657_v40  ;;  %9687 = vmatprep.subr.bf16.mxu0 %v9895_v13  ;;  %v9688_v42 = vpack.c.bf16 %v7757_v26, %v11931_v56  ;;  %v7661_v5 = vsel %vm12465_vm3, %v7655_v11, %v7657_v40  ;;  %vm12471_vm3 = vcmask 1047704  }
0x246d   :  { %v7683_v18 = vpop.permute.xlu1 %7682  ;;  %9689 = vmatpush3.bf16.msra.mxu0 %v9688_v42 }
0x246e   :  { %v7687_v32 = vsel %vm12466_vm13, %v7681_v63, %v7683_v18  ;;  %7699 = vst.msk [vmem:[#allocation2 + $0x1b0] sm:$0xff] %vm12467_vm2, %v7683_v18  ;;  %9690 = vmatprep.subr.bf16.mxu0 %v9895_v13  ;;  %vm12472_vm13 = vcmask 154624   ;;  %vm12473_vm2 = vcmask 1047696  }
0x246f   :  { %v9677_v24 = vpack.c.bf16 %v7687_v32, %v7661_v5 }
0x2471   :  { %v7709_v37 = vpop.permute.xlu1 %7708  ;;  %9678 = vmatprep.subr.bf16.mxu1 %v9677_v24  ;;  %v7762_v51 = vld [vmem:[#allocation2 + $0x178] sm:$0xff] }
0x2472   :  { %v7713_v23 = vsel %vm12468_vm4, %v7707_v48, %v7709_v37  ;;  %7725 = vst.msk [vmem:[#allocation2 + $0x1e8] sm:$0xff] %vm12469_vm6, %v7709_v37  ;;  %9680 = vmatpush1.bf16.msra.mxu1 %v9679_v3  ;;  %vm12474_vm4 = vcmask 146432   ;;  %vm12475_vm6 = vcmask 138240  }
0x2473   :  { %7863 = vmatprep.subr.mxu1 %v7713_v23 }
0x2475   :  { %v7767_v46 = vld [vmem:[#allocation2 + $0x1b0] sm:$0xff] }
0x2476   :  { %v9691_v15 = vpack.c.bf16 %v7767_v46, %v7762_v51  ;;  %7864 = vmatpush1.msra.mxu1 %v7712_v41  ;;  %v8052_v46 = vstv %s8715_s11 }
0x2477   :  { %8713 = vmatmul.mubr.msk.f32.vlgmr.msra.gmra.mrb[56].mxu1 %vm372_vm15, %v8711_v17 }
0x2478   :  { %9692 = vmatpush3.bf16.msra.mxu0 %v9691_v15  ;;  %8395 = vmatprep.mubr.f32.mxu1 %v10698_v0 }
0x2479   :  { %9215 = vmatprep.subr.mxu0 %v10698_v0  ;;  %v7772_v8 = vld [vmem:[#allocation2 + $0x1e8] sm:$0xff] }
0x247c   :  { %9216 = vmatpush3.msra.mxu0 %v7772_v8 }
0x247d   :  { %9218 = vmatmul.mubr.msk.f32.vlgmr.msra.gmra.mrb[58].mxu0 %vm372_vm15, %v8711_v17 }
0x247e   :  { %8466 = vmatprep.mubr.f32.mxu0 %v10698_v0 }
0x2533   :  { %v7842_v58 = vpop.f32.mrb[56].mxu0 }
0x2534   :  { %v7844_v45 = vpop.f32.mrb[57].mxu0  ;;  %v7988_v14 = vmul.f32 %v7842_v58, %v10246_v53 }
0x2535   :  { %v7989_v21 = vmul.f32 %v7844_v45, %v10250_v54 }
0x2536   :  { %v8002_v30 = vmul.f32 %v7988_v14, %v7988_v14 }
0x2537   :  { %v8003_v11 = vmul.f32 %v7989_v21, %v7989_v21  ;;  %v7995_v59 = vadd.f32 %v7989_v21, %v7988_v14 }
0x2539   :  { %v8007_v50 = vadd.f32 %v8003_v11, %v8002_v30 }
0x254a   :  { %v7913_v9 = vpop.f32.mrb[56].mxu1 }
0x254b   :  { %v7990_v22 = vmul.f32 %v7913_v9, %v10261_v60  ;;  %v7915_v36 = vpop.f32.mrb[57].mxu1 }
0x254c   :  { %v7991_v19 = vmul.f32 %v7915_v36, %v10265_v1 }
0x254d   :  { %v7996_v62 = vadd.f32 %v7995_v59, %v7990_v22  ;;  %v8004_v63 = vmul.f32 %v7990_v22, %v7990_v22 }
0x254e   :  { %v8005_v6 = vmul.f32 %v7991_v19, %v7991_v19 }
0x254f   :  { %v8008_v28 = vadd.f32 %v8007_v50, %v8004_v63  ;;  %v7997_v34 = vadd.f32 %v7996_v62, %v7991_v19 }
0x2550   :  { %v7984_v55 = vpop.f32.mrb[58].mxu0 }
0x2551   :  { %v7992_v3 = vmul.f32 %v7984_v55, %v10272_v10  ;;  %v9219_v38 = vpop.f32.mrb[59].mxu0  ;;  %v8009_v17 = vadd.f32 %v8008_v28, %v8005_v6 }
0x2553   :  { %v8006_v35 = vmul.f32 %v7992_v3, %v7992_v3  ;;  %v7998_v7 = vadd.f32 %v7997_v34, %v7992_v3 }
0x2555   :  { %7999 = vadd.xlane.f32.xlu0 %v7998_v7  ;;  %v8010_v20 = vadd.f32 %v8009_v17, %v8006_v35 }
0x2557   :  { %8011 = vadd.xlane.f32.xlu1 %v8010_v20 }
0x25e2   :  { %v8000_v47 = vpop.xlane.xlu0 %7999 }
0x25e3   :  { %v8001_v25 = vmul.f32 0.001953125, %v8000_v47 }
0x25e4   :  { %v8012_v61 = vpop.xlane.xlu1 %8011 }
0x25e5   :  { %v8014_v43 = vmul.f32 %v8001_v25, %v8001_v25  ;;  %v8013_v27 = vmul.f32 0.001953125, %v8012_v61 }
0x25e7   :  { %v8015_v4 = vsub.f32 %v8013_v27, %v8014_v43 }
0x25e9   :  { %v8016_v49 = vadd.f32 1e-05, %v8015_v4 }
0x25eb   :  { %9865 = vrsqrt.f32 %v8016_v49 }
0x25f5   :  { %v9866_v57 = vpop.eup %9865 }
0x25f6   :  { %v8018_v33 = vmul.f32 %v9866_v57, %v11859_v2 }
0x25f8   :  { %8023 = vperm.xlu0 %9839, %v8018_v33   ;;  %v8019_v39 = vmul.f32 %v8018_v33, %v8001_v25 }
0x25fa   :  { %v8020_v40 = vsub.f32 %v11865_v31, %v8019_v39 }
0x25fc   :  { %8033 = vperm.xlu1 %9840, %v8020_v40  }
0x2677   :  { %v8024_v26 = vpop.permute.xlu0 %8023 }
0x2678   :  { %v8026_v42 = vmul.f32 %v8024_v26, %v7988_v14  ;;  %v8027_v18 = vmul.f32 %v8024_v26, %v7989_v21  ;;  %v8028_v5 = vmul.f32 %v8024_v26, %v7990_v22  ;;  %v8029_v32 = vmul.f32 %v8024_v26, %v7991_v19 }
0x2679   :  { %v8030_v24 = vmul.f32 %v8024_v26, %v7992_v3 }
0x267b   :  { %v8034_v48 = vpop.permute.xlu1 %8033 }
0x267c   :  { %v8036_v37 = vadd.f32 %v8034_v48, %v8026_v42  ;;  %v8037_v23 = vadd.f32 %v8034_v48, %v8027_v18  ;;  %v8038_v41 = vadd.f32 %v8034_v48, %v8028_v5  ;;  %v8039_v51 = vadd.f32 %v8034_v48, %v8029_v32 }
0x267d   :  { %v8040_v15 = vadd.f32 %v8034_v48, %v8030_v24 }
0x267e   :  { %v8041_v2 = vmul.f32 %v8036_v37, %v10246_v53  ;;  %v8042_v8 = vmul.f32 %v8037_v23, %v10250_v54  ;;  %v8043_v31 = vmul.f32 %v8038_v41, %v10261_v60  ;;  %v8044_v58 = vmul.f32 %v8039_v51, %v10265_v1 }
0x267f   :  { %v8045_v45 = vmul.f32 %v8040_v15, %v10272_v10 }
0x2680   :  { %vm8047_vm5 = vcmp.ge.f32.partialorder %v8041_v2, 0.0  ;;  %vm8048_vm7 = vcmp.ge.f32.partialorder %v8042_v8, 0.0  ;;  %vm8049_vm11 = vcmp.ge.f32.partialorder %v8043_v31, 0.0  ;;  %vm8050_vm14 = vcmp.ge.f32.partialorder %v8044_v58, 0.0 }
0x2681   :  { %vm8051_vm1 = vcmp.ge.f32.partialorder %v8045_v45, 0.0  ;;  %v8053_v14 = vmul.f32 %v8052_v46, %v8041_v2  ;;  %v8054_v21 = vmul.f32 %v8052_v46, %v8042_v8  ;;  %v8055_v30 = vmul.f32 %v8052_v46, %v8043_v31 }
0x2682   :  { %v8056_v11 = vmul.f32 %v8052_v46, %v8044_v58  ;;  %v8057_v9 = vmul.f32 %v8052_v46, %v8045_v45 }
0x2683   :  { %v12069_v59 = vsel %vm8047_vm5, %v8041_v2, %v8053_v14  ;;  %v12071_v22 = vsel %vm8048_vm7, %v8042_v8, %v8054_v21  ;;  %v12073_v36 = vsel %vm8049_vm11, %v8043_v31, %v8055_v30  ;;  %vm12477_vm5 = vcmask 908288   ;;  %vm12478_vm7 = vmmov %vm12472_vm13 }
0x2684   :  { %v12075_v19 = vsel %vm8050_vm14, %v8044_v58, %v8056_v11  ;;  %v12077_v50 = vsel %vm8051_vm1, %v8045_v45, %v8057_v9  ;;  %8122 = vrot.lane.b32.xlu0 %v12071_v22, %s9889_s19  ;;  %8068 = vrot.lane.b32.xlu1 %v12069_v59, %s9887_s8  ;;  %vm12479_vm11 = vmmov %vm12474_vm4  ;;  %vm12482_vm1 = vcmask 900096  }
0x2685   :  { %vm12481_vm14 = vmmov %vm12477_vm5 }
0x2688   :  { %8148 = vrot.lane.b32.xlu0 %v12071_v22, %s9890_s20  ;;  %8070 = vrot.lane.b32.xlu1 %v12071_v22, %s9887_s8 }
0x268c   :  { %8181 = vrot.lane.b32.xlu0 %v12073_v36, %s9891_s23  ;;  %8094 = vrot.lane.b32.xlu1 %v12069_v59, %s12295_s0 }
0x2690   :  { %8205 = vrot.lane.b32.xlu0 %v12071_v22, %s12294_s14  ;;  %8096 = vrot.lane.b32.xlu1 %v12071_v22, %s12295_s0 }
0x2694   :  { %8231 = vrot.lane.b32.xlu0 %v12071_v22, %s12296_s17  ;;  %8120 = vrot.lane.b32.xlu1 %v12069_v59, %s9889_s19 }
0x2698   :  { %8203 = vrot.lane.b32.xlu0 %v12069_v59, %s12294_s14  ;;  %8146 = vrot.lane.b32.xlu1 %v12069_v59, %s9890_s20 }
0x269c   :  { %8072 = vrot.lane.b32.xlu0 %v12073_v36, %s9887_s8  ;;  %8179 = vrot.lane.b32.xlu1 %v12071_v22, %s9891_s23 }
0x26a0   :  { %8098 = vrot.lane.b32.xlu0 %v12073_v36, %s12295_s0  ;;  %8177 = vrot.lane.b32.xlu1 %v12069_v59, %s9891_s23 }
0x26a4   :  { %8124 = vrot.lane.b32.xlu0 %v12073_v36, %s9889_s19  ;;  %8207 = vrot.lane.b32.xlu1 %v12073_v36, %s12294_s14 }
0x26a8   :  { %8150 = vrot.lane.b32.xlu0 %v12073_v36, %s9890_s20  ;;  %8233 = vrot.lane.b32.xlu1 %v12073_v36, %s12296_s17 }
0x26ac   :  { %8257 = vrot.lane.b32.xlu0 %v12071_v22, %s9894_s28  ;;  %8229 = vrot.lane.b32.xlu1 %v12069_v59, %s12296_s17 }
0x26b0   :  { %8076 = vrot.lane.b32.xlu0 %v12077_v50, %s9887_s8  ;;  %8074 = vrot.lane.b32.xlu1 %v12075_v19, %s9887_s8 }
0x26b4   :  { %8255 = vrot.lane.b32.xlu0 %v12069_v59, %s9894_s28  ;;  %8100 = vrot.lane.b32.xlu1 %v12075_v19, %s12295_s0 }
0x26b8   :  { %8185 = vrot.lane.b32.xlu0 %v12077_v50, %s9891_s23  ;;  %8126 = vrot.lane.b32.xlu1 %v12075_v19, %s9889_s19 }
0x26bc   :  { %8154 = vrot.lane.b32.xlu0 %v12077_v50, %s9890_s20  ;;  %8152 = vrot.lane.b32.xlu1 %v12075_v19, %s9890_s20 }
0x26c0   :  { %8211 = vrot.lane.b32.xlu0 %v12077_v50, %s12294_s14  ;;  %8259 = vrot.lane.b32.xlu1 %v12073_v36, %s9894_s28 }
0x26c4   :  { %8237 = vrot.lane.b32.xlu0 %v12077_v50, %s12296_s17  ;;  %8102 = vrot.lane.b32.xlu1 %v12077_v50, %s12295_s0 }
0x26c8   :  { %8263 = vrot.lane.b32.xlu0 %v12077_v50, %s9894_s28  ;;  %8183 = vrot.lane.b32.xlu1 %v12075_v19, %s9891_s23 }
0x26cc   :  { %8128 = vrot.lane.b32.xlu1 %v12077_v50, %s9889_s19 }
0x26d0   :  { %8209 = vrot.lane.b32.xlu1 %v12075_v19, %s12294_s14  ;;  %s8720_s14 = sld [smem:[#allocation6 + $0xd]] }
0x26d4   :  { %8235 = vrot.lane.b32.xlu1 %v12075_v19, %s12296_s17 }
0x26d8   :  { %8261 = vrot.lane.b32.xlu1 %v12075_v19, %s9894_s28 }
0x26f6   :  { %v8123_v62 = vpop.permute.xlu0 %8122  ;;  %v8069_v63 = vpop.permute.xlu1 %8068 }
0x26f7   :  { %8088 = vst.msk [vmem:[#allocation2 + $0x8] sm:$0xff] %vm12471_vm3, %v8069_v63  ;;  %vm12483_vm3 = vmmov %vm12482_vm1 }
0x26fa   :  { %v8149_v28 = vpop.permute.xlu0 %8148  ;;  %v8071_v6 = vpop.permute.xlu1 %8070 }
0x26fb   :  { %v8078_v55 = vsel %vm12472_vm13, %v8069_v63, %v8071_v6  ;;  %vm12484_vm13 = vmmov %vm12478_vm7 }
0x26fe   :  { %v12161_v34 = vpop.permute.xlu0 %8181  ;;  %v8095_v3 = vpop.permute.xlu1 %8094  ;;  %v8283_v47 = vld [vmem:[#allocation2 + $0x8] sm:$0xff] }
0x26ff   :  { %8114 = vst.msk [vmem:[#allocation2 + $0x40] sm:$0xff] %vm12473_vm2, %v8095_v3  ;;  %vm12485_vm2 = vmmov %vm12478_vm7 }
0x2702   :  { %v8206_v38 = vpop.permute.xlu0 %8205  ;;  %v8097_v35 = vpop.permute.xlu1 %8096 }
0x2703   :  { %v8104_v7 = vsel %vm12474_vm4, %v8095_v3, %v8097_v35  ;;  %vm12486_vm4 = vcmask 891904  }
0x2704   :  { %v9693_v17 = vpack.c.bf16 %v8104_v7, %v8078_v55 }
0x2706   :  { %v8232_v20 = vpop.permute.xlu0 %8231  ;;  %v8121_v52 = vpop.permute.xlu1 %8120  ;;  %9694 = vmatprep.subr.bf16.mxu1 %v9693_v17  ;;  %v8288_v25 = vld [vmem:[#allocation2 + $0x40] sm:$0xff] }
0x2707   :  { %v8130_v61 = vsel %vm12475_vm6, %v8121_v52, %v8123_v62  ;;  %8140 = vst.msk [vmem:[#allocation2 + $0x78] sm:$0xff] %vm12476_vm12, %v8121_v52  ;;  %v9695_v43 = vpack.c.bf16 %v8288_v25, %v8283_v47 }
0x2709   :  { %9696 = vmatpush1.bf16.msra.mxu1 %v9695_v43 }
0x270a   :  { %v8204_v27 = vpop.permute.xlu0 %8203  ;;  %v8147_v4 = vpop.permute.xlu1 %8146 }
0x270b   :  { %v8213_v49 = vsel %vm12477_vm5, %v8204_v27, %v8206_v38  ;;  %v8156_v57 = vsel %vm191_vm8, %v8147_v4, %v8149_v28  ;;  %8166 = vst.msk [vmem:[#allocation2 + $0xb0] sm:$0xff] %vm202_vm9, %v8147_v4  ;;  %vm12480_vm9 = vmmov %vm12475_vm6 }
0x270c   :  { %v9697_v33 = vpack.c.bf16 %v8156_v57, %v8130_v61  ;;  %vm12487_vm6 = vmmov %vm12479_vm11 }
0x270d   :  { %vm12488_vm12 = vmmov %vm12480_vm9 }
0x270e   :  { %v8073_v39 = vpop.permute.xlu0 %8072  ;;  %v8180_v40 = vpop.permute.xlu1 %8179  ;;  %9698 = vmatprep.subr.bf16.mxu1 %v9697_v33  ;;  %v8293_v32 = vld [vmem:[#allocation2 + $0x78] sm:$0xff] }
0x270f   :  { %v8079_v26 = vsel %vm12478_vm7, %v8071_v6, %v8073_v39  ;;  %v8188_v42 = vsel %vm224_vm10, %v8180_v40, %v12161_v34  ;;  %vm12489_vm7 = vmmov %vm12486_vm4 }
0x2710   :  { %v9701_v41 = vpack.c.bf16 %v8188_v42, %v12071_v22 }
0x2712   :  { %v8099_v18 = vpop.permute.xlu0 %8098  ;;  %v8178_v5 = vpop.permute.xlu1 %8177  ;;  %v8298_v24 = vld [vmem:[#allocation2 + $0xb0] sm:$0xff] }
0x2713   :  { %v8105_v48 = vsel %vm12479_vm11, %v8097_v35, %v8099_v18  ;;  %v8187_v37 = vsel %vm224_vm10, %v8178_v5, %v8180_v40  ;;  %v9699_v23 = vpack.c.bf16 %v8298_v24, %v8293_v32  ;;  %vm12491_vm11 = vmmov %vm12487_vm6 }
0x2714   :  { %v9703_v8 = vpack.c.bf16 %v8187_v37, %v12069_v59  ;;  %v9711_v7 = vpack.c.bf16 %v8105_v48, %v8079_v26 }
0x2715   :  { %9700 = vmatpush1.bf16.msra.mxu1 %v9699_v23 }
0x2716   :  { %v8125_v51 = vpop.permute.xlu0 %8124  ;;  %v12176_v46 = vpop.permute.xlu1 %8207  ;;  %9702 = vmatprep.subr.bf16.mxu1 %v9701_v41 }
0x2717   :  { %v8131_v15 = vsel %vm12480_vm9, %v8123_v62, %v8125_v51  ;;  %v8214_v2 = vsel %vm12481_vm14, %v8206_v38, %v12176_v46  ;;  %vm12492_vm9 = vmmov %vm12486_vm4 }
0x2718   :  { %vm12494_vm14 = vmmov %vm12477_vm5 }
0x2719   :  { %9704 = vmatpush1.bf16.msra.mxu1 %v9703_v8 }
0x271a   :  { %v8151_v31 = vpop.permute.xlu0 %8150  ;;  %v12182_v58 = vpop.permute.xlu1 %8233 }
0x271b   :  { %v8157_v45 = vsel %vm191_vm8, %v8149_v28, %v8151_v31  ;;  %v8240_v14 = vsel %vm12482_vm1, %v8232_v20, %v12182_v58 }
0x271c   :  { %v9705_v21 = vpack.c.bf16 %v8240_v14, %v8214_v2  ;;  %v9715_v4 = vpack.c.bf16 %v8157_v45, %v8131_v15 }
0x271e   :  { %v8258_v30 = vpop.permute.xlu0 %8257  ;;  %v8230_v11 = vpop.permute.xlu1 %8229  ;;  %9706 = vmatprep.subr.bf16.mxu1 %v9705_v21 }
0x271f   :  { %v8239_v9 = vsel %vm12483_vm3, %v8230_v11, %v8232_v20 }
0x2720   :  { %v9707_v22 = vpack.c.bf16 %v8239_v9, %v8213_v49 }
0x2722   :  { %v8077_v62 = vpop.permute.xlu0 %8076  ;;  %v8075_v63 = vpop.permute.xlu1 %8074  ;;  %9708 = vmatpush1.bf16.msra.mxu1 %v9707_v22 }
0x2723   :  { %v8080_v59 = vsel %vm12484_vm13, %v8073_v39, %v8075_v63  ;;  %v8081_v6 = vsel %vm12485_vm2, %v8075_v63, %v8077_v62  ;;  %v8716_v39 = vld [vmem:[%s12266_s1 + $0x68] sm:$0xff]  ;;  %vm12497_vm13 = vmmov %vm12486_vm4 }
0x2724   :  { %vm12498_vm2 = vmmov %vm12486_vm4 }
0x2726   :  { %v8256_v55 = vpop.permute.xlu0 %8255  ;;  %v8101_v3 = vpop.permute.xlu1 %8100 }
0x2727   :  { %v8265_v28 = vsel %vm12486_vm4, %v8256_v55, %v8258_v30  ;;  %v8106_v38 = vsel %vm12487_vm6, %v8099_v18, %v8101_v3 }
0x2728   :  { %v9709_v35 = vpack.c.bf16 %v8106_v38, %v8080_v59 }
0x272a   :  { %v8186_v17 = vpop.permute.xlu0 %8185  ;;  %v8127_v52 = vpop.permute.xlu1 %8126  ;;  %9710 = vmatprep.subr.bf16.mxu0 %v9709_v35 }
0x272b   :  { %8202 = vst.msk [vmem:[#allocation2 + $0x140] sm:$0xff] %vm224_vm10, %v8186_v17  ;;  %v8132_v20 = vsel %vm12488_vm12, %v8125_v51, %v8127_v52  ;;  %9712 = vmatpush1.bf16.msra.mxu0 %v9711_v7 }
0x272e   :  { %v8155_v47 = vpop.permute.xlu0 %8154  ;;  %v8153_v25 = vpop.permute.xlu1 %8152 }
0x272f   :  { %v8158_v61 = vsel %vm191_vm8, %v8151_v31, %v8153_v25  ;;  %v8159_v43 = vsel %vm191_vm8, %v8153_v25, %v8155_v47  ;;  %vm12490_vm8 = vmmov %vm12482_vm1 }
0x2730   :  { %v9713_v27 = vpack.c.bf16 %v8158_v61, %v8132_v20  ;;  %vm12495_vm1 = vmmov %vm12477_vm5 }
0x2732   :  { %v8212_v49 = vpop.permute.xlu0 %8211  ;;  %v8260_v57 = vpop.permute.xlu1 %8259  ;;  %9714 = vmatprep.subr.bf16.mxu0 %v9713_v27  ;;  %v8312_v2 = vld [vmem:[#allocation2 + $0x140] sm:$0xff] }
0x2733   :  { %8228 = vst.msk [vmem:[#allocation2 + $0x178] sm:$0xff] %vm12477_vm5, %v8212_v49  ;;  %v8266_v33 = vsel %vm12489_vm7, %v8258_v30, %v8260_v57  ;;  %9716 = vmatpush1.bf16.msra.mxu0 %v9715_v4 }
0x2734   :  { %8347 = vmatprep.subr.mxu1 %v8266_v33 }
0x2735   :  { %8348 = vmatpush1.msra.mxu1 %v8265_v28 }
0x2736   :  { %v8238_v40 = vpop.permute.xlu0 %8237  ;;  %v8103_v26 = vpop.permute.xlu1 %8102  ;;  %9725 = vmatprep.subr.bf16.mxu1 %v9895_v13  ;;  %8717 = vmatmul.mubr.msk.f32.vlgmr.msra.gmra.mrb[58].mxu1 %vm372_vm15, %v8716_v39 }
0x2737   :  { %8254 = vst.msk [vmem:[#allocation2 + $0x1b0] sm:$0xff] %vm12490_vm8, %v8238_v40  ;;  %v8107_v42 = vsel %vm12491_vm11, %v8101_v3, %v8103_v26  ;;  %9238 = vmatprep.mubr.msk.f32.mxu1 %vm9896_vm0, %v10698_v0  ;;  %vm12493_vm0 = vmmov %vm12488_vm12 }
0x2738   :  { %v9726_v18 = vpack.c.bf16 %v8107_v42, %v8081_v6 }
0x273a   :  { %v8264_v5 = vpop.permute.xlu0 %8263  ;;  %v8184_v32 = vpop.permute.xlu1 %8183  ;;  %9727 = vmatpush3.bf16.msra.mxu1 %v9726_v18  ;;  %v8317_v30 = vld [vmem:[#allocation2 + $0x178] sm:$0xff] }
0x273b   :  { %8280 = vst.msk [vmem:[#allocation2 + $0x1e8] sm:$0xff] %vm12492_vm9, %v8264_v5  ;;  %v8189_v24 = vsel %vm224_vm10, %v12161_v34, %v8184_v32  ;;  %v8190_v48 = vsel %vm224_vm10, %v8184_v32, %v8186_v17  ;;  %9728 = vmatprep.subr.bf16.mxu1 %v9895_v13  ;;  %vm12496_vm10 = vmmov %vm12483_vm3 }
0x273c   :  { %v9717_v37 = vpack.c.bf16 %v8190_v48, %v12075_v19  ;;  %v9719_v23 = vpack.c.bf16 %v8189_v24, %v12073_v36  ;;  %v9732_v19 = vpack.c.bf16 %v8312_v2, %v12077_v50 }
0x273e   :  { %v8129_v41 = vpop.permute.xlu1 %8128  ;;  %9718 = vmatprep.subr.bf16.mxu0 %v9717_v37  ;;  %v8322_v45 = vld [vmem:[#allocation2 + $0x1b0] sm:$0xff]  ;;  %v8548_v37 = vld [vmem:[%s12267_s2] sm:$0xff] }
0x273f   :  { %v8133_v51 = vsel %vm12493_vm0, %v8127_v52, %v8129_v41  ;;  %9720 = vmatpush1.bf16.msra.mxu0 %v9719_v23  ;;  %v9735_v9 = vpack.c.bf16 %v8322_v45, %v8317_v30 }
0x2740   :  { %v9729_v15 = vpack.c.bf16 %v8159_v43, %v8133_v51  ;;  %v8549_v51 = vld [vmem:[%s12268_s3] sm:$0xff] }
0x2742   :  { %v8210_v8 = vpop.permute.xlu1 %8209  ;;  %9730 = vmatpush3.bf16.msra.mxu1 %v9729_v15 }
0x2743   :  { %v8215_v34 = vsel %vm12494_vm14, %v12176_v46, %v8210_v8  ;;  %v8216_v31 = vsel %vm12495_vm1, %v8210_v8, %v8212_v49  ;;  %9731 = vmatprep.subr.bf16.mxu1 %v9895_v13 }
0x2746   :  { %v8236_v36 = vpop.permute.xlu1 %8235  ;;  %9733 = vmatpush3.bf16.msra.mxu1 %v9732_v19 }
0x2747   :  { %v8241_v14 = vsel %vm12496_vm10, %v12182_v58, %v8236_v36  ;;  %v8242_v21 = vsel %vm12483_vm3, %v8236_v36, %v8238_v40  ;;  %9734 = vmatprep.subr.bf16.mxu1 %v9895_v13  ;;  %v8327_v58 = vld [vmem:[#allocation2 + $0x1e8] sm:$0xff]  ;;  %v9964_v40 = vmov 12  }
0x2748   :  { %v9721_v11 = vpack.c.bf16 %v8242_v21, %v8216_v31  ;;  %v9723_v46 = vpack.c.bf16 %v8241_v14, %v8215_v34  ;;  %9841 = vset.pattern.permute.xlu0 %v9964_v40  ;;  %9842 = vset.pattern.permute.xlu1 %v9964_v40 }
0x274a   :  { %v8262_v22 = vpop.permute.xlu1 %8261  ;;  %9722 = vmatprep.subr.bf16.mxu0 %v9721_v11  ;;  %9736 = vmatpush3.bf16.msra.mxu1 %v9735_v9 }
0x274b   :  { %v8267_v62 = vsel %vm12497_vm13, %v8260_v57, %v8262_v22  ;;  %v8268_v50 = vsel %vm12498_vm2, %v8262_v22, %v8264_v5  ;;  %9724 = vmatpush1.bf16.msra.mxu0 %v9723_v46  ;;  %9236 = vmatprep.subr.mxu1 %v10698_v0 }
0x274c   :  { %8418 = vmatprep.subr.mxu0 %v8268_v50 }
0x274e   :  { %9237 = vmatpush3.msra.mxu1 %v8327_v58 }
0x274f   :  { %8419 = vmatpush1.msra.mxu0 %v8267_v62  ;;  %9239 = vmatmul.mubr.msk.f32.vlgmr.msra.gmra.mrb[60].mxu1 %vm372_vm15, %v8716_v39 }
0x2750   :  { %8718 = vmatmul.mubr.msk.f32.vlgmr.msra.gmra.mrb[60].mxu0 %vm372_vm15, %v8716_v39 }
0x2809   :  { %v8397_v13 = vpop.f32.mrb[58].mxu1 }
0x280a   :  { %v8399_v63 = vpop.f32.mrb[59].mxu1  ;;  %v8543_v59 = vmul.f32 %v8397_v13, %v10246_v53  ;;  %v8612_v13 = vstv %s8720_s14 }
0x280b   :  { %v8544_v6 = vmul.f32 %v8399_v63, %v10250_v54 }
0x280c   :  { %v8557_v55 = vmul.f32 %v8543_v59, %v8543_v59 }
0x280d   :  { %v8558_v3 = vmul.f32 %v8544_v6, %v8544_v6  ;;  %v8550_v0 = vadd.f32 %v8544_v6, %v8543_v59 }
0x280f   :  { %v8562_v47 = vadd.f32 %v8558_v3, %v8557_v55 }
0x2822   :  { %v8539_v28 = vpop.f32.mrb[60].mxu1 }
0x2823   :  { %v8468_v38 = vpop.f32.mrb[60].mxu0  ;;  %v9240_v35 = vpop.f32.mrb[61].mxu1  ;;  %v8547_v52 = vmul.f32 %v8539_v28, %v10272_v10 }
0x2824   :  { %v8545_v7 = vmul.f32 %v8468_v38, %v10261_v60  ;;  %v8470_v17 = vpop.f32.mrb[61].mxu0 }
0x2825   :  { %v8546_v20 = vmul.f32 %v8470_v17, %v10265_v1  ;;  %v8561_v49 = vmul.f32 %v8547_v52, %v8547_v52 }
0x2826   :  { %v8551_v25 = vadd.f32 %v8550_v0, %v8545_v7  ;;  %v8559_v61 = vmul.f32 %v8545_v7, %v8545_v7 }
0x2827   :  { %v8560_v43 = vmul.f32 %v8546_v20, %v8546_v20 }
0x2828   :  { %v8563_v27 = vadd.f32 %v8562_v47, %v8559_v61  ;;  %v8552_v4 = vadd.f32 %v8551_v25, %v8546_v20 }
0x282a   :  { %v8553_v57 = vadd.f32 %v8552_v4, %v8547_v52  ;;  %v8564_v33 = vadd.f32 %v8563_v27, %v8560_v43 }
0x282c   :  { %8554 = vadd.xlane.f32.xlu1 %v8553_v57  ;;  %v8565_v39 = vadd.f32 %v8564_v33, %v8561_v49 }
0x282e   :  { %8566 = vadd.xlane.f32.xlu0 %v8565_v39 }
0x28b9   :  { %v8555_v26 = vpop.xlane.xlu1 %8554 }
0x28ba   :  { %v8556_v42 = vmul.f32 0.001953125, %v8555_v26 }
0x28bb   :  { %v8567_v18 = vpop.xlane.xlu0 %8566 }
0x28bc   :  { %v8569_v5 = vmul.f32 %v8556_v42, %v8556_v42  ;;  %v8568_v32 = vmul.f32 0.001953125, %v8567_v18 }
0x28be   :  { %v8570_v24 = vsub.f32 %v8568_v32, %v8569_v5 }
0x28c0   :  { %v8571_v48 = vadd.f32 1e-05, %v8570_v24 }
0x28c2   :  { %9867 = vrsqrt.f32 %v8571_v48 }
0x28cc   :  { %v9868_v23 = vpop.eup %9867 }
0x28cd   :  { %v8573_v41 = vmul.f32 %v9868_v23, %v8548_v37 }
0x28cf   :  { %8578 = vperm.xlu0 %9841, %v8573_v41   ;;  %v8574_v15 = vmul.f32 %v8573_v41, %v8556_v42 }
0x28d1   :  { %v8575_v2 = vsub.f32 %v8549_v51, %v8574_v15 }
0x28d3   :  { %8588 = vperm.xlu1 %9842, %v8575_v2  }
0x294e   :  { %v8579_v8 = vpop.permute.xlu0 %8578 }
0x294f   :  { %v8581_v34 = vmul.f32 %v8579_v8, %v8543_v59  ;;  %v8582_v31 = vmul.f32 %v8579_v8, %v8544_v6  ;;  %v8583_v19 = vmul.f32 %v8579_v8, %v8545_v7  ;;  %v8584_v45 = vmul.f32 %v8579_v8, %v8546_v20 }
0x2950   :  { %v8585_v36 = vmul.f32 %v8579_v8, %v8547_v52 }
0x2952   :  { %v8589_v14 = vpop.permute.xlu1 %8588 }
0x2953   :  { %v8591_v21 = vadd.f32 %v8589_v14, %v8581_v34  ;;  %v8592_v30 = vadd.f32 %v8589_v14, %v8582_v31  ;;  %v8593_v11 = vadd.f32 %v8589_v14, %v8583_v19  ;;  %v8594_v9 = vadd.f32 %v8589_v14, %v8584_v45 }
0x2954   :  { %v8595_v46 = vadd.f32 %v8589_v14, %v8585_v36 }
0x2955   :  { %v8596_v22 = vmul.f32 %v8591_v21, %v10246_v53  ;;  %v8597_v62 = vmul.f32 %v8592_v30, %v10250_v54  ;;  %v8598_v50 = vmul.f32 %v8593_v11, %v10261_v60  ;;  %v8599_v58 = vmul.f32 %v8594_v9, %v10265_v1 }
0x2956   :  { %v8600_v63 = vmul.f32 %v8595_v46, %v10272_v10 }
0x2957   :  { %v8601_v59 = vadd.f32 %v8596_v22, %v11873_v29  ;;  %v8602_v6 = vadd.f32 %v8597_v62, %v11880_v12  ;;  %v8603_v55 = vadd.f32 %v8598_v50, %v11891_v16  ;;  %v8604_v3 = vadd.f32 %v8599_v58, %v11906_v44 }
0x2958   :  { %v8605_v28 = vadd.f32 %v8600_v63, %v11931_v56 }
0x2959   :  { %vm8607_vm15 = vcmp.ge.f32.partialorder %v8601_v59, 0.0  ;;  %vm8608_vm4 = vcmp.ge.f32.partialorder %v8602_v6, 0.0  ;;  %vm8609_vm6 = vcmp.ge.f32.partialorder %v8603_v55, 0.0  ;;  %vm8610_vm12 = vcmp.ge.f32.partialorder %v8604_v3, 0.0 }
0x295a   :  { %vm8611_vm5 = vcmp.ge.f32.partialorder %v8605_v28, 0.0  ;;  %v8613_v53 = vmul.f32 %v8612_v13, %v8601_v59  ;;  %v8614_v54 = vmul.f32 %v8612_v13, %v8602_v6  ;;  %v8615_v60 = vmul.f32 %v8612_v13, %v8603_v55 }
0x295b   :  { %v8616_v1 = vmul.f32 %v8612_v13, %v8604_v3  ;;  %v8617_v10 = vmul.f32 %v8612_v13, %v8605_v28 }
0x295c   :  { %v8618_v38 = vsel %vm8607_vm15, %v8601_v59, %v8613_v53  ;;  %v8619_v29 = vsel %vm8608_vm4, %v8602_v6, %v8614_v54  ;;  %v8620_v35 = vsel %vm8609_vm6, %v8603_v55, %v8615_v60 }
0x295d   :  { %v8621_v12 = vsel %vm8610_vm12, %v8604_v3, %v8616_v1  ;;  %v8622_v0 = vsel %vm8611_vm5, %v8605_v28, %v8617_v10  ;;  %8623 = vst [vmem:[%s12274_s9] sm:$0xff] %v8618_v38  ;;  %8624 = vst [vmem:[%s12274_s9 + $0x8] sm:$0xff] %v8619_v29 }
0x295e   :  { %8625 = vst [vmem:[%s12274_s9 + $0x10] sm:$0xff] %v8620_v35  ;;  %8626 = vst [vmem:[%s12274_s9 + $0x18] sm:$0xff] %v8621_v12 }
0x295f   :  { %8627 = vst [vmem:[%s12274_s9 + $0x20] sm:$0xff] %v8622_v0 }
0x2960   :  { %8632 = vsyncpa [#allocation7], 1 }

</bundles_post_ra>
